<compile_context>
chip_gen: v7x
topology: tpu7x:2x2x1
jax: 0.10.0
libtpu: 0.0.40
codegen_flags: <defaults>
</compile_context>

<pallas_src>
import numpy as np
import jax
import jax.numpy as jnp
from jax.experimental import pallas as pl
from jax.experimental.pallas import tpu as pltpu


_LAYER_SPECS = [(1, 16), (16, 32), (32, 48), (48, 64)]   # (Cin, Cout) per conv
_K, _STRIDE, _PAD = 3, 2, 1


def _out_dim(d):
    return (d + 2 * _PAD - _K) // _STRIDE + 1


# --------------------------------------------------------------------------
# Fused Pallas kernel: conv1..conv4 + bias + LeakyReLU, activations resident
# in VMEM.  For layers 2-4 the conv is computed as
#     Y = LReLU( b + sum_t  W_t @ (H @ G_t) )
# where H is the (Cin, Pin) lane-dense input activation, G_t the (Pin, Pout)
# 0/1 tap-selection matrix (zero columns where the tap lands in the padding)
# and W_t the (Cout, Cin) weight slice of tap t.
# --------------------------------------------------------------------------
def _extractnet_kernel(p1_ref, w1_ref, b1_ref,
                       g2_ref, w2_ref, b2_ref,
                       g3_ref, w3_ref, b3_ref,
                       g4_ref, w4_ref, b4_ref,
                       y2_ref, y3_ref, y4_ref):

    def lrelu(a):
        return jnp.where(a >= 0, a, 0.1 * a)

    def conv_layer(h, g_ref, w_ref, b_ref):
        n_taps, _, pout = g_ref.shape
        cout = w_ref.shape[1]
        acc = jnp.zeros((cout, pout), jnp.float32)
        for t in range(n_taps):                          # statically unrolled
            g_t = g_ref[t].astype(jnp.float32)           # (Pin, Pout), exact 0/1
            gathered = jnp.dot(h, g_t, preferred_element_type=jnp.float32)
            acc = acc + jnp.dot(w_ref[t], gathered,
                                preferred_element_type=jnp.float32)
        return lrelu(acc + b_ref[...])

    # layer 1 (Cin == 1): (16, 27) @ (27, P1) -> lane-dense (16, P1) activation
    h1 = lrelu(jnp.dot(w1_ref[...], p1_ref[...],
                       preferred_element_type=jnp.float32) + b1_ref[...])

    h2 = conv_layer(h1, g2_ref, w2_ref, b2_ref)
    y2_ref[...] = h2.astype(y2_ref.dtype)

    h3 = conv_layer(h2, g3_ref, w3_ref, b3_ref)
    y3_ref[...] = h3.astype(y3_ref.dtype)

    h4 = conv_layer(h3, g4_ref, w4_ref, b4_ref)
    y4_ref[...] = h4.astype(y4_ref.dtype)


# --------------------------------------------------------------------------
# Host/XLA glue
# --------------------------------------------------------------------------
def _full_spec(shape):
    rank = len(shape)

    def index_map(i):
        return (0,) * rank

    return pl.BlockSpec(shape, index_map)


def _layer1_patches_T(x_ndhwc):
    """(27, N*Do*Ho*Wo) lane-dense patch matrix for the Cin==1 first conv."""
    N, D, H, W, _ = x_ndhwc.shape
    Do, Ho, Wo = _out_dim(D), _out_dim(H), _out_dim(W)
    xp = jnp.pad(x_ndhwc[..., 0],
                 ((0, 0), (_PAD, _PAD), (_PAD, _PAD), (_PAD, _PAD)))
    cols = []
    for kd in range(_K):
        for kh in range(_K):
            for kw in range(_K):
                cols.append(xp[:, kd:kd + _STRIDE * Do:_STRIDE,
                                  kh:kh + _STRIDE * Ho:_STRIDE,
                                  kw:kw + _STRIDE * Wo:_STRIDE].reshape(-1))
    return jnp.stack(cols, axis=0), (Do, Ho, Wo)


def _tap_selection_mats(N, D, H, W):
    """(27, Pin, Pout) 0/1 tap-selection matrices for Conv3d(k=3, s=2, p=1)."""
    Do, Ho, Wo = _out_dim(D), _out_dim(H), _out_dim(W)
    Pin, Pout = N * D * H * W, N * Do * Ho * Wo
    G = np.zeros((27, Pin, Pout), np.float32)
    t = 0
    for kd in range(_K):
        for kh in range(_K):
            for kw in range(_K):
                for n in range(N):
                    for od in range(Do):
                        di = _STRIDE * od + kd - _PAD
                        if di < 0 or di >= D:
                            continue
                        for oh in range(Ho):
                            hi = _STRIDE * oh + kh - _PAD
                            if hi < 0 or hi >= H:
                                continue
                            for ow in range(Wo):
                                wi = _STRIDE * ow + kw - _PAD
                                if wi < 0 or wi >= W:
                                    continue
                                pi = ((n * D + di) * H + hi) * W + wi
                                po = ((n * Do + od) * Ho + oh) * Wo + ow
                                G[t, pi, po] = 1.0
                t += 1
    # 0/1 values are exactly representable in bf16 -> lossless, half the bytes.
    return jnp.asarray(G, jnp.bfloat16), (Do, Ho, Wo)


def init_extractnet_params(key):
    """PyTorch-default-style uniform init; weights in OIkkk layout."""
    params = []
    for i, (cin, cout) in enumerate(_LAYER_SPECS):
        kw, kb = jax.random.split(jax.random.fold_in(key, i))
        bound = 1.0 / np.sqrt(cin * 27)
        w = jax.random.uniform(kw, (cout, cin, 3, 3, 3), jnp.float32,
                               -bound, bound)
        b = jax.random.uniform(kb, (cout,), jnp.float32, -bound, bound)
        params.append((w, b))
    return params


def extract_net_forward(x_ncdhw, params):
    """ExtractNet.forward: returns {'1/4', '1/8', '1/16'} feature maps (NCDHW)."""
    N, cin, D, H, W = x_ncdhw.shape
    assert cin == 1
    x = jnp.transpose(x_ncdhw, (0, 2, 3, 4, 1)).astype(jnp.float32)   # NDHWC

    (w1, b1), (w2, b2), (w3, b3), (w4, b4) = params

    # layer-1 patches (Cin == 1 -> 27 rows, lane-dense over output voxels)
    p1, (D1, H1, W1) = _layer1_patches_T(x)
    # tap-selection matrices for the in-kernel gathers of layers 2..4
    g2, (D2, H2, W2) = _tap_selection_mats(N, D1, H1, W1)
    g3, (D3, H3, W3) = _tap_selection_mats(N, D2, H2, W2)
    g4, (D4, H4, W4) = _tap_selection_mats(N, D3, H3, W3)

    # weights: layer 1 as (16, 27); layers 2-4 as per-tap stacks (27, Cout, Cin)
    w1m = w1.reshape(16, 27)

    def tap_stack(w):
        co, ci = w.shape[0], w.shape[1]
        return jnp.transpose(w, (2, 3, 4, 0, 1)).reshape(27, co, ci)

    w2s, w3s, w4s = tap_stack(w2), tap_stack(w3), tap_stack(w4)

    P2 = N * D2 * H2 * W2
    P3 = N * D3 * H3 * W3
    P4 = N * D4 * H4 * W4

    inputs = (p1, w1m, b1.reshape(-1, 1),
              g2, w2s, b2.reshape(-1, 1),
              g3, w3s, b3.reshape(-1, 1),
              g4, w4s, b4.reshape(-1, 1))

    y2, y3, y4 = pl.pallas_call(
        _extractnet_kernel,
        out_shape=(jax.ShapeDtypeStruct((32, P2), jnp.float32),
                   jax.ShapeDtypeStruct((48, P3), jnp.float32),
                   jax.ShapeDtypeStruct((64, P4), jnp.float32)),
        grid_spec=pltpu.PrefetchScalarGridSpec(
            num_scalar_prefetch=0,
            grid=(1,),
            in_specs=[_full_spec(a.shape) for a in inputs],
            out_specs=(_full_spec((32, P2)),
                       _full_spec((48, P3)),
                       _full_spec((64, P4))),
        ),
        compiler_params=pltpu.CompilerParams(
            dimension_semantics=("arbitrary",),
            vmem_limit_bytes=40 * 1024 * 1024),
    )(*inputs)

    def to_ncdhw(y, c, d, h, w):
        return jnp.transpose(y.reshape(c, N, d, h, w), (1, 0, 2, 3, 4))

    return {'1/4': to_ncdhw(y2, 32, D2, H2, W2),
            '1/8': to_ncdhw(y3, 48, D3, H3, W3),
            '1/16': to_ncdhw(y4, 64, D4, H4, W4)}


# --------------------------------------------------------------------------
# NumPy reference (float64) for a correctness sanity check
# --------------------------------------------------------------------------
def _ref_forward(x_ncdhw, params):
    x = np.transpose(np.asarray(x_ncdhw, np.float64), (0, 2, 3, 4, 1))
    feats = []
    for (w, b) in params:
        cout = w.shape[0]
        w_flat = np.transpose(np.asarray(w, np.float64),
                              (2, 3, 4, 1, 0)).reshape(-1, cout)
        N, D, H, W, C = x.shape
        xp = np.pad(x, ((0, 0), (1, 1), (1, 1), (1, 1), (0, 0)))
        Do, Ho, Wo = _out_dim(D), _out_dim(H), _out_dim(W)
        cols = []
        for kd in range(3):
            for kh in range(3):
                for kw in range(3):
                    cols.append(xp[:, kd:kd + 2 * Do:2,
                                      kh:kh + 2 * Ho:2,
                                      kw:kw + 2 * Wo:2, :])
        patches = np.stack(cols, axis=-2).reshape(N * Do * Ho * Wo, 27 * C)
        y = patches @ w_flat + np.asarray(b, np.float64)
        y = np.where(y >= 0, y, 0.1 * y)
        x = y.reshape(N, Do, Ho, Wo, cout)
        feats.append(x)
    to_ncdhw = lambda t: np.transpose(t, (0, 4, 1, 2, 3))
    return {'1/4': to_ncdhw(feats[1]),
            '1/8': to_ncdhw(feats[2]),
            '1/16': to_ncdhw(feats[3])}


if __name__ == "__main__":
    key = jax.random.PRNGKey(0)
    pkey, xkey = jax.random.split(key)

    params = init_extractnet_params(pkey)
    # PyTorch NCDHW input: batch=1, channels=1, 16^3 volume
    x = jax.random.normal(xkey, (1, 1, 16, 16, 16), jnp.float32)

    out = extract_net_forward(x, params)
    out = jax.tree_util.tree_map(jax.block_until_ready, out)

    assert out['1/4'].shape == (1, 32, 4, 4, 4)
    assert out['1/8'].shape == (1, 48, 2, 2, 2)
    assert out['1/16'].shape == (1, 64, 1, 1, 1)

    ref = _ref_forward(x, params)
    for k in ('1/4', '1/8', '1/16'):
        assert np.allclose(np.asarray(out[k]), ref[k], rtol=2e-2, atol=2e-3), k

    print("KERNEL_OK")
</pallas_src>

<mosaic_0001>
module attributes {stable_mosaic.version = 11 : i64} {
  func.func @_extractnet_kernel(%arg0: i32, %arg1: memref<27x512xf32, #tpu.memory_space<vmem>>, %arg2: memref<16x27xf32, #tpu.memory_space<vmem>>, %arg3: memref<16x1xf32, #tpu.memory_space<vmem>>, %arg4: memref<27x512x64xbf16, #tpu.memory_space<vmem>>, %arg5: memref<27x32x16xf32, #tpu.memory_space<vmem>>, %arg6: memref<32x1xf32, #tpu.memory_space<vmem>>, %arg7: memref<27x64x8xbf16, #tpu.memory_space<vmem>>, %arg8: memref<27x48x32xf32, #tpu.memory_space<vmem>>, %arg9: memref<48x1xf32, #tpu.memory_space<vmem>>, %arg10: memref<27x8x1xbf16, #tpu.memory_space<vmem>>, %arg11: memref<27x64x48xf32, #tpu.memory_space<vmem>>, %arg12: memref<64x1xf32, #tpu.memory_space<vmem>>, %arg13: memref<32x64xf32, #tpu.memory_space<vmem>>, %arg14: memref<48x8xf32, #tpu.memory_space<vmem>>, %arg15: memref<64x1xf32, #tpu.memory_space<vmem>>) attributes {dimension_semantics = [#tpu.dimension_semantics<arbitrary>], iteration_bounds = array<i64: 1>, scalar_prefetch = 0 : i64, scratch_operands = 0 : i64, tpu.core_type = #tpu.core_type<tc>, window_params = [{pipeline_mode = #tpu.pipeline_mode<synchronous>, transform_indices = @transform_0, window_bounds = array<i64: 27, 512>}, {pipeline_mode = #tpu.pipeline_mode<synchronous>, transform_indices = @transform_1, window_bounds = array<i64: 16, 27>}, {pipeline_mode = #tpu.pipeline_mode<synchronous>, transform_indices = @transform_2, window_bounds = array<i64: 16, 1>}, {pipeline_mode = #tpu.pipeline_mode<synchronous>, transform_indices = @transform_3, window_bounds = array<i64: 27, 512, 64>}, {pipeline_mode = #tpu.pipeline_mode<synchronous>, transform_indices = @transform_4, window_bounds = array<i64: 27, 32, 16>}, {pipeline_mode = #tpu.pipeline_mode<synchronous>, transform_indices = @transform_5, window_bounds = array<i64: 32, 1>}, {pipeline_mode = #tpu.pipeline_mode<synchronous>, transform_indices = @transform_6, window_bounds = array<i64: 27, 64, 8>}, {pipeline_mode = #tpu.pipeline_mode<synchronous>, transform_indices = @transform_7, window_bounds = array<i64: 27, 48, 32>}, {pipeline_mode = #tpu.pipeline_mode<synchronous>, transform_indices = @transform_8, window_bounds = array<i64: 48, 1>}, {pipeline_mode = #tpu.pipeline_mode<synchronous>, transform_indices = @transform_9, window_bounds = array<i64: 27, 8, 1>}, {pipeline_mode = #tpu.pipeline_mode<synchronous>, transform_indices = @transform_10, window_bounds = array<i64: 27, 64, 48>}, {pipeline_mode = #tpu.pipeline_mode<synchronous>, transform_indices = @transform_11, window_bounds = array<i64: 64, 1>}, {pipeline_mode = #tpu.pipeline_mode<synchronous>, transform_indices = @transform_12, window_bounds = array<i64: 32, 64>}, {pipeline_mode = #tpu.pipeline_mode<synchronous>, transform_indices = @transform_13, window_bounds = array<i64: 48, 8>}, {pipeline_mode = #tpu.pipeline_mode<synchronous>, transform_indices = @transform_14, window_bounds = array<i64: 64, 1>}]} {
    %c0 = arith.constant 0 : index
    %c0_0 = arith.constant 0 : index
    %0 = vector.load %arg2[%c0, %c0_0] : memref<16x27xf32, #tpu.memory_space<vmem>>, vector<16x27xf32>
    %c0_1 = arith.constant 0 : index
    %c0_2 = arith.constant 0 : index
    %1 = vector.load %arg1[%c0_1, %c0_2] : memref<27x512xf32, #tpu.memory_space<vmem>>, vector<27x512xf32>
    %cst = arith.constant dense<0.000000e+00> : vector<16x512xf32>
    %2 = tpu.matmul %0, %1, %cst {dimension_numbers = #tpu.dot_dimension_numbers<[1], [0], [0], [1], [0, 0, 1, 1], [], []>} : vector<16x27xf32>, vector<27x512xf32>, vector<16x512xf32> -> vector<16x512xf32>
    %c0_3 = arith.constant 0 : index
    %c0_4 = arith.constant 0 : index
    %3 = vector.load %arg3[%c0_3, %c0_4] : memref<16x1xf32, #tpu.memory_space<vmem>>, vector<16x1xf32>
    %4 = vector.broadcast %3 : vector<16x1xf32> to vector<16x512xf32>
    %5 = arith.addf %2, %4 : vector<16x512xf32>
    %cst_5 = arith.constant 0.000000e+00 : f32
    %6 = vector.broadcast %cst_5 : f32 to vector<16x512xf32>
    %7 = arith.cmpf oge, %5, %6 : vector<16x512xf32>
    %cst_6 = arith.constant 1.000000e-01 : f32
    %8 = vector.broadcast %cst_6 : f32 to vector<16x512xf32>
    %9 = arith.mulf %8, %5 : vector<16x512xf32>
    %10 = arith.select %7, %5, %9 : vector<16x512xi1>, vector<16x512xf32>
    %cst_7 = arith.constant 0.000000e+00 : f32
    %11 = vector.broadcast %cst_7 : f32 to vector<32x64xf32>
    %c0_8 = arith.constant 0 : index
    %c0_9 = arith.constant 0 : index
    %c0_10 = arith.constant 0 : index
    %12 = vector.load %arg4[%c0_8, %c0_9, %c0_10] : memref<27x512x64xbf16, #tpu.memory_space<vmem>>, vector<1x512x64xbf16>
    %13 = vector.shape_cast %12 : vector<1x512x64xbf16> to vector<512x64xbf16>
    %14 = arith.extf %13 : vector<512x64xbf16> to vector<512x64xf32>
    %cst_11 = arith.constant dense<0.000000e+00> : vector<16x64xf32>
    %15 = tpu.matmul %10, %14, %cst_11 {dimension_numbers = #tpu.dot_dimension_numbers<[1], [0], [0], [1], [0, 0, 1, 1], [], []>} : vector<16x512xf32>, vector<512x64xf32>, vector<16x64xf32> -> vector<16x64xf32>
    %c0_12 = arith.constant 0 : index
    %c0_13 = arith.constant 0 : index
    %c0_14 = arith.constant 0 : index
    %16 = vector.load %arg5[%c0_12, %c0_13, %c0_14] : memref<27x32x16xf32, #tpu.memory_space<vmem>>, vector<1x32x16xf32>
    %17 = vector.shape_cast %16 : vector<1x32x16xf32> to vector<32x16xf32>
    %cst_15 = arith.constant dense<0.000000e+00> : vector<32x64xf32>
    %18 = tpu.matmul %17, %15, %cst_15 {dimension_numbers = #tpu.dot_dimension_numbers<[1], [0], [0], [1], [0, 0, 1, 1], [], []>} : vector<32x16xf32>, vector<16x64xf32>, vector<32x64xf32> -> vector<32x64xf32>
    %19 = arith.addf %11, %18 : vector<32x64xf32>
    %c1 = arith.constant 1 : index
    %c0_16 = arith.constant 0 : index
    %c0_17 = arith.constant 0 : index
    %20 = vector.load %arg4[%c1, %c0_16, %c0_17] : memref<27x512x64xbf16, #tpu.memory_space<vmem>>, vector<1x512x64xbf16>
    %21 = vector.shape_cast %20 : vector<1x512x64xbf16> to vector<512x64xbf16>
    %22 = arith.extf %21 : vector<512x64xbf16> to vector<512x64xf32>
    %cst_18 = arith.constant dense<0.000000e+00> : vector<16x64xf32>
    %23 = tpu.matmul %10, %22, %cst_18 {dimension_numbers = #tpu.dot_dimension_numbers<[1], [0], [0], [1], [0, 0, 1, 1], [], []>} : vector<16x512xf32>, vector<512x64xf32>, vector<16x64xf32> -> vector<16x64xf32>
    %c1_19 = arith.constant 1 : index
    %c0_20 = arith.constant 0 : index
    %c0_21 = arith.constant 0 : index
    %24 = vector.load %arg5[%c1_19, %c0_20, %c0_21] : memref<27x32x16xf32, #tpu.memory_space<vmem>>, vector<1x32x16xf32>
    %25 = vector.shape_cast %24 : vector<1x32x16xf32> to vector<32x16xf32>
    %cst_22 = arith.constant dense<0.000000e+00> : vector<32x64xf32>
    %26 = tpu.matmul %25, %23, %cst_22 {dimension_numbers = #tpu.dot_dimension_numbers<[1], [0], [0], [1], [0, 0, 1, 1], [], []>} : vector<32x16xf32>, vector<16x64xf32>, vector<32x64xf32> -> vector<32x64xf32>
    %27 = arith.addf %19, %26 : vector<32x64xf32>
    %c2 = arith.constant 2 : index
    %c0_23 = arith.constant 0 : index
    %c0_24 = arith.constant 0 : index
    %28 = vector.load %arg4[%c2, %c0_23, %c0_24] : memref<27x512x64xbf16, #tpu.memory_space<vmem>>, vector<1x512x64xbf16>
    %29 = vector.shape_cast %28 : vector<1x512x64xbf16> to vector<512x64xbf16>
    %30 = arith.extf %29 : vector<512x64xbf16> to vector<512x64xf32>
    %cst_25 = arith.constant dense<0.000000e+00> : vector<16x64xf32>
    %31 = tpu.matmul %10, %30, %cst_25 {dimension_numbers = #tpu.dot_dimension_numbers<[1], [0], [0], [1], [0, 0, 1, 1], [], []>} : vector<16x512xf32>, vector<512x64xf32>, vector<16x64xf32> -> vector<16x64xf32>
    %c2_26 = arith.constant 2 : index
    %c0_27 = arith.constant 0 : index
    %c0_28 = arith.constant 0 : index
    %32 = vector.load %arg5[%c2_26, %c0_27, %c0_28] : memref<27x32x16xf32, #tpu.memory_space<vmem>>, vector<1x32x16xf32>
    %33 = vector.shape_cast %32 : vector<1x32x16xf32> to vector<32x16xf32>
    %cst_29 = arith.constant dense<0.000000e+00> : vector<32x64xf32>
    %34 = tpu.matmul %33, %31, %cst_29 {dimension_numbers = #tpu.dot_dimension_numbers<[1], [0], [0], [1], [0, 0, 1, 1], [], []>} : vector<32x16xf32>, vector<16x64xf32>, vector<32x64xf32> -> vector<32x64xf32>
    %35 = arith.addf %27, %34 : vector<32x64xf32>
    %c3 = arith.constant 3 : index
    %c0_30 = arith.constant 0 : index
    %c0_31 = arith.constant 0 : index
    %36 = vector.load %arg4[%c3, %c0_30, %c0_31] : memref<27x512x64xbf16, #tpu.memory_space<vmem>>, vector<1x512x64xbf16>
    %37 = vector.shape_cast %36 : vector<1x512x64xbf16> to vector<512x64xbf16>
    %38 = arith.extf %37 : vector<512x64xbf16> to vector<512x64xf32>
    %cst_32 = arith.constant dense<0.000000e+00> : vector<16x64xf32>
    %39 = tpu.matmul %10, %38, %cst_32 {dimension_numbers = #tpu.dot_dimension_numbers<[1], [0], [0], [1], [0, 0, 1, 1], [], []>} : vector<16x512xf32>, vector<512x64xf32>, vector<16x64xf32> -> vector<16x64xf32>
    %c3_33 = arith.constant 3 : index
    %c0_34 = arith.constant 0 : index
    %c0_35 = arith.constant 0 : index
    %40 = vector.load %arg5[%c3_33, %c0_34, %c0_35] : memref<27x32x16xf32, #tpu.memory_space<vmem>>, vector<1x32x16xf32>
    %41 = vector.shape_cast %40 : vector<1x32x16xf32> to vector<32x16xf32>
    %cst_36 = arith.constant dense<0.000000e+00> : vector<32x64xf32>
    %42 = tpu.matmul %41, %39, %cst_36 {dimension_numbers = #tpu.dot_dimension_numbers<[1], [0], [0], [1], [0, 0, 1, 1], [], []>} : vector<32x16xf32>, vector<16x64xf32>, vector<32x64xf32> -> vector<32x64xf32>
    %43 = arith.addf %35, %42 : vector<32x64xf32>
    %c4 = arith.constant 4 : index
    %c0_37 = arith.constant 0 : index
    %c0_38 = arith.constant 0 : index
    %44 = vector.load %arg4[%c4, %c0_37, %c0_38] : memref<27x512x64xbf16, #tpu.memory_space<vmem>>, vector<1x512x64xbf16>
    %45 = vector.shape_cast %44 : vector<1x512x64xbf16> to vector<512x64xbf16>
    %46 = arith.extf %45 : vector<512x64xbf16> to vector<512x64xf32>
    %cst_39 = arith.constant dense<0.000000e+00> : vector<16x64xf32>
    %47 = tpu.matmul %10, %46, %cst_39 {dimension_numbers = #tpu.dot_dimension_numbers<[1], [0], [0], [1], [0, 0, 1, 1], [], []>} : vector<16x512xf32>, vector<512x64xf32>, vector<16x64xf32> -> vector<16x64xf32>
    %c4_40 = arith.constant 4 : index
    %c0_41 = arith.constant 0 : index
    %c0_42 = arith.constant 0 : index
    %48 = vector.load %arg5[%c4_40, %c0_41, %c0_42] : memref<27x32x16xf32, #tpu.memory_space<vmem>>, vector<1x32x16xf32>
    %49 = vector.shape_cast %48 : vector<1x32x16xf32> to vector<32x16xf32>
    %cst_43 = arith.constant dense<0.000000e+00> : vector<32x64xf32>
    %50 = tpu.matmul %49, %47, %cst_43 {dimension_numbers = #tpu.dot_dimension_numbers<[1], [0], [0], [1], [0, 0, 1, 1], [], []>} : vector<32x16xf32>, vector<16x64xf32>, vector<32x64xf32> -> vector<32x64xf32>
    %51 = arith.addf %43, %50 : vector<32x64xf32>
    %c5 = arith.constant 5 : index
    %c0_44 = arith.constant 0 : index
    %c0_45 = arith.constant 0 : index
    %52 = vector.load %arg4[%c5, %c0_44, %c0_45] : memref<27x512x64xbf16, #tpu.memory_space<vmem>>, vector<1x512x64xbf16>
    %53 = vector.shape_cast %52 : vector<1x512x64xbf16> to vector<512x64xbf16>
    %54 = arith.extf %53 : vector<512x64xbf16> to vector<512x64xf32>
    %cst_46 = arith.constant dense<0.000000e+00> : vector<16x64xf32>
    %55 = tpu.matmul %10, %54, %cst_46 {dimension_numbers = #tpu.dot_dimension_numbers<[1], [0], [0], [1], [0, 0, 1, 1], [], []>} : vector<16x512xf32>, vector<512x64xf32>, vector<16x64xf32> -> vector<16x64xf32>
    %c5_47 = arith.constant 5 : index
    %c0_48 = arith.constant 0 : index
    %c0_49 = arith.constant 0 : index
    %56 = vector.load %arg5[%c5_47, %c0_48, %c0_49] : memref<27x32x16xf32, #tpu.memory_space<vmem>>, vector<1x32x16xf32>
    %57 = vector.shape_cast %56 : vector<1x32x16xf32> to vector<32x16xf32>
    %cst_50 = arith.constant dense<0.000000e+00> : vector<32x64xf32>
    %58 = tpu.matmul %57, %55, %cst_50 {dimension_numbers = #tpu.dot_dimension_numbers<[1], [0], [0], [1], [0, 0, 1, 1], [], []>} : vector<32x16xf32>, vector<16x64xf32>, vector<32x64xf32> -> vector<32x64xf32>
    %59 = arith.addf %51, %58 : vector<32x64xf32>
    %c6 = arith.constant 6 : index
    %c0_51 = arith.constant 0 : index
    %c0_52 = arith.constant 0 : index
    %60 = vector.load %arg4[%c6, %c0_51, %c0_52] : memref<27x512x64xbf16, #tpu.memory_space<vmem>>, vector<1x512x64xbf16>
    %61 = vector.shape_cast %60 : vector<1x512x64xbf16> to vector<512x64xbf16>
    %62 = arith.extf %61 : vector<512x64xbf16> to vector<512x64xf32>
    %cst_53 = arith.constant dense<0.000000e+00> : vector<16x64xf32>
    %63 = tpu.matmul %10, %62, %cst_53 {dimension_numbers = #tpu.dot_dimension_numbers<[1], [0], [0], [1], [0, 0, 1, 1], [], []>} : vector<16x512xf32>, vector<512x64xf32>, vector<16x64xf32> -> vector<16x64xf32>
    %c6_54 = arith.constant 6 : index
    %c0_55 = arith.constant 0 : index
    %c0_56 = arith.constant 0 : index
    %64 = vector.load %arg5[%c6_54, %c0_55, %c0_56] : memref<27x32x16xf32, #tpu.memory_space<vmem>>, vector<1x32x16xf32>
    %65 = vector.shape_cast %64 : vector<1x32x16xf32> to vector<32x16xf32>
    %cst_57 = arith.constant dense<0.000000e+00> : vector<32x64xf32>
    %66 = tpu.matmul %65, %63, %cst_57 {dimension_numbers = #tpu.dot_dimension_numbers<[1], [0], [0], [1], [0, 0, 1, 1], [], []>} : vector<32x16xf32>, vector<16x64xf32>, vector<32x64xf32> -> vector<32x64xf32>
    %67 = arith.addf %59, %66 : vector<32x64xf32>
    %c7 = arith.constant 7 : index
    %c0_58 = arith.constant 0 : index
    %c0_59 = arith.constant 0 : index
    %68 = vector.load %arg4[%c7, %c0_58, %c0_59] : memref<27x512x64xbf16, #tpu.memory_space<vmem>>, vector<1x512x64xbf16>
    %69 = vector.shape_cast %68 : vector<1x512x64xbf16> to vector<512x64xbf16>
    %70 = arith.extf %69 : vector<512x64xbf16> to vector<512x64xf32>
    %cst_60 = arith.constant dense<0.000000e+00> : vector<16x64xf32>
    %71 = tpu.matmul %10, %70, %cst_60 {dimension_numbers = #tpu.dot_dimension_numbers<[1], [0], [0], [1], [0, 0, 1, 1], [], []>} : vector<16x512xf32>, vector<512x64xf32>, vector<16x64xf32> -> vector<16x64xf32>
    %c7_61 = arith.constant 7 : index
    %c0_62 = arith.constant 0 : index
    %c0_63 = arith.constant 0 : index
    %72 = vector.load %arg5[%c7_61, %c0_62, %c0_63] : memref<27x32x16xf32, #tpu.memory_space<vmem>>, vector<1x32x16xf32>
    %73 = vector.shape_cast %72 : vector<1x32x16xf32> to vector<32x16xf32>
    %cst_64 = arith.constant dense<0.000000e+00> : vector<32x64xf32>
    %74 = tpu.matmul %73, %71, %cst_64 {dimension_numbers = #tpu.dot_dimension_numbers<[1], [0], [0], [1], [0, 0, 1, 1], [], []>} : vector<32x16xf32>, vector<16x64xf32>, vector<32x64xf32> -> vector<32x64xf32>
    %75 = arith.addf %67, %74 : vector<32x64xf32>
    %c8 = arith.constant 8 : index
    %c0_65 = arith.constant 0 : index
    %c0_66 = arith.constant 0 : index
    %76 = vector.load %arg4[%c8, %c0_65, %c0_66] : memref<27x512x64xbf16, #tpu.memory_space<vmem>>, vector<1x512x64xbf16>
    %77 = vector.shape_cast %76 : vector<1x512x64xbf16> to vector<512x64xbf16>
    %78 = arith.extf %77 : vector<512x64xbf16> to vector<512x64xf32>
    %cst_67 = arith.constant dense<0.000000e+00> : vector<16x64xf32>
    %79 = tpu.matmul %10, %78, %cst_67 {dimension_numbers = #tpu.dot_dimension_numbers<[1], [0], [0], [1], [0, 0, 1, 1], [], []>} : vector<16x512xf32>, vector<512x64xf32>, vector<16x64xf32> -> vector<16x64xf32>
    %c8_68 = arith.constant 8 : index
    %c0_69 = arith.constant 0 : index
    %c0_70 = arith.constant 0 : index
    %80 = vector.load %arg5[%c8_68, %c0_69, %c0_70] : memref<27x32x16xf32, #tpu.memory_space<vmem>>, vector<1x32x16xf32>
    %81 = vector.shape_cast %80 : vector<1x32x16xf32> to vector<32x16xf32>
    %cst_71 = arith.constant dense<0.000000e+00> : vector<32x64xf32>
    %82 = tpu.matmul %81, %79, %cst_71 {dimension_numbers = #tpu.dot_dimension_numbers<[1], [0], [0], [1], [0, 0, 1, 1], [], []>} : vector<32x16xf32>, vector<16x64xf32>, vector<32x64xf32> -> vector<32x64xf32>
    %83 = arith.addf %75, %82 : vector<32x64xf32>
    %c9 = arith.constant 9 : index
    %c0_72 = arith.constant 0 : index
    %c0_73 = arith.constant 0 : index
    %84 = vector.load %arg4[%c9, %c0_72, %c0_73] : memref<27x512x64xbf16, #tpu.memory_space<vmem>>, vector<1x512x64xbf16>
    %85 = vector.shape_cast %84 : vector<1x512x64xbf16> to vector<512x64xbf16>
    %86 = arith.extf %85 : vector<512x64xbf16> to vector<512x64xf32>
    %cst_74 = arith.constant dense<0.000000e+00> : vector<16x64xf32>
    %87 = tpu.matmul %10, %86, %cst_74 {dimension_numbers = #tpu.dot_dimension_numbers<[1], [0], [0], [1], [0, 0, 1, 1], [], []>} : vector<16x512xf32>, vector<512x64xf32>, vector<16x64xf32> -> vector<16x64xf32>
    %c9_75 = arith.constant 9 : index
    %c0_76 = arith.constant 0 : index
    %c0_77 = arith.constant 0 : index
    %88 = vector.load %arg5[%c9_75, %c0_76, %c0_77] : memref<27x32x16xf32, #tpu.memory_space<vmem>>, vector<1x32x16xf32>
    %89 = vector.shape_cast %88 : vector<1x32x16xf32> to vector<32x16xf32>
    %cst_78 = arith.constant dense<0.000000e+00> : vector<32x64xf32>
    %90 = tpu.matmul %89, %87, %cst_78 {dimension_numbers = #tpu.dot_dimension_numbers<[1], [0], [0], [1], [0, 0, 1, 1], [], []>} : vector<32x16xf32>, vector<16x64xf32>, vector<32x64xf32> -> vector<32x64xf32>
    %91 = arith.addf %83, %90 : vector<32x64xf32>
    %c10 = arith.constant 10 : index
    %c0_79 = arith.constant 0 : index
    %c0_80 = arith.constant 0 : index
    %92 = vector.load %arg4[%c10, %c0_79, %c0_80] : memref<27x512x64xbf16, #tpu.memory_space<vmem>>, vector<1x512x64xbf16>
    %93 = vector.shape_cast %92 : vector<1x512x64xbf16> to vector<512x64xbf16>
    %94 = arith.extf %93 : vector<512x64xbf16> to vector<512x64xf32>
    %cst_81 = arith.constant dense<0.000000e+00> : vector<16x64xf32>
    %95 = tpu.matmul %10, %94, %cst_81 {dimension_numbers = #tpu.dot_dimension_numbers<[1], [0], [0], [1], [0, 0, 1, 1], [], []>} : vector<16x512xf32>, vector<512x64xf32>, vector<16x64xf32> -> vector<16x64xf32>
    %c10_82 = arith.constant 10 : index
    %c0_83 = arith.constant 0 : index
    %c0_84 = arith.constant 0 : index
    %96 = vector.load %arg5[%c10_82, %c0_83, %c0_84] : memref<27x32x16xf32, #tpu.memory_space<vmem>>, vector<1x32x16xf32>
    %97 = vector.shape_cast %96 : vector<1x32x16xf32> to vector<32x16xf32>
    %cst_85 = arith.constant dense<0.000000e+00> : vector<32x64xf32>
    %98 = tpu.matmul %97, %95, %cst_85 {dimension_numbers = #tpu.dot_dimension_numbers<[1], [0], [0], [1], [0, 0, 1, 1], [], []>} : vector<32x16xf32>, vector<16x64xf32>, vector<32x64xf32> -> vector<32x64xf32>
    %99 = arith.addf %91, %98 : vector<32x64xf32>
    %c11 = arith.constant 11 : index
    %c0_86 = arith.constant 0 : index
    %c0_87 = arith.constant 0 : index
    %100 = vector.load %arg4[%c11, %c0_86, %c0_87] : memref<27x512x64xbf16, #tpu.memory_space<vmem>>, vector<1x512x64xbf16>
    %101 = vector.shape_cast %100 : vector<1x512x64xbf16> to vector<512x64xbf16>
    %102 = arith.extf %101 : vector<512x64xbf16> to vector<512x64xf32>
    %cst_88 = arith.constant dense<0.000000e+00> : vector<16x64xf32>
    %103 = tpu.matmul %10, %102, %cst_88 {dimension_numbers = #tpu.dot_dimension_numbers<[1], [0], [0], [1], [0, 0, 1, 1], [], []>} : vector<16x512xf32>, vector<512x64xf32>, vector<16x64xf32> -> vector<16x64xf32>
    %c11_89 = arith.constant 11 : index
    %c0_90 = arith.constant 0 : index
    %c0_91 = arith.constant 0 : index
    %104 = vector.load %arg5[%c11_89, %c0_90, %c0_91] : memref<27x32x16xf32, #tpu.memory_space<vmem>>, vector<1x32x16xf32>
    %105 = vector.shape_cast %104 : vector<1x32x16xf32> to vector<32x16xf32>
    %cst_92 = arith.constant dense<0.000000e+00> : vector<32x64xf32>
    %106 = tpu.matmul %105, %103, %cst_92 {dimension_numbers = #tpu.dot_dimension_numbers<[1], [0], [0], [1], [0, 0, 1, 1], [], []>} : vector<32x16xf32>, vector<16x64xf32>, vector<32x64xf32> -> vector<32x64xf32>
    %107 = arith.addf %99, %106 : vector<32x64xf32>
    %c12 = arith.constant 12 : index
    %c0_93 = arith.constant 0 : index
    %c0_94 = arith.constant 0 : index
    %108 = vector.load %arg4[%c12, %c0_93, %c0_94] : memref<27x512x64xbf16, #tpu.memory_space<vmem>>, vector<1x512x64xbf16>
    %109 = vector.shape_cast %108 : vector<1x512x64xbf16> to vector<512x64xbf16>
    %110 = arith.extf %109 : vector<512x64xbf16> to vector<512x64xf32>
    %cst_95 = arith.constant dense<0.000000e+00> : vector<16x64xf32>
    %111 = tpu.matmul %10, %110, %cst_95 {dimension_numbers = #tpu.dot_dimension_numbers<[1], [0], [0], [1], [0, 0, 1, 1], [], []>} : vector<16x512xf32>, vector<512x64xf32>, vector<16x64xf32> -> vector<16x64xf32>
    %c12_96 = arith.constant 12 : index
    %c0_97 = arith.constant 0 : index
    %c0_98 = arith.constant 0 : index
    %112 = vector.load %arg5[%c12_96, %c0_97, %c0_98] : memref<27x32x16xf32, #tpu.memory_space<vmem>>, vector<1x32x16xf32>
    %113 = vector.shape_cast %112 : vector<1x32x16xf32> to vector<32x16xf32>
    %cst_99 = arith.constant dense<0.000000e+00> : vector<32x64xf32>
    %114 = tpu.matmul %113, %111, %cst_99 {dimension_numbers = #tpu.dot_dimension_numbers<[1], [0], [0], [1], [0, 0, 1, 1], [], []>} : vector<32x16xf32>, vector<16x64xf32>, vector<32x64xf32> -> vector<32x64xf32>
    %115 = arith.addf %107, %114 : vector<32x64xf32>
    %c13 = arith.constant 13 : index
    %c0_100 = arith.constant 0 : index
    %c0_101 = arith.constant 0 : index
    %116 = vector.load %arg4[%c13, %c0_100, %c0_101] : memref<27x512x64xbf16, #tpu.memory_space<vmem>>, vector<1x512x64xbf16>
    %117 = vector.shape_cast %116 : vector<1x512x64xbf16> to vector<512x64xbf16>
    %118 = arith.extf %117 : vector<512x64xbf16> to vector<512x64xf32>
    %cst_102 = arith.constant dense<0.000000e+00> : vector<16x64xf32>
    %119 = tpu.matmul %10, %118, %cst_102 {dimension_numbers = #tpu.dot_dimension_numbers<[1], [0], [0], [1], [0, 0, 1, 1], [], []>} : vector<16x512xf32>, vector<512x64xf32>, vector<16x64xf32> -> vector<16x64xf32>
    %c13_103 = arith.constant 13 : index
    %c0_104 = arith.constant 0 : index
    %c0_105 = arith.constant 0 : index
    %120 = vector.load %arg5[%c13_103, %c0_104, %c0_105] : memref<27x32x16xf32, #tpu.memory_space<vmem>>, vector<1x32x16xf32>
    %121 = vector.shape_cast %120 : vector<1x32x16xf32> to vector<32x16xf32>
    %cst_106 = arith.constant dense<0.000000e+00> : vector<32x64xf32>
    %122 = tpu.matmul %121, %119, %cst_106 {dimension_numbers = #tpu.dot_dimension_numbers<[1], [0], [0], [1], [0, 0, 1, 1], [], []>} : vector<32x16xf32>, vector<16x64xf32>, vector<32x64xf32> -> vector<32x64xf32>
    %123 = arith.addf %115, %122 : vector<32x64xf32>
    %c14 = arith.constant 14 : index
    %c0_107 = arith.constant 0 : index
    %c0_108 = arith.constant 0 : index
    %124 = vector.load %arg4[%c14, %c0_107, %c0_108] : memref<27x512x64xbf16, #tpu.memory_space<vmem>>, vector<1x512x64xbf16>
    %125 = vector.shape_cast %124 : vector<1x512x64xbf16> to vector<512x64xbf16>
    %126 = arith.extf %125 : vector<512x64xbf16> to vector<512x64xf32>
    %cst_109 = arith.constant dense<0.000000e+00> : vector<16x64xf32>
    %127 = tpu.matmul %10, %126, %cst_109 {dimension_numbers = #tpu.dot_dimension_numbers<[1], [0], [0], [1], [0, 0, 1, 1], [], []>} : vector<16x512xf32>, vector<512x64xf32>, vector<16x64xf32> -> vector<16x64xf32>
    %c14_110 = arith.constant 14 : index
    %c0_111 = arith.constant 0 : index
    %c0_112 = arith.constant 0 : index
    %128 = vector.load %arg5[%c14_110, %c0_111, %c0_112] : memref<27x32x16xf32, #tpu.memory_space<vmem>>, vector<1x32x16xf32>
    %129 = vector.shape_cast %128 : vector<1x32x16xf32> to vector<32x16xf32>
    %cst_113 = arith.constant dense<0.000000e+00> : vector<32x64xf32>
    %130 = tpu.matmul %129, %127, %cst_113 {dimension_numbers = #tpu.dot_dimension_numbers<[1], [0], [0], [1], [0, 0, 1, 1], [], []>} : vector<32x16xf32>, vector<16x64xf32>, vector<32x64xf32> -> vector<32x64xf32>
    %131 = arith.addf %123, %130 : vector<32x64xf32>
    %c15 = arith.constant 15 : index
    %c0_114 = arith.constant 0 : index
    %c0_115 = arith.constant 0 : index
    %132 = vector.load %arg4[%c15, %c0_114, %c0_115] : memref<27x512x64xbf16, #tpu.memory_space<vmem>>, vector<1x512x64xbf16>
    %133 = vector.shape_cast %132 : vector<1x512x64xbf16> to vector<512x64xbf16>
    %134 = arith.extf %133 : vector<512x64xbf16> to vector<512x64xf32>
    %cst_116 = arith.constant dense<0.000000e+00> : vector<16x64xf32>
    %135 = tpu.matmul %10, %134, %cst_116 {dimension_numbers = #tpu.dot_dimension_numbers<[1], [0], [0], [1], [0, 0, 1, 1], [], []>} : vector<16x512xf32>, vector<512x64xf32>, vector<16x64xf32> -> vector<16x64xf32>
    %c15_117 = arith.constant 15 : index
    %c0_118 = arith.constant 0 : index
    %c0_119 = arith.constant 0 : index
    %136 = vector.load %arg5[%c15_117, %c0_118, %c0_119] : memref<27x32x16xf32, #tpu.memory_space<vmem>>, vector<1x32x16xf32>
    %137 = vector.shape_cast %136 : vector<1x32x16xf32> to vector<32x16xf32>
    %cst_120 = arith.constant dense<0.000000e+00> : vector<32x64xf32>
    %138 = tpu.matmul %137, %135, %cst_120 {dimension_numbers = #tpu.dot_dimension_numbers<[1], [0], [0], [1], [0, 0, 1, 1], [], []>} : vector<32x16xf32>, vector<16x64xf32>, vector<32x64xf32> -> vector<32x64xf32>
    %139 = arith.addf %131, %138 : vector<32x64xf32>
    %c16 = arith.constant 16 : index
    %c0_121 = arith.constant 0 : index
    %c0_122 = arith.constant 0 : index
    %140 = vector.load %arg4[%c16, %c0_121, %c0_122] : memref<27x512x64xbf16, #tpu.memory_space<vmem>>, vector<1x512x64xbf16>
    %141 = vector.shape_cast %140 : vector<1x512x64xbf16> to vector<512x64xbf16>
    %142 = arith.extf %141 : vector<512x64xbf16> to vector<512x64xf32>
    %cst_123 = arith.constant dense<0.000000e+00> : vector<16x64xf32>
    %143 = tpu.matmul %10, %142, %cst_123 {dimension_numbers = #tpu.dot_dimension_numbers<[1], [0], [0], [1], [0, 0, 1, 1], [], []>} : vector<16x512xf32>, vector<512x64xf32>, vector<16x64xf32> -> vector<16x64xf32>
    %c16_124 = arith.constant 16 : index
    %c0_125 = arith.constant 0 : index
    %c0_126 = arith.constant 0 : index
    %144 = vector.load %arg5[%c16_124, %c0_125, %c0_126] : memref<27x32x16xf32, #tpu.memory_space<vmem>>, vector<1x32x16xf32>
    %145 = vector.shape_cast %144 : vector<1x32x16xf32> to vector<32x16xf32>
    %cst_127 = arith.constant dense<0.000000e+00> : vector<32x64xf32>
    %146 = tpu.matmul %145, %143, %cst_127 {dimension_numbers = #tpu.dot_dimension_numbers<[1], [0], [0], [1], [0, 0, 1, 1], [], []>} : vector<32x16xf32>, vector<16x64xf32>, vector<32x64xf32> -> vector<32x64xf32>
    %147 = arith.addf %139, %146 : vector<32x64xf32>
    %c17 = arith.constant 17 : index
    %c0_128 = arith.constant 0 : index
    %c0_129 = arith.constant 0 : index
    %148 = vector.load %arg4[%c17, %c0_128, %c0_129] : memref<27x512x64xbf16, #tpu.memory_space<vmem>>, vector<1x512x64xbf16>
    %149 = vector.shape_cast %148 : vector<1x512x64xbf16> to vector<512x64xbf16>
    %150 = arith.extf %149 : vector<512x64xbf16> to vector<512x64xf32>
    %cst_130 = arith.constant dense<0.000000e+00> : vector<16x64xf32>
    %151 = tpu.matmul %10, %150, %cst_130 {dimension_numbers = #tpu.dot_dimension_numbers<[1], [0], [0], [1], [0, 0, 1, 1], [], []>} : vector<16x512xf32>, vector<512x64xf32>, vector<16x64xf32> -> vector<16x64xf32>
    %c17_131 = arith.constant 17 : index
    %c0_132 = arith.constant 0 : index
    %c0_133 = arith.constant 0 : index
    %152 = vector.load %arg5[%c17_131, %c0_132, %c0_133] : memref<27x32x16xf32, #tpu.memory_space<vmem>>, vector<1x32x16xf32>
    %153 = vector.shape_cast %152 : vector<1x32x16xf32> to vector<32x16xf32>
    %cst_134 = arith.constant dense<0.000000e+00> : vector<32x64xf32>
    %154 = tpu.matmul %153, %151, %cst_134 {dimension_numbers = #tpu.dot_dimension_numbers<[1], [0], [0], [1], [0, 0, 1, 1], [], []>} : vector<32x16xf32>, vector<16x64xf32>, vector<32x64xf32> -> vector<32x64xf32>
    %155 = arith.addf %147, %154 : vector<32x64xf32>
    %c18 = arith.constant 18 : index
    %c0_135 = arith.constant 0 : index
    %c0_136 = arith.constant 0 : index
    %156 = vector.load %arg4[%c18, %c0_135, %c0_136] : memref<27x512x64xbf16, #tpu.memory_space<vmem>>, vector<1x512x64xbf16>
    %157 = vector.shape_cast %156 : vector<1x512x64xbf16> to vector<512x64xbf16>
    %158 = arith.extf %157 : vector<512x64xbf16> to vector<512x64xf32>
    %cst_137 = arith.constant dense<0.000000e+00> : vector<16x64xf32>
    %159 = tpu.matmul %10, %158, %cst_137 {dimension_numbers = #tpu.dot_dimension_numbers<[1], [0], [0], [1], [0, 0, 1, 1], [], []>} : vector<16x512xf32>, vector<512x64xf32>, vector<16x64xf32> -> vector<16x64xf32>
    %c18_138 = arith.constant 18 : index
    %c0_139 = arith.constant 0 : index
    %c0_140 = arith.constant 0 : index
    %160 = vector.load %arg5[%c18_138, %c0_139, %c0_140] : memref<27x32x16xf32, #tpu.memory_space<vmem>>, vector<1x32x16xf32>
    %161 = vector.shape_cast %160 : vector<1x32x16xf32> to vector<32x16xf32>
    %cst_141 = arith.constant dense<0.000000e+00> : vector<32x64xf32>
    %162 = tpu.matmul %161, %159, %cst_141 {dimension_numbers = #tpu.dot_dimension_numbers<[1], [0], [0], [1], [0, 0, 1, 1], [], []>} : vector<32x16xf32>, vector<16x64xf32>, vector<32x64xf32> -> vector<32x64xf32>
    %163 = arith.addf %155, %162 : vector<32x64xf32>
    %c19 = arith.constant 19 : index
    %c0_142 = arith.constant 0 : index
    %c0_143 = arith.constant 0 : index
    %164 = vector.load %arg4[%c19, %c0_142, %c0_143] : memref<27x512x64xbf16, #tpu.memory_space<vmem>>, vector<1x512x64xbf16>
    %165 = vector.shape_cast %164 : vector<1x512x64xbf16> to vector<512x64xbf16>
    %166 = arith.extf %165 : vector<512x64xbf16> to vector<512x64xf32>
    %cst_144 = arith.constant dense<0.000000e+00> : vector<16x64xf32>
    %167 = tpu.matmul %10, %166, %cst_144 {dimension_numbers = #tpu.dot_dimension_numbers<[1], [0], [0], [1], [0, 0, 1, 1], [], []>} : vector<16x512xf32>, vector<512x64xf32>, vector<16x64xf32> -> vector<16x64xf32>
    %c19_145 = arith.constant 19 : index
    %c0_146 = arith.constant 0 : index
    %c0_147 = arith.constant 0 : index
    %168 = vector.load %arg5[%c19_145, %c0_146, %c0_147] : memref<27x32x16xf32, #tpu.memory_space<vmem>>, vector<1x32x16xf32>
    %169 = vector.shape_cast %168 : vector<1x32x16xf32> to vector<32x16xf32>
    %cst_148 = arith.constant dense<0.000000e+00> : vector<32x64xf32>
    %170 = tpu.matmul %169, %167, %cst_148 {dimension_numbers = #tpu.dot_dimension_numbers<[1], [0], [0], [1], [0, 0, 1, 1], [], []>} : vector<32x16xf32>, vector<16x64xf32>, vector<32x64xf32> -> vector<32x64xf32>
    %171 = arith.addf %163, %170 : vector<32x64xf32>
    %c20 = arith.constant 20 : index
    %c0_149 = arith.constant 0 : index
    %c0_150 = arith.constant 0 : index
    %172 = vector.load %arg4[%c20, %c0_149, %c0_150] : memref<27x512x64xbf16, #tpu.memory_space<vmem>>, vector<1x512x64xbf16>
    %173 = vector.shape_cast %172 : vector<1x512x64xbf16> to vector<512x64xbf16>
    %174 = arith.extf %173 : vector<512x64xbf16> to vector<512x64xf32>
    %cst_151 = arith.constant dense<0.000000e+00> : vector<16x64xf32>
    %175 = tpu.matmul %10, %174, %cst_151 {dimension_numbers = #tpu.dot_dimension_numbers<[1], [0], [0], [1], [0, 0, 1, 1], [], []>} : vector<16x512xf32>, vector<512x64xf32>, vector<16x64xf32> -> vector<16x64xf32>
    %c20_152 = arith.constant 20 : index
    %c0_153 = arith.constant 0 : index
    %c0_154 = arith.constant 0 : index
    %176 = vector.load %arg5[%c20_152, %c0_153, %c0_154] : memref<27x32x16xf32, #tpu.memory_space<vmem>>, vector<1x32x16xf32>
    %177 = vector.shape_cast %176 : vector<1x32x16xf32> to vector<32x16xf32>
    %cst_155 = arith.constant dense<0.000000e+00> : vector<32x64xf32>
    %178 = tpu.matmul %177, %175, %cst_155 {dimension_numbers = #tpu.dot_dimension_numbers<[1], [0], [0], [1], [0, 0, 1, 1], [], []>} : vector<32x16xf32>, vector<16x64xf32>, vector<32x64xf32> -> vector<32x64xf32>
    %179 = arith.addf %171, %178 : vector<32x64xf32>
    %c21 = arith.constant 21 : index
    %c0_156 = arith.constant 0 : index
    %c0_157 = arith.constant 0 : index
    %180 = vector.load %arg4[%c21, %c0_156, %c0_157] : memref<27x512x64xbf16, #tpu.memory_space<vmem>>, vector<1x512x64xbf16>
    %181 = vector.shape_cast %180 : vector<1x512x64xbf16> to vector<512x64xbf16>
    %182 = arith.extf %181 : vector<512x64xbf16> to vector<512x64xf32>
    %cst_158 = arith.constant dense<0.000000e+00> : vector<16x64xf32>
    %183 = tpu.matmul %10, %182, %cst_158 {dimension_numbers = #tpu.dot_dimension_numbers<[1], [0], [0], [1], [0, 0, 1, 1], [], []>} : vector<16x512xf32>, vector<512x64xf32>, vector<16x64xf32> -> vector<16x64xf32>
    %c21_159 = arith.constant 21 : index
    %c0_160 = arith.constant 0 : index
    %c0_161 = arith.constant 0 : index
    %184 = vector.load %arg5[%c21_159, %c0_160, %c0_161] : memref<27x32x16xf32, #tpu.memory_space<vmem>>, vector<1x32x16xf32>
    %185 = vector.shape_cast %184 : vector<1x32x16xf32> to vector<32x16xf32>
    %cst_162 = arith.constant dense<0.000000e+00> : vector<32x64xf32>
    %186 = tpu.matmul %185, %183, %cst_162 {dimension_numbers = #tpu.dot_dimension_numbers<[1], [0], [0], [1], [0, 0, 1, 1], [], []>} : vector<32x16xf32>, vector<16x64xf32>, vector<32x64xf32> -> vector<32x64xf32>
    %187 = arith.addf %179, %186 : vector<32x64xf32>
    %c22 = arith.constant 22 : index
    %c0_163 = arith.constant 0 : index
    %c0_164 = arith.constant 0 : index
    %188 = vector.load %arg4[%c22, %c0_163, %c0_164] : memref<27x512x64xbf16, #tpu.memory_space<vmem>>, vector<1x512x64xbf16>
    %189 = vector.shape_cast %188 : vector<1x512x64xbf16> to vector<512x64xbf16>
    %190 = arith.extf %189 : vector<512x64xbf16> to vector<512x64xf32>
    %cst_165 = arith.constant dense<0.000000e+00> : vector<16x64xf32>
    %191 = tpu.matmul %10, %190, %cst_165 {dimension_numbers = #tpu.dot_dimension_numbers<[1], [0], [0], [1], [0, 0, 1, 1], [], []>} : vector<16x512xf32>, vector<512x64xf32>, vector<16x64xf32> -> vector<16x64xf32>
    %c22_166 = arith.constant 22 : index
    %c0_167 = arith.constant 0 : index
    %c0_168 = arith.constant 0 : index
    %192 = vector.load %arg5[%c22_166, %c0_167, %c0_168] : memref<27x32x16xf32, #tpu.memory_space<vmem>>, vector<1x32x16xf32>
    %193 = vector.shape_cast %192 : vector<1x32x16xf32> to vector<32x16xf32>
    %cst_169 = arith.constant dense<0.000000e+00> : vector<32x64xf32>
    %194 = tpu.matmul %193, %191, %cst_169 {dimension_numbers = #tpu.dot_dimension_numbers<[1], [0], [0], [1], [0, 0, 1, 1], [], []>} : vector<32x16xf32>, vector<16x64xf32>, vector<32x64xf32> -> vector<32x64xf32>
    %195 = arith.addf %187, %194 : vector<32x64xf32>
    %c23 = arith.constant 23 : index
    %c0_170 = arith.constant 0 : index
    %c0_171 = arith.constant 0 : index
    %196 = vector.load %arg4[%c23, %c0_170, %c0_171] : memref<27x512x64xbf16, #tpu.memory_space<vmem>>, vector<1x512x64xbf16>
    %197 = vector.shape_cast %196 : vector<1x512x64xbf16> to vector<512x64xbf16>
    %198 = arith.extf %197 : vector<512x64xbf16> to vector<512x64xf32>
    %cst_172 = arith.constant dense<0.000000e+00> : vector<16x64xf32>
    %199 = tpu.matmul %10, %198, %cst_172 {dimension_numbers = #tpu.dot_dimension_numbers<[1], [0], [0], [1], [0, 0, 1, 1], [], []>} : vector<16x512xf32>, vector<512x64xf32>, vector<16x64xf32> -> vector<16x64xf32>
    %c23_173 = arith.constant 23 : index
    %c0_174 = arith.constant 0 : index
    %c0_175 = arith.constant 0 : index
    %200 = vector.load %arg5[%c23_173, %c0_174, %c0_175] : memref<27x32x16xf32, #tpu.memory_space<vmem>>, vector<1x32x16xf32>
    %201 = vector.shape_cast %200 : vector<1x32x16xf32> to vector<32x16xf32>
    %cst_176 = arith.constant dense<0.000000e+00> : vector<32x64xf32>
    %202 = tpu.matmul %201, %199, %cst_176 {dimension_numbers = #tpu.dot_dimension_numbers<[1], [0], [0], [1], [0, 0, 1, 1], [], []>} : vector<32x16xf32>, vector<16x64xf32>, vector<32x64xf32> -> vector<32x64xf32>
    %203 = arith.addf %195, %202 : vector<32x64xf32>
    %c24 = arith.constant 24 : index
    %c0_177 = arith.constant 0 : index
    %c0_178 = arith.constant 0 : index
    %204 = vector.load %arg4[%c24, %c0_177, %c0_178] : memref<27x512x64xbf16, #tpu.memory_space<vmem>>, vector<1x512x64xbf16>
    %205 = vector.shape_cast %204 : vector<1x512x64xbf16> to vector<512x64xbf16>
    %206 = arith.extf %205 : vector<512x64xbf16> to vector<512x64xf32>
    %cst_179 = arith.constant dense<0.000000e+00> : vector<16x64xf32>
    %207 = tpu.matmul %10, %206, %cst_179 {dimension_numbers = #tpu.dot_dimension_numbers<[1], [0], [0], [1], [0, 0, 1, 1], [], []>} : vector<16x512xf32>, vector<512x64xf32>, vector<16x64xf32> -> vector<16x64xf32>
    %c24_180 = arith.constant 24 : index
    %c0_181 = arith.constant 0 : index
    %c0_182 = arith.constant 0 : index
    %208 = vector.load %arg5[%c24_180, %c0_181, %c0_182] : memref<27x32x16xf32, #tpu.memory_space<vmem>>, vector<1x32x16xf32>
    %209 = vector.shape_cast %208 : vector<1x32x16xf32> to vector<32x16xf32>
    %cst_183 = arith.constant dense<0.000000e+00> : vector<32x64xf32>
    %210 = tpu.matmul %209, %207, %cst_183 {dimension_numbers = #tpu.dot_dimension_numbers<[1], [0], [0], [1], [0, 0, 1, 1], [], []>} : vector<32x16xf32>, vector<16x64xf32>, vector<32x64xf32> -> vector<32x64xf32>
    %211 = arith.addf %203, %210 : vector<32x64xf32>
    %c25 = arith.constant 25 : index
    %c0_184 = arith.constant 0 : index
    %c0_185 = arith.constant 0 : index
    %212 = vector.load %arg4[%c25, %c0_184, %c0_185] : memref<27x512x64xbf16, #tpu.memory_space<vmem>>, vector<1x512x64xbf16>
    %213 = vector.shape_cast %212 : vector<1x512x64xbf16> to vector<512x64xbf16>
    %214 = arith.extf %213 : vector<512x64xbf16> to vector<512x64xf32>
    %cst_186 = arith.constant dense<0.000000e+00> : vector<16x64xf32>
    %215 = tpu.matmul %10, %214, %cst_186 {dimension_numbers = #tpu.dot_dimension_numbers<[1], [0], [0], [1], [0, 0, 1, 1], [], []>} : vector<16x512xf32>, vector<512x64xf32>, vector<16x64xf32> -> vector<16x64xf32>
    %c25_187 = arith.constant 25 : index
    %c0_188 = arith.constant 0 : index
    %c0_189 = arith.constant 0 : index
    %216 = vector.load %arg5[%c25_187, %c0_188, %c0_189] : memref<27x32x16xf32, #tpu.memory_space<vmem>>, vector<1x32x16xf32>
    %217 = vector.shape_cast %216 : vector<1x32x16xf32> to vector<32x16xf32>
    %cst_190 = arith.constant dense<0.000000e+00> : vector<32x64xf32>
    %218 = tpu.matmul %217, %215, %cst_190 {dimension_numbers = #tpu.dot_dimension_numbers<[1], [0], [0], [1], [0, 0, 1, 1], [], []>} : vector<32x16xf32>, vector<16x64xf32>, vector<32x64xf32> -> vector<32x64xf32>
    %219 = arith.addf %211, %218 : vector<32x64xf32>
    %c26 = arith.constant 26 : index
    %c0_191 = arith.constant 0 : index
    %c0_192 = arith.constant 0 : index
    %220 = vector.load %arg4[%c26, %c0_191, %c0_192] : memref<27x512x64xbf16, #tpu.memory_space<vmem>>, vector<1x512x64xbf16>
    %221 = vector.shape_cast %220 : vector<1x512x64xbf16> to vector<512x64xbf16>
    %222 = arith.extf %221 : vector<512x64xbf16> to vector<512x64xf32>
    %cst_193 = arith.constant dense<0.000000e+00> : vector<16x64xf32>
    %223 = tpu.matmul %10, %222, %cst_193 {dimension_numbers = #tpu.dot_dimension_numbers<[1], [0], [0], [1], [0, 0, 1, 1], [], []>} : vector<16x512xf32>, vector<512x64xf32>, vector<16x64xf32> -> vector<16x64xf32>
    %c26_194 = arith.constant 26 : index
    %c0_195 = arith.constant 0 : index
    %c0_196 = arith.constant 0 : index
    %224 = vector.load %arg5[%c26_194, %c0_195, %c0_196] : memref<27x32x16xf32, #tpu.memory_space<vmem>>, vector<1x32x16xf32>
    %225 = vector.shape_cast %224 : vector<1x32x16xf32> to vector<32x16xf32>
    %cst_197 = arith.constant dense<0.000000e+00> : vector<32x64xf32>
    %226 = tpu.matmul %225, %223, %cst_197 {dimension_numbers = #tpu.dot_dimension_numbers<[1], [0], [0], [1], [0, 0, 1, 1], [], []>} : vector<32x16xf32>, vector<16x64xf32>, vector<32x64xf32> -> vector<32x64xf32>
    %227 = arith.addf %219, %226 : vector<32x64xf32>
    %c0_198 = arith.constant 0 : index
    %c0_199 = arith.constant 0 : index
    %228 = vector.load %arg6[%c0_198, %c0_199] : memref<32x1xf32, #tpu.memory_space<vmem>>, vector<32x1xf32>
    %229 = vector.broadcast %228 : vector<32x1xf32> to vector<32x64xf32>
    %230 = arith.addf %227, %229 : vector<32x64xf32>
    %cst_200 = arith.constant 0.000000e+00 : f32
    %231 = vector.broadcast %cst_200 : f32 to vector<32x64xf32>
    %232 = arith.cmpf oge, %230, %231 : vector<32x64xf32>
    %cst_201 = arith.constant 1.000000e-01 : f32
    %233 = vector.broadcast %cst_201 : f32 to vector<32x64xf32>
    %234 = arith.mulf %233, %230 : vector<32x64xf32>
    %235 = arith.select %232, %230, %234 : vector<32x64xi1>, vector<32x64xf32>
    %c0_202 = arith.constant 0 : index
    %c0_203 = arith.constant 0 : index
    %236 = vector.load %arg13[%c0_202, %c0_203] : memref<32x64xf32, #tpu.memory_space<vmem>>, vector<32x64xf32>
    tpu.vector_store %arg13[%c0_202, %c0_203], %235 {strides = array<i32>} : memref<32x64xf32, #tpu.memory_space<vmem>>, vector<32x64xf32>,
    %cst_204 = arith.constant 0.000000e+00 : f32
    %237 = vector.broadcast %cst_204 : f32 to vector<48x8xf32>
    %c0_205 = arith.constant 0 : index
    %c0_206 = arith.constant 0 : index
    %c0_207 = arith.constant 0 : index
    %238 = vector.load %arg7[%c0_205, %c0_206, %c0_207] : memref<27x64x8xbf16, #tpu.memory_space<vmem>>, vector<1x64x8xbf16>
    %239 = vector.shape_cast %238 : vector<1x64x8xbf16> to vector<64x8xbf16>
    %240 = arith.extf %239 : vector<64x8xbf16> to vector<64x8xf32>
    %cst_208 = arith.constant dense<0.000000e+00> : vector<32x8xf32>
    %241 = tpu.matmul %235, %240, %cst_208 {dimension_numbers = #tpu.dot_dimension_numbers<[1], [0], [0], [1], [0, 0, 1, 1], [], []>} : vector<32x64xf32>, vector<64x8xf32>, vector<32x8xf32> -> vector<32x8xf32>
    %c0_209 = arith.constant 0 : index
    %c0_210 = arith.constant 0 : index
    %c0_211 = arith.constant 0 : index
    %242 = vector.load %arg8[%c0_209, %c0_210, %c0_211] : memref<27x48x32xf32, #tpu.memory_space<vmem>>, vector<1x48x32xf32>
    %243 = vector.shape_cast %242 : vector<1x48x32xf32> to vector<48x32xf32>
    %cst_212 = arith.constant dense<0.000000e+00> : vector<48x8xf32>
    %244 = tpu.matmul %243, %241, %cst_212 {dimension_numbers = #tpu.dot_dimension_numbers<[1], [0], [0], [1], [0, 0, 1, 1], [], []>} : vector<48x32xf32>, vector<32x8xf32>, vector<48x8xf32> -> vector<48x8xf32>
    %245 = arith.addf %237, %244 : vector<48x8xf32>
    %c1_213 = arith.constant 1 : index
    %c0_214 = arith.constant 0 : index
    %c0_215 = arith.constant 0 : index
    %246 = vector.load %arg7[%c1_213, %c0_214, %c0_215] : memref<27x64x8xbf16, #tpu.memory_space<vmem>>, vector<1x64x8xbf16>
    %247 = vector.shape_cast %246 : vector<1x64x8xbf16> to vector<64x8xbf16>
    %248 = arith.extf %247 : vector<64x8xbf16> to vector<64x8xf32>
    %cst_216 = arith.constant dense<0.000000e+00> : vector<32x8xf32>
    %249 = tpu.matmul %235, %248, %cst_216 {dimension_numbers = #tpu.dot_dimension_numbers<[1], [0], [0], [1], [0, 0, 1, 1], [], []>} : vector<32x64xf32>, vector<64x8xf32>, vector<32x8xf32> -> vector<32x8xf32>
    %c1_217 = arith.constant 1 : index
    %c0_218 = arith.constant 0 : index
    %c0_219 = arith.constant 0 : index
    %250 = vector.load %arg8[%c1_217, %c0_218, %c0_219] : memref<27x48x32xf32, #tpu.memory_space<vmem>>, vector<1x48x32xf32>
    %251 = vector.shape_cast %250 : vector<1x48x32xf32> to vector<48x32xf32>
    %cst_220 = arith.constant dense<0.000000e+00> : vector<48x8xf32>
    %252 = tpu.matmul %251, %249, %cst_220 {dimension_numbers = #tpu.dot_dimension_numbers<[1], [0], [0], [1], [0, 0, 1, 1], [], []>} : vector<48x32xf32>, vector<32x8xf32>, vector<48x8xf32> -> vector<48x8xf32>
    %253 = arith.addf %245, %252 : vector<48x8xf32>
    %c2_221 = arith.constant 2 : index
    %c0_222 = arith.constant 0 : index
    %c0_223 = arith.constant 0 : index
    %254 = vector.load %arg7[%c2_221, %c0_222, %c0_223] : memref<27x64x8xbf16, #tpu.memory_space<vmem>>, vector<1x64x8xbf16>
    %255 = vector.shape_cast %254 : vector<1x64x8xbf16> to vector<64x8xbf16>
    %256 = arith.extf %255 : vector<64x8xbf16> to vector<64x8xf32>
    %cst_224 = arith.constant dense<0.000000e+00> : vector<32x8xf32>
    %257 = tpu.matmul %235, %256, %cst_224 {dimension_numbers = #tpu.dot_dimension_numbers<[1], [0], [0], [1], [0, 0, 1, 1], [], []>} : vector<32x64xf32>, vector<64x8xf32>, vector<32x8xf32> -> vector<32x8xf32>
    %c2_225 = arith.constant 2 : index
    %c0_226 = arith.constant 0 : index
    %c0_227 = arith.constant 0 : index
    %258 = vector.load %arg8[%c2_225, %c0_226, %c0_227] : memref<27x48x32xf32, #tpu.memory_space<vmem>>, vector<1x48x32xf32>
    %259 = vector.shape_cast %258 : vector<1x48x32xf32> to vector<48x32xf32>
    %cst_228 = arith.constant dense<0.000000e+00> : vector<48x8xf32>
    %260 = tpu.matmul %259, %257, %cst_228 {dimension_numbers = #tpu.dot_dimension_numbers<[1], [0], [0], [1], [0, 0, 1, 1], [], []>} : vector<48x32xf32>, vector<32x8xf32>, vector<48x8xf32> -> vector<48x8xf32>
    %261 = arith.addf %253, %260 : vector<48x8xf32>
    %c3_229 = arith.constant 3 : index
    %c0_230 = arith.constant 0 : index
    %c0_231 = arith.constant 0 : index
    %262 = vector.load %arg7[%c3_229, %c0_230, %c0_231] : memref<27x64x8xbf16, #tpu.memory_space<vmem>>, vector<1x64x8xbf16>
    %263 = vector.shape_cast %262 : vector<1x64x8xbf16> to vector<64x8xbf16>
    %264 = arith.extf %263 : vector<64x8xbf16> to vector<64x8xf32>
    %cst_232 = arith.constant dense<0.000000e+00> : vector<32x8xf32>
    %265 = tpu.matmul %235, %264, %cst_232 {dimension_numbers = #tpu.dot_dimension_numbers<[1], [0], [0], [1], [0, 0, 1, 1], [], []>} : vector<32x64xf32>, vector<64x8xf32>, vector<32x8xf32> -> vector<32x8xf32>
    %c3_233 = arith.constant 3 : index
    %c0_234 = arith.constant 0 : index
    %c0_235 = arith.constant 0 : index
    %266 = vector.load %arg8[%c3_233, %c0_234, %c0_235] : memref<27x48x32xf32, #tpu.memory_space<vmem>>, vector<1x48x32xf32>
    %267 = vector.shape_cast %266 : vector<1x48x32xf32> to vector<48x32xf32>
    %cst_236 = arith.constant dense<0.000000e+00> : vector<48x8xf32>
    %268 = tpu.matmul %267, %265, %cst_236 {dimension_numbers = #tpu.dot_dimension_numbers<[1], [0], [0], [1], [0, 0, 1, 1], [], []>} : vector<48x32xf32>, vector<32x8xf32>, vector<48x8xf32> -> vector<48x8xf32>
    %269 = arith.addf %261, %268 : vector<48x8xf32>
    %c4_237 = arith.constant 4 : index
    %c0_238 = arith.constant 0 : index
    %c0_239 = arith.constant 0 : index
    %270 = vector.load %arg7[%c4_237, %c0_238, %c0_239] : memref<27x64x8xbf16, #tpu.memory_space<vmem>>, vector<1x64x8xbf16>
    %271 = vector.shape_cast %270 : vector<1x64x8xbf16> to vector<64x8xbf16>
    %272 = arith.extf %271 : vector<64x8xbf16> to vector<64x8xf32>
    %cst_240 = arith.constant dense<0.000000e+00> : vector<32x8xf32>
    %273 = tpu.matmul %235, %272, %cst_240 {dimension_numbers = #tpu.dot_dimension_numbers<[1], [0], [0], [1], [0, 0, 1, 1], [], []>} : vector<32x64xf32>, vector<64x8xf32>, vector<32x8xf32> -> vector<32x8xf32>
    %c4_241 = arith.constant 4 : index
    %c0_242 = arith.constant 0 : index
    %c0_243 = arith.constant 0 : index
    %274 = vector.load %arg8[%c4_241, %c0_242, %c0_243] : memref<27x48x32xf32, #tpu.memory_space<vmem>>, vector<1x48x32xf32>
    %275 = vector.shape_cast %274 : vector<1x48x32xf32> to vector<48x32xf32>
    %cst_244 = arith.constant dense<0.000000e+00> : vector<48x8xf32>
    %276 = tpu.matmul %275, %273, %cst_244 {dimension_numbers = #tpu.dot_dimension_numbers<[1], [0], [0], [1], [0, 0, 1, 1], [], []>} : vector<48x32xf32>, vector<32x8xf32>, vector<48x8xf32> -> vector<48x8xf32>
    %277 = arith.addf %269, %276 : vector<48x8xf32>
    %c5_245 = arith.constant 5 : index
    %c0_246 = arith.constant 0 : index
    %c0_247 = arith.constant 0 : index
    %278 = vector.load %arg7[%c5_245, %c0_246, %c0_247] : memref<27x64x8xbf16, #tpu.memory_space<vmem>>, vector<1x64x8xbf16>
    %279 = vector.shape_cast %278 : vector<1x64x8xbf16> to vector<64x8xbf16>
    %280 = arith.extf %279 : vector<64x8xbf16> to vector<64x8xf32>
    %cst_248 = arith.constant dense<0.000000e+00> : vector<32x8xf32>
    %281 = tpu.matmul %235, %280, %cst_248 {dimension_numbers = #tpu.dot_dimension_numbers<[1], [0], [0], [1], [0, 0, 1, 1], [], []>} : vector<32x64xf32>, vector<64x8xf32>, vector<32x8xf32> -> vector<32x8xf32>
    %c5_249 = arith.constant 5 : index
    %c0_250 = arith.constant 0 : index
    %c0_251 = arith.constant 0 : index
    %282 = vector.load %arg8[%c5_249, %c0_250, %c0_251] : memref<27x48x32xf32, #tpu.memory_space<vmem>>, vector<1x48x32xf32>
    %283 = vector.shape_cast %282 : vector<1x48x32xf32> to vector<48x32xf32>
    %cst_252 = arith.constant dense<0.000000e+00> : vector<48x8xf32>
    %284 = tpu.matmul %283, %281, %cst_252 {dimension_numbers = #tpu.dot_dimension_numbers<[1], [0], [0], [1], [0, 0, 1, 1], [], []>} : vector<48x32xf32>, vector<32x8xf32>, vector<48x8xf32> -> vector<48x8xf32>
    %285 = arith.addf %277, %284 : vector<48x8xf32>
    %c6_253 = arith.constant 6 : index
    %c0_254 = arith.constant 0 : index
    %c0_255 = arith.constant 0 : index
    %286 = vector.load %arg7[%c6_253, %c0_254, %c0_255] : memref<27x64x8xbf16, #tpu.memory_space<vmem>>, vector<1x64x8xbf16>
    %287 = vector.shape_cast %286 : vector<1x64x8xbf16> to vector<64x8xbf16>
    %288 = arith.extf %287 : vector<64x8xbf16> to vector<64x8xf32>
    %cst_256 = arith.constant dense<0.000000e+00> : vector<32x8xf32>
    %289 = tpu.matmul %235, %288, %cst_256 {dimension_numbers = #tpu.dot_dimension_numbers<[1], [0], [0], [1], [0, 0, 1, 1], [], []>} : vector<32x64xf32>, vector<64x8xf32>, vector<32x8xf32> -> vector<32x8xf32>
    %c6_257 = arith.constant 6 : index
    %c0_258 = arith.constant 0 : index
    %c0_259 = arith.constant 0 : index
    %290 = vector.load %arg8[%c6_257, %c0_258, %c0_259] : memref<27x48x32xf32, #tpu.memory_space<vmem>>, vector<1x48x32xf32>
    %291 = vector.shape_cast %290 : vector<1x48x32xf32> to vector<48x32xf32>
    %cst_260 = arith.constant dense<0.000000e+00> : vector<48x8xf32>
    %292 = tpu.matmul %291, %289, %cst_260 {dimension_numbers = #tpu.dot_dimension_numbers<[1], [0], [0], [1], [0, 0, 1, 1], [], []>} : vector<48x32xf32>, vector<32x8xf32>, vector<48x8xf32> -> vector<48x8xf32>
    %293 = arith.addf %285, %292 : vector<48x8xf32>
    %c7_261 = arith.constant 7 : index
    %c0_262 = arith.constant 0 : index
    %c0_263 = arith.constant 0 : index
    %294 = vector.load %arg7[%c7_261, %c0_262, %c0_263] : memref<27x64x8xbf16, #tpu.memory_space<vmem>>, vector<1x64x8xbf16>
    %295 = vector.shape_cast %294 : vector<1x64x8xbf16> to vector<64x8xbf16>
    %296 = arith.extf %295 : vector<64x8xbf16> to vector<64x8xf32>
    %cst_264 = arith.constant dense<0.000000e+00> : vector<32x8xf32>
    %297 = tpu.matmul %235, %296, %cst_264 {dimension_numbers = #tpu.dot_dimension_numbers<[1], [0], [0], [1], [0, 0, 1, 1], [], []>} : vector<32x64xf32>, vector<64x8xf32>, vector<32x8xf32> -> vector<32x8xf32>
    %c7_265 = arith.constant 7 : index
    %c0_266 = arith.constant 0 : index
    %c0_267 = arith.constant 0 : index
    %298 = vector.load %arg8[%c7_265, %c0_266, %c0_267] : memref<27x48x32xf32, #tpu.memory_space<vmem>>, vector<1x48x32xf32>
    %299 = vector.shape_cast %298 : vector<1x48x32xf32> to vector<48x32xf32>
    %cst_268 = arith.constant dense<0.000000e+00> : vector<48x8xf32>
    %300 = tpu.matmul %299, %297, %cst_268 {dimension_numbers = #tpu.dot_dimension_numbers<[1], [0], [0], [1], [0, 0, 1, 1], [], []>} : vector<48x32xf32>, vector<32x8xf32>, vector<48x8xf32> -> vector<48x8xf32>
    %301 = arith.addf %293, %300 : vector<48x8xf32>
    %c8_269 = arith.constant 8 : index
    %c0_270 = arith.constant 0 : index
    %c0_271 = arith.constant 0 : index
    %302 = vector.load %arg7[%c8_269, %c0_270, %c0_271] : memref<27x64x8xbf16, #tpu.memory_space<vmem>>, vector<1x64x8xbf16>
    %303 = vector.shape_cast %302 : vector<1x64x8xbf16> to vector<64x8xbf16>
    %304 = arith.extf %303 : vector<64x8xbf16> to vector<64x8xf32>
    %cst_272 = arith.constant dense<0.000000e+00> : vector<32x8xf32>
    %305 = tpu.matmul %235, %304, %cst_272 {dimension_numbers = #tpu.dot_dimension_numbers<[1], [0], [0], [1], [0, 0, 1, 1], [], []>} : vector<32x64xf32>, vector<64x8xf32>, vector<32x8xf32> -> vector<32x8xf32>
    %c8_273 = arith.constant 8 : index
    %c0_274 = arith.constant 0 : index
    %c0_275 = arith.constant 0 : index
    %306 = vector.load %arg8[%c8_273, %c0_274, %c0_275] : memref<27x48x32xf32, #tpu.memory_space<vmem>>, vector<1x48x32xf32>
    %307 = vector.shape_cast %306 : vector<1x48x32xf32> to vector<48x32xf32>
    %cst_276 = arith.constant dense<0.000000e+00> : vector<48x8xf32>
    %308 = tpu.matmul %307, %305, %cst_276 {dimension_numbers = #tpu.dot_dimension_numbers<[1], [0], [0], [1], [0, 0, 1, 1], [], []>} : vector<48x32xf32>, vector<32x8xf32>, vector<48x8xf32> -> vector<48x8xf32>
    %309 = arith.addf %301, %308 : vector<48x8xf32>
    %c9_277 = arith.constant 9 : index
    %c0_278 = arith.constant 0 : index
    %c0_279 = arith.constant 0 : index
    %310 = vector.load %arg7[%c9_277, %c0_278, %c0_279] : memref<27x64x8xbf16, #tpu.memory_space<vmem>>, vector<1x64x8xbf16>
    %311 = vector.shape_cast %310 : vector<1x64x8xbf16> to vector<64x8xbf16>
    %312 = arith.extf %311 : vector<64x8xbf16> to vector<64x8xf32>
    %cst_280 = arith.constant dense<0.000000e+00> : vector<32x8xf32>
    %313 = tpu.matmul %235, %312, %cst_280 {dimension_numbers = #tpu.dot_dimension_numbers<[1], [0], [0], [1], [0, 0, 1, 1], [], []>} : vector<32x64xf32>, vector<64x8xf32>, vector<32x8xf32> -> vector<32x8xf32>
    %c9_281 = arith.constant 9 : index
    %c0_282 = arith.constant 0 : index
    %c0_283 = arith.constant 0 : index
    %314 = vector.load %arg8[%c9_281, %c0_282, %c0_283] : memref<27x48x32xf32, #tpu.memory_space<vmem>>, vector<1x48x32xf32>
    %315 = vector.shape_cast %314 : vector<1x48x32xf32> to vector<48x32xf32>
    %cst_284 = arith.constant dense<0.000000e+00> : vector<48x8xf32>
    %316 = tpu.matmul %315, %313, %cst_284 {dimension_numbers = #tpu.dot_dimension_numbers<[1], [0], [0], [1], [0, 0, 1, 1], [], []>} : vector<48x32xf32>, vector<32x8xf32>, vector<48x8xf32> -> vector<48x8xf32>
    %317 = arith.addf %309, %316 : vector<48x8xf32>
    %c10_285 = arith.constant 10 : index
    %c0_286 = arith.constant 0 : index
    %c0_287 = arith.constant 0 : index
    %318 = vector.load %arg7[%c10_285, %c0_286, %c0_287] : memref<27x64x8xbf16, #tpu.memory_space<vmem>>, vector<1x64x8xbf16>
    %319 = vector.shape_cast %318 : vector<1x64x8xbf16> to vector<64x8xbf16>
    %320 = arith.extf %319 : vector<64x8xbf16> to vector<64x8xf32>
    %cst_288 = arith.constant dense<0.000000e+00> : vector<32x8xf32>
    %321 = tpu.matmul %235, %320, %cst_288 {dimension_numbers = #tpu.dot_dimension_numbers<[1], [0], [0], [1], [0, 0, 1, 1], [], []>} : vector<32x64xf32>, vector<64x8xf32>, vector<32x8xf32> -> vector<32x8xf32>
    %c10_289 = arith.constant 10 : index
    %c0_290 = arith.constant 0 : index
    %c0_291 = arith.constant 0 : index
    %322 = vector.load %arg8[%c10_289, %c0_290, %c0_291] : memref<27x48x32xf32, #tpu.memory_space<vmem>>, vector<1x48x32xf32>
    %323 = vector.shape_cast %322 : vector<1x48x32xf32> to vector<48x32xf32>
    %cst_292 = arith.constant dense<0.000000e+00> : vector<48x8xf32>
    %324 = tpu.matmul %323, %321, %cst_292 {dimension_numbers = #tpu.dot_dimension_numbers<[1], [0], [0], [1], [0, 0, 1, 1], [], []>} : vector<48x32xf32>, vector<32x8xf32>, vector<48x8xf32> -> vector<48x8xf32>
    %325 = arith.addf %317, %324 : vector<48x8xf32>
    %c11_293 = arith.constant 11 : index
    %c0_294 = arith.constant 0 : index
    %c0_295 = arith.constant 0 : index
    %326 = vector.load %arg7[%c11_293, %c0_294, %c0_295] : memref<27x64x8xbf16, #tpu.memory_space<vmem>>, vector<1x64x8xbf16>
    %327 = vector.shape_cast %326 : vector<1x64x8xbf16> to vector<64x8xbf16>
    %328 = arith.extf %327 : vector<64x8xbf16> to vector<64x8xf32>
    %cst_296 = arith.constant dense<0.000000e+00> : vector<32x8xf32>
    %329 = tpu.matmul %235, %328, %cst_296 {dimension_numbers = #tpu.dot_dimension_numbers<[1], [0], [0], [1], [0, 0, 1, 1], [], []>} : vector<32x64xf32>, vector<64x8xf32>, vector<32x8xf32> -> vector<32x8xf32>
    %c11_297 = arith.constant 11 : index
    %c0_298 = arith.constant 0 : index
    %c0_299 = arith.constant 0 : index
    %330 = vector.load %arg8[%c11_297, %c0_298, %c0_299] : memref<27x48x32xf32, #tpu.memory_space<vmem>>, vector<1x48x32xf32>
    %331 = vector.shape_cast %330 : vector<1x48x32xf32> to vector<48x32xf32>
    %cst_300 = arith.constant dense<0.000000e+00> : vector<48x8xf32>
    %332 = tpu.matmul %331, %329, %cst_300 {dimension_numbers = #tpu.dot_dimension_numbers<[1], [0], [0], [1], [0, 0, 1, 1], [], []>} : vector<48x32xf32>, vector<32x8xf32>, vector<48x8xf32> -> vector<48x8xf32>
    %333 = arith.addf %325, %332 : vector<48x8xf32>
    %c12_301 = arith.constant 12 : index
    %c0_302 = arith.constant 0 : index
    %c0_303 = arith.constant 0 : index
    %334 = vector.load %arg7[%c12_301, %c0_302, %c0_303] : memref<27x64x8xbf16, #tpu.memory_space<vmem>>, vector<1x64x8xbf16>
    %335 = vector.shape_cast %334 : vector<1x64x8xbf16> to vector<64x8xbf16>
    %336 = arith.extf %335 : vector<64x8xbf16> to vector<64x8xf32>
    %cst_304 = arith.constant dense<0.000000e+00> : vector<32x8xf32>
    %337 = tpu.matmul %235, %336, %cst_304 {dimension_numbers = #tpu.dot_dimension_numbers<[1], [0], [0], [1], [0, 0, 1, 1], [], []>} : vector<32x64xf32>, vector<64x8xf32>, vector<32x8xf32> -> vector<32x8xf32>
    %c12_305 = arith.constant 12 : index
    %c0_306 = arith.constant 0 : index
    %c0_307 = arith.constant 0 : index
    %338 = vector.load %arg8[%c12_305, %c0_306, %c0_307] : memref<27x48x32xf32, #tpu.memory_space<vmem>>, vector<1x48x32xf32>
    %339 = vector.shape_cast %338 : vector<1x48x32xf32> to vector<48x32xf32>
    %cst_308 = arith.constant dense<0.000000e+00> : vector<48x8xf32>
    %340 = tpu.matmul %339, %337, %cst_308 {dimension_numbers = #tpu.dot_dimension_numbers<[1], [0], [0], [1], [0, 0, 1, 1], [], []>} : vector<48x32xf32>, vector<32x8xf32>, vector<48x8xf32> -> vector<48x8xf32>
    %341 = arith.addf %333, %340 : vector<48x8xf32>
    %c13_309 = arith.constant 13 : index
    %c0_310 = arith.constant 0 : index
    %c0_311 = arith.constant 0 : index
    %342 = vector.load %arg7[%c13_309, %c0_310, %c0_311] : memref<27x64x8xbf16, #tpu.memory_space<vmem>>, vector<1x64x8xbf16>
    %343 = vector.shape_cast %342 : vector<1x64x8xbf16> to vector<64x8xbf16>
    %344 = arith.extf %343 : vector<64x8xbf16> to vector<64x8xf32>
    %cst_312 = arith.constant dense<0.000000e+00> : vector<32x8xf32>
    %345 = tpu.matmul %235, %344, %cst_312 {dimension_numbers = #tpu.dot_dimension_numbers<[1], [0], [0], [1], [0, 0, 1, 1], [], []>} : vector<32x64xf32>, vector<64x8xf32>, vector<32x8xf32> -> vector<32x8xf32>
    %c13_313 = arith.constant 13 : index
    %c0_314 = arith.constant 0 : index
    %c0_315 = arith.constant 0 : index
    %346 = vector.load %arg8[%c13_313, %c0_314, %c0_315] : memref<27x48x32xf32, #tpu.memory_space<vmem>>, vector<1x48x32xf32>
    %347 = vector.shape_cast %346 : vector<1x48x32xf32> to vector<48x32xf32>
    %cst_316 = arith.constant dense<0.000000e+00> : vector<48x8xf32>
    %348 = tpu.matmul %347, %345, %cst_316 {dimension_numbers = #tpu.dot_dimension_numbers<[1], [0], [0], [1], [0, 0, 1, 1], [], []>} : vector<48x32xf32>, vector<32x8xf32>, vector<48x8xf32> -> vector<48x8xf32>
    %349 = arith.addf %341, %348 : vector<48x8xf32>
    %c14_317 = arith.constant 14 : index
    %c0_318 = arith.constant 0 : index
    %c0_319 = arith.constant 0 : index
    %350 = vector.load %arg7[%c14_317, %c0_318, %c0_319] : memref<27x64x8xbf16, #tpu.memory_space<vmem>>, vector<1x64x8xbf16>
    %351 = vector.shape_cast %350 : vector<1x64x8xbf16> to vector<64x8xbf16>
    %352 = arith.extf %351 : vector<64x8xbf16> to vector<64x8xf32>
    %cst_320 = arith.constant dense<0.000000e+00> : vector<32x8xf32>
    %353 = tpu.matmul %235, %352, %cst_320 {dimension_numbers = #tpu.dot_dimension_numbers<[1], [0], [0], [1], [0, 0, 1, 1], [], []>} : vector<32x64xf32>, vector<64x8xf32>, vector<32x8xf32> -> vector<32x8xf32>
    %c14_321 = arith.constant 14 : index
    %c0_322 = arith.constant 0 : index
    %c0_323 = arith.constant 0 : index
    %354 = vector.load %arg8[%c14_321, %c0_322, %c0_323] : memref<27x48x32xf32, #tpu.memory_space<vmem>>, vector<1x48x32xf32>
    %355 = vector.shape_cast %354 : vector<1x48x32xf32> to vector<48x32xf32>
    %cst_324 = arith.constant dense<0.000000e+00> : vector<48x8xf32>
    %356 = tpu.matmul %355, %353, %cst_324 {dimension_numbers = #tpu.dot_dimension_numbers<[1], [0], [0], [1], [0, 0, 1, 1], [], []>} : vector<48x32xf32>, vector<32x8xf32>, vector<48x8xf32> -> vector<48x8xf32>
    %357 = arith.addf %349, %356 : vector<48x8xf32>
    %c15_325 = arith.constant 15 : index
    %c0_326 = arith.constant 0 : index
    %c0_327 = arith.constant 0 : index
    %358 = vector.load %arg7[%c15_325, %c0_326, %c0_327] : memref<27x64x8xbf16, #tpu.memory_space<vmem>>, vector<1x64x8xbf16>
    %359 = vector.shape_cast %358 : vector<1x64x8xbf16> to vector<64x8xbf16>
    %360 = arith.extf %359 : vector<64x8xbf16> to vector<64x8xf32>
    %cst_328 = arith.constant dense<0.000000e+00> : vector<32x8xf32>
    %361 = tpu.matmul %235, %360, %cst_328 {dimension_numbers = #tpu.dot_dimension_numbers<[1], [0], [0], [1], [0, 0, 1, 1], [], []>} : vector<32x64xf32>, vector<64x8xf32>, vector<32x8xf32> -> vector<32x8xf32>
    %c15_329 = arith.constant 15 : index
    %c0_330 = arith.constant 0 : index
    %c0_331 = arith.constant 0 : index
    %362 = vector.load %arg8[%c15_329, %c0_330, %c0_331] : memref<27x48x32xf32, #tpu.memory_space<vmem>>, vector<1x48x32xf32>
    %363 = vector.shape_cast %362 : vector<1x48x32xf32> to vector<48x32xf32>
    %cst_332 = arith.constant dense<0.000000e+00> : vector<48x8xf32>
    %364 = tpu.matmul %363, %361, %cst_332 {dimension_numbers = #tpu.dot_dimension_numbers<[1], [0], [0], [1], [0, 0, 1, 1], [], []>} : vector<48x32xf32>, vector<32x8xf32>, vector<48x8xf32> -> vector<48x8xf32>
    %365 = arith.addf %357, %364 : vector<48x8xf32>
    %c16_333 = arith.constant 16 : index
    %c0_334 = arith.constant 0 : index
    %c0_335 = arith.constant 0 : index
    %366 = vector.load %arg7[%c16_333, %c0_334, %c0_335] : memref<27x64x8xbf16, #tpu.memory_space<vmem>>, vector<1x64x8xbf16>
    %367 = vector.shape_cast %366 : vector<1x64x8xbf16> to vector<64x8xbf16>
    %368 = arith.extf %367 : vector<64x8xbf16> to vector<64x8xf32>
    %cst_336 = arith.constant dense<0.000000e+00> : vector<32x8xf32>
    %369 = tpu.matmul %235, %368, %cst_336 {dimension_numbers = #tpu.dot_dimension_numbers<[1], [0], [0], [1], [0, 0, 1, 1], [], []>} : vector<32x64xf32>, vector<64x8xf32>, vector<32x8xf32> -> vector<32x8xf32>
    %c16_337 = arith.constant 16 : index
    %c0_338 = arith.constant 0 : index
    %c0_339 = arith.constant 0 : index
    %370 = vector.load %arg8[%c16_337, %c0_338, %c0_339] : memref<27x48x32xf32, #tpu.memory_space<vmem>>, vector<1x48x32xf32>
    %371 = vector.shape_cast %370 : vector<1x48x32xf32> to vector<48x32xf32>
    %cst_340 = arith.constant dense<0.000000e+00> : vector<48x8xf32>
    %372 = tpu.matmul %371, %369, %cst_340 {dimension_numbers = #tpu.dot_dimension_numbers<[1], [0], [0], [1], [0, 0, 1, 1], [], []>} : vector<48x32xf32>, vector<32x8xf32>, vector<48x8xf32> -> vector<48x8xf32>
    %373 = arith.addf %365, %372 : vector<48x8xf32>
    %c17_341 = arith.constant 17 : index
    %c0_342 = arith.constant 0 : index
    %c0_343 = arith.constant 0 : index
    %374 = vector.load %arg7[%c17_341, %c0_342, %c0_343] : memref<27x64x8xbf16, #tpu.memory_space<vmem>>, vector<1x64x8xbf16>
    %375 = vector.shape_cast %374 : vector<1x64x8xbf16> to vector<64x8xbf16>
    %376 = arith.extf %375 : vector<64x8xbf16> to vector<64x8xf32>
    %cst_344 = arith.constant dense<0.000000e+00> : vector<32x8xf32>
    %377 = tpu.matmul %235, %376, %cst_344 {dimension_numbers = #tpu.dot_dimension_numbers<[1], [0], [0], [1], [0, 0, 1, 1], [], []>} : vector<32x64xf32>, vector<64x8xf32>, vector<32x8xf32> -> vector<32x8xf32>
    %c17_345 = arith.constant 17 : index
    %c0_346 = arith.constant 0 : index
    %c0_347 = arith.constant 0 : index
    %378 = vector.load %arg8[%c17_345, %c0_346, %c0_347] : memref<27x48x32xf32, #tpu.memory_space<vmem>>, vector<1x48x32xf32>
    %379 = vector.shape_cast %378 : vector<1x48x32xf32> to vector<48x32xf32>
    %cst_348 = arith.constant dense<0.000000e+00> : vector<48x8xf32>
    %380 = tpu.matmul %379, %377, %cst_348 {dimension_numbers = #tpu.dot_dimension_numbers<[1], [0], [0], [1], [0, 0, 1, 1], [], []>} : vector<48x32xf32>, vector<32x8xf32>, vector<48x8xf32> -> vector<48x8xf32>
    %381 = arith.addf %373, %380 : vector<48x8xf32>
    %c18_349 = arith.constant 18 : index
    %c0_350 = arith.constant 0 : index
    %c0_351 = arith.constant 0 : index
    %382 = vector.load %arg7[%c18_349, %c0_350, %c0_351] : memref<27x64x8xbf16, #tpu.memory_space<vmem>>, vector<1x64x8xbf16>
    %383 = vector.shape_cast %382 : vector<1x64x8xbf16> to vector<64x8xbf16>
    %384 = arith.extf %383 : vector<64x8xbf16> to vector<64x8xf32>
    %cst_352 = arith.constant dense<0.000000e+00> : vector<32x8xf32>
    %385 = tpu.matmul %235, %384, %cst_352 {dimension_numbers = #tpu.dot_dimension_numbers<[1], [0], [0], [1], [0, 0, 1, 1], [], []>} : vector<32x64xf32>, vector<64x8xf32>, vector<32x8xf32> -> vector<32x8xf32>
    %c18_353 = arith.constant 18 : index
    %c0_354 = arith.constant 0 : index
    %c0_355 = arith.constant 0 : index
    %386 = vector.load %arg8[%c18_353, %c0_354, %c0_355] : memref<27x48x32xf32, #tpu.memory_space<vmem>>, vector<1x48x32xf32>
    %387 = vector.shape_cast %386 : vector<1x48x32xf32> to vector<48x32xf32>
    %cst_356 = arith.constant dense<0.000000e+00> : vector<48x8xf32>
    %388 = tpu.matmul %387, %385, %cst_356 {dimension_numbers = #tpu.dot_dimension_numbers<[1], [0], [0], [1], [0, 0, 1, 1], [], []>} : vector<48x32xf32>, vector<32x8xf32>, vector<48x8xf32> -> vector<48x8xf32>
    %389 = arith.addf %381, %388 : vector<48x8xf32>
    %c19_357 = arith.constant 19 : index
    %c0_358 = arith.constant 0 : index
    %c0_359 = arith.constant 0 : index
    %390 = vector.load %arg7[%c19_357, %c0_358, %c0_359] : memref<27x64x8xbf16, #tpu.memory_space<vmem>>, vector<1x64x8xbf16>
    %391 = vector.shape_cast %390 : vector<1x64x8xbf16> to vector<64x8xbf16>
    %392 = arith.extf %391 : vector<64x8xbf16> to vector<64x8xf32>
    %cst_360 = arith.constant dense<0.000000e+00> : vector<32x8xf32>
    %393 = tpu.matmul %235, %392, %cst_360 {dimension_numbers = #tpu.dot_dimension_numbers<[1], [0], [0], [1], [0, 0, 1, 1], [], []>} : vector<32x64xf32>, vector<64x8xf32>, vector<32x8xf32> -> vector<32x8xf32>
    %c19_361 = arith.constant 19 : index
    %c0_362 = arith.constant 0 : index
    %c0_363 = arith.constant 0 : index
    %394 = vector.load %arg8[%c19_361, %c0_362, %c0_363] : memref<27x48x32xf32, #tpu.memory_space<vmem>>, vector<1x48x32xf32>
    %395 = vector.shape_cast %394 : vector<1x48x32xf32> to vector<48x32xf32>
    %cst_364 = arith.constant dense<0.000000e+00> : vector<48x8xf32>
    %396 = tpu.matmul %395, %393, %cst_364 {dimension_numbers = #tpu.dot_dimension_numbers<[1], [0], [0], [1], [0, 0, 1, 1], [], []>} : vector<48x32xf32>, vector<32x8xf32>, vector<48x8xf32> -> vector<48x8xf32>
    %397 = arith.addf %389, %396 : vector<48x8xf32>
    %c20_365 = arith.constant 20 : index
    %c0_366 = arith.constant 0 : index
    %c0_367 = arith.constant 0 : index
    %398 = vector.load %arg7[%c20_365, %c0_366, %c0_367] : memref<27x64x8xbf16, #tpu.memory_space<vmem>>, vector<1x64x8xbf16>
    %399 = vector.shape_cast %398 : vector<1x64x8xbf16> to vector<64x8xbf16>
    %400 = arith.extf %399 : vector<64x8xbf16> to vector<64x8xf32>
    %cst_368 = arith.constant dense<0.000000e+00> : vector<32x8xf32>
    %401 = tpu.matmul %235, %400, %cst_368 {dimension_numbers = #tpu.dot_dimension_numbers<[1], [0], [0], [1], [0, 0, 1, 1], [], []>} : vector<32x64xf32>, vector<64x8xf32>, vector<32x8xf32> -> vector<32x8xf32>
    %c20_369 = arith.constant 20 : index
    %c0_370 = arith.constant 0 : index
    %c0_371 = arith.constant 0 : index
    %402 = vector.load %arg8[%c20_369, %c0_370, %c0_371] : memref<27x48x32xf32, #tpu.memory_space<vmem>>, vector<1x48x32xf32>
    %403 = vector.shape_cast %402 : vector<1x48x32xf32> to vector<48x32xf32>
    %cst_372 = arith.constant dense<0.000000e+00> : vector<48x8xf32>
    %404 = tpu.matmul %403, %401, %cst_372 {dimension_numbers = #tpu.dot_dimension_numbers<[1], [0], [0], [1], [0, 0, 1, 1], [], []>} : vector<48x32xf32>, vector<32x8xf32>, vector<48x8xf32> -> vector<48x8xf32>
    %405 = arith.addf %397, %404 : vector<48x8xf32>
    %c21_373 = arith.constant 21 : index
    %c0_374 = arith.constant 0 : index
    %c0_375 = arith.constant 0 : index
    %406 = vector.load %arg7[%c21_373, %c0_374, %c0_375] : memref<27x64x8xbf16, #tpu.memory_space<vmem>>, vector<1x64x8xbf16>
    %407 = vector.shape_cast %406 : vector<1x64x8xbf16> to vector<64x8xbf16>
    %408 = arith.extf %407 : vector<64x8xbf16> to vector<64x8xf32>
    %cst_376 = arith.constant dense<0.000000e+00> : vector<32x8xf32>
    %409 = tpu.matmul %235, %408, %cst_376 {dimension_numbers = #tpu.dot_dimension_numbers<[1], [0], [0], [1], [0, 0, 1, 1], [], []>} : vector<32x64xf32>, vector<64x8xf32>, vector<32x8xf32> -> vector<32x8xf32>
    %c21_377 = arith.constant 21 : index
    %c0_378 = arith.constant 0 : index
    %c0_379 = arith.constant 0 : index
    %410 = vector.load %arg8[%c21_377, %c0_378, %c0_379] : memref<27x48x32xf32, #tpu.memory_space<vmem>>, vector<1x48x32xf32>
    %411 = vector.shape_cast %410 : vector<1x48x32xf32> to vector<48x32xf32>
    %cst_380 = arith.constant dense<0.000000e+00> : vector<48x8xf32>
    %412 = tpu.matmul %411, %409, %cst_380 {dimension_numbers = #tpu.dot_dimension_numbers<[1], [0], [0], [1], [0, 0, 1, 1], [], []>} : vector<48x32xf32>, vector<32x8xf32>, vector<48x8xf32> -> vector<48x8xf32>
    %413 = arith.addf %405, %412 : vector<48x8xf32>
    %c22_381 = arith.constant 22 : index
    %c0_382 = arith.constant 0 : index
    %c0_383 = arith.constant 0 : index
    %414 = vector.load %arg7[%c22_381, %c0_382, %c0_383] : memref<27x64x8xbf16, #tpu.memory_space<vmem>>, vector<1x64x8xbf16>
    %415 = vector.shape_cast %414 : vector<1x64x8xbf16> to vector<64x8xbf16>
    %416 = arith.extf %415 : vector<64x8xbf16> to vector<64x8xf32>
    %cst_384 = arith.constant dense<0.000000e+00> : vector<32x8xf32>
    %417 = tpu.matmul %235, %416, %cst_384 {dimension_numbers = #tpu.dot_dimension_numbers<[1], [0], [0], [1], [0, 0, 1, 1], [], []>} : vector<32x64xf32>, vector<64x8xf32>, vector<32x8xf32> -> vector<32x8xf32>
    %c22_385 = arith.constant 22 : index
    %c0_386 = arith.constant 0 : index
    %c0_387 = arith.constant 0 : index
    %418 = vector.load %arg8[%c22_385, %c0_386, %c0_387] : memref<27x48x32xf32, #tpu.memory_space<vmem>>, vector<1x48x32xf32>
    %419 = vector.shape_cast %418 : vector<1x48x32xf32> to vector<48x32xf32>
    %cst_388 = arith.constant dense<0.000000e+00> : vector<48x8xf32>
    %420 = tpu.matmul %419, %417, %cst_388 {dimension_numbers = #tpu.dot_dimension_numbers<[1], [0], [0], [1], [0, 0, 1, 1], [], []>} : vector<48x32xf32>, vector<32x8xf32>, vector<48x8xf32> -> vector<48x8xf32>
    %421 = arith.addf %413, %420 : vector<48x8xf32>
    %c23_389 = arith.constant 23 : index
    %c0_390 = arith.constant 0 : index
    %c0_391 = arith.constant 0 : index
    %422 = vector.load %arg7[%c23_389, %c0_390, %c0_391] : memref<27x64x8xbf16, #tpu.memory_space<vmem>>, vector<1x64x8xbf16>
    %423 = vector.shape_cast %422 : vector<1x64x8xbf16> to vector<64x8xbf16>
    %424 = arith.extf %423 : vector<64x8xbf16> to vector<64x8xf32>
    %cst_392 = arith.constant dense<0.000000e+00> : vector<32x8xf32>
    %425 = tpu.matmul %235, %424, %cst_392 {dimension_numbers = #tpu.dot_dimension_numbers<[1], [0], [0], [1], [0, 0, 1, 1], [], []>} : vector<32x64xf32>, vector<64x8xf32>, vector<32x8xf32> -> vector<32x8xf32>
    %c23_393 = arith.constant 23 : index
    %c0_394 = arith.constant 0 : index
    %c0_395 = arith.constant 0 : index
    %426 = vector.load %arg8[%c23_393, %c0_394, %c0_395] : memref<27x48x32xf32, #tpu.memory_space<vmem>>, vector<1x48x32xf32>
    %427 = vector.shape_cast %426 : vector<1x48x32xf32> to vector<48x32xf32>
    %cst_396 = arith.constant dense<0.000000e+00> : vector<48x8xf32>
    %428 = tpu.matmul %427, %425, %cst_396 {dimension_numbers = #tpu.dot_dimension_numbers<[1], [0], [0], [1], [0, 0, 1, 1], [], []>} : vector<48x32xf32>, vector<32x8xf32>, vector<48x8xf32> -> vector<48x8xf32>
    %429 = arith.addf %421, %428 : vector<48x8xf32>
    %c24_397 = arith.constant 24 : index
    %c0_398 = arith.constant 0 : index
    %c0_399 = arith.constant 0 : index
    %430 = vector.load %arg7[%c24_397, %c0_398, %c0_399] : memref<27x64x8xbf16, #tpu.memory_space<vmem>>, vector<1x64x8xbf16>
    %431 = vector.shape_cast %430 : vector<1x64x8xbf16> to vector<64x8xbf16>
    %432 = arith.extf %431 : vector<64x8xbf16> to vector<64x8xf32>
    %cst_400 = arith.constant dense<0.000000e+00> : vector<32x8xf32>
    %433 = tpu.matmul %235, %432, %cst_400 {dimension_numbers = #tpu.dot_dimension_numbers<[1], [0], [0], [1], [0, 0, 1, 1], [], []>} : vector<32x64xf32>, vector<64x8xf32>, vector<32x8xf32> -> vector<32x8xf32>
    %c24_401 = arith.constant 24 : index
    %c0_402 = arith.constant 0 : index
    %c0_403 = arith.constant 0 : index
    %434 = vector.load %arg8[%c24_401, %c0_402, %c0_403] : memref<27x48x32xf32, #tpu.memory_space<vmem>>, vector<1x48x32xf32>
    %435 = vector.shape_cast %434 : vector<1x48x32xf32> to vector<48x32xf32>
    %cst_404 = arith.constant dense<0.000000e+00> : vector<48x8xf32>
    %436 = tpu.matmul %435, %433, %cst_404 {dimension_numbers = #tpu.dot_dimension_numbers<[1], [0], [0], [1], [0, 0, 1, 1], [], []>} : vector<48x32xf32>, vector<32x8xf32>, vector<48x8xf32> -> vector<48x8xf32>
    %437 = arith.addf %429, %436 : vector<48x8xf32>
    %c25_405 = arith.constant 25 : index
    %c0_406 = arith.constant 0 : index
    %c0_407 = arith.constant 0 : index
    %438 = vector.load %arg7[%c25_405, %c0_406, %c0_407] : memref<27x64x8xbf16, #tpu.memory_space<vmem>>, vector<1x64x8xbf16>
    %439 = vector.shape_cast %438 : vector<1x64x8xbf16> to vector<64x8xbf16>
    %440 = arith.extf %439 : vector<64x8xbf16> to vector<64x8xf32>
    %cst_408 = arith.constant dense<0.000000e+00> : vector<32x8xf32>
    %441 = tpu.matmul %235, %440, %cst_408 {dimension_numbers = #tpu.dot_dimension_numbers<[1], [0], [0], [1], [0, 0, 1, 1], [], []>} : vector<32x64xf32>, vector<64x8xf32>, vector<32x8xf32> -> vector<32x8xf32>
    %c25_409 = arith.constant 25 : index
    %c0_410 = arith.constant 0 : index
    %c0_411 = arith.constant 0 : index
    %442 = vector.load %arg8[%c25_409, %c0_410, %c0_411] : memref<27x48x32xf32, #tpu.memory_space<vmem>>, vector<1x48x32xf32>
    %443 = vector.shape_cast %442 : vector<1x48x32xf32> to vector<48x32xf32>
    %cst_412 = arith.constant dense<0.000000e+00> : vector<48x8xf32>
    %444 = tpu.matmul %443, %441, %cst_412 {dimension_numbers = #tpu.dot_dimension_numbers<[1], [0], [0], [1], [0, 0, 1, 1], [], []>} : vector<48x32xf32>, vector<32x8xf32>, vector<48x8xf32> -> vector<48x8xf32>
    %445 = arith.addf %437, %444 : vector<48x8xf32>
    %c26_413 = arith.constant 26 : index
    %c0_414 = arith.constant 0 : index
    %c0_415 = arith.constant 0 : index
    %446 = vector.load %arg7[%c26_413, %c0_414, %c0_415] : memref<27x64x8xbf16, #tpu.memory_space<vmem>>, vector<1x64x8xbf16>
    %447 = vector.shape_cast %446 : vector<1x64x8xbf16> to vector<64x8xbf16>
    %448 = arith.extf %447 : vector<64x8xbf16> to vector<64x8xf32>
    %cst_416 = arith.constant dense<0.000000e+00> : vector<32x8xf32>
    %449 = tpu.matmul %235, %448, %cst_416 {dimension_numbers = #tpu.dot_dimension_numbers<[1], [0], [0], [1], [0, 0, 1, 1], [], []>} : vector<32x64xf32>, vector<64x8xf32>, vector<32x8xf32> -> vector<32x8xf32>
    %c26_417 = arith.constant 26 : index
    %c0_418 = arith.constant 0 : index
    %c0_419 = arith.constant 0 : index
    %450 = vector.load %arg8[%c26_417, %c0_418, %c0_419] : memref<27x48x32xf32, #tpu.memory_space<vmem>>, vector<1x48x32xf32>
    %451 = vector.shape_cast %450 : vector<1x48x32xf32> to vector<48x32xf32>
    %cst_420 = arith.constant dense<0.000000e+00> : vector<48x8xf32>
    %452 = tpu.matmul %451, %449, %cst_420 {dimension_numbers = #tpu.dot_dimension_numbers<[1], [0], [0], [1], [0, 0, 1, 1], [], []>} : vector<48x32xf32>, vector<32x8xf32>, vector<48x8xf32> -> vector<48x8xf32>
    %453 = arith.addf %445, %452 : vector<48x8xf32>
    %c0_421 = arith.constant 0 : index
    %c0_422 = arith.constant 0 : index
    %454 = vector.load %arg9[%c0_421, %c0_422] : memref<48x1xf32, #tpu.memory_space<vmem>>, vector<48x1xf32>
    %455 = vector.broadcast %454 : vector<48x1xf32> to vector<48x8xf32>
    %456 = arith.addf %453, %455 : vector<48x8xf32>
    %cst_423 = arith.constant 0.000000e+00 : f32
    %457 = vector.broadcast %cst_423 : f32 to vector<48x8xf32>
    %458 = arith.cmpf oge, %456, %457 : vector<48x8xf32>
    %cst_424 = arith.constant 1.000000e-01 : f32
    %459 = vector.broadcast %cst_424 : f32 to vector<48x8xf32>
    %460 = arith.mulf %459, %456 : vector<48x8xf32>
    %461 = arith.select %458, %456, %460 : vector<48x8xi1>, vector<48x8xf32>
    %c0_425 = arith.constant 0 : index
    %c0_426 = arith.constant 0 : index
    %462 = vector.load %arg14[%c0_425, %c0_426] : memref<48x8xf32, #tpu.memory_space<vmem>>, vector<48x8xf32>
    tpu.vector_store %arg14[%c0_425, %c0_426], %461 {strides = array<i32>} : memref<48x8xf32, #tpu.memory_space<vmem>>, vector<48x8xf32>,
    %cst_427 = arith.constant 0.000000e+00 : f32
    %463 = vector.broadcast %cst_427 : f32 to vector<64x1xf32>
    %c0_428 = arith.constant 0 : index
    %c0_429 = arith.constant 0 : index
    %c0_430 = arith.constant 0 : index
    %464 = vector.load %arg10[%c0_428, %c0_429, %c0_430] : memref<27x8x1xbf16, #tpu.memory_space<vmem>>, vector<1x8x1xbf16>
    %465 = vector.shape_cast %464 : vector<1x8x1xbf16> to vector<8x1xbf16>
    %466 = arith.extf %465 : vector<8x1xbf16> to vector<8x1xf32>
    %cst_431 = arith.constant dense<0.000000e+00> : vector<48x1xf32>
    %467 = tpu.matmul %461, %466, %cst_431 {dimension_numbers = #tpu.dot_dimension_numbers<[1], [0], [0], [1], [0, 0, 1, 1], [], []>} : vector<48x8xf32>, vector<8x1xf32>, vector<48x1xf32> -> vector<48x1xf32>
    %c0_432 = arith.constant 0 : index
    %c0_433 = arith.constant 0 : index
    %c0_434 = arith.constant 0 : index
    %468 = vector.load %arg11[%c0_432, %c0_433, %c0_434] : memref<27x64x48xf32, #tpu.memory_space<vmem>>, vector<1x64x48xf32>
    %469 = vector.shape_cast %468 : vector<1x64x48xf32> to vector<64x48xf32>
    %cst_435 = arith.constant dense<0.000000e+00> : vector<64x1xf32>
    %470 = tpu.matmul %469, %467, %cst_435 {dimension_numbers = #tpu.dot_dimension_numbers<[1], [0], [0], [1], [0, 0, 1, 1], [], []>} : vector<64x48xf32>, vector<48x1xf32>, vector<64x1xf32> -> vector<64x1xf32>
    %471 = arith.addf %463, %470 : vector<64x1xf32>
    %c1_436 = arith.constant 1 : index
    %c0_437 = arith.constant 0 : index
    %c0_438 = arith.constant 0 : index
    %472 = vector.load %arg10[%c1_436, %c0_437, %c0_438] : memref<27x8x1xbf16, #tpu.memory_space<vmem>>, vector<1x8x1xbf16>
    %473 = vector.shape_cast %472 : vector<1x8x1xbf16> to vector<8x1xbf16>
    %474 = arith.extf %473 : vector<8x1xbf16> to vector<8x1xf32>
    %cst_439 = arith.constant dense<0.000000e+00> : vector<48x1xf32>
    %475 = tpu.matmul %461, %474, %cst_439 {dimension_numbers = #tpu.dot_dimension_numbers<[1], [0], [0], [1], [0, 0, 1, 1], [], []>} : vector<48x8xf32>, vector<8x1xf32>, vector<48x1xf32> -> vector<48x1xf32>
    %c1_440 = arith.constant 1 : index
    %c0_441 = arith.constant 0 : index
    %c0_442 = arith.constant 0 : index
    %476 = vector.load %arg11[%c1_440, %c0_441, %c0_442] : memref<27x64x48xf32, #tpu.memory_space<vmem>>, vector<1x64x48xf32>
    %477 = vector.shape_cast %476 : vector<1x64x48xf32> to vector<64x48xf32>
    %cst_443 = arith.constant dense<0.000000e+00> : vector<64x1xf32>
    %478 = tpu.matmul %477, %475, %cst_443 {dimension_numbers = #tpu.dot_dimension_numbers<[1], [0], [0], [1], [0, 0, 1, 1], [], []>} : vector<64x48xf32>, vector<48x1xf32>, vector<64x1xf32> -> vector<64x1xf32>
    %479 = arith.addf %471, %478 : vector<64x1xf32>
    %c2_444 = arith.constant 2 : index
    %c0_445 = arith.constant 0 : index
    %c0_446 = arith.constant 0 : index
    %480 = vector.load %arg10[%c2_444, %c0_445, %c0_446] : memref<27x8x1xbf16, #tpu.memory_space<vmem>>, vector<1x8x1xbf16>
    %481 = vector.shape_cast %480 : vector<1x8x1xbf16> to vector<8x1xbf16>
    %482 = arith.extf %481 : vector<8x1xbf16> to vector<8x1xf32>
    %cst_447 = arith.constant dense<0.000000e+00> : vector<48x1xf32>
    %483 = tpu.matmul %461, %482, %cst_447 {dimension_numbers = #tpu.dot_dimension_numbers<[1], [0], [0], [1], [0, 0, 1, 1], [], []>} : vector<48x8xf32>, vector<8x1xf32>, vector<48x1xf32> -> vector<48x1xf32>
    %c2_448 = arith.constant 2 : index
    %c0_449 = arith.constant 0 : index
    %c0_450 = arith.constant 0 : index
    %484 = vector.load %arg11[%c2_448, %c0_449, %c0_450] : memref<27x64x48xf32, #tpu.memory_space<vmem>>, vector<1x64x48xf32>
    %485 = vector.shape_cast %484 : vector<1x64x48xf32> to vector<64x48xf32>
    %cst_451 = arith.constant dense<0.000000e+00> : vector<64x1xf32>
    %486 = tpu.matmul %485, %483, %cst_451 {dimension_numbers = #tpu.dot_dimension_numbers<[1], [0], [0], [1], [0, 0, 1, 1], [], []>} : vector<64x48xf32>, vector<48x1xf32>, vector<64x1xf32> -> vector<64x1xf32>
    %487 = arith.addf %479, %486 : vector<64x1xf32>
    %c3_452 = arith.constant 3 : index
    %c0_453 = arith.constant 0 : index
    %c0_454 = arith.constant 0 : index
    %488 = vector.load %arg10[%c3_452, %c0_453, %c0_454] : memref<27x8x1xbf16, #tpu.memory_space<vmem>>, vector<1x8x1xbf16>
    %489 = vector.shape_cast %488 : vector<1x8x1xbf16> to vector<8x1xbf16>
    %490 = arith.extf %489 : vector<8x1xbf16> to vector<8x1xf32>
    %cst_455 = arith.constant dense<0.000000e+00> : vector<48x1xf32>
    %491 = tpu.matmul %461, %490, %cst_455 {dimension_numbers = #tpu.dot_dimension_numbers<[1], [0], [0], [1], [0, 0, 1, 1], [], []>} : vector<48x8xf32>, vector<8x1xf32>, vector<48x1xf32> -> vector<48x1xf32>
    %c3_456 = arith.constant 3 : index
    %c0_457 = arith.constant 0 : index
    %c0_458 = arith.constant 0 : index
    %492 = vector.load %arg11[%c3_456, %c0_457, %c0_458] : memref<27x64x48xf32, #tpu.memory_space<vmem>>, vector<1x64x48xf32>
    %493 = vector.shape_cast %492 : vector<1x64x48xf32> to vector<64x48xf32>
    %cst_459 = arith.constant dense<0.000000e+00> : vector<64x1xf32>
    %494 = tpu.matmul %493, %491, %cst_459 {dimension_numbers = #tpu.dot_dimension_numbers<[1], [0], [0], [1], [0, 0, 1, 1], [], []>} : vector<64x48xf32>, vector<48x1xf32>, vector<64x1xf32> -> vector<64x1xf32>
    %495 = arith.addf %487, %494 : vector<64x1xf32>
    %c4_460 = arith.constant 4 : index
    %c0_461 = arith.constant 0 : index
    %c0_462 = arith.constant 0 : index
    %496 = vector.load %arg10[%c4_460, %c0_461, %c0_462] : memref<27x8x1xbf16, #tpu.memory_space<vmem>>, vector<1x8x1xbf16>
    %497 = vector.shape_cast %496 : vector<1x8x1xbf16> to vector<8x1xbf16>
    %498 = arith.extf %497 : vector<8x1xbf16> to vector<8x1xf32>
    %cst_463 = arith.constant dense<0.000000e+00> : vector<48x1xf32>
    %499 = tpu.matmul %461, %498, %cst_463 {dimension_numbers = #tpu.dot_dimension_numbers<[1], [0], [0], [1], [0, 0, 1, 1], [], []>} : vector<48x8xf32>, vector<8x1xf32>, vector<48x1xf32> -> vector<48x1xf32>
    %c4_464 = arith.constant 4 : index
    %c0_465 = arith.constant 0 : index
    %c0_466 = arith.constant 0 : index
    %500 = vector.load %arg11[%c4_464, %c0_465, %c0_466] : memref<27x64x48xf32, #tpu.memory_space<vmem>>, vector<1x64x48xf32>
    %501 = vector.shape_cast %500 : vector<1x64x48xf32> to vector<64x48xf32>
    %cst_467 = arith.constant dense<0.000000e+00> : vector<64x1xf32>
    %502 = tpu.matmul %501, %499, %cst_467 {dimension_numbers = #tpu.dot_dimension_numbers<[1], [0], [0], [1], [0, 0, 1, 1], [], []>} : vector<64x48xf32>, vector<48x1xf32>, vector<64x1xf32> -> vector<64x1xf32>
    %503 = arith.addf %495, %502 : vector<64x1xf32>
    %c5_468 = arith.constant 5 : index
    %c0_469 = arith.constant 0 : index
    %c0_470 = arith.constant 0 : index
    %504 = vector.load %arg10[%c5_468, %c0_469, %c0_470] : memref<27x8x1xbf16, #tpu.memory_space<vmem>>, vector<1x8x1xbf16>
    %505 = vector.shape_cast %504 : vector<1x8x1xbf16> to vector<8x1xbf16>
    %506 = arith.extf %505 : vector<8x1xbf16> to vector<8x1xf32>
    %cst_471 = arith.constant dense<0.000000e+00> : vector<48x1xf32>
    %507 = tpu.matmul %461, %506, %cst_471 {dimension_numbers = #tpu.dot_dimension_numbers<[1], [0], [0], [1], [0, 0, 1, 1], [], []>} : vector<48x8xf32>, vector<8x1xf32>, vector<48x1xf32> -> vector<48x1xf32>
    %c5_472 = arith.constant 5 : index
    %c0_473 = arith.constant 0 : index
    %c0_474 = arith.constant 0 : index
    %508 = vector.load %arg11[%c5_472, %c0_473, %c0_474] : memref<27x64x48xf32, #tpu.memory_space<vmem>>, vector<1x64x48xf32>
    %509 = vector.shape_cast %508 : vector<1x64x48xf32> to vector<64x48xf32>
    %cst_475 = arith.constant dense<0.000000e+00> : vector<64x1xf32>
    %510 = tpu.matmul %509, %507, %cst_475 {dimension_numbers = #tpu.dot_dimension_numbers<[1], [0], [0], [1], [0, 0, 1, 1], [], []>} : vector<64x48xf32>, vector<48x1xf32>, vector<64x1xf32> -> vector<64x1xf32>
    %511 = arith.addf %503, %510 : vector<64x1xf32>
    %c6_476 = arith.constant 6 : index
    %c0_477 = arith.constant 0 : index
    %c0_478 = arith.constant 0 : index
    %512 = vector.load %arg10[%c6_476, %c0_477, %c0_478] : memref<27x8x1xbf16, #tpu.memory_space<vmem>>, vector<1x8x1xbf16>
    %513 = vector.shape_cast %512 : vector<1x8x1xbf16> to vector<8x1xbf16>
    %514 = arith.extf %513 : vector<8x1xbf16> to vector<8x1xf32>
    %cst_479 = arith.constant dense<0.000000e+00> : vector<48x1xf32>
    %515 = tpu.matmul %461, %514, %cst_479 {dimension_numbers = #tpu.dot_dimension_numbers<[1], [0], [0], [1], [0, 0, 1, 1], [], []>} : vector<48x8xf32>, vector<8x1xf32>, vector<48x1xf32> -> vector<48x1xf32>
    %c6_480 = arith.constant 6 : index
    %c0_481 = arith.constant 0 : index
    %c0_482 = arith.constant 0 : index
    %516 = vector.load %arg11[%c6_480, %c0_481, %c0_482] : memref<27x64x48xf32, #tpu.memory_space<vmem>>, vector<1x64x48xf32>
    %517 = vector.shape_cast %516 : vector<1x64x48xf32> to vector<64x48xf32>
    %cst_483 = arith.constant dense<0.000000e+00> : vector<64x1xf32>
    %518 = tpu.matmul %517, %515, %cst_483 {dimension_numbers = #tpu.dot_dimension_numbers<[1], [0], [0], [1], [0, 0, 1, 1], [], []>} : vector<64x48xf32>, vector<48x1xf32>, vector<64x1xf32> -> vector<64x1xf32>
    %519 = arith.addf %511, %518 : vector<64x1xf32>
    %c7_484 = arith.constant 7 : index
    %c0_485 = arith.constant 0 : index
    %c0_486 = arith.constant 0 : index
    %520 = vector.load %arg10[%c7_484, %c0_485, %c0_486] : memref<27x8x1xbf16, #tpu.memory_space<vmem>>, vector<1x8x1xbf16>
    %521 = vector.shape_cast %520 : vector<1x8x1xbf16> to vector<8x1xbf16>
    %522 = arith.extf %521 : vector<8x1xbf16> to vector<8x1xf32>
    %cst_487 = arith.constant dense<0.000000e+00> : vector<48x1xf32>
    %523 = tpu.matmul %461, %522, %cst_487 {dimension_numbers = #tpu.dot_dimension_numbers<[1], [0], [0], [1], [0, 0, 1, 1], [], []>} : vector<48x8xf32>, vector<8x1xf32>, vector<48x1xf32> -> vector<48x1xf32>
    %c7_488 = arith.constant 7 : index
    %c0_489 = arith.constant 0 : index
    %c0_490 = arith.constant 0 : index
    %524 = vector.load %arg11[%c7_488, %c0_489, %c0_490] : memref<27x64x48xf32, #tpu.memory_space<vmem>>, vector<1x64x48xf32>
    %525 = vector.shape_cast %524 : vector<1x64x48xf32> to vector<64x48xf32>
    %cst_491 = arith.constant dense<0.000000e+00> : vector<64x1xf32>
    %526 = tpu.matmul %525, %523, %cst_491 {dimension_numbers = #tpu.dot_dimension_numbers<[1], [0], [0], [1], [0, 0, 1, 1], [], []>} : vector<64x48xf32>, vector<48x1xf32>, vector<64x1xf32> -> vector<64x1xf32>
    %527 = arith.addf %519, %526 : vector<64x1xf32>
    %c8_492 = arith.constant 8 : index
    %c0_493 = arith.constant 0 : index
    %c0_494 = arith.constant 0 : index
    %528 = vector.load %arg10[%c8_492, %c0_493, %c0_494] : memref<27x8x1xbf16, #tpu.memory_space<vmem>>, vector<1x8x1xbf16>
    %529 = vector.shape_cast %528 : vector<1x8x1xbf16> to vector<8x1xbf16>
    %530 = arith.extf %529 : vector<8x1xbf16> to vector<8x1xf32>
    %cst_495 = arith.constant dense<0.000000e+00> : vector<48x1xf32>
    %531 = tpu.matmul %461, %530, %cst_495 {dimension_numbers = #tpu.dot_dimension_numbers<[1], [0], [0], [1], [0, 0, 1, 1], [], []>} : vector<48x8xf32>, vector<8x1xf32>, vector<48x1xf32> -> vector<48x1xf32>
    %c8_496 = arith.constant 8 : index
    %c0_497 = arith.constant 0 : index
    %c0_498 = arith.constant 0 : index
    %532 = vector.load %arg11[%c8_496, %c0_497, %c0_498] : memref<27x64x48xf32, #tpu.memory_space<vmem>>, vector<1x64x48xf32>
    %533 = vector.shape_cast %532 : vector<1x64x48xf32> to vector<64x48xf32>
    %cst_499 = arith.constant dense<0.000000e+00> : vector<64x1xf32>
    %534 = tpu.matmul %533, %531, %cst_499 {dimension_numbers = #tpu.dot_dimension_numbers<[1], [0], [0], [1], [0, 0, 1, 1], [], []>} : vector<64x48xf32>, vector<48x1xf32>, vector<64x1xf32> -> vector<64x1xf32>
    %535 = arith.addf %527, %534 : vector<64x1xf32>
    %c9_500 = arith.constant 9 : index
    %c0_501 = arith.constant 0 : index
    %c0_502 = arith.constant 0 : index
    %536 = vector.load %arg10[%c9_500, %c0_501, %c0_502] : memref<27x8x1xbf16, #tpu.memory_space<vmem>>, vector<1x8x1xbf16>
    %537 = vector.shape_cast %536 : vector<1x8x1xbf16> to vector<8x1xbf16>
    %538 = arith.extf %537 : vector<8x1xbf16> to vector<8x1xf32>
    %cst_503 = arith.constant dense<0.000000e+00> : vector<48x1xf32>
    %539 = tpu.matmul %461, %538, %cst_503 {dimension_numbers = #tpu.dot_dimension_numbers<[1], [0], [0], [1], [0, 0, 1, 1], [], []>} : vector<48x8xf32>, vector<8x1xf32>, vector<48x1xf32> -> vector<48x1xf32>
    %c9_504 = arith.constant 9 : index
    %c0_505 = arith.constant 0 : index
    %c0_506 = arith.constant 0 : index
    %540 = vector.load %arg11[%c9_504, %c0_505, %c0_506] : memref<27x64x48xf32, #tpu.memory_space<vmem>>, vector<1x64x48xf32>
    %541 = vector.shape_cast %540 : vector<1x64x48xf32> to vector<64x48xf32>
    %cst_507 = arith.constant dense<0.000000e+00> : vector<64x1xf32>
    %542 = tpu.matmul %541, %539, %cst_507 {dimension_numbers = #tpu.dot_dimension_numbers<[1], [0], [0], [1], [0, 0, 1, 1], [], []>} : vector<64x48xf32>, vector<48x1xf32>, vector<64x1xf32> -> vector<64x1xf32>
    %543 = arith.addf %535, %542 : vector<64x1xf32>
    %c10_508 = arith.constant 10 : index
    %c0_509 = arith.constant 0 : index
    %c0_510 = arith.constant 0 : index
    %544 = vector.load %arg10[%c10_508, %c0_509, %c0_510] : memref<27x8x1xbf16, #tpu.memory_space<vmem>>, vector<1x8x1xbf16>
    %545 = vector.shape_cast %544 : vector<1x8x1xbf16> to vector<8x1xbf16>
    %546 = arith.extf %545 : vector<8x1xbf16> to vector<8x1xf32>
    %cst_511 = arith.constant dense<0.000000e+00> : vector<48x1xf32>
    %547 = tpu.matmul %461, %546, %cst_511 {dimension_numbers = #tpu.dot_dimension_numbers<[1], [0], [0], [1], [0, 0, 1, 1], [], []>} : vector<48x8xf32>, vector<8x1xf32>, vector<48x1xf32> -> vector<48x1xf32>
    %c10_512 = arith.constant 10 : index
    %c0_513 = arith.constant 0 : index
    %c0_514 = arith.constant 0 : index
    %548 = vector.load %arg11[%c10_512, %c0_513, %c0_514] : memref<27x64x48xf32, #tpu.memory_space<vmem>>, vector<1x64x48xf32>
    %549 = vector.shape_cast %548 : vector<1x64x48xf32> to vector<64x48xf32>
    %cst_515 = arith.constant dense<0.000000e+00> : vector<64x1xf32>
    %550 = tpu.matmul %549, %547, %cst_515 {dimension_numbers = #tpu.dot_dimension_numbers<[1], [0], [0], [1], [0, 0, 1, 1], [], []>} : vector<64x48xf32>, vector<48x1xf32>, vector<64x1xf32> -> vector<64x1xf32>
    %551 = arith.addf %543, %550 : vector<64x1xf32>
    %c11_516 = arith.constant 11 : index
    %c0_517 = arith.constant 0 : index
    %c0_518 = arith.constant 0 : index
    %552 = vector.load %arg10[%c11_516, %c0_517, %c0_518] : memref<27x8x1xbf16, #tpu.memory_space<vmem>>, vector<1x8x1xbf16>
    %553 = vector.shape_cast %552 : vector<1x8x1xbf16> to vector<8x1xbf16>
    %554 = arith.extf %553 : vector<8x1xbf16> to vector<8x1xf32>
    %cst_519 = arith.constant dense<0.000000e+00> : vector<48x1xf32>
    %555 = tpu.matmul %461, %554, %cst_519 {dimension_numbers = #tpu.dot_dimension_numbers<[1], [0], [0], [1], [0, 0, 1, 1], [], []>} : vector<48x8xf32>, vector<8x1xf32>, vector<48x1xf32> -> vector<48x1xf32>
    %c11_520 = arith.constant 11 : index
    %c0_521 = arith.constant 0 : index
    %c0_522 = arith.constant 0 : index
    %556 = vector.load %arg11[%c11_520, %c0_521, %c0_522] : memref<27x64x48xf32, #tpu.memory_space<vmem>>, vector<1x64x48xf32>
    %557 = vector.shape_cast %556 : vector<1x64x48xf32> to vector<64x48xf32>
    %cst_523 = arith.constant dense<0.000000e+00> : vector<64x1xf32>
    %558 = tpu.matmul %557, %555, %cst_523 {dimension_numbers = #tpu.dot_dimension_numbers<[1], [0], [0], [1], [0, 0, 1, 1], [], []>} : vector<64x48xf32>, vector<48x1xf32>, vector<64x1xf32> -> vector<64x1xf32>
    %559 = arith.addf %551, %558 : vector<64x1xf32>
    %c12_524 = arith.constant 12 : index
    %c0_525 = arith.constant 0 : index
    %c0_526 = arith.constant 0 : index
    %560 = vector.load %arg10[%c12_524, %c0_525, %c0_526] : memref<27x8x1xbf16, #tpu.memory_space<vmem>>, vector<1x8x1xbf16>
    %561 = vector.shape_cast %560 : vector<1x8x1xbf16> to vector<8x1xbf16>
    %562 = arith.extf %561 : vector<8x1xbf16> to vector<8x1xf32>
    %cst_527 = arith.constant dense<0.000000e+00> : vector<48x1xf32>
    %563 = tpu.matmul %461, %562, %cst_527 {dimension_numbers = #tpu.dot_dimension_numbers<[1], [0], [0], [1], [0, 0, 1, 1], [], []>} : vector<48x8xf32>, vector<8x1xf32>, vector<48x1xf32> -> vector<48x1xf32>
    %c12_528 = arith.constant 12 : index
    %c0_529 = arith.constant 0 : index
    %c0_530 = arith.constant 0 : index
    %564 = vector.load %arg11[%c12_528, %c0_529, %c0_530] : memref<27x64x48xf32, #tpu.memory_space<vmem>>, vector<1x64x48xf32>
    %565 = vector.shape_cast %564 : vector<1x64x48xf32> to vector<64x48xf32>
    %cst_531 = arith.constant dense<0.000000e+00> : vector<64x1xf32>
    %566 = tpu.matmul %565, %563, %cst_531 {dimension_numbers = #tpu.dot_dimension_numbers<[1], [0], [0], [1], [0, 0, 1, 1], [], []>} : vector<64x48xf32>, vector<48x1xf32>, vector<64x1xf32> -> vector<64x1xf32>
    %567 = arith.addf %559, %566 : vector<64x1xf32>
    %c13_532 = arith.constant 13 : index
    %c0_533 = arith.constant 0 : index
    %c0_534 = arith.constant 0 : index
    %568 = vector.load %arg10[%c13_532, %c0_533, %c0_534] : memref<27x8x1xbf16, #tpu.memory_space<vmem>>, vector<1x8x1xbf16>
    %569 = vector.shape_cast %568 : vector<1x8x1xbf16> to vector<8x1xbf16>
    %570 = arith.extf %569 : vector<8x1xbf16> to vector<8x1xf32>
    %cst_535 = arith.constant dense<0.000000e+00> : vector<48x1xf32>
    %571 = tpu.matmul %461, %570, %cst_535 {dimension_numbers = #tpu.dot_dimension_numbers<[1], [0], [0], [1], [0, 0, 1, 1], [], []>} : vector<48x8xf32>, vector<8x1xf32>, vector<48x1xf32> -> vector<48x1xf32>
    %c13_536 = arith.constant 13 : index
    %c0_537 = arith.constant 0 : index
    %c0_538 = arith.constant 0 : index
    %572 = vector.load %arg11[%c13_536, %c0_537, %c0_538] : memref<27x64x48xf32, #tpu.memory_space<vmem>>, vector<1x64x48xf32>
    %573 = vector.shape_cast %572 : vector<1x64x48xf32> to vector<64x48xf32>
    %cst_539 = arith.constant dense<0.000000e+00> : vector<64x1xf32>
    %574 = tpu.matmul %573, %571, %cst_539 {dimension_numbers = #tpu.dot_dimension_numbers<[1], [0], [0], [1], [0, 0, 1, 1], [], []>} : vector<64x48xf32>, vector<48x1xf32>, vector<64x1xf32> -> vector<64x1xf32>
    %575 = arith.addf %567, %574 : vector<64x1xf32>
    %c14_540 = arith.constant 14 : index
    %c0_541 = arith.constant 0 : index
    %c0_542 = arith.constant 0 : index
    %576 = vector.load %arg10[%c14_540, %c0_541, %c0_542] : memref<27x8x1xbf16, #tpu.memory_space<vmem>>, vector<1x8x1xbf16>
    %577 = vector.shape_cast %576 : vector<1x8x1xbf16> to vector<8x1xbf16>
    %578 = arith.extf %577 : vector<8x1xbf16> to vector<8x1xf32>
    %cst_543 = arith.constant dense<0.000000e+00> : vector<48x1xf32>
    %579 = tpu.matmul %461, %578, %cst_543 {dimension_numbers = #tpu.dot_dimension_numbers<[1], [0], [0], [1], [0, 0, 1, 1], [], []>} : vector<48x8xf32>, vector<8x1xf32>, vector<48x1xf32> -> vector<48x1xf32>
    %c14_544 = arith.constant 14 : index
    %c0_545 = arith.constant 0 : index
    %c0_546 = arith.constant 0 : index
    %580 = vector.load %arg11[%c14_544, %c0_545, %c0_546] : memref<27x64x48xf32, #tpu.memory_space<vmem>>, vector<1x64x48xf32>
    %581 = vector.shape_cast %580 : vector<1x64x48xf32> to vector<64x48xf32>
    %cst_547 = arith.constant dense<0.000000e+00> : vector<64x1xf32>
    %582 = tpu.matmul %581, %579, %cst_547 {dimension_numbers = #tpu.dot_dimension_numbers<[1], [0], [0], [1], [0, 0, 1, 1], [], []>} : vector<64x48xf32>, vector<48x1xf32>, vector<64x1xf32> -> vector<64x1xf32>
    %583 = arith.addf %575, %582 : vector<64x1xf32>
    %c15_548 = arith.constant 15 : index
    %c0_549 = arith.constant 0 : index
    %c0_550 = arith.constant 0 : index
    %584 = vector.load %arg10[%c15_548, %c0_549, %c0_550] : memref<27x8x1xbf16, #tpu.memory_space<vmem>>, vector<1x8x1xbf16>
    %585 = vector.shape_cast %584 : vector<1x8x1xbf16> to vector<8x1xbf16>
    %586 = arith.extf %585 : vector<8x1xbf16> to vector<8x1xf32>
    %cst_551 = arith.constant dense<0.000000e+00> : vector<48x1xf32>
    %587 = tpu.matmul %461, %586, %cst_551 {dimension_numbers = #tpu.dot_dimension_numbers<[1], [0], [0], [1], [0, 0, 1, 1], [], []>} : vector<48x8xf32>, vector<8x1xf32>, vector<48x1xf32> -> vector<48x1xf32>
    %c15_552 = arith.constant 15 : index
    %c0_553 = arith.constant 0 : index
    %c0_554 = arith.constant 0 : index
    %588 = vector.load %arg11[%c15_552, %c0_553, %c0_554] : memref<27x64x48xf32, #tpu.memory_space<vmem>>, vector<1x64x48xf32>
    %589 = vector.shape_cast %588 : vector<1x64x48xf32> to vector<64x48xf32>
    %cst_555 = arith.constant dense<0.000000e+00> : vector<64x1xf32>
    %590 = tpu.matmul %589, %587, %cst_555 {dimension_numbers = #tpu.dot_dimension_numbers<[1], [0], [0], [1], [0, 0, 1, 1], [], []>} : vector<64x48xf32>, vector<48x1xf32>, vector<64x1xf32> -> vector<64x1xf32>
    %591 = arith.addf %583, %590 : vector<64x1xf32>
    %c16_556 = arith.constant 16 : index
    %c0_557 = arith.constant 0 : index
    %c0_558 = arith.constant 0 : index
    %592 = vector.load %arg10[%c16_556, %c0_557, %c0_558] : memref<27x8x1xbf16, #tpu.memory_space<vmem>>, vector<1x8x1xbf16>
    %593 = vector.shape_cast %592 : vector<1x8x1xbf16> to vector<8x1xbf16>
    %594 = arith.extf %593 : vector<8x1xbf16> to vector<8x1xf32>
    %cst_559 = arith.constant dense<0.000000e+00> : vector<48x1xf32>
    %595 = tpu.matmul %461, %594, %cst_559 {dimension_numbers = #tpu.dot_dimension_numbers<[1], [0], [0], [1], [0, 0, 1, 1], [], []>} : vector<48x8xf32>, vector<8x1xf32>, vector<48x1xf32> -> vector<48x1xf32>
    %c16_560 = arith.constant 16 : index
    %c0_561 = arith.constant 0 : index
    %c0_562 = arith.constant 0 : index
    %596 = vector.load %arg11[%c16_560, %c0_561, %c0_562] : memref<27x64x48xf32, #tpu.memory_space<vmem>>, vector<1x64x48xf32>
    %597 = vector.shape_cast %596 : vector<1x64x48xf32> to vector<64x48xf32>
    %cst_563 = arith.constant dense<0.000000e+00> : vector<64x1xf32>
    %598 = tpu.matmul %597, %595, %cst_563 {dimension_numbers = #tpu.dot_dimension_numbers<[1], [0], [0], [1], [0, 0, 1, 1], [], []>} : vector<64x48xf32>, vector<48x1xf32>, vector<64x1xf32> -> vector<64x1xf32>
    %599 = arith.addf %591, %598 : vector<64x1xf32>
    %c17_564 = arith.constant 17 : index
    %c0_565 = arith.constant 0 : index
    %c0_566 = arith.constant 0 : index
    %600 = vector.load %arg10[%c17_564, %c0_565, %c0_566] : memref<27x8x1xbf16, #tpu.memory_space<vmem>>, vector<1x8x1xbf16>
    %601 = vector.shape_cast %600 : vector<1x8x1xbf16> to vector<8x1xbf16>
    %602 = arith.extf %601 : vector<8x1xbf16> to vector<8x1xf32>
    %cst_567 = arith.constant dense<0.000000e+00> : vector<48x1xf32>
    %603 = tpu.matmul %461, %602, %cst_567 {dimension_numbers = #tpu.dot_dimension_numbers<[1], [0], [0], [1], [0, 0, 1, 1], [], []>} : vector<48x8xf32>, vector<8x1xf32>, vector<48x1xf32> -> vector<48x1xf32>
    %c17_568 = arith.constant 17 : index
    %c0_569 = arith.constant 0 : index
    %c0_570 = arith.constant 0 : index
    %604 = vector.load %arg11[%c17_568, %c0_569, %c0_570] : memref<27x64x48xf32, #tpu.memory_space<vmem>>, vector<1x64x48xf32>
    %605 = vector.shape_cast %604 : vector<1x64x48xf32> to vector<64x48xf32>
    %cst_571 = arith.constant dense<0.000000e+00> : vector<64x1xf32>
    %606 = tpu.matmul %605, %603, %cst_571 {dimension_numbers = #tpu.dot_dimension_numbers<[1], [0], [0], [1], [0, 0, 1, 1], [], []>} : vector<64x48xf32>, vector<48x1xf32>, vector<64x1xf32> -> vector<64x1xf32>
    %607 = arith.addf %599, %606 : vector<64x1xf32>
    %c18_572 = arith.constant 18 : index
    %c0_573 = arith.constant 0 : index
    %c0_574 = arith.constant 0 : index
    %608 = vector.load %arg10[%c18_572, %c0_573, %c0_574] : memref<27x8x1xbf16, #tpu.memory_space<vmem>>, vector<1x8x1xbf16>
    %609 = vector.shape_cast %608 : vector<1x8x1xbf16> to vector<8x1xbf16>
    %610 = arith.extf %609 : vector<8x1xbf16> to vector<8x1xf32>
    %cst_575 = arith.constant dense<0.000000e+00> : vector<48x1xf32>
    %611 = tpu.matmul %461, %610, %cst_575 {dimension_numbers = #tpu.dot_dimension_numbers<[1], [0], [0], [1], [0, 0, 1, 1], [], []>} : vector<48x8xf32>, vector<8x1xf32>, vector<48x1xf32> -> vector<48x1xf32>
    %c18_576 = arith.constant 18 : index
    %c0_577 = arith.constant 0 : index
    %c0_578 = arith.constant 0 : index
    %612 = vector.load %arg11[%c18_576, %c0_577, %c0_578] : memref<27x64x48xf32, #tpu.memory_space<vmem>>, vector<1x64x48xf32>
    %613 = vector.shape_cast %612 : vector<1x64x48xf32> to vector<64x48xf32>
    %cst_579 = arith.constant dense<0.000000e+00> : vector<64x1xf32>
    %614 = tpu.matmul %613, %611, %cst_579 {dimension_numbers = #tpu.dot_dimension_numbers<[1], [0], [0], [1], [0, 0, 1, 1], [], []>} : vector<64x48xf32>, vector<48x1xf32>, vector<64x1xf32> -> vector<64x1xf32>
    %615 = arith.addf %607, %614 : vector<64x1xf32>
    %c19_580 = arith.constant 19 : index
    %c0_581 = arith.constant 0 : index
    %c0_582 = arith.constant 0 : index
    %616 = vector.load %arg10[%c19_580, %c0_581, %c0_582] : memref<27x8x1xbf16, #tpu.memory_space<vmem>>, vector<1x8x1xbf16>
    %617 = vector.shape_cast %616 : vector<1x8x1xbf16> to vector<8x1xbf16>
    %618 = arith.extf %617 : vector<8x1xbf16> to vector<8x1xf32>
    %cst_583 = arith.constant dense<0.000000e+00> : vector<48x1xf32>
    %619 = tpu.matmul %461, %618, %cst_583 {dimension_numbers = #tpu.dot_dimension_numbers<[1], [0], [0], [1], [0, 0, 1, 1], [], []>} : vector<48x8xf32>, vector<8x1xf32>, vector<48x1xf32> -> vector<48x1xf32>
    %c19_584 = arith.constant 19 : index
    %c0_585 = arith.constant 0 : index
    %c0_586 = arith.constant 0 : index
    %620 = vector.load %arg11[%c19_584, %c0_585, %c0_586] : memref<27x64x48xf32, #tpu.memory_space<vmem>>, vector<1x64x48xf32>
    %621 = vector.shape_cast %620 : vector<1x64x48xf32> to vector<64x48xf32>
    %cst_587 = arith.constant dense<0.000000e+00> : vector<64x1xf32>
    %622 = tpu.matmul %621, %619, %cst_587 {dimension_numbers = #tpu.dot_dimension_numbers<[1], [0], [0], [1], [0, 0, 1, 1], [], []>} : vector<64x48xf32>, vector<48x1xf32>, vector<64x1xf32> -> vector<64x1xf32>
    %623 = arith.addf %615, %622 : vector<64x1xf32>
    %c20_588 = arith.constant 20 : index
    %c0_589 = arith.constant 0 : index
    %c0_590 = arith.constant 0 : index
    %624 = vector.load %arg10[%c20_588, %c0_589, %c0_590] : memref<27x8x1xbf16, #tpu.memory_space<vmem>>, vector<1x8x1xbf16>
    %625 = vector.shape_cast %624 : vector<1x8x1xbf16> to vector<8x1xbf16>
    %626 = arith.extf %625 : vector<8x1xbf16> to vector<8x1xf32>
    %cst_591 = arith.constant dense<0.000000e+00> : vector<48x1xf32>
    %627 = tpu.matmul %461, %626, %cst_591 {dimension_numbers = #tpu.dot_dimension_numbers<[1], [0], [0], [1], [0, 0, 1, 1], [], []>} : vector<48x8xf32>, vector<8x1xf32>, vector<48x1xf32> -> vector<48x1xf32>
    %c20_592 = arith.constant 20 : index
    %c0_593 = arith.constant 0 : index
    %c0_594 = arith.constant 0 : index
    %628 = vector.load %arg11[%c20_592, %c0_593, %c0_594] : memref<27x64x48xf32, #tpu.memory_space<vmem>>, vector<1x64x48xf32>
    %629 = vector.shape_cast %628 : vector<1x64x48xf32> to vector<64x48xf32>
    %cst_595 = arith.constant dense<0.000000e+00> : vector<64x1xf32>
    %630 = tpu.matmul %629, %627, %cst_595 {dimension_numbers = #tpu.dot_dimension_numbers<[1], [0], [0], [1], [0, 0, 1, 1], [], []>} : vector<64x48xf32>, vector<48x1xf32>, vector<64x1xf32> -> vector<64x1xf32>
    %631 = arith.addf %623, %630 : vector<64x1xf32>
    %c21_596 = arith.constant 21 : index
    %c0_597 = arith.constant 0 : index
    %c0_598 = arith.constant 0 : index
    %632 = vector.load %arg10[%c21_596, %c0_597, %c0_598] : memref<27x8x1xbf16, #tpu.memory_space<vmem>>, vector<1x8x1xbf16>
    %633 = vector.shape_cast %632 : vector<1x8x1xbf16> to vector<8x1xbf16>
    %634 = arith.extf %633 : vector<8x1xbf16> to vector<8x1xf32>
    %cst_599 = arith.constant dense<0.000000e+00> : vector<48x1xf32>
    %635 = tpu.matmul %461, %634, %cst_599 {dimension_numbers = #tpu.dot_dimension_numbers<[1], [0], [0], [1], [0, 0, 1, 1], [], []>} : vector<48x8xf32>, vector<8x1xf32>, vector<48x1xf32> -> vector<48x1xf32>
    %c21_600 = arith.constant 21 : index
    %c0_601 = arith.constant 0 : index
    %c0_602 = arith.constant 0 : index
    %636 = vector.load %arg11[%c21_600, %c0_601, %c0_602] : memref<27x64x48xf32, #tpu.memory_space<vmem>>, vector<1x64x48xf32>
    %637 = vector.shape_cast %636 : vector<1x64x48xf32> to vector<64x48xf32>
    %cst_603 = arith.constant dense<0.000000e+00> : vector<64x1xf32>
    %638 = tpu.matmul %637, %635, %cst_603 {dimension_numbers = #tpu.dot_dimension_numbers<[1], [0], [0], [1], [0, 0, 1, 1], [], []>} : vector<64x48xf32>, vector<48x1xf32>, vector<64x1xf32> -> vector<64x1xf32>
    %639 = arith.addf %631, %638 : vector<64x1xf32>
    %c22_604 = arith.constant 22 : index
    %c0_605 = arith.constant 0 : index
    %c0_606 = arith.constant 0 : index
    %640 = vector.load %arg10[%c22_604, %c0_605, %c0_606] : memref<27x8x1xbf16, #tpu.memory_space<vmem>>, vector<1x8x1xbf16>
    %641 = vector.shape_cast %640 : vector<1x8x1xbf16> to vector<8x1xbf16>
    %642 = arith.extf %641 : vector<8x1xbf16> to vector<8x1xf32>
    %cst_607 = arith.constant dense<0.000000e+00> : vector<48x1xf32>
    %643 = tpu.matmul %461, %642, %cst_607 {dimension_numbers = #tpu.dot_dimension_numbers<[1], [0], [0], [1], [0, 0, 1, 1], [], []>} : vector<48x8xf32>, vector<8x1xf32>, vector<48x1xf32> -> vector<48x1xf32>
    %c22_608 = arith.constant 22 : index
    %c0_609 = arith.constant 0 : index
    %c0_610 = arith.constant 0 : index
    %644 = vector.load %arg11[%c22_608, %c0_609, %c0_610] : memref<27x64x48xf32, #tpu.memory_space<vmem>>, vector<1x64x48xf32>
    %645 = vector.shape_cast %644 : vector<1x64x48xf32> to vector<64x48xf32>
    %cst_611 = arith.constant dense<0.000000e+00> : vector<64x1xf32>
    %646 = tpu.matmul %645, %643, %cst_611 {dimension_numbers = #tpu.dot_dimension_numbers<[1], [0], [0], [1], [0, 0, 1, 1], [], []>} : vector<64x48xf32>, vector<48x1xf32>, vector<64x1xf32> -> vector<64x1xf32>
    %647 = arith.addf %639, %646 : vector<64x1xf32>
    %c23_612 = arith.constant 23 : index
    %c0_613 = arith.constant 0 : index
    %c0_614 = arith.constant 0 : index
    %648 = vector.load %arg10[%c23_612, %c0_613, %c0_614] : memref<27x8x1xbf16, #tpu.memory_space<vmem>>, vector<1x8x1xbf16>
    %649 = vector.shape_cast %648 : vector<1x8x1xbf16> to vector<8x1xbf16>
    %650 = arith.extf %649 : vector<8x1xbf16> to vector<8x1xf32>
    %cst_615 = arith.constant dense<0.000000e+00> : vector<48x1xf32>
    %651 = tpu.matmul %461, %650, %cst_615 {dimension_numbers = #tpu.dot_dimension_numbers<[1], [0], [0], [1], [0, 0, 1, 1], [], []>} : vector<48x8xf32>, vector<8x1xf32>, vector<48x1xf32> -> vector<48x1xf32>
    %c23_616 = arith.constant 23 : index
    %c0_617 = arith.constant 0 : index
    %c0_618 = arith.constant 0 : index
    %652 = vector.load %arg11[%c23_616, %c0_617, %c0_618] : memref<27x64x48xf32, #tpu.memory_space<vmem>>, vector<1x64x48xf32>
    %653 = vector.shape_cast %652 : vector<1x64x48xf32> to vector<64x48xf32>
    %cst_619 = arith.constant dense<0.000000e+00> : vector<64x1xf32>
    %654 = tpu.matmul %653, %651, %cst_619 {dimension_numbers = #tpu.dot_dimension_numbers<[1], [0], [0], [1], [0, 0, 1, 1], [], []>} : vector<64x48xf32>, vector<48x1xf32>, vector<64x1xf32> -> vector<64x1xf32>
    %655 = arith.addf %647, %654 : vector<64x1xf32>
    %c24_620 = arith.constant 24 : index
    %c0_621 = arith.constant 0 : index
    %c0_622 = arith.constant 0 : index
    %656 = vector.load %arg10[%c24_620, %c0_621, %c0_622] : memref<27x8x1xbf16, #tpu.memory_space<vmem>>, vector<1x8x1xbf16>
    %657 = vector.shape_cast %656 : vector<1x8x1xbf16> to vector<8x1xbf16>
    %658 = arith.extf %657 : vector<8x1xbf16> to vector<8x1xf32>
    %cst_623 = arith.constant dense<0.000000e+00> : vector<48x1xf32>
    %659 = tpu.matmul %461, %658, %cst_623 {dimension_numbers = #tpu.dot_dimension_numbers<[1], [0], [0], [1], [0, 0, 1, 1], [], []>} : vector<48x8xf32>, vector<8x1xf32>, vector<48x1xf32> -> vector<48x1xf32>
    %c24_624 = arith.constant 24 : index
    %c0_625 = arith.constant 0 : index
    %c0_626 = arith.constant 0 : index
    %660 = vector.load %arg11[%c24_624, %c0_625, %c0_626] : memref<27x64x48xf32, #tpu.memory_space<vmem>>, vector<1x64x48xf32>
    %661 = vector.shape_cast %660 : vector<1x64x48xf32> to vector<64x48xf32>
    %cst_627 = arith.constant dense<0.000000e+00> : vector<64x1xf32>
    %662 = tpu.matmul %661, %659, %cst_627 {dimension_numbers = #tpu.dot_dimension_numbers<[1], [0], [0], [1], [0, 0, 1, 1], [], []>} : vector<64x48xf32>, vector<48x1xf32>, vector<64x1xf32> -> vector<64x1xf32>
    %663 = arith.addf %655, %662 : vector<64x1xf32>
    %c25_628 = arith.constant 25 : index
    %c0_629 = arith.constant 0 : index
    %c0_630 = arith.constant 0 : index
    %664 = vector.load %arg10[%c25_628, %c0_629, %c0_630] : memref<27x8x1xbf16, #tpu.memory_space<vmem>>, vector<1x8x1xbf16>
    %665 = vector.shape_cast %664 : vector<1x8x1xbf16> to vector<8x1xbf16>
    %666 = arith.extf %665 : vector<8x1xbf16> to vector<8x1xf32>
    %cst_631 = arith.constant dense<0.000000e+00> : vector<48x1xf32>
    %667 = tpu.matmul %461, %666, %cst_631 {dimension_numbers = #tpu.dot_dimension_numbers<[1], [0], [0], [1], [0, 0, 1, 1], [], []>} : vector<48x8xf32>, vector<8x1xf32>, vector<48x1xf32> -> vector<48x1xf32>
    %c25_632 = arith.constant 25 : index
    %c0_633 = arith.constant 0 : index
    %c0_634 = arith.constant 0 : index
    %668 = vector.load %arg11[%c25_632, %c0_633, %c0_634] : memref<27x64x48xf32, #tpu.memory_space<vmem>>, vector<1x64x48xf32>
    %669 = vector.shape_cast %668 : vector<1x64x48xf32> to vector<64x48xf32>
    %cst_635 = arith.constant dense<0.000000e+00> : vector<64x1xf32>
    %670 = tpu.matmul %669, %667, %cst_635 {dimension_numbers = #tpu.dot_dimension_numbers<[1], [0], [0], [1], [0, 0, 1, 1], [], []>} : vector<64x48xf32>, vector<48x1xf32>, vector<64x1xf32> -> vector<64x1xf32>
    %671 = arith.addf %663, %670 : vector<64x1xf32>
    %c26_636 = arith.constant 26 : index
    %c0_637 = arith.constant 0 : index
    %c0_638 = arith.constant 0 : index
    %672 = vector.load %arg10[%c26_636, %c0_637, %c0_638] : memref<27x8x1xbf16, #tpu.memory_space<vmem>>, vector<1x8x1xbf16>
    %673 = vector.shape_cast %672 : vector<1x8x1xbf16> to vector<8x1xbf16>
    %674 = arith.extf %673 : vector<8x1xbf16> to vector<8x1xf32>
    %cst_639 = arith.constant dense<0.000000e+00> : vector<48x1xf32>
    %675 = tpu.matmul %461, %674, %cst_639 {dimension_numbers = #tpu.dot_dimension_numbers<[1], [0], [0], [1], [0, 0, 1, 1], [], []>} : vector<48x8xf32>, vector<8x1xf32>, vector<48x1xf32> -> vector<48x1xf32>
    %c26_640 = arith.constant 26 : index
    %c0_641 = arith.constant 0 : index
    %c0_642 = arith.constant 0 : index
    %676 = vector.load %arg11[%c26_640, %c0_641, %c0_642] : memref<27x64x48xf32, #tpu.memory_space<vmem>>, vector<1x64x48xf32>
    %677 = vector.shape_cast %676 : vector<1x64x48xf32> to vector<64x48xf32>
    %cst_643 = arith.constant dense<0.000000e+00> : vector<64x1xf32>
    %678 = tpu.matmul %677, %675, %cst_643 {dimension_numbers = #tpu.dot_dimension_numbers<[1], [0], [0], [1], [0, 0, 1, 1], [], []>} : vector<64x48xf32>, vector<48x1xf32>, vector<64x1xf32> -> vector<64x1xf32>
    %679 = arith.addf %671, %678 : vector<64x1xf32>
    %c0_644 = arith.constant 0 : index
    %c0_645 = arith.constant 0 : index
    %680 = vector.load %arg12[%c0_644, %c0_645] : memref<64x1xf32, #tpu.memory_space<vmem>>, vector<64x1xf32>
    %681 = arith.addf %679, %680 : vector<64x1xf32>
    %cst_646 = arith.constant 0.000000e+00 : f32
    %682 = vector.broadcast %cst_646 : f32 to vector<64x1xf32>
    %683 = arith.cmpf oge, %681, %682 : vector<64x1xf32>
    %cst_647 = arith.constant 1.000000e-01 : f32
    %684 = vector.broadcast %cst_647 : f32 to vector<64x1xf32>
    %685 = arith.mulf %684, %681 : vector<64x1xf32>
    %686 = arith.select %683, %681, %685 : vector<64x1xi1>, vector<64x1xf32>
    %c0_648 = arith.constant 0 : index
    %c0_649 = arith.constant 0 : index
    %687 = vector.load %arg15[%c0_648, %c0_649] : memref<64x1xf32, #tpu.memory_space<vmem>>, vector<64x1xf32>
    tpu.vector_store %arg15[%c0_648, %c0_649], %686 {strides = array<i32>} : memref<64x1xf32, #tpu.memory_space<vmem>>, vector<64x1xf32>,
    return
  }
  func.func @transform_0(%arg0: i32) -> (i32, i32) {
    %c0_i32 = arith.constant 0 : i32
    %c0_i32_0 = arith.constant 0 : i32
    %c0_i32_1 = arith.constant 0 : i32
    return %c0_i32, %c0_i32_0 : i32, i32
  }
  func.func @transform_1(%arg0: i32) -> (i32, i32) {
    %c0_i32 = arith.constant 0 : i32
    %c0_i32_0 = arith.constant 0 : i32
    %c0_i32_1 = arith.constant 0 : i32
    return %c0_i32, %c0_i32_0 : i32, i32
  }
  func.func @transform_2(%arg0: i32) -> (i32, i32) {
    %c0_i32 = arith.constant 0 : i32
    %c0_i32_0 = arith.constant 0 : i32
    %c0_i32_1 = arith.constant 0 : i32
    return %c0_i32, %c0_i32_0 : i32, i32
  }
  func.func @transform_3(%arg0: i32) -> (i32, i32, i32) {
    %c0_i32 = arith.constant 0 : i32
    %c0_i32_0 = arith.constant 0 : i32
    %c0_i32_1 = arith.constant 0 : i32
    %c0_i32_2 = arith.constant 0 : i32
    return %c0_i32, %c0_i32_0, %c0_i32_1 : i32, i32, i32
  }
  func.func @transform_4(%arg0: i32) -> (i32, i32, i32) {
    %c0_i32 = arith.constant 0 : i32
    %c0_i32_0 = arith.constant 0 : i32
    %c0_i32_1 = arith.constant 0 : i32
    %c0_i32_2 = arith.constant 0 : i32
    return %c0_i32, %c0_i32_0, %c0_i32_1 : i32, i32, i32
  }
  func.func @transform_5(%arg0: i32) -> (i32, i32) {
    %c0_i32 = arith.constant 0 : i32
    %c0_i32_0 = arith.constant 0 : i32
    %c0_i32_1 = arith.constant 0 : i32
    return %c0_i32, %c0_i32_0 : i32, i32
  }
  func.func @transform_6(%arg0: i32) -> (i32, i32, i32) {
    %c0_i32 = arith.constant 0 : i32
    %c0_i32_0 = arith.constant 0 : i32
    %c0_i32_1 = arith.constant 0 : i32
    %c0_i32_2 = arith.constant 0 : i32
    return %c0_i32, %c0_i32_0, %c0_i32_1 : i32, i32, i32
  }
  func.func @transform_7(%arg0: i32) -> (i32, i32, i32) {
    %c0_i32 = arith.constant 0 : i32
    %c0_i32_0 = arith.constant 0 : i32
    %c0_i32_1 = arith.constant 0 : i32
    %c0_i32_2 = arith.constant 0 : i32
    return %c0_i32, %c0_i32_0, %c0_i32_1 : i32, i32, i32
  }
  func.func @transform_8(%arg0: i32) -> (i32, i32) {
    %c0_i32 = arith.constant 0 : i32
    %c0_i32_0 = arith.constant 0 : i32
    %c0_i32_1 = arith.constant 0 : i32
    return %c0_i32, %c0_i32_0 : i32, i32
  }
  func.func @transform_9(%arg0: i32) -> (i32, i32, i32) {
    %c0_i32 = arith.constant 0 : i32
    %c0_i32_0 = arith.constant 0 : i32
    %c0_i32_1 = arith.constant 0 : i32
    %c0_i32_2 = arith.constant 0 : i32
    return %c0_i32, %c0_i32_0, %c0_i32_1 : i32, i32, i32
  }
  func.func @transform_10(%arg0: i32) -> (i32, i32, i32) {
    %c0_i32 = arith.constant 0 : i32
    %c0_i32_0 = arith.constant 0 : i32
    %c0_i32_1 = arith.constant 0 : i32
    %c0_i32_2 = arith.constant 0 : i32
    return %c0_i32, %c0_i32_0, %c0_i32_1 : i32, i32, i32
  }
  func.func @transform_11(%arg0: i32) -> (i32, i32) {
    %c0_i32 = arith.constant 0 : i32
    %c0_i32_0 = arith.constant 0 : i32
    %c0_i32_1 = arith.constant 0 : i32
    return %c0_i32, %c0_i32_0 : i32, i32
  }
  func.func @transform_12(%arg0: i32) -> (i32, i32) {
    %c0_i32 = arith.constant 0 : i32
    %c0_i32_0 = arith.constant 0 : i32
    %c0_i32_1 = arith.constant 0 : i32
    return %c0_i32, %c0_i32_0 : i32, i32
  }
  func.func @transform_13(%arg0: i32) -> (i32, i32) {
    %c0_i32 = arith.constant 0 : i32
    %c0_i32_0 = arith.constant 0 : i32
    %c0_i32_1 = arith.constant 0 : i32
    return %c0_i32, %c0_i32_0 : i32, i32
  }
  func.func @transform_14(%arg0: i32) -> (i32, i32) {
    %c0_i32 = arith.constant 0 : i32
    %c0_i32_0 = arith.constant 0 : i32
    %c0_i32_1 = arith.constant 0 : i32
    return %c0_i32, %c0_i32_0 : i32, i32
  }
}

</mosaic_0001>

<bundles_post_ra>
// kernel: tpu_custom_call.1
= control target key start
LH: loop header
LB: loop body
LE: loop exit
PB: predicated region body
PF: predicated region fallthrough
CT: control target
= control target key end

     0   :  { %vm82_vm0 = vcmask 1042432   ;;  %v40547_v7 = vmov 0.0   ;;  %v40548_v13 = vmov 0   ;;  %vm40549_vm1 = vmmov 1   ;;  %s47184_s0 = inlined_call_operand.vmem [shape: f32[27,512], index: 0, kind: input, shape index: {}]   ;;  %s47185_s1 = inlined_call_operand.vmem [shape: f32[16,27], index: 1, kind: input, shape index: {}]   ;;  %s47186_s2 = inlined_call_operand.vmem [shape: f32[16,1], index: 2, kind: input, shape index: {}]   ;;  %s47187_s3 = inlined_call_operand.vmem [shape: bf16[27,512,64], index: 3, kind: input, shape index: {}]   ;;  %s47188_s4 = inlined_call_operand.vmem [shape: f32[27,32,16], index: 4, kind: input, shape index: {}]   ;;  %s47189_s5 = inlined_call_operand.vmem [shape: f32[32,1], index: 5, kind: input, shape index: {}]   ;;  %s47190_s6 = inlined_call_operand.vmem [shape: bf16[27,64,8], index: 6, kind: input, shape index: {}]   ;;  %s47191_s7 = inlined_call_operand.vmem [shape: f32[27,48,32], index: 7, kind: input, shape index: {}]   ;;  %s47192_s8 = inlined_call_operand.vmem [shape: f32[48,1], index: 8, kind: input, shape index: {}]   ;;  %s47193_s9 = inlined_call_operand.vmem [shape: bf16[27,8,1], index: 9, kind: input, shape index: {}]   ;;  %s47194_s10 = inlined_call_operand.vmem [shape: f32[27,64,48], index: 10, kind: input, shape index: {}]   ;;  %s47195_s11 = inlined_call_operand.vmem [shape: f32[64,1], index: 11, kind: input, shape index: {}]   ;;  %s47196_s12 = inlined_call_operand.hbm [shape: f32[32,64], index: 12, kind: output, shape index: {0}]   ;;  %s47197_s13 = inlined_call_operand.vmem [shape: f32[48,8], index: 13, kind: output, shape index: {1}]   ;;  %s47198_s14 = inlined_call_operand.vmem [shape: f32[64,1], index: 14, kind: output, shape index: {2}]  }
   0x1   :  { %v48_v0 = vld [vmem:[%s47184_s0 + $0x8] sm:$0xff]  ;;  %v50_v2 = vld [vmem:[%s47184_s0 + $0x18] sm:$0xff]  ;;  %v47_v5 = vld [vmem:[%s47184_s0] sm:$0xff]  ;;  %159 = vmatprep.mubr.f32.mxu0 %v40547_v7  ;;  %236 = vmatprep.mubr.f32.mxu1 %v40547_v7  ;;  %vm75_vm3 = vcmask 220160  }
   0x2   :  { %v52_v1 = vld [vmem:[%s47184_s0 + $0x28] sm:$0xff]  ;;  %v54_v4 = vld [vmem:[%s47184_s0 + $0x38] sm:$0xff]  ;;  %v51_v6 = vld [vmem:[%s47184_s0 + $0x20] sm:$0xff]  ;;  %40521 = vset.pattern.permute.xlu0 %v40548_v13  ;;  %40522 = vset.pattern.permute.xlu1 %v40548_v13 }
   0x3   :  { %v37219_v3 = vpack.c.bf16 %v52_v1, %v48_v0  ;;  %v37229_v8 = vpack.c.bf16 %v54_v4, %v50_v2  ;;  %v37221_v9 = vpack.c.bf16 %v51_v6, %v47_v5  ;;  %v49_v10 = vld [vmem:[%s47184_s0 + $0x10] sm:$0xff]  ;;  %v56_v12 = vld [vmem:[%s47184_s0 + $0x48] sm:$0xff]  ;;  %vm40659_vm2 = vmpackc.low %vm82_vm0, %vm40549_vm1 }
   0x4   :  { %v53_v11 = vld [vmem:[%s47184_s0 + $0x30] sm:$0xff]  ;;  %v60_v15 = vld [vmem:[%s47184_s0 + $0x68] sm:$0x7]  ;;  %v58_v17 = vld [vmem:[%s47184_s0 + $0x58] sm:$0xff] }
   0x5   :  { %37220 = vmatprep.subr.bf16.mxu0 %v37219_v3  ;;  %v37231_v14 = vpack.c.bf16 %v53_v11, %v49_v10  ;;  %37230 = vmatprep.subr.bf16.mxu1 %v37229_v8  ;;  %v37223_v18 = vpack.c.bf16 %v60_v15, %v56_v12  ;;  %v62_v19 = vld [vmem:[%s47184_s0 + $0x78] sm:$0x7]  ;;  %v55_v20 = vld [vmem:[%s47184_s0 + $0x40] sm:$0xff]  ;;  %v57_v24 = vld [vmem:[%s47184_s0 + $0x50] sm:$0xff] }
   0x6   :  { %37222 = vmatpush1.bf16.msra.mxu0 %v37221_v9  ;;  %v59_v21 = vld [vmem:[%s47184_s0 + $0x60] sm:$0x7]  ;;  %v37233_v22 = vpack.c.bf16 %v62_v19, %v58_v17  ;;  %v61_v25 = vld [vmem:[%s47184_s0 + $0x70] sm:$0x7]  ;;  %v64_v29 = vld [vmem:[%s47186_s2 + $0x8] sm:$0xff] }
   0x7   :  { %37232 = vmatpush1.bf16.msra.mxu1 %v37231_v14  ;;  %v37226_v23 = vpack.c.bf16 %v59_v21, %v55_v20  ;;  %37225 = vmatprep.subr.msk.bf16.mxu0 %vm40659_vm2, %v37223_v18  ;;  %v37236_v26 = vpack.c.bf16 %v61_v25, %v57_v24  ;;  %v63_v27 = vld [vmem:[%s47186_s2] sm:$0xff]  ;;  %v30614_v34 = vld [vmem:[%s47187_s3 + $0x48] sm:$0xff]   ;;  %v10661_v36 = vld [vmem:[%s47189_s5 + $0x10] sm:$0xff] }
   0x8   :  { %37235 = vmatprep.subr.msk.bf16.mxu1 %vm40659_vm2, %v37233_v22  ;;  %v45_v28 = vld [vmem:[%s47185_s1] sm:$0xff]  ;;  %67 = vperm.xlu0 %40521, %v63_v27   ;;  %v46_v35 = vld [vmem:[%s47185_s1 + $0x8] sm:$0xff] }
   0x9   :  { %v30613_v30 = vld [vmem:[%s47187_s3 + $0x40] sm:$0xff]   ;;  %v30678_v37 = vld [vmem:[%s47187_s3 + $0x248] sm:$0xff]  }
   0xa   :  { %37228 = vmatpush1.bf16.msk.msra.mxu0 %vm40659_vm2, %v37226_v23  ;;  %v30677_v31 = vld [vmem:[%s47187_s3 + $0x240] sm:$0xff]  }
   0xb   :  { %37238 = vmatpush1.bf16.msk.msra.mxu1 %vm40659_vm2, %v37236_v26  ;;  %37240 = vmatprep.subr.bf16.mxu0 %v30613_v30  ;;  %v26719_v32 = vld [vmem:[%s47187_s3] sm:$0xff]  }
   0xc   :  { %37376 = vmatprep.subr.bf16.mxu1 %v30677_v31  ;;  %72 = vperm.xlu0 %40521, %v64_v29   ;;  %v30669_v33 = vld [vmem:[%s47187_s3 + $0x200] sm:$0xff]  }
   0xd   :  { %23590 = vmatmul.mubr.msk.f32.vlgmr.msra.gmra.mrb[0].mxu0 %vm75_vm3, %v45_v28 }
   0xe   :  { %23594 = vmatmul.mubr.msk.f32.vlgmr.msra.gmra.mrb[0].mxu1 %vm75_vm3, %v45_v28  ;;  %165 = vmatprep.mubr.f32.mxu0 %v40547_v7 }
   0xf   :  { %242 = vmatprep.mubr.f32.mxu1 %v40547_v7  ;;  %37242 = vmatpush3.bf16.msra.mxu0 %v26719_v32 }
  0x10   :  { %20 = vsyncpa [#allocation3], 0  ;;  %37378 = vmatpush3.bf16.msra.mxu1 %v30669_v33  ;;  %37244 = vmatprep.subr.bf16.mxu0 %v30614_v34  ;;  %v30606_v38 = vld [vmem:[%s47187_s3 + $0x8] sm:$0xff]   ;;  %v30615_v40 = vld [vmem:[%s47187_s3 + $0x50] sm:$0xff]   ;;  %vm839_vm12 = vcmask 130048   ;;  %vm10699_vm14 = vcmask 523264  }
  0x11   :  { %23591 = vmatmul.mubr.msk.f32.gmra.mrb[2].mxu0 %vm75_vm3, %v46_v35  ;;  %10675 = vperm.xlu0 %40521, %v10661_v36   ;;  %v30670_v39 = vld [vmem:[%s47187_s3 + $0x208] sm:$0xff]   ;;  %v16859_v41 = vld [vmem:[%s47192_s8] sm:$0xff]  ;;  %v30679_v42 = vld [vmem:[%s47187_s3 + $0x250] sm:$0xff]   ;;  %vm10932_vm2 = vcmask 261120  }
  0x12   :  { %23595 = vmatmul.mubr.msk.f32.gmra.mrb[2].mxu1 %vm75_vm3, %v46_v35  ;;  %37380 = vmatprep.subr.bf16.mxu1 %v30678_v37  ;;  %v30607_v43 = vld [vmem:[%s47187_s3 + $0x10] sm:$0xff]   ;;  %v30616_v45 = vld [vmem:[%s47187_s3 + $0x58] sm:$0xff]   ;;  %v30617_v50 = vld [vmem:[%s47187_s3 + $0x60] sm:$0xff]  }
  0x13   :  { %37246 = vmatpush3.bf16.msra.mxu0 %v30606_v38  ;;  %v30671_v44 = vld [vmem:[%s47187_s3 + $0x210] sm:$0xff]   ;;  %v30680_v47 = vld [vmem:[%s47187_s3 + $0x258] sm:$0xff]   ;;  %v16863_v51 = vld [vmem:[%s47192_s8 + $0x20] sm:$0xff] }
  0x14   :  { %37382 = vmatpush3.bf16.msra.mxu1 %v30670_v39  ;;  %37248 = vmatprep.subr.bf16.mxu0 %v30615_v40  ;;  %v16861_v46 = vld [vmem:[%s47192_s8 + $0x10] sm:$0xff]  ;;  %v30608_v48 = vld [vmem:[%s47187_s3 + $0x18] sm:$0xff]   ;;  %v30681_v52 = vld [vmem:[%s47187_s3 + $0x260] sm:$0xff]  }
  0x15   :  { %16867 = vperm.xlu0 %40521, %v16859_v41   ;;  %37384 = vmatprep.subr.bf16.mxu1 %v30679_v42  ;;  %v30672_v49 = vld [vmem:[%s47187_s3 + $0x218] sm:$0xff]   ;;  %v30609_v53 = vld [vmem:[%s47187_s3 + $0x20] sm:$0xff]   ;;  %v30618_v55 = vld [vmem:[%s47187_s3 + $0x68] sm:$0xff]  }
  0x16   :  { %v30673_v54 = vld [vmem:[%s47187_s3 + $0x220] sm:$0xff]   ;;  %v30682_v56 = vld [vmem:[%s47187_s3 + $0x268] sm:$0xff]   ;;  %v30619_v59 = vld [vmem:[%s47187_s3 + $0x70] sm:$0xff]  }
  0x17   :  { %37250 = vmatpush3.bf16.msra.mxu0 %v30607_v43  ;;  %v30610_v57 = vld [vmem:[%s47187_s3 + $0x28] sm:$0xff]   ;;  %v30683_v60 = vld [vmem:[%s47187_s3 + $0x270] sm:$0xff]   ;;  %v30620_v63 = vld [vmem:[%s47187_s3 + $0x78] sm:$0xff]  }
  0x18   :  { %37386 = vmatpush3.bf16.msra.mxu1 %v30671_v44  ;;  %37252 = vmatprep.subr.bf16.mxu0 %v30616_v45  ;;  %v30674_v58 = vld [vmem:[%s47187_s3 + $0x228] sm:$0xff]   ;;  %v30611_v61 = vld [vmem:[%s47187_s3 + $0x30] sm:$0xff]   ;;  %v30684_v0 = vld [vmem:[%s47187_s3 + $0x278] sm:$0xff]  }
  0x19   :  { %16877 = vperm.xlu0 %40521, %v16861_v46   ;;  %37388 = vmatprep.subr.bf16.mxu1 %v30680_v47  ;;  %v30675_v62 = vld [vmem:[%s47187_s3 + $0x230] sm:$0xff]   ;;  %v30612_v1 = vld [vmem:[%s47187_s3 + $0x38] sm:$0xff]   ;;  %v30629_v3 = vld [vmem:[%s47187_s3 + $0xc0] sm:$0xff]  }
  0x1a   :  { %v30676_v2 = vld [vmem:[%s47187_s3 + $0x238] sm:$0xff]   ;;  %v30709_v4 = vld [vmem:[%s47187_s3 + $0x340] sm:$0xff]   ;;  %v30630_v26 = vld [vmem:[%s47187_s3 + $0xc8] sm:$0xff]  }
  0x1b   :  { %37254 = vmatpush3.bf16.msra.mxu0 %v30608_v48  ;;  %v30621_v22 = vld [vmem:[%s47187_s3 + $0x80] sm:$0xff]   ;;  %v30710_v27 = vld [vmem:[%s47187_s3 + $0x348] sm:$0xff]   ;;  %v30631_v35 = vld [vmem:[%s47187_s3 + $0xd0] sm:$0xff]  }
  0x1c   :  { %37390 = vmatpush3.bf16.msra.mxu1 %v30672_v49  ;;  %37256 = vmatprep.subr.bf16.mxu0 %v30617_v50  ;;  %v30701_v23 = vld [vmem:[%s47187_s3 + $0x300] sm:$0xff]   ;;  %v30622_v32 = vld [vmem:[%s47187_s3 + $0x88] sm:$0xff]   ;;  %v30711_v36 = vld [vmem:[%s47187_s3 + $0x350] sm:$0xff]  }
  0x1d   :  { %16887 = vperm.xlu0 %40521, %v16863_v51   ;;  %37392 = vmatprep.subr.bf16.mxu1 %v30681_v52  ;;  %v30702_v33 = vld [vmem:[%s47187_s3 + $0x308] sm:$0xff]   ;;  %v30623_v38 = vld [vmem:[%s47187_s3 + $0x90] sm:$0xff]   ;;  %v30632_v40 = vld [vmem:[%s47187_s3 + $0xd8] sm:$0xff]  }
  0x1e   :  { %v30703_v39 = vld [vmem:[%s47187_s3 + $0x310] sm:$0xff]   ;;  %v30712_v41 = vld [vmem:[%s47187_s3 + $0x358] sm:$0xff]   ;;  %v30633_v44 = vld [vmem:[%s47187_s3 + $0xe0] sm:$0xff]  }
  0x1f   :  { %37258 = vmatpush3.bf16.msra.mxu0 %v30609_v53  ;;  %v30624_v42 = vld [vmem:[%s47187_s3 + $0x98] sm:$0xff]   ;;  %v30713_v45 = vld [vmem:[%s47187_s3 + $0x360] sm:$0xff]   ;;  %v30634_v48 = vld [vmem:[%s47187_s3 + $0xe8] sm:$0xff]  }
  0x20   :  { %37394 = vmatpush3.bf16.msra.mxu1 %v30673_v54  ;;  %37260 = vmatprep.subr.bf16.mxu0 %v30618_v55  ;;  %v30704_v43 = vld [vmem:[%s47187_s3 + $0x318] sm:$0xff]   ;;  %v30625_v46 = vld [vmem:[%s47187_s3 + $0xa0] sm:$0xff]   ;;  %v30714_v49 = vld [vmem:[%s47187_s3 + $0x368] sm:$0xff]  }
  0x21   :  { %37396 = vmatprep.subr.bf16.mxu1 %v30682_v56  ;;  %v30705_v47 = vld [vmem:[%s47187_s3 + $0x320] sm:$0xff]   ;;  %v30626_v50 = vld [vmem:[%s47187_s3 + $0xa8] sm:$0xff]   ;;  %v30635_v52 = vld [vmem:[%s47187_s3 + $0xf0] sm:$0xff]  }
  0x22   :  { %v30706_v51 = vld [vmem:[%s47187_s3 + $0x328] sm:$0xff]   ;;  %v30715_v53 = vld [vmem:[%s47187_s3 + $0x370] sm:$0xff]  }
  0x23   :  { %37262 = vmatpush3.bf16.msra.mxu0 %v30610_v57  ;;  %v30627_v54 = vld [vmem:[%s47187_s3 + $0xb0] sm:$0xff]   ;;  %v30636_v57 = vld [vmem:[%s47187_s3 + $0xf8] sm:$0xff]  }
  0x24   :  { %37398 = vmatpush3.bf16.msra.mxu1 %v30674_v58  ;;  %37264 = vmatprep.subr.bf16.mxu0 %v30619_v59  ;;  %v30707_v55 = vld [vmem:[%s47187_s3 + $0x330] sm:$0xff]   ;;  %v30716_v58 = vld [vmem:[%s47187_s3 + $0x378] sm:$0xff]  }
  0x25   :  { %37400 = vmatprep.subr.bf16.mxu1 %v30683_v60  ;;  %v30628_v60 = vld [vmem:[%s47187_s3 + $0xb8] sm:$0xff]  }
  0x27   :  { %37266 = vmatpush3.bf16.msra.mxu0 %v30611_v61  ;;  %v30708_v61 = vld [vmem:[%s47187_s3 + $0x338] sm:$0xff]  }
  0x28   :  { %37402 = vmatpush3.bf16.msra.mxu1 %v30675_v62  ;;  %37268 = vmatprep.subr.bf16.mxu0 %v30620_v63 }
  0x29   :  { %37404 = vmatprep.subr.bf16.mxu1 %v30684_v0  ;;  %v30645_v0 = vld [vmem:[%s47187_s3 + $0x140] sm:$0xff]  }
  0x2b   :  { %37270 = vmatpush3.bf16.msra.mxu0 %v30612_v1  ;;  %v30741_v1 = vld [vmem:[%s47187_s3 + $0x440] sm:$0xff]  }
  0x2c   :  { %37406 = vmatpush3.bf16.msra.mxu1 %v30676_v2  ;;  %37272 = vmatprep.subr.bf16.mxu0 %v30629_v3  ;;  %v30637_v3 = vld [vmem:[%s47187_s3 + $0x100] sm:$0xff]  }
  0x2d   :  { %37444 = vmatprep.subr.bf16.mxu1 %v30709_v4 }
  0x87   :  { %v40819_v5 = vpop.permute.xlu0 %67 }
  0x8b   :  { %v40825_v13 = vpop.permute.xlu0 %72 }
  0xe0   :  { %v161_v6 = vpop.f32.mrb[0].mxu0 }
  0xe1   :  { %v162_v7 = vadd.f32 %v161_v6, %v40819_v5  ;;  %v40822_v8 = vpop.f32.mrb[0].mxu1  ;;  %v163_v9 = vpop.f32.mrb[1].mxu0  ;;  %v30733_v6 = vld [vmem:[%s47187_s3 + $0x400] sm:$0xff]  }
  0xe2   :  { %v164_v10 = vadd.f32 %v163_v9, %v40819_v5  ;;  %v240_v11 = vpop.f32.mrb[1].mxu1  ;;  %v239_v56 = vadd.f32 %v40822_v8, %v40819_v5  ;;  %v30646_v8 = vld [vmem:[%s47187_s3 + $0x148] sm:$0xff]  }
  0xe3   :  { %v257_v12 = vmul.f32 0.1, %v162_v7  ;;  %vm249_vm4 = vcmp.ge.f32.partialorder %v162_v7, 0.0  ;;  %v241_v18 = vadd.f32 %v240_v11, %v40819_v5  ;;  %v30742_v9 = vld [vmem:[%s47187_s3 + $0x448] sm:$0xff]  }
  0xe4   :  { %vm250_vm5 = vcmp.ge.f32.partialorder %v164_v10, 0.0  ;;  %v258_v14 = vmul.f32 0.1, %v164_v10  ;;  %v167_v15 = vpop.f32.mrb[2].mxu0  ;;  %v259_v62 = vmul.f32 0.1, %v239_v56 }
  0xe5   :  { %v40827_v16 = vpop.f32.mrb[2].mxu1  ;;  %v168_v19 = vadd.f32 %v167_v15, %v40825_v13  ;;  %v169_v20 = vpop.f32.mrb[3].mxu0  ;;  %v40841_v24 = vsel %vm249_vm4, %v162_v7, %v257_v12  ;;  %v260_v30 = vmul.f32 0.1, %v241_v18  ;;  %vm252_vm8 = vcmp.ge.f32.partialorder %v241_v18, 0.0  ;;  %v30734_v12 = vld [vmem:[%s47187_s3 + $0x408] sm:$0xff]  }
  0xe6   :  { %v40829_v17 = vsel %vm250_vm5, %v164_v10, %v258_v14  ;;  %v40833_v21 = vpop.f32.mrb[3].mxu1  ;;  %v170_v25 = vadd.f32 %v169_v20, %v40825_v13  ;;  %v245_v63 = vadd.f32 %v40827_v16, %v40825_v13  ;;  %vm251_vm9 = vcmp.ge.f32.partialorder %v239_v56, 0.0  ;;  %v30638_v10 = vld [vmem:[%s47187_s3 + $0x108] sm:$0xff]   ;;  %v30743_v14 = vld [vmem:[%s47187_s3 + $0x450] sm:$0xff]   ;;  %v30640_v20 = vld [vmem:[%s47187_s3 + $0x118] sm:$0xff]  }
  0xe7   :  { %465 = vmatprep.mubr.f32.mxu0 %v40829_v17  ;;  %1227 = vmatprep.mubr.f32.mxu1 %v40829_v17  ;;  %v261_v28 = vmul.f32 0.1, %v168_v19  ;;  %vm253_vm6 = vcmp.ge.f32.partialorder %v168_v19, 0.0  ;;  %v40874_v37 = vsel %vm252_vm8, %v241_v18, %v260_v30  ;;  %v247_v59 = vadd.f32 %v40833_v21, %v40825_v13  ;;  %v30647_v13 = vld [vmem:[%s47187_s3 + $0x150] sm:$0xff]   ;;  %v30648_v18 = vld [vmem:[%s47187_s3 + $0x158] sm:$0xff]   ;;  %v30738_v30 = vld [vmem:[%s47187_s3 + $0x428] sm:$0xff]  }
  0xe8   :  { %466 = vmatmul.mubr.f32.vlgmr.msra.gmra.mrb[4].mxu0 %v40841_v24  ;;  %1228 = vmatmul.mubr.f32.vlgmr.msra.gmra.mrb[4].mxu1 %v40841_v24  ;;  %vm254_vm7 = vcmp.ge.f32.partialorder %v170_v25, 0.0  ;;  %v262_v29 = vmul.f32 0.1, %v170_v25  ;;  %v40959_v4 = vsel %vm251_vm9, %v239_v56, %v259_v62  ;;  %v263_v5 = vmul.f32 0.1, %v245_v63  ;;  %v30639_v15 = vld [vmem:[%s47187_s3 + $0x110] sm:$0xff]  }
  0xe9   :  { %37274 = vmatpush3.bf16.msra.mxu0 %v30621_v22  ;;  %37446 = vmatpush3.bf16.msra.mxu1 %v30701_v23  ;;  %v40862_v34 = vsel %vm253_vm6, %v168_v19, %v261_v28  ;;  %v264_v2 = vmul.f32 0.1, %v247_v59  ;;  %vm256_vm10 = vcmp.ge.f32.partialorder %v247_v59, 0.0  ;;  %vm255_vm11 = vcmp.ge.f32.partialorder %v245_v63, 0.0  ;;  %v30735_v16 = vld [vmem:[%s47187_s3 + $0x410] sm:$0xff]   ;;  %v30744_v19 = vld [vmem:[%s47187_s3 + $0x458] sm:$0xff]  }
  0xea   :  { %37276 = vmatprep.subr.bf16.mxu0 %v30630_v26  ;;  %37448 = vmatprep.subr.bf16.mxu1 %v30710_v27  ;;  %v40854_v31 = vsel %vm254_vm7, %v170_v25, %v262_v29  ;;  %v40979_v11 = vsel %vm255_vm11, %v245_v63, %v263_v5  ;;  %v30736_v21 = vld [vmem:[%s47187_s3 + $0x418] sm:$0xff]   ;;  %v30649_v22 = vld [vmem:[%s47187_s3 + $0x160] sm:$0xff]   ;;  %v30650_v27 = vld [vmem:[%s47187_s3 + $0x168] sm:$0xff]   ;;  %vm16919_vm4 = vcmask 64512  }
  0xeb   :  { %470 = vmatprep.mubr.f32.mxu0 %v40854_v31  ;;  %1232 = vmatprep.mubr.f32.mxu1 %v40854_v31  ;;  %v40964_v7 = vsel %vm256_vm10, %v247_v59, %v264_v2  ;;  %v30745_v23 = vld [vmem:[%s47187_s3 + $0x460] sm:$0xff]   ;;  %v30746_v28 = vld [vmem:[%s47187_s3 + $0x468] sm:$0xff]   ;;  %v30656_v56 = vld [vmem:[%s47187_s3 + $0x198] sm:$0xff]   ;;  %vm17156_vm10 = vcmask 392192  }
  0xec   :  { %471 = vmatmul.mubr.f32.gmra.mrb[6].mxu0 %v40862_v34  ;;  %1233 = vmatmul.mubr.f32.gmra.mrb[6].mxu1 %v40862_v34  ;;  %v30641_v25 = vld [vmem:[%s47187_s3 + $0x120] sm:$0xff]   ;;  %v30642_v29 = vld [vmem:[%s47187_s3 + $0x128] sm:$0xff]   ;;  %v30667_v2 = vld [vmem:[%s47187_s3 + $0x1f0] sm:$0xff]  }
  0xed   :  { %37278 = vmatpush3.bf16.msra.mxu0 %v30622_v32  ;;  %37450 = vmatpush3.bf16.msra.mxu1 %v30702_v33  ;;  %v30737_v26 = vld [vmem:[%s47187_s3 + $0x420] sm:$0xff]   ;;  %v30651_v32 = vld [vmem:[%s47187_s3 + $0x170] sm:$0xff]   ;;  %v30666_v62 = vld [vmem:[%s47187_s3 + $0x1e8] sm:$0xff]  }
  0xee   :  { %540 = vmatprep.mubr.f32.mxu0 %v40874_v37  ;;  %1612 = vmatprep.mubr.f32.mxu1 %v40829_v17  ;;  %v30747_v33 = vld [vmem:[%s47187_s3 + $0x470] sm:$0xff]   ;;  %v30777_v59 = vld [vmem:[%s47187_s3 + $0x560] sm:$0xff]   ;;  %v30778_v63 = vld [vmem:[%s47187_s3 + $0x568] sm:$0xff]  }
  0xef   :  { %37280 = vmatprep.subr.bf16.mxu0 %v30631_v35  ;;  %37452 = vmatprep.subr.bf16.mxu1 %v30711_v36  ;;  %v30643_v35 = vld [vmem:[%s47187_s3 + $0x130] sm:$0xff]  }
  0xf0   :  { %v30739_v36 = vld [vmem:[%s47187_s3 + $0x430] sm:$0xff]  }
  0xf1   :  { %37282 = vmatpush3.bf16.msra.mxu0 %v30623_v38  ;;  %37454 = vmatpush3.bf16.msra.mxu1 %v30703_v39  ;;  %v30652_v38 = vld [vmem:[%s47187_s3 + $0x178] sm:$0xff]   ;;  %v30659_v5 = vld [vmem:[%s47187_s3 + $0x1b0] sm:$0xff]  }
  0xf2   :  { %37284 = vmatprep.subr.bf16.mxu0 %v30632_v40  ;;  %37456 = vmatprep.subr.bf16.mxu1 %v30712_v41  ;;  %v30748_v39 = vld [vmem:[%s47187_s3 + $0x478] sm:$0xff]  }
  0xf3   :  { %v30644_v40 = vld [vmem:[%s47187_s3 + $0x138] sm:$0xff]  }
  0xf4   :  { %v30740_v41 = vld [vmem:[%s47187_s3 + $0x438] sm:$0xff]  }
  0xf5   :  { %37286 = vmatpush3.bf16.msra.mxu0 %v30624_v42  ;;  %37458 = vmatpush3.bf16.msra.mxu1 %v30704_v43  ;;  %v30661_v42 = vld [vmem:[%s47187_s3 + $0x1c0] sm:$0xff]  }
  0xf6   :  { %37288 = vmatprep.subr.bf16.mxu0 %v30633_v44  ;;  %37460 = vmatprep.subr.bf16.mxu1 %v30713_v45  ;;  %v30773_v43 = vld [vmem:[%s47187_s3 + $0x540] sm:$0xff]  }
  0xf7   :  { %v30653_v44 = vld [vmem:[%s47187_s3 + $0x180] sm:$0xff]  }
  0xf8   :  { %v30765_v45 = vld [vmem:[%s47187_s3 + $0x500] sm:$0xff]  }
  0xf9   :  { %37290 = vmatpush3.bf16.msra.mxu0 %v30625_v46  ;;  %37462 = vmatpush3.bf16.msra.mxu1 %v30705_v47  ;;  %v30662_v46 = vld [vmem:[%s47187_s3 + $0x1c8] sm:$0xff]  }
  0xfa   :  { %37292 = vmatprep.subr.bf16.mxu0 %v30634_v48  ;;  %37464 = vmatprep.subr.bf16.mxu1 %v30714_v49  ;;  %v30774_v47 = vld [vmem:[%s47187_s3 + $0x548] sm:$0xff]  }
  0xfb   :  { %v30654_v48 = vld [vmem:[%s47187_s3 + $0x188] sm:$0xff]  }
  0xfc   :  { %v30766_v49 = vld [vmem:[%s47187_s3 + $0x508] sm:$0xff]  }
  0xfd   :  { %37294 = vmatpush3.bf16.msra.mxu0 %v30626_v50  ;;  %37466 = vmatpush3.bf16.msra.mxu1 %v30706_v51  ;;  %v30663_v50 = vld [vmem:[%s47187_s3 + $0x1d0] sm:$0xff]  }
  0xfe   :  { %37296 = vmatprep.subr.bf16.mxu0 %v30635_v52  ;;  %37468 = vmatprep.subr.bf16.mxu1 %v30715_v53  ;;  %v30775_v51 = vld [vmem:[%s47187_s3 + $0x550] sm:$0xff]  }
  0xff   :  { %v30655_v52 = vld [vmem:[%s47187_s3 + $0x190] sm:$0xff]  }
 0x100   :  { %v30767_v53 = vld [vmem:[%s47187_s3 + $0x510] sm:$0xff]  }
 0x101   :  { %37298 = vmatpush3.bf16.msra.mxu0 %v30627_v54  ;;  %37470 = vmatpush3.bf16.msra.mxu1 %v30707_v55  ;;  %v30664_v54 = vld [vmem:[%s47187_s3 + $0x1d8] sm:$0xff]  }
 0x102   :  { %37300 = vmatprep.subr.bf16.mxu0 %v30636_v57  ;;  %37472 = vmatprep.subr.bf16.mxu1 %v30716_v58  ;;  %v30776_v55 = vld [vmem:[%s47187_s3 + $0x558] sm:$0xff]   ;;  %v30665_v58 = vld [vmem:[%s47187_s3 + $0x1e0] sm:$0xff]  }
 0x103   :  { %v30768_v57 = vld [vmem:[%s47187_s3 + $0x518] sm:$0xff]  }
 0x105   :  { %37302 = vmatpush3.bf16.msra.mxu0 %v30628_v60  ;;  %37474 = vmatpush3.bf16.msra.mxu1 %v30708_v61  ;;  %v30657_v60 = vld [vmem:[%s47187_s3 + $0x1a0] sm:$0xff]  }
 0x106   :  { %37304 = vmatprep.subr.bf16.mxu0 %v30645_v0  ;;  %37512 = vmatprep.subr.bf16.mxu1 %v30741_v1  ;;  %v30769_v61 = vld [vmem:[%s47187_s3 + $0x520] sm:$0xff]   ;;  %v30658_v0 = vld [vmem:[%s47187_s3 + $0x1a8] sm:$0xff]  }
 0x107   :  { %v30770_v1 = vld [vmem:[%s47187_s3 + $0x528] sm:$0xff]  }
 0x108   :  { %541 = vmatmul.mubr.f32.vlgmr.msra.gmra.mrb[8].mxu0 %v40959_v4  ;;  %1613 = vmatmul.mubr.f32.vlgmr.msra.gmra.mrb[8].mxu1 %v40841_v24 }
 0x109   :  { %545 = vmatprep.mubr.f32.mxu0 %v40964_v7  ;;  %37306 = vmatpush3.bf16.msra.mxu0 %v30637_v3  ;;  %v30779_v3 = vld [vmem:[%s47187_s3 + $0x570] sm:$0xff]  }
 0x10a   :  { %1617 = vmatprep.mubr.f32.mxu1 %v40854_v31  ;;  %37514 = vmatpush3.bf16.msra.mxu1 %v30733_v6  ;;  %v30771_v6 = vld [vmem:[%s47187_s3 + $0x530] sm:$0xff]  }
 0x10b   :  { %37308 = vmatprep.subr.bf16.mxu0 %v30646_v8  ;;  %37516 = vmatprep.subr.bf16.mxu1 %v30742_v9  ;;  %v30668_v8 = vld [vmem:[%s47187_s3 + $0x1f8] sm:$0xff]  }
 0x10c   :  { %546 = vmatmul.mubr.f32.gmra.mrb[10].mxu0 %v40979_v11  ;;  %1618 = vmatmul.mubr.f32.gmra.mrb[10].mxu1 %v40862_v34  ;;  %v30780_v9 = vld [vmem:[%s47187_s3 + $0x578] sm:$0xff]  }
 0x10d   :  { %37310 = vmatpush3.bf16.msra.mxu0 %v30638_v10  ;;  %748 = vmatprep.mubr.f32.mxu0 %v40829_v17  ;;  %v30660_v10 = vld [vmem:[%s47187_s3 + $0x1b8] sm:$0xff]  }
 0x10e   :  { %37518 = vmatpush3.bf16.msra.mxu1 %v30734_v12  ;;  %1997 = vmatprep.mubr.f32.mxu1 %v40829_v17  ;;  %v30772_v12 = vld [vmem:[%s47187_s3 + $0x538] sm:$0xff]  }
 0x10f   :  { %37312 = vmatprep.subr.bf16.mxu0 %v30647_v13  ;;  %37520 = vmatprep.subr.bf16.mxu1 %v30743_v14  ;;  %v30789_v13 = vld [vmem:[%s47187_s3 + $0x5c0] sm:$0xff]  }
 0x110   :  { %v30781_v14 = vld [vmem:[%s47187_s3 + $0x580] sm:$0xff]  }
 0x111   :  { %37314 = vmatpush3.bf16.msra.mxu0 %v30639_v15  ;;  %v30790_v15 = vld [vmem:[%s47187_s3 + $0x5c8] sm:$0xff]  }
 0x112   :  { %37522 = vmatpush3.bf16.msra.mxu1 %v30735_v16  ;;  %37316 = vmatprep.subr.bf16.mxu0 %v30648_v18  ;;  %v30782_v16 = vld [vmem:[%s47187_s3 + $0x588] sm:$0xff]   ;;  %v30791_v18 = vld [vmem:[%s47187_s3 + $0x5d0] sm:$0xff]  }
 0x113   :  { %37524 = vmatprep.subr.bf16.mxu1 %v30744_v19  ;;  %v30783_v19 = vld [vmem:[%s47187_s3 + $0x590] sm:$0xff]  }
 0x115   :  { %37318 = vmatpush3.bf16.msra.mxu0 %v30640_v20  ;;  %v30792_v20 = vld [vmem:[%s47187_s3 + $0x5d8] sm:$0xff]  }
 0x116   :  { %37526 = vmatpush3.bf16.msra.mxu1 %v30736_v21  ;;  %37320 = vmatprep.subr.bf16.mxu0 %v30649_v22  ;;  %v30784_v21 = vld [vmem:[%s47187_s3 + $0x598] sm:$0xff]   ;;  %v30793_v22 = vld [vmem:[%s47187_s3 + $0x5e0] sm:$0xff]  }
 0x117   :  { %37528 = vmatprep.subr.bf16.mxu1 %v30745_v23  ;;  %v30785_v23 = vld [vmem:[%s47187_s3 + $0x5a0] sm:$0xff]  }
 0x119   :  { %37322 = vmatpush3.bf16.msra.mxu0 %v30641_v25  ;;  %v30794_v25 = vld [vmem:[%s47187_s3 + $0x5e8] sm:$0xff]  }
 0x11a   :  { %37530 = vmatpush3.bf16.msra.mxu1 %v30737_v26  ;;  %37324 = vmatprep.subr.bf16.mxu0 %v30650_v27  ;;  %v30786_v26 = vld [vmem:[%s47187_s3 + $0x5a8] sm:$0xff]   ;;  %v30795_v27 = vld [vmem:[%s47187_s3 + $0x5f0] sm:$0xff]  }
 0x11b   :  { %37532 = vmatprep.subr.bf16.mxu1 %v30746_v28  ;;  %v30787_v28 = vld [vmem:[%s47187_s3 + $0x5b0] sm:$0xff]  }
 0x11d   :  { %37326 = vmatpush3.bf16.msra.mxu0 %v30642_v29  ;;  %v30796_v29 = vld [vmem:[%s47187_s3 + $0x5f8] sm:$0xff]  }
 0x11e   :  { %37534 = vmatpush3.bf16.msra.mxu1 %v30738_v30  ;;  %37328 = vmatprep.subr.bf16.mxu0 %v30651_v32  ;;  %v30788_v30 = vld [vmem:[%s47187_s3 + $0x5b8] sm:$0xff]   ;;  %v30821_v32 = vld [vmem:[%s47187_s3 + $0x6c0] sm:$0xff]  }
 0x11f   :  { %37536 = vmatprep.subr.bf16.mxu1 %v30747_v33  ;;  %v30813_v33 = vld [vmem:[%s47187_s3 + $0x680] sm:$0xff]  }
 0x121   :  { %37330 = vmatpush3.bf16.msra.mxu0 %v30643_v35  ;;  %v30822_v35 = vld [vmem:[%s47187_s3 + $0x6c8] sm:$0xff]  }
 0x122   :  { %37538 = vmatpush3.bf16.msra.mxu1 %v30739_v36  ;;  %37332 = vmatprep.subr.bf16.mxu0 %v30652_v38  ;;  %v30814_v36 = vld [vmem:[%s47187_s3 + $0x688] sm:$0xff]   ;;  %v30823_v38 = vld [vmem:[%s47187_s3 + $0x6d0] sm:$0xff]  }
 0x123   :  { %37540 = vmatprep.subr.bf16.mxu1 %v30748_v39  ;;  %v30815_v39 = vld [vmem:[%s47187_s3 + $0x690] sm:$0xff]  }
 0x125   :  { %37334 = vmatpush3.bf16.msra.mxu0 %v30644_v40  ;;  %v30824_v40 = vld [vmem:[%s47187_s3 + $0x6d8] sm:$0xff]  }
 0x126   :  { %37542 = vmatpush3.bf16.msra.mxu1 %v30740_v41  ;;  %37336 = vmatprep.subr.bf16.mxu0 %v30661_v42  ;;  %v30816_v41 = vld [vmem:[%s47187_s3 + $0x698] sm:$0xff]   ;;  %v30825_v42 = vld [vmem:[%s47187_s3 + $0x6e0] sm:$0xff]  }
 0x127   :  { %37580 = vmatprep.subr.bf16.mxu1 %v30773_v43  ;;  %v30817_v43 = vld [vmem:[%s47187_s3 + $0x6a0] sm:$0xff]  }
 0x128   :  { %749 = vmatmul.mubr.f32.vlgmr.msra.gmra.mrb[12].mxu0 %v40841_v24 }
 0x129   :  { %1998 = vmatmul.mubr.f32.vlgmr.msra.gmra.mrb[12].mxu1 %v40841_v24  ;;  %753 = vmatprep.mubr.f32.mxu0 %v40854_v31 }
 0x12a   :  { %37338 = vmatpush3.bf16.msra.mxu0 %v30653_v44  ;;  %2002 = vmatprep.mubr.f32.mxu1 %v40854_v31  ;;  %v30826_v44 = vld [vmem:[%s47187_s3 + $0x6e8] sm:$0xff]  }
 0x12b   :  { %37582 = vmatpush3.bf16.msra.mxu1 %v30765_v45  ;;  %37340 = vmatprep.subr.bf16.mxu0 %v30662_v46  ;;  %v30818_v45 = vld [vmem:[%s47187_s3 + $0x6a8] sm:$0xff]   ;;  %v30827_v46 = vld [vmem:[%s47187_s3 + $0x6f0] sm:$0xff]  }
 0x12c   :  { %754 = vmatmul.mubr.f32.gmra.mrb[14].mxu0 %v40862_v34  ;;  %37584 = vmatprep.subr.bf16.mxu1 %v30774_v47  ;;  %v30819_v47 = vld [vmem:[%s47187_s3 + $0x6b0] sm:$0xff]  }
 0x12d   :  { %2003 = vmatmul.mubr.f32.gmra.mrb[14].mxu1 %v40862_v34  ;;  %823 = vmatprep.mubr.f32.mxu0 %v40874_v37 }
 0x12e   :  { %37342 = vmatpush3.bf16.msra.mxu0 %v30654_v48  ;;  %2382 = vmatprep.mubr.f32.mxu1 %v40829_v17  ;;  %v30828_v48 = vld [vmem:[%s47187_s3 + $0x6f8] sm:$0xff]  }
 0x12f   :  { %37586 = vmatpush3.bf16.msra.mxu1 %v30766_v49  ;;  %37344 = vmatprep.subr.bf16.mxu0 %v30663_v50  ;;  %v30820_v49 = vld [vmem:[%s47187_s3 + $0x6b8] sm:$0xff]   ;;  %v30853_v50 = vld [vmem:[%s47187_s3 + $0x7c0] sm:$0xff]  }
 0x130   :  { %37588 = vmatprep.subr.bf16.mxu1 %v30775_v51  ;;  %v30845_v51 = vld [vmem:[%s47187_s3 + $0x780] sm:$0xff]  }
 0x132   :  { %37346 = vmatpush3.bf16.msra.mxu0 %v30655_v52  ;;  %v30854_v52 = vld [vmem:[%s47187_s3 + $0x7c8] sm:$0xff]  }
 0x133   :  { %37590 = vmatpush3.bf16.msra.mxu1 %v30767_v53  ;;  %37348 = vmatprep.subr.bf16.mxu0 %v30664_v54  ;;  %v30846_v53 = vld [vmem:[%s47187_s3 + $0x788] sm:$0xff]   ;;  %v30855_v54 = vld [vmem:[%s47187_s3 + $0x7d0] sm:$0xff]  }
 0x134   :  { %37592 = vmatprep.subr.bf16.mxu1 %v30776_v55  ;;  %v30847_v55 = vld [vmem:[%s47187_s3 + $0x790] sm:$0xff]  }
 0x136   :  { %37350 = vmatpush3.bf16.msra.mxu0 %v30656_v56  ;;  %v30856_v56 = vld [vmem:[%s47187_s3 + $0x7d8] sm:$0xff]  }
 0x137   :  { %37594 = vmatpush3.bf16.msra.mxu1 %v30768_v57  ;;  %37352 = vmatprep.subr.bf16.mxu0 %v30665_v58  ;;  %v30848_v57 = vld [vmem:[%s47187_s3 + $0x798] sm:$0xff]   ;;  %v30857_v58 = vld [vmem:[%s47187_s3 + $0x7e0] sm:$0xff]  }
 0x138   :  { %37596 = vmatprep.subr.bf16.mxu1 %v30777_v59  ;;  %v30849_v59 = vld [vmem:[%s47187_s3 + $0x7a0] sm:$0xff]  }
 0x13a   :  { %37354 = vmatpush3.bf16.msra.mxu0 %v30657_v60  ;;  %v30858_v60 = vld [vmem:[%s47187_s3 + $0x7e8] sm:$0xff]  }
 0x13b   :  { %37598 = vmatpush3.bf16.msra.mxu1 %v30769_v61  ;;  %37356 = vmatprep.subr.bf16.mxu0 %v30666_v62  ;;  %v30850_v61 = vld [vmem:[%s47187_s3 + $0x7a8] sm:$0xff]   ;;  %v30859_v62 = vld [vmem:[%s47187_s3 + $0x7f0] sm:$0xff]  }
 0x13c   :  { %37600 = vmatprep.subr.bf16.mxu1 %v30778_v63  ;;  %v30851_v63 = vld [vmem:[%s47187_s3 + $0x7b0] sm:$0xff]  }
 0x13e   :  { %37358 = vmatpush3.bf16.msra.mxu0 %v30658_v0  ;;  %v30860_v0 = vld [vmem:[%s47187_s3 + $0x7f8] sm:$0xff]  }
 0x13f   :  { %37602 = vmatpush3.bf16.msra.mxu1 %v30770_v1  ;;  %37360 = vmatprep.subr.bf16.mxu0 %v30667_v2  ;;  %v30852_v1 = vld [vmem:[%s47187_s3 + $0x7b8] sm:$0xff]   ;;  %v30885_v2 = vld [vmem:[%s47187_s3 + $0x8c0] sm:$0xff]  }
 0x140   :  { %37604 = vmatprep.subr.bf16.mxu1 %v30779_v3  ;;  %v30877_v3 = vld [vmem:[%s47187_s3 + $0x880] sm:$0xff]  }
 0x142   :  { %37362 = vmatpush3.bf16.msra.mxu0 %v30659_v5  ;;  %v30886_v5 = vld [vmem:[%s47187_s3 + $0x8c8] sm:$0xff]  }
 0x143   :  { %37606 = vmatpush3.bf16.msra.mxu1 %v30771_v6  ;;  %37364 = vmatprep.subr.bf16.mxu0 %v30668_v8  ;;  %v23660_v6 = vld [vmem:[%s47188_s4 + $0x20] sm:$0xff]  ;;  %v30878_v8 = vld [vmem:[%s47187_s3 + $0x888] sm:$0xff]  }
 0x144   :  { %37608 = vmatprep.subr.bf16.mxu1 %v30780_v9  ;;  %v30887_v9 = vld [vmem:[%s47187_s3 + $0x8d0] sm:$0xff]  }
 0x146   :  { %37366 = vmatpush3.bf16.msra.mxu0 %v30660_v10  ;;  %v30879_v10 = vld [vmem:[%s47187_s3 + $0x890] sm:$0xff]  }
 0x147   :  { %37610 = vmatpush3.bf16.msra.mxu1 %v30772_v12  ;;  %v30888_v12 = vld [vmem:[%s47187_s3 + $0x8d8] sm:$0xff]  }
 0x148   :  { %37612 = vmatprep.subr.bf16.mxu1 %v30789_v13  ;;  %v30880_v13 = vld [vmem:[%s47187_s3 + $0x898] sm:$0xff]  }
 0x149   :  { %824 = vmatmul.mubr.f32.vlgmr.msra.gmra.mrb[16].mxu0 %v40959_v4 }
 0x14a   :  { %2383 = vmatmul.mubr.f32.vlgmr.msra.gmra.mrb[16].mxu1 %v40841_v24  ;;  %828 = vmatprep.mubr.f32.mxu0 %v40964_v7 }
 0x14b   :  { %2387 = vmatprep.mubr.f32.mxu1 %v40854_v31  ;;  %37614 = vmatpush3.bf16.msra.mxu1 %v30781_v14  ;;  %v30889_v14 = vld [vmem:[%s47187_s3 + $0x8e0] sm:$0xff]  }
 0x14c   :  { %37616 = vmatprep.subr.bf16.mxu1 %v30790_v15  ;;  %v30881_v15 = vld [vmem:[%s47187_s3 + $0x8a0] sm:$0xff]  }
 0x14d   :  { %829 = vmatmul.mubr.f32.gmra.mrb[18].mxu0 %v40979_v11 }
 0x14e   :  { %2388 = vmatmul.mubr.f32.gmra.mrb[18].mxu1 %v40862_v34  ;;  %34955 = vmatprep.mubr.msk.f32.mxu0 %vm839_vm12, %v23660_v6  ;;  %v30933_v6 = vld [vmem:[%s47187_s3 + $0xa40] sm:$0xff]  }
 0x14f   :  { %37618 = vmatpush3.bf16.msra.mxu1 %v30782_v16  ;;  %2457 = vmatprep.mubr.f32.mxu1 %v40874_v37  ;;  %v30890_v16 = vld [vmem:[%s47187_s3 + $0x8e8] sm:$0xff]  }
 0x150   :  { %37620 = vmatprep.subr.bf16.mxu1 %v30791_v18 }
 0x153   :  { %37622 = vmatpush3.bf16.msra.mxu1 %v30783_v19 }
 0x154   :  { %37624 = vmatprep.subr.bf16.mxu1 %v30792_v20 }
 0x157   :  { %37626 = vmatpush3.bf16.msra.mxu1 %v30784_v21 }
 0x158   :  { %37628 = vmatprep.subr.bf16.mxu1 %v30793_v22 }
 0x15b   :  { %37630 = vmatpush3.bf16.msra.mxu1 %v30785_v23 }
 0x15c   :  { %37632 = vmatprep.subr.bf16.mxu1 %v30794_v25  ;;  %v30882_v25 = vld [vmem:[%s47187_s3 + $0x8a8] sm:$0xff]  }
 0x15f   :  { %37634 = vmatpush3.bf16.msra.mxu1 %v30786_v26  ;;  %v30891_v26 = vld [vmem:[%s47187_s3 + $0x8f0] sm:$0xff]  }
 0x160   :  { %37636 = vmatprep.subr.bf16.mxu1 %v30795_v27 }
 0x163   :  { %37638 = vmatpush3.bf16.msra.mxu1 %v30787_v28 }
 0x164   :  { %37640 = vmatprep.subr.bf16.mxu1 %v30796_v29 }
 0x167   :  { %37642 = vmatpush3.bf16.msra.mxu1 %v30788_v30 }
 0x168   :  { %37680 = vmatprep.subr.bf16.mxu1 %v30821_v32  ;;  %v30883_v32 = vld [vmem:[%s47187_s3 + $0x8b0] sm:$0xff]  }
 0x16a   :  { %2458 = vmatmul.mubr.f32.vlgmr.msra.gmra.mrb[20].mxu1 %v40959_v4 }
 0x16b   :  { %2462 = vmatprep.mubr.f32.mxu1 %v40964_v7  ;;  %37682 = vmatpush3.bf16.msra.mxu1 %v30813_v33 }
 0x16c   :  { %37684 = vmatprep.subr.bf16.mxu1 %v30822_v35 }
 0x16e   :  { %2463 = vmatmul.mubr.f32.gmra.mrb[22].mxu1 %v40979_v11 }
 0x16f   :  { %37686 = vmatpush3.bf16.msra.mxu1 %v30814_v36  ;;  %2842 = vmatprep.mubr.f32.mxu1 %v40874_v37  ;;  %v30892_v36 = vld [vmem:[%s47187_s3 + $0x8f8] sm:$0xff]  }
 0x170   :  { %37688 = vmatprep.subr.bf16.mxu1 %v30823_v38  ;;  %v30884_v38 = vld [vmem:[%s47187_s3 + $0x8b8] sm:$0xff]  }
 0x173   :  { %37690 = vmatpush3.bf16.msra.mxu1 %v30815_v39  ;;  %v30901_v39 = vld [vmem:[%s47187_s3 + $0x940] sm:$0xff]  }
 0x174   :  { %37692 = vmatprep.subr.bf16.mxu1 %v30824_v40  ;;  %v30893_v40 = vld [vmem:[%s47187_s3 + $0x900] sm:$0xff]  }
 0x177   :  { %37694 = vmatpush3.bf16.msra.mxu1 %v30816_v41  ;;  %v30902_v41 = vld [vmem:[%s47187_s3 + $0x948] sm:$0xff]  }
 0x178   :  { %37696 = vmatprep.subr.bf16.mxu1 %v30825_v42  ;;  %v30894_v42 = vld [vmem:[%s47187_s3 + $0x908] sm:$0xff]  }
 0x17b   :  { %37698 = vmatpush3.bf16.msra.mxu1 %v30817_v43  ;;  %v30903_v43 = vld [vmem:[%s47187_s3 + $0x950] sm:$0xff]  }
 0x17c   :  { %37700 = vmatprep.subr.bf16.mxu1 %v30826_v44  ;;  %v30895_v44 = vld [vmem:[%s47187_s3 + $0x910] sm:$0xff]  }
 0x17f   :  { %37702 = vmatpush3.bf16.msra.mxu1 %v30818_v45  ;;  %v30904_v45 = vld [vmem:[%s47187_s3 + $0x958] sm:$0xff]  }
 0x180   :  { %37704 = vmatprep.subr.bf16.mxu1 %v30827_v46  ;;  %v30896_v46 = vld [vmem:[%s47187_s3 + $0x918] sm:$0xff]  }
 0x183   :  { %37706 = vmatpush3.bf16.msra.mxu1 %v30819_v47  ;;  %v30905_v47 = vld [vmem:[%s47187_s3 + $0x960] sm:$0xff]  }
 0x184   :  { %37708 = vmatprep.subr.bf16.mxu1 %v30828_v48  ;;  %v30897_v48 = vld [vmem:[%s47187_s3 + $0x920] sm:$0xff]  }
 0x187   :  { %37710 = vmatpush3.bf16.msra.mxu1 %v30820_v49  ;;  %v30906_v49 = vld [vmem:[%s47187_s3 + $0x968] sm:$0xff]  }
 0x188   :  { %37748 = vmatprep.subr.bf16.mxu1 %v30853_v50 }
 0x18a   :  { %2843 = vmatmul.mubr.f32.vlgmr.msra.gmra.mrb[24].mxu1 %v40959_v4 }
 0x18b   :  { %2847 = vmatprep.mubr.f32.mxu1 %v40964_v7  ;;  %37750 = vmatpush3.bf16.msra.mxu1 %v30845_v51 }
 0x18c   :  { %37752 = vmatprep.subr.bf16.mxu1 %v30854_v52 }
 0x18e   :  { %2848 = vmatmul.mubr.f32.gmra.mrb[26].mxu1 %v40979_v11 }
 0x18f   :  { %37754 = vmatpush3.bf16.msra.mxu1 %v30846_v53  ;;  %3227 = vmatprep.mubr.f32.mxu1 %v40874_v37 }
 0x190   :  { %37756 = vmatprep.subr.bf16.mxu1 %v30855_v54  ;;  %v30898_v54 = vld [vmem:[%s47187_s3 + $0x928] sm:$0xff]  }
 0x193   :  { %37758 = vmatpush3.bf16.msra.mxu1 %v30847_v55 }
 0x194   :  { %37760 = vmatprep.subr.bf16.mxu1 %v30856_v56 }
 0x197   :  { %37762 = vmatpush3.bf16.msra.mxu1 %v30848_v57  ;;  %v30907_v57 = vld [vmem:[%s47187_s3 + $0x970] sm:$0xff]  }
 0x198   :  { %37764 = vmatprep.subr.bf16.mxu1 %v30857_v58 }
 0x19b   :  { %37766 = vmatpush3.bf16.msra.mxu1 %v30849_v59 }
 0x19c   :  { %37768 = vmatprep.subr.bf16.mxu1 %v30858_v60 }
 0x19f   :  { %37770 = vmatpush3.bf16.msra.mxu1 %v30850_v61 }
 0x1a0   :  { %37772 = vmatprep.subr.bf16.mxu1 %v30859_v62 }
 0x1a3   :  { %37774 = vmatpush3.bf16.msra.mxu1 %v30851_v63  ;;  %v30899_v63 = vld [vmem:[%s47187_s3 + $0x930] sm:$0xff]  }
 0x1a4   :  { %37776 = vmatprep.subr.bf16.mxu1 %v30860_v0 }
 0x1a7   :  { %37778 = vmatpush3.bf16.msra.mxu1 %v30852_v1 }
 0x1a8   :  { %37816 = vmatprep.subr.bf16.mxu1 %v30885_v2  ;;  %v30908_v2 = vld [vmem:[%s47187_s3 + $0x978] sm:$0xff]  }
 0x1aa   :  { %3228 = vmatmul.mubr.f32.vlgmr.msra.gmra.mrb[28].mxu1 %v40959_v4 }
 0x1ab   :  { %3232 = vmatprep.mubr.f32.mxu1 %v40964_v7  ;;  %37818 = vmatpush3.bf16.msra.mxu1 %v30877_v3 }
 0x1ac   :  { %37820 = vmatprep.subr.bf16.mxu1 %v30886_v5  ;;  %v30900_v5 = vld [vmem:[%s47187_s3 + $0x938] sm:$0xff]  }
 0x1ae   :  { %3233 = vmatmul.mubr.f32.gmra.mrb[30].mxu1 %v40979_v11 }
 0x1af   :  { %37822 = vmatpush3.bf16.msra.mxu1 %v30878_v8  ;;  %3612 = vmatprep.mubr.f32.mxu1 %v40874_v37 }
 0x1b0   :  { %37824 = vmatprep.subr.bf16.mxu1 %v30887_v9  ;;  %v30925_v9 = vld [vmem:[%s47187_s3 + $0xa00] sm:$0xff]  }
 0x1b3   :  { %37826 = vmatpush3.bf16.msra.mxu1 %v30879_v10  ;;  %v30934_v10 = vld [vmem:[%s47187_s3 + $0xa48] sm:$0xff]  }
 0x1b4   :  { %37828 = vmatprep.subr.bf16.mxu1 %v30888_v12  ;;  %v30926_v12 = vld [vmem:[%s47187_s3 + $0xa08] sm:$0xff]  }
 0x1b7   :  { %37830 = vmatpush3.bf16.msra.mxu1 %v30880_v13  ;;  %v30935_v13 = vld [vmem:[%s47187_s3 + $0xa50] sm:$0xff]  }
 0x1b8   :  { %37832 = vmatprep.subr.bf16.mxu1 %v30889_v14  ;;  %v30927_v14 = vld [vmem:[%s47187_s3 + $0xa10] sm:$0xff]  }
 0x1bb   :  { %v31608_v18 = vpop.f32.mrb[4].mxu0  ;;  %v31772_v19 = vpop.f32.mrb[4].mxu1  ;;  %37834 = vmatpush3.bf16.msra.mxu1 %v30881_v15  ;;  %v30936_v15 = vld [vmem:[%s47187_s3 + $0xa58] sm:$0xff]  }
 0x1bc   :  { %v31609_v20 = vpop.f32.mrb[5].mxu0  ;;  %v31773_v21 = vpop.f32.mrb[5].mxu1  ;;  %37836 = vmatprep.subr.bf16.mxu1 %v30890_v16  ;;  %v30928_v16 = vld [vmem:[%s47187_s3 + $0xa18] sm:$0xff]  }
 0x1bd   :  { %v31610_v22 = vadd.f32 %v31609_v20, %v31608_v18  ;;  %v41364_v23 = vadd.f32 %v31773_v21, %v31772_v19  ;;  %v30937_v18 = vld [vmem:[%s47187_s3 + $0xa60] sm:$0xff]   ;;  %v30938_v20 = vld [vmem:[%s47187_s3 + $0xa68] sm:$0xff]  }
 0x1be   :  { %v30929_v19 = vld [vmem:[%s47187_s3 + $0xa20] sm:$0xff]  }
 0x1bf   :  { %37838 = vmatpush3.bf16.msra.mxu1 %v30882_v25  ;;  %v31611_v27 = vpop.f32.mrb[6].mxu0  ;;  %v31775_v28 = vpop.f32.mrb[6].mxu1 }
 0x1c0   :  { %37840 = vmatprep.subr.bf16.mxu1 %v30891_v26  ;;  %v31612_v29 = vpop.f32.mrb[7].mxu0  ;;  %v31776_v30 = vpop.f32.mrb[7].mxu1  ;;  %v30930_v26 = vld [vmem:[%s47187_s3 + $0xa28] sm:$0xff]  }
 0x1c1   :  { %v31613_v33 = vadd.f32 %v31612_v29, %v31611_v27  ;;  %v41375_v35 = vadd.f32 %v31776_v30, %v31775_v28  ;;  %v30939_v29 = vld [vmem:[%s47187_s3 + $0xa70] sm:$0xff]  }
 0x1c3   :  { %37842 = vmatpush3.bf16.msra.mxu1 %v30883_v32 }
 0x1c4   :  { %37844 = vmatprep.subr.bf16.mxu1 %v30892_v36 }
 0x1c7   :  { %37846 = vmatpush3.bf16.msra.mxu1 %v30884_v38  ;;  %v30931_v38 = vld [vmem:[%s47187_s3 + $0xa30] sm:$0xff]  }
 0x1c8   :  { %37852 = vmatprep.subr.bf16.mxu1 %v30901_v39 }
 0x1ca   :  { %3613 = vmatmul.mubr.f32.vlgmr.msra.gmra.mrb[32].mxu1 %v40959_v4 }
 0x1cb   :  { %3617 = vmatprep.mubr.f32.mxu1 %v40964_v7  ;;  %37854 = vmatpush3.bf16.msra.mxu1 %v30893_v40 }
 0x1cc   :  { %37856 = vmatprep.subr.bf16.mxu1 %v30902_v41  ;;  %v30940_v41 = vld [vmem:[%s47187_s3 + $0xa78] sm:$0xff]  }
 0x1ce   :  { %3618 = vmatmul.mubr.f32.gmra.mrb[34].mxu1 %v40979_v11 }
 0x1cf   :  { %37858 = vmatpush3.bf16.msra.mxu1 %v30894_v42  ;;  %3922 = vmatprep.mubr.f32.mxu1 %v40829_v17 }
 0x1d0   :  { %37860 = vmatprep.subr.bf16.mxu1 %v30903_v43  ;;  %v30932_v43 = vld [vmem:[%s47187_s3 + $0xa38] sm:$0xff]  }
 0x1d3   :  { %37862 = vmatpush3.bf16.msra.mxu1 %v30895_v44  ;;  %v30965_v44 = vld [vmem:[%s47187_s3 + $0xb40] sm:$0xff]  }
 0x1d4   :  { %37864 = vmatprep.subr.bf16.mxu1 %v30904_v45  ;;  %v30957_v45 = vld [vmem:[%s47187_s3 + $0xb00] sm:$0xff]  }
 0x1d7   :  { %37866 = vmatpush3.bf16.msra.mxu1 %v30896_v46  ;;  %v30966_v46 = vld [vmem:[%s47187_s3 + $0xb48] sm:$0xff]  }
 0x1d8   :  { %37868 = vmatprep.subr.bf16.mxu1 %v30905_v47  ;;  %v30958_v47 = vld [vmem:[%s47187_s3 + $0xb08] sm:$0xff]  }
 0x1db   :  { %37870 = vmatpush3.bf16.msra.mxu1 %v30897_v48  ;;  %v31646_v50 = vpop.f32.mrb[8].mxu0  ;;  %v31854_v51 = vpop.f32.mrb[8].mxu1  ;;  %v30967_v48 = vld [vmem:[%s47187_s3 + $0xb50] sm:$0xff]  }
 0x1dc   :  { %v31647_v52 = vpop.f32.mrb[9].mxu0  ;;  %v31855_v53 = vpop.f32.mrb[9].mxu1  ;;  %37872 = vmatprep.subr.bf16.mxu1 %v30906_v49  ;;  %v30959_v49 = vld [vmem:[%s47187_s3 + $0xb10] sm:$0xff]  }
 0x1dd   :  { %v31648_v55 = vadd.f32 %v31647_v52, %v31646_v50  ;;  %v41423_v56 = vadd.f32 %v31855_v53, %v31854_v51  ;;  %v30968_v50 = vld [vmem:[%s47187_s3 + $0xb58] sm:$0xff]   ;;  %v30969_v52 = vld [vmem:[%s47187_s3 + $0xb60] sm:$0xff]  }
 0x1de   :  { %v30960_v51 = vld [vmem:[%s47187_s3 + $0xb18] sm:$0xff]   ;;  %v30961_v53 = vld [vmem:[%s47187_s3 + $0xb20] sm:$0xff]  }
 0x1df   :  { %v543_v58 = vadd.f32 %v31648_v55, %v31610_v22  ;;  %37874 = vmatpush3.bf16.msra.mxu1 %v30898_v54  ;;  %v31649_v59 = vpop.f32.mrb[10].mxu0  ;;  %v31857_v60 = vpop.f32.mrb[10].mxu1  ;;  %v30970_v54 = vld [vmem:[%s47187_s3 + $0xb68] sm:$0xff]  }
 0x1e0   :  { %v31650_v61 = vpop.f32.mrb[11].mxu0  ;;  %v31858_v62 = vpop.f32.mrb[11].mxu1  ;;  %37876 = vmatprep.subr.bf16.mxu1 %v30907_v57  ;;  %v30962_v57 = vld [vmem:[%s47187_s3 + $0xb28] sm:$0xff]  }
 0x1e1   :  { %v31651_v0 = vadd.f32 %v31650_v61, %v31649_v59  ;;  %v41431_v1 = vadd.f32 %v31858_v62, %v31857_v60  ;;  %v30971_v60 = vld [vmem:[%s47187_s3 + $0xb70] sm:$0xff]  }
 0x1e3   :  { %v548_v3 = vadd.f32 %v31651_v0, %v31613_v33  ;;  %37878 = vmatpush3.bf16.msra.mxu1 %v30899_v63 }
 0x1e4   :  { %37880 = vmatprep.subr.bf16.mxu1 %v30908_v2 }
 0x1e5   :  { %v41442_v8 = vpack.c.bf16 %v548_v3, %v543_v58  ;;  %v30963_v3 = vld [vmem:[%s47187_s3 + $0xb30] sm:$0xff]  }
 0x1e7   :  { %37882 = vmatpush3.bf16.msra.mxu1 %v30900_v5 }
 0x1e8   :  { %37920 = vmatprep.subr.bf16.mxu1 %v30933_v6 }
 0x1ea   :  { %3923 = vmatmul.mubr.f32.vlgmr.msra.gmra.mrb[36].mxu1 %v40841_v24 }
 0x1eb   :  { %3927 = vmatprep.mubr.f32.mxu1 %v40854_v31  ;;  %37922 = vmatpush3.bf16.msra.mxu1 %v30925_v9  ;;  %v30972_v9 = vld [vmem:[%s47187_s3 + $0xb78] sm:$0xff]  }
 0x1ec   :  { %37924 = vmatprep.subr.bf16.mxu1 %v30934_v10 }
 0x1ee   :  { %3928 = vmatmul.mubr.f32.gmra.mrb[38].mxu1 %v40862_v34 }
 0x1ef   :  { %37926 = vmatpush3.bf16.msra.mxu1 %v30926_v12  ;;  %4307 = vmatprep.mubr.f32.mxu1 %v40829_v17 }
 0x1f0   :  { %37928 = vmatprep.subr.bf16.mxu1 %v30935_v13 }
 0x1f3   :  { %37930 = vmatpush3.bf16.msra.mxu1 %v30927_v14 }
 0x1f4   :  { %37932 = vmatprep.subr.bf16.mxu1 %v30936_v15  ;;  %v30964_v15 = vld [vmem:[%s47187_s3 + $0xb38] sm:$0xff]  }
 0x1f7   :  { %37934 = vmatpush3.bf16.msra.mxu1 %v30928_v16  ;;  %v30997_v16 = vld [vmem:[%s47187_s3 + $0xc40] sm:$0xff]  }
 0x1f8   :  { %37936 = vmatprep.subr.bf16.mxu1 %v30937_v18 }
 0x1fb   :  { %37938 = vmatpush3.bf16.msra.mxu1 %v30929_v19  ;;  %v31684_v21 = vpop.f32.mrb[12].mxu0  ;;  %v30989_v19 = vld [vmem:[%s47187_s3 + $0xc00] sm:$0xff]  }
 0x1fc   :  { %v31936_v22 = vpop.f32.mrb[12].mxu1  ;;  %v31685_v25 = vpop.f32.mrb[13].mxu0  ;;  %37940 = vmatprep.subr.bf16.mxu1 %v30938_v20  ;;  %v23661_v20 = vld [vmem:[%s47188_s4 + $0x28] sm:$0xff] }
 0x1fd   :  { %v31686_v27 = vadd.f32 %v31685_v25, %v31684_v21  ;;  %v31937_v28 = vpop.f32.mrb[13].mxu1  ;;  %v30998_v21 = vld [vmem:[%s47187_s3 + $0xc48] sm:$0xff]   ;;  %v30693_v25 = vld [vmem:[%s47187_s3 + $0x2c0] sm:$0xff]  }
 0x1fe   :  { %v41484_v30 = vadd.f32 %v31937_v28, %v31936_v22  ;;  %v23662_v22 = vld [vmem:[%s47188_s4 + $0x30] sm:$0xff] }
 0x1ff   :  { %37942 = vmatpush3.bf16.msra.mxu1 %v30930_v26  ;;  %v31687_v32 = vpop.f32.mrb[14].mxu0  ;;  %v30990_v26 = vld [vmem:[%s47187_s3 + $0xc08] sm:$0xff]   ;;  %v30999_v28 = vld [vmem:[%s47187_s3 + $0xc50] sm:$0xff]  }
 0x200   :  { %v31939_v33 = vpop.f32.mrb[14].mxu1  ;;  %v31688_v36 = vpop.f32.mrb[15].mxu0  ;;  %37944 = vmatprep.subr.bf16.mxu1 %v30939_v29  ;;  %v551_v29 = vld [vmem:[%s47188_s4] sm:$0xff] }
 0x201   :  { %v31689_v39 = vadd.f32 %v31688_v36, %v31687_v32  ;;  %v31940_v40 = vpop.f32.mrb[15].mxu1  ;;  %v552_v32 = vld [vmem:[%s47188_s4 + $0x8] sm:$0xff]  ;;  %v30685_v36 = vld [vmem:[%s47187_s3 + $0x280] sm:$0xff]  }
 0x202   :  { %v41492_v42 = vadd.f32 %v31940_v40, %v31939_v33  ;;  %v31000_v33 = vld [vmem:[%s47187_s3 + $0xc58] sm:$0xff]  }
 0x203   :  { %37946 = vmatpush3.bf16.msra.mxu1 %v30931_v38  ;;  %v553_v38 = vld [vmem:[%s47188_s4 + $0x10] sm:$0xff]  ;;  %v30992_v40 = vld [vmem:[%s47187_s3 + $0xc18] sm:$0xff]  }
 0x204   :  { %37948 = vmatprep.subr.bf16.mxu1 %v30940_v41  ;;  %v554_v41 = vld [vmem:[%s47188_s4 + $0x18] sm:$0xff] }
 0x207   :  { %37950 = vmatpush3.bf16.msra.mxu1 %v30932_v43  ;;  %v31001_v43 = vld [vmem:[%s47187_s3 + $0xc60] sm:$0xff]  }
 0x208   :  { %37988 = vmatprep.subr.bf16.mxu1 %v30965_v44  ;;  %v30686_v44 = vld [vmem:[%s47187_s3 + $0x288] sm:$0xff]  }
 0x20a   :  { %4308 = vmatmul.mubr.f32.vlgmr.msra.gmra.mrb[40].mxu1 %v40841_v24 }
 0x20b   :  { %4312 = vmatprep.mubr.f32.mxu1 %v40854_v31  ;;  %37990 = vmatpush3.bf16.msra.mxu1 %v30957_v45  ;;  %v30695_v45 = vld [vmem:[%s47187_s3 + $0x2d0] sm:$0xff]  }
 0x20c   :  { %37992 = vmatprep.subr.bf16.mxu1 %v30966_v46  ;;  %v30993_v46 = vld [vmem:[%s47187_s3 + $0xc20] sm:$0xff]  }
 0x20e   :  { %4313 = vmatmul.mubr.f32.gmra.mrb[42].mxu1 %v40862_v34 }
 0x20f   :  { %37994 = vmatpush3.bf16.msra.mxu1 %v30958_v47  ;;  %4692 = vmatprep.mubr.f32.mxu1 %v40829_v17  ;;  %v31002_v47 = vld [vmem:[%s47187_s3 + $0xc68] sm:$0xff]  }
 0x210   :  { %37996 = vmatprep.subr.bf16.mxu1 %v30967_v48  ;;  %v30687_v48 = vld [vmem:[%s47187_s3 + $0x290] sm:$0xff]  }
 0x213   :  { %37998 = vmatpush3.bf16.msra.mxu1 %v30959_v49  ;;  %v30696_v49 = vld [vmem:[%s47187_s3 + $0x2d8] sm:$0xff]  }
 0x214   :  { %38000 = vmatprep.subr.bf16.mxu1 %v30968_v50  ;;  %v30994_v50 = vld [vmem:[%s47187_s3 + $0xc28] sm:$0xff]  }
 0x217   :  { %38002 = vmatpush3.bf16.msra.mxu1 %v30960_v51 }
 0x218   :  { %38004 = vmatprep.subr.bf16.mxu1 %v30969_v52  ;;  %v31003_v52 = vld [vmem:[%s47187_s3 + $0xc70] sm:$0xff]  }
 0x21b   :  { %38006 = vmatpush3.bf16.msra.mxu1 %v30961_v53 }
 0x21c   :  { %v31722_v55 = vpop.f32.mrb[16].mxu0  ;;  %38008 = vmatprep.subr.bf16.mxu1 %v30970_v54  ;;  %v30688_v54 = vld [vmem:[%s47187_s3 + $0x298] sm:$0xff]  }
 0x21d   :  { %v32018_v58 = vpop.f32.mrb[16].mxu1  ;;  %v31723_v59 = vpop.f32.mrb[17].mxu0 }
 0x21e   :  { %v31724_v61 = vadd.f32 %v31723_v59, %v31722_v55  ;;  %v32019_v62 = vpop.f32.mrb[17].mxu1 }
 0x21f   :  { %v41540_v63 = vadd.f32 %v32019_v62, %v32018_v58  ;;  %38010 = vmatpush3.bf16.msra.mxu1 %v30962_v57  ;;  %v30697_v57 = vld [vmem:[%s47187_s3 + $0x2e0] sm:$0xff]   ;;  %v30995_v58 = vld [vmem:[%s47187_s3 + $0xc30] sm:$0xff]  }
 0x220   :  { %v826_v0 = vadd.f32 %v31724_v61, %v31686_v27  ;;  %v31725_v2 = vpop.f32.mrb[18].mxu0  ;;  %38012 = vmatprep.subr.bf16.mxu1 %v30971_v60  ;;  %v23663_v27 = vld [vmem:[%s47188_s4 + $0x38] sm:$0xff] }
 0x221   :  { %v32021_v5 = vpop.f32.mrb[18].mxu1  ;;  %v31726_v6 = vpop.f32.mrb[19].mxu0  ;;  %v31004_v61 = vld [vmem:[%s47187_s3 + $0xc78] sm:$0xff]  }
 0x222   :  { %v31727_v10 = vadd.f32 %v31726_v6, %v31725_v2  ;;  %v32022_v12 = vpop.f32.mrb[19].mxu1  ;;  %v31029_v6 = vld [vmem:[%s47187_s3 + $0xd40] sm:$0xff]  }
 0x223   :  { %v41548_v13 = vadd.f32 %v32022_v12, %v32021_v5  ;;  %38014 = vmatpush3.bf16.msra.mxu1 %v30963_v3  ;;  %v30698_v3 = vld [vmem:[%s47187_s3 + $0x2e8] sm:$0xff]  }
 0x224   :  { %v831_v14 = vadd.f32 %v31727_v10, %v31689_v39  ;;  %38016 = vmatprep.subr.bf16.mxu1 %v30972_v9  ;;  %v30694_v39 = vld [vmem:[%s47187_s3 + $0x2c8] sm:$0xff]   ;;  %v30699_v10 = vld [vmem:[%s47187_s3 + $0x2f0] sm:$0xff]  }
 0x225   :  { %v30690_v9 = vld [vmem:[%s47187_s3 + $0x2a8] sm:$0xff]  }
 0x226   :  { %v37367_v18 = vpack.c.bf16 %v831_v14, %v826_v0  ;;  %v30689_v0 = vld [vmem:[%s47187_s3 + $0x2a0] sm:$0xff]   ;;  %v31030_v14 = vld [vmem:[%s47187_s3 + $0xd48] sm:$0xff]  }
 0x227   :  { %38018 = vmatpush3.bf16.msra.mxu1 %v30964_v15  ;;  %v30691_v15 = vld [vmem:[%s47187_s3 + $0x2b0] sm:$0xff]  }
 0x228   :  { %37368 = vmatprep.subr.bf16.mxu0 %v37367_v18  ;;  %38056 = vmatprep.subr.bf16.mxu1 %v30997_v16  ;;  %v30700_v16 = vld [vmem:[%s47187_s3 + $0x2f8] sm:$0xff]  }
 0x229   :  { %37370 = vmatpush3.bf16.msra.mxu0 %v37367_v18  ;;  %v31022_v18 = vld [vmem:[%s47187_s3 + $0xd08] sm:$0xff]  }
 0x22a   :  { %4693 = vmatmul.mubr.f32.vlgmr.msra.gmra.mrb[44].mxu1 %v40841_v24  ;;  %37372 = vmatprep.subr.bf16.mxu0 %v41442_v8 }
 0x22b   :  { %4697 = vmatprep.mubr.f32.mxu1 %v40854_v31  ;;  %38058 = vmatpush3.bf16.msra.mxu1 %v30989_v19  ;;  %v31031_v19 = vld [vmem:[%s47187_s3 + $0xd50] sm:$0xff]  }
 0x22c   :  { %34956 = vmatmul.mubr.msk.f32.vlgmr.msra.gmra.mrb[20].mxu0 %vm839_vm12, %v23661_v20  ;;  %38060 = vmatprep.subr.bf16.mxu1 %v30998_v21  ;;  %v30692_v20 = vld [vmem:[%s47187_s3 + $0x2b8] sm:$0xff]   ;;  %v31023_v21 = vld [vmem:[%s47187_s3 + $0xd10] sm:$0xff]  }
 0x22d   :  { %37374 = vmatpush3.bf16.msra.mxu0 %v41442_v8  ;;  %34958 = vmatprep.mubr.msk.f32.mxu0 %vm839_vm12, %v23662_v22  ;;  %v30991_v8 = vld [vmem:[%s47187_s3 + $0xc10] sm:$0xff]   ;;  %v31032_v22 = vld [vmem:[%s47187_s3 + $0xd58] sm:$0xff]  }
 0x22e   :  { %4698 = vmatmul.mubr.f32.gmra.mrb[46].mxu1 %v40862_v34  ;;  %37408 = vmatprep.subr.bf16.mxu0 %v30693_v25  ;;  %v31024_v25 = vld [vmem:[%s47187_s3 + $0xd18] sm:$0xff]  }
 0x22f   :  { %38062 = vmatpush3.bf16.msra.mxu1 %v30990_v26  ;;  %5077 = vmatprep.mubr.f32.mxu1 %v40829_v17  ;;  %v31033_v26 = vld [vmem:[%s47187_s3 + $0xd60] sm:$0xff]  }
 0x230   :  { %34959 = vmatmul.mubr.msk.f32.gmra.mrb[22].mxu0 %vm839_vm12, %v23663_v27  ;;  %38064 = vmatprep.subr.bf16.mxu1 %v30999_v28  ;;  %v31025_v27 = vld [vmem:[%s47187_s3 + $0xd20] sm:$0xff]   ;;  %v31034_v28 = vld [vmem:[%s47187_s3 + $0xd68] sm:$0xff]  }
 0x231   :  { %34965 = vmatprep.mubr.msk.f32.mxu0 %vm839_vm12, %v551_v29  ;;  %v31026_v29 = vld [vmem:[%s47187_s3 + $0xd28] sm:$0xff]  }
 0x233   :  { %38066 = vmatpush3.bf16.msra.mxu1 %v30991_v8 }
 0x234   :  { %34966 = vmatmul.mubr.msk.f32.vlgmr.msra.gmra.mrb[20].mxu0 %vm839_vm12, %v552_v32  ;;  %38068 = vmatprep.subr.bf16.mxu1 %v31000_v33  ;;  %v31035_v32 = vld [vmem:[%s47187_s3 + $0xd70] sm:$0xff]  }
 0x235   :  { %37410 = vmatpush3.bf16.msra.mxu0 %v30685_v36  ;;  %34968 = vmatprep.mubr.msk.f32.mxu0 %vm839_vm12, %v553_v38  ;;  %v31027_v38 = vld [vmem:[%s47187_s3 + $0xd30] sm:$0xff]  }
 0x236   :  { %37412 = vmatprep.subr.bf16.mxu0 %v30694_v39 }
 0x237   :  { %38070 = vmatpush3.bf16.msra.mxu1 %v30992_v40  ;;  %v31036_v40 = vld [vmem:[%s47187_s3 + $0xd78] sm:$0xff]  }
 0x238   :  { %34969 = vmatmul.mubr.msk.f32.gmra.mrb[22].mxu0 %vm839_vm12, %v554_v41  ;;  %38072 = vmatprep.subr.bf16.mxu1 %v31001_v43 }
 0x239   :  { %37414 = vmatpush3.bf16.msra.mxu0 %v30686_v44  ;;  %1302 = vmatprep.mubr.f32.mxu0 %v40874_v37  ;;  %v31028_v44 = vld [vmem:[%s47187_s3 + $0xd38] sm:$0xff]  }
 0x23a   :  { %37416 = vmatprep.subr.bf16.mxu0 %v30695_v45  ;;  %v31045_v45 = vld [vmem:[%s47187_s3 + $0xdc0] sm:$0xff]  }
 0x23b   :  { %38074 = vmatpush3.bf16.msra.mxu1 %v30993_v46  ;;  %v31037_v46 = vld [vmem:[%s47187_s3 + $0xd80] sm:$0xff]  }
 0x23c   :  { %38076 = vmatprep.subr.bf16.mxu1 %v31002_v47  ;;  %v31046_v47 = vld [vmem:[%s47187_s3 + $0xdc8] sm:$0xff]  }
 0x23d   :  { %37418 = vmatpush3.bf16.msra.mxu0 %v30687_v48  ;;  %v32056_v51 = vpop.f32.mrb[20].mxu1  ;;  %v31038_v48 = vld [vmem:[%s47187_s3 + $0xd88] sm:$0xff]  }
 0x23e   :  { %v32057_v53 = vpop.f32.mrb[21].mxu1  ;;  %37420 = vmatprep.subr.bf16.mxu0 %v30696_v49  ;;  %v31047_v49 = vld [vmem:[%s47187_s3 + $0xdd0] sm:$0xff]  }
 0x23f   :  { %v32058_v55 = vadd.f32 %v32057_v53, %v32056_v51  ;;  %38078 = vmatpush3.bf16.msra.mxu1 %v30994_v50  ;;  %v31039_v50 = vld [vmem:[%s47187_s3 + $0xd90] sm:$0xff]   ;;  %v31048_v51 = vld [vmem:[%s47187_s3 + $0xdd8] sm:$0xff]   ;;  %v31049_v53 = vld [vmem:[%s47187_s3 + $0xde0] sm:$0xff]  }
 0x240   :  { %38080 = vmatprep.subr.bf16.mxu1 %v31003_v52  ;;  %v31040_v52 = vld [vmem:[%s47187_s3 + $0xd98] sm:$0xff]  }
 0x241   :  { %v2460_v59 = vadd.f32 %v32058_v55, %v41540_v63  ;;  %37422 = vmatpush3.bf16.msra.mxu0 %v30688_v54  ;;  %v32059_v60 = vpop.f32.mrb[22].mxu1  ;;  %v30996_v63 = vld [vmem:[%s47187_s3 + $0xc38] sm:$0xff]   ;;  %v31041_v54 = vld [vmem:[%s47187_s3 + $0xda0] sm:$0xff]   ;;  %v31050_v55 = vld [vmem:[%s47187_s3 + $0xde8] sm:$0xff]  }
 0x242   :  { %v32060_v62 = vpop.f32.mrb[23].mxu1  ;;  %37424 = vmatprep.subr.bf16.mxu0 %v30697_v57  ;;  %v31042_v57 = vld [vmem:[%s47187_s3 + $0xda8] sm:$0xff]  }
 0x243   :  { %v32061_v2 = vadd.f32 %v32060_v62, %v32059_v60  ;;  %38082 = vmatpush3.bf16.msra.mxu1 %v30995_v58  ;;  %v31043_v62 = vld [vmem:[%s47187_s3 + $0xdb0] sm:$0xff]  }
 0x244   :  { %38084 = vmatprep.subr.bf16.mxu1 %v31004_v61 }
 0x245   :  { %v2465_v5 = vadd.f32 %v32061_v2, %v41548_v13  ;;  %37426 = vmatpush3.bf16.msra.mxu0 %v30689_v0  ;;  %v31021_v13 = vld [vmem:[%s47187_s3 + $0xd00] sm:$0xff]   ;;  %v31052_v2 = vld [vmem:[%s47187_s3 + $0xdf8] sm:$0xff]  }
 0x246   :  { %37428 = vmatprep.subr.bf16.mxu0 %v30698_v3 }
 0x247   :  { %38086 = vmatpush3.bf16.msra.mxu1 %v30996_v63  ;;  %v41680_v12 = vpack.c.bf16 %v2465_v5, %v2460_v59  ;;  %v31051_v59 = vld [vmem:[%s47187_s3 + $0xdf0] sm:$0xff]   ;;  %v31044_v5 = vld [vmem:[%s47187_s3 + $0xdb8] sm:$0xff]  }
 0x248   :  { %38124 = vmatprep.subr.bf16.mxu1 %v31029_v6  ;;  %v31077_v6 = vld [vmem:[%s47187_s3 + $0xec0] sm:$0xff]  }
 0x249   :  { %37430 = vmatpush3.bf16.msra.mxu0 %v30690_v9  ;;  %v31069_v9 = vld [vmem:[%s47187_s3 + $0xe80] sm:$0xff]  }
 0x24a   :  { %5078 = vmatmul.mubr.f32.vlgmr.msra.gmra.mrb[48].mxu1 %v40841_v24  ;;  %37432 = vmatprep.subr.bf16.mxu0 %v30699_v10  ;;  %v31078_v10 = vld [vmem:[%s47187_s3 + $0xec8] sm:$0xff]  }
 0x24b   :  { %5082 = vmatprep.mubr.f32.mxu1 %v40854_v31  ;;  %38126 = vmatpush3.bf16.msra.mxu1 %v31021_v13  ;;  %v31070_v13 = vld [vmem:[%s47187_s3 + $0xe88] sm:$0xff]  }
 0x24c   :  { %38128 = vmatprep.subr.bf16.mxu1 %v31030_v14  ;;  %v31079_v14 = vld [vmem:[%s47187_s3 + $0xed0] sm:$0xff]  }
 0x24d   :  { %37434 = vmatpush3.bf16.msra.mxu0 %v30691_v15  ;;  %v31071_v15 = vld [vmem:[%s47187_s3 + $0xe90] sm:$0xff]  }
 0x24e   :  { %5083 = vmatmul.mubr.f32.gmra.mrb[50].mxu1 %v40862_v34  ;;  %37436 = vmatprep.subr.bf16.mxu0 %v30700_v16  ;;  %v31080_v16 = vld [vmem:[%s47187_s3 + $0xed8] sm:$0xff]  }
 0x24f   :  { %38130 = vmatpush3.bf16.msra.mxu1 %v31022_v18  ;;  %5462 = vmatprep.mubr.f32.mxu1 %v40829_v17  ;;  %v31072_v18 = vld [vmem:[%s47187_s3 + $0xe98] sm:$0xff]  }
 0x250   :  { %38132 = vmatprep.subr.bf16.mxu1 %v31031_v19  ;;  %v31081_v19 = vld [vmem:[%s47187_s3 + $0xee0] sm:$0xff]  }
 0x251   :  { %37438 = vmatpush3.bf16.msra.mxu0 %v30692_v20  ;;  %v31073_v20 = vld [vmem:[%s47187_s3 + $0xea0] sm:$0xff]  }
 0x253   :  { %38134 = vmatpush3.bf16.msra.mxu1 %v31023_v21  ;;  %v31082_v21 = vld [vmem:[%s47187_s3 + $0xee8] sm:$0xff]  }
 0x254   :  { %1303 = vmatmul.mubr.f32.vlgmr.msra.gmra.mrb[24].mxu0 %v40959_v4  ;;  %38136 = vmatprep.subr.bf16.mxu1 %v31032_v22  ;;  %v31074_v22 = vld [vmem:[%s47187_s3 + $0xea8] sm:$0xff]  }
 0x255   :  { %1307 = vmatprep.mubr.f32.mxu0 %v40964_v7 }
 0x257   :  { %38138 = vmatpush3.bf16.msra.mxu1 %v31024_v25 }
 0x258   :  { %1308 = vmatmul.mubr.f32.gmra.mrb[26].mxu0 %v40979_v11  ;;  %38140 = vmatprep.subr.bf16.mxu1 %v31033_v26  ;;  %v31083_v26 = vld [vmem:[%s47187_s3 + $0xef0] sm:$0xff]  }
 0x25b   :  { %38142 = vmatpush3.bf16.msra.mxu1 %v31025_v27 }
 0x25c   :  { %38144 = vmatprep.subr.bf16.mxu1 %v31034_v28 }
 0x25d   :  { %v32138_v8 = vpop.f32.mrb[24].mxu1 }
 0x25e   :  { %v32139_v33 = vpop.f32.mrb[25].mxu1 }
 0x25f   :  { %v41734_v36 = vadd.f32 %v32139_v33, %v32138_v8  ;;  %38146 = vmatpush3.bf16.msra.mxu1 %v31026_v29  ;;  %v31075_v29 = vld [vmem:[%s47187_s3 + $0xeb0] sm:$0xff]  }
 0x260   :  { %38148 = vmatprep.subr.bf16.mxu1 %v31035_v32  ;;  %v31084_v32 = vld [vmem:[%s47187_s3 + $0xef8] sm:$0xff]  }
 0x261   :  { %v32141_v39 = vpop.f32.mrb[26].mxu1 }
 0x262   :  { %v32142_v41 = vpop.f32.mrb[27].mxu1 }
 0x263   :  { %v41742_v43 = vadd.f32 %v32142_v41, %v32141_v39  ;;  %38150 = vmatpush3.bf16.msra.mxu1 %v31027_v38  ;;  %v31076_v39 = vld [vmem:[%s47187_s3 + $0xeb8] sm:$0xff]   ;;  %v31101_v41 = vld [vmem:[%s47187_s3 + $0xf80] sm:$0xff]  }
 0x264   :  { %38152 = vmatprep.subr.bf16.mxu1 %v31036_v40  ;;  %v31109_v40 = vld [vmem:[%s47187_s3 + $0xfc0] sm:$0xff]  }
 0x267   :  { %38154 = vmatpush3.bf16.msra.mxu1 %v31028_v44  ;;  %v31110_v44 = vld [vmem:[%s47187_s3 + $0xfc8] sm:$0xff]  }
 0x268   :  { %38156 = vmatprep.subr.bf16.mxu1 %v31045_v45  ;;  %v31102_v45 = vld [vmem:[%s47187_s3 + $0xf88] sm:$0xff]  }
 0x26a   :  { %5463 = vmatmul.mubr.f32.vlgmr.msra.gmra.mrb[52].mxu1 %v40841_v24 }
 0x26b   :  { %5467 = vmatprep.mubr.f32.mxu1 %v40854_v31  ;;  %38158 = vmatpush3.bf16.msra.mxu1 %v31037_v46  ;;  %v31111_v46 = vld [vmem:[%s47187_s3 + $0xfd0] sm:$0xff]  }
 0x26c   :  { %38160 = vmatprep.subr.bf16.mxu1 %v31046_v47  ;;  %v31103_v47 = vld [vmem:[%s47187_s3 + $0xf90] sm:$0xff]  }
 0x26e   :  { %5468 = vmatmul.mubr.f32.gmra.mrb[54].mxu1 %v40862_v34 }
 0x26f   :  { %38162 = vmatpush3.bf16.msra.mxu1 %v31038_v48  ;;  %5537 = vmatprep.mubr.f32.mxu1 %v40874_v37  ;;  %v31112_v48 = vld [vmem:[%s47187_s3 + $0xfd8] sm:$0xff]  }
 0x270   :  { %38164 = vmatprep.subr.bf16.mxu1 %v31047_v49  ;;  %v31104_v49 = vld [vmem:[%s47187_s3 + $0xf98] sm:$0xff]  }
 0x273   :  { %38166 = vmatpush3.bf16.msra.mxu1 %v31039_v50  ;;  %v23736_v50 = vld [vmem:[%s47188_s4 + $0x40] sm:$0xff] }
 0x274   :  { %38168 = vmatprep.subr.bf16.mxu1 %v31048_v51  ;;  %v31113_v51 = vld [vmem:[%s47187_s3 + $0xfe0] sm:$0xff]   ;;  %34975 = vmatprep.mubr.msk.f32.mxu0 %vm839_vm12, %v23736_v50  ;;  %v31160_v50 = vld [vmem:[%s47187_s3 + $0x1158] sm:$0xff]  }
 0x277   :  { %38170 = vmatpush3.bf16.msra.mxu1 %v31040_v52  ;;  %v31105_v52 = vld [vmem:[%s47187_s3 + $0xfa0] sm:$0xff]  }
 0x278   :  { %38172 = vmatprep.subr.bf16.mxu1 %v31049_v53  ;;  %v31114_v53 = vld [vmem:[%s47187_s3 + $0xfe8] sm:$0xff]  }
 0x27b   :  { %38174 = vmatpush3.bf16.msra.mxu1 %v31041_v54  ;;  %v31106_v54 = vld [vmem:[%s47187_s3 + $0xfa8] sm:$0xff]  }
 0x27c   :  { %38176 = vmatprep.subr.bf16.mxu1 %v31050_v55 }
 0x27d   :  { %v32220_v58 = vpop.f32.mrb[28].mxu1 }
 0x27e   :  { %v32221_v60 = vpop.f32.mrb[29].mxu1 }
 0x27f   :  { %v41790_v61 = vadd.f32 %v32221_v60, %v32220_v58  ;;  %38178 = vmatpush3.bf16.msra.mxu1 %v31042_v57  ;;  %v31115_v57 = vld [vmem:[%s47187_s3 + $0xff0] sm:$0xff]  }
 0x280   :  { %38180 = vmatprep.subr.bf16.mxu1 %v31051_v59  ;;  %v31107_v60 = vld [vmem:[%s47187_s3 + $0xfb0] sm:$0xff]  }
 0x281   :  { %v32223_v0 = vpop.f32.mrb[30].mxu1 }
 0x282   :  { %v32224_v3 = vpop.f32.mrb[31].mxu1 }
 0x283   :  { %v41798_v63 = vadd.f32 %v32224_v3, %v32223_v0  ;;  %38182 = vmatpush3.bf16.msra.mxu1 %v31043_v62  ;;  %v31116_v0 = vld [vmem:[%s47187_s3 + $0xff8] sm:$0xff]  }
 0x284   :  { %38184 = vmatprep.subr.bf16.mxu1 %v31052_v2 }
 0x287   :  { %38186 = vmatpush3.bf16.msra.mxu1 %v31044_v5  ;;  %v31108_v5 = vld [vmem:[%s47187_s3 + $0xfb8] sm:$0xff]  }
 0x288   :  { %38224 = vmatprep.subr.bf16.mxu1 %v31077_v6  ;;  %v31141_v6 = vld [vmem:[%s47187_s3 + $0x10c0] sm:$0xff]  }
 0x28a   :  { %5538 = vmatmul.mubr.f32.vlgmr.msra.gmra.mrb[56].mxu1 %v40959_v4 }
 0x28b   :  { %5542 = vmatprep.mubr.f32.mxu1 %v40964_v7  ;;  %38226 = vmatpush3.bf16.msra.mxu1 %v31069_v9  ;;  %v31133_v9 = vld [vmem:[%s47187_s3 + $0x1080] sm:$0xff]  }
 0x28c   :  { %38228 = vmatprep.subr.bf16.mxu1 %v31078_v10  ;;  %v31142_v10 = vld [vmem:[%s47187_s3 + $0x10c8] sm:$0xff]  }
 0x28e   :  { %5543 = vmatmul.mubr.f32.gmra.mrb[58].mxu1 %v40979_v11 }
 0x28f   :  { %38230 = vmatpush3.bf16.msra.mxu1 %v31070_v13  ;;  %5922 = vmatprep.mubr.f32.mxu1 %v40874_v37  ;;  %v31134_v13 = vld [vmem:[%s47187_s3 + $0x1088] sm:$0xff]  }
 0x290   :  { %38232 = vmatprep.subr.bf16.mxu1 %v31079_v14  ;;  %v31143_v14 = vld [vmem:[%s47187_s3 + $0x10d0] sm:$0xff]  }
 0x293   :  { %38234 = vmatpush3.bf16.msra.mxu1 %v31071_v15  ;;  %v31135_v15 = vld [vmem:[%s47187_s3 + $0x1090] sm:$0xff]  }
 0x294   :  { %38236 = vmatprep.subr.bf16.mxu1 %v31080_v16  ;;  %v31144_v16 = vld [vmem:[%s47187_s3 + $0x10d8] sm:$0xff]  }
 0x297   :  { %38238 = vmatpush3.bf16.msra.mxu1 %v31072_v18  ;;  %v31136_v18 = vld [vmem:[%s47187_s3 + $0x1098] sm:$0xff]  }
 0x298   :  { %38240 = vmatprep.subr.bf16.mxu1 %v31081_v19  ;;  %v31145_v19 = vld [vmem:[%s47187_s3 + $0x10e0] sm:$0xff]  }
 0x29b   :  { %38242 = vmatpush3.bf16.msra.mxu1 %v31073_v20  ;;  %v31137_v20 = vld [vmem:[%s47187_s3 + $0x10a0] sm:$0xff]  }
 0x29c   :  { %38244 = vmatprep.subr.bf16.mxu1 %v31082_v21  ;;  %v31146_v21 = vld [vmem:[%s47187_s3 + $0x10e8] sm:$0xff]  }
 0x29d   :  { %v32302_v25 = vpop.f32.mrb[32].mxu1 }
 0x29e   :  { %v32303_v27 = vpop.f32.mrb[33].mxu1 }
 0x29f   :  { %v41846_v28 = vadd.f32 %v32303_v27, %v32302_v25  ;;  %38246 = vmatpush3.bf16.msra.mxu1 %v31074_v22  ;;  %v31138_v22 = vld [vmem:[%s47187_s3 + $0x10a8] sm:$0xff]  }
 0x2a0   :  { %38248 = vmatprep.subr.bf16.mxu1 %v31083_v26  ;;  %v31147_v26 = vld [vmem:[%s47187_s3 + $0x10f0] sm:$0xff]  }
 0x2a1   :  { %v32305_v8 = vpop.f32.mrb[34].mxu1 }
 0x2a2   :  { %v32306_v33 = vpop.f32.mrb[35].mxu1 }
 0x2a3   :  { %v41854_v38 = vadd.f32 %v32306_v33, %v32305_v8  ;;  %38250 = vmatpush3.bf16.msra.mxu1 %v31075_v29  ;;  %v31139_v8 = vld [vmem:[%s47187_s3 + $0x10b0] sm:$0xff]   ;;  %v31148_v33 = vld [vmem:[%s47187_s3 + $0x10f8] sm:$0xff]  }
 0x2a4   :  { %38252 = vmatprep.subr.bf16.mxu1 %v31084_v32 }
 0x2a7   :  { %38254 = vmatpush3.bf16.msra.mxu1 %v31076_v39 }
 0x2a8   :  { %38292 = vmatprep.subr.bf16.mxu1 %v31109_v40 }
 0x2aa   :  { %5923 = vmatmul.mubr.f32.vlgmr.msra.gmra.mrb[60].mxu1 %v40959_v4 }
 0x2ab   :  { %5927 = vmatprep.mubr.f32.mxu1 %v40964_v7  ;;  %38294 = vmatpush3.bf16.msra.mxu1 %v31101_v41  ;;  %v31140_v41 = vld [vmem:[%s47187_s3 + $0x10b8] sm:$0xff]  }
 0x2ac   :  { %38296 = vmatprep.subr.bf16.mxu1 %v31110_v44  ;;  %v31157_v44 = vld [vmem:[%s47187_s3 + $0x1140] sm:$0xff]  }
 0x2ae   :  { %5928 = vmatmul.mubr.f32.gmra.mrb[62].mxu1 %v40979_v11 }
 0x2af   :  { %38298 = vmatpush3.bf16.msra.mxu1 %v31102_v45  ;;  %6307 = vmatprep.mubr.f32.mxu1 %v40874_v37  ;;  %v31149_v45 = vld [vmem:[%s47187_s3 + $0x1100] sm:$0xff]  }
 0x2b0   :  { %38300 = vmatprep.subr.bf16.mxu1 %v31111_v46  ;;  %v31158_v46 = vld [vmem:[%s47187_s3 + $0x1148] sm:$0xff]  }
 0x2b3   :  { %38302 = vmatpush3.bf16.msra.mxu1 %v31103_v47  ;;  %v31150_v47 = vld [vmem:[%s47187_s3 + $0x1108] sm:$0xff]  }
 0x2b4   :  { %38304 = vmatprep.subr.bf16.mxu1 %v31112_v48  ;;  %v31159_v48 = vld [vmem:[%s47187_s3 + $0x1150] sm:$0xff]  }
 0x2b7   :  { %38306 = vmatpush3.bf16.msra.mxu1 %v31104_v49  ;;  %v31151_v49 = vld [vmem:[%s47187_s3 + $0x1110] sm:$0xff]  }
 0x2b8   :  { %38308 = vmatprep.subr.bf16.mxu1 %v31113_v51  ;;  %v31152_v51 = vld [vmem:[%s47187_s3 + $0x1118] sm:$0xff]  }
 0x2bb   :  { %38310 = vmatpush3.bf16.msra.mxu1 %v31105_v52  ;;  %v31161_v52 = vld [vmem:[%s47187_s3 + $0x1160] sm:$0xff]  }
 0x2bc   :  { %38312 = vmatprep.subr.bf16.mxu1 %v31114_v53  ;;  %v31153_v53 = vld [vmem:[%s47187_s3 + $0x1120] sm:$0xff]  }
 0x2bd   :  { %v32346_v55 = vpop.f32.mrb[36].mxu1 }
 0x2be   :  { %v32347_v58 = vpop.f32.mrb[37].mxu1 }
 0x2bf   :  { %v41906_v59 = vadd.f32 %v32347_v58, %v32346_v55  ;;  %38314 = vmatpush3.bf16.msra.mxu1 %v31106_v54  ;;  %v31162_v54 = vld [vmem:[%s47187_s3 + $0x1168] sm:$0xff]   ;;  %v31163_v58 = vld [vmem:[%s47187_s3 + $0x1170] sm:$0xff]  }
 0x2c0   :  { %38316 = vmatprep.subr.bf16.mxu1 %v31115_v57  ;;  %v31154_v55 = vld [vmem:[%s47187_s3 + $0x1128] sm:$0xff]  }
 0x2c1   :  { %v32349_v62 = vpop.f32.mrb[38].mxu1 }
 0x2c2   :  { %v32350_v2 = vpop.f32.mrb[39].mxu1 }
 0x2c3   :  { %v41914_v3 = vadd.f32 %v32350_v2, %v32349_v62  ;;  %38318 = vmatpush3.bf16.msra.mxu1 %v31107_v60 }
 0x2c4   :  { %38320 = vmatprep.subr.bf16.mxu1 %v31116_v0  ;;  %v31155_v0 = vld [vmem:[%s47187_s3 + $0x1130] sm:$0xff]  }
 0x2c7   :  { %38322 = vmatpush3.bf16.msra.mxu1 %v31108_v5  ;;  %v31164_v5 = vld [vmem:[%s47187_s3 + $0x1178] sm:$0xff]  }
 0x2c8   :  { %38360 = vmatprep.subr.bf16.mxu1 %v31141_v6 }
 0x2ca   :  { %6308 = vmatmul.mubr.f32.vlgmr.msra.gmra.mrb[64].mxu1 %v40959_v4 }
 0x2cb   :  { %6312 = vmatprep.mubr.f32.mxu1 %v40964_v7  ;;  %38362 = vmatpush3.bf16.msra.mxu1 %v31133_v9 }
 0x2cc   :  { %38364 = vmatprep.subr.bf16.mxu1 %v31142_v10  ;;  %v31156_v10 = vld [vmem:[%s47187_s3 + $0x1138] sm:$0xff]  }
 0x2ce   :  { %6313 = vmatmul.mubr.f32.gmra.mrb[66].mxu1 %v40979_v11 }
 0x2cf   :  { %38366 = vmatpush3.bf16.msra.mxu1 %v31134_v13  ;;  %6692 = vmatprep.mubr.f32.mxu1 %v40874_v37  ;;  %v31189_v13 = vld [vmem:[%s47187_s3 + $0x1240] sm:$0xff]  }
 0x2d0   :  { %38368 = vmatprep.subr.bf16.mxu1 %v31143_v14  ;;  %v31181_v14 = vld [vmem:[%s47187_s3 + $0x1200] sm:$0xff]  }
 0x2d3   :  { %38370 = vmatpush3.bf16.msra.mxu1 %v31135_v15  ;;  %v31190_v15 = vld [vmem:[%s47187_s3 + $0x1248] sm:$0xff]  }
 0x2d4   :  { %38372 = vmatprep.subr.bf16.mxu1 %v31144_v16  ;;  %v31182_v16 = vld [vmem:[%s47187_s3 + $0x1208] sm:$0xff]  }
 0x2d7   :  { %38374 = vmatpush3.bf16.msra.mxu1 %v31136_v18  ;;  %v31191_v18 = vld [vmem:[%s47187_s3 + $0x1250] sm:$0xff]  }
 0x2d8   :  { %38376 = vmatprep.subr.bf16.mxu1 %v31145_v19  ;;  %v31183_v19 = vld [vmem:[%s47187_s3 + $0x1210] sm:$0xff]  }
 0x2db   :  { %38378 = vmatpush3.bf16.msra.mxu1 %v31137_v20  ;;  %v31192_v20 = vld [vmem:[%s47187_s3 + $0x1258] sm:$0xff]  }
 0x2dc   :  { %38380 = vmatprep.subr.bf16.mxu1 %v31146_v21  ;;  %v31184_v21 = vld [vmem:[%s47187_s3 + $0x1218] sm:$0xff]  }
 0x2dd   :  { %v32428_v25 = vpop.f32.mrb[40].mxu1 }
 0x2de   :  { %v32429_v27 = vpop.f32.mrb[41].mxu1 }
 0x2df   :  { %v41962_v29 = vadd.f32 %v32429_v27, %v32428_v25  ;;  %38382 = vmatpush3.bf16.msra.mxu1 %v31138_v22  ;;  %v31193_v22 = vld [vmem:[%s47187_s3 + $0x1260] sm:$0xff]   ;;  %v31186_v27 = vld [vmem:[%s47187_s3 + $0x1228] sm:$0xff]  }
 0x2e0   :  { %38384 = vmatprep.subr.bf16.mxu1 %v31147_v26  ;;  %v31185_v25 = vld [vmem:[%s47187_s3 + $0x1220] sm:$0xff]   ;;  %v31194_v26 = vld [vmem:[%s47187_s3 + $0x1268] sm:$0xff]  }
 0x2e1   :  { %v32431_v32 = vpop.f32.mrb[42].mxu1 }
 0x2e2   :  { %v32432_v39 = vpop.f32.mrb[43].mxu1 }
 0x2e3   :  { %v41970_v40 = vadd.f32 %v32432_v39, %v32431_v32  ;;  %38386 = vmatpush3.bf16.msra.mxu1 %v31139_v8  ;;  %v31195_v32 = vld [vmem:[%s47187_s3 + $0x1270] sm:$0xff]  }
 0x2e4   :  { %38388 = vmatprep.subr.bf16.mxu1 %v31148_v33 }
 0x2e7   :  { %38390 = vmatpush3.bf16.msra.mxu1 %v31140_v41  ;;  %v31187_v41 = vld [vmem:[%s47187_s3 + $0x1230] sm:$0xff]  }
 0x2e8   :  { %38396 = vmatprep.subr.bf16.mxu1 %v31157_v44 }
 0x2ea   :  { %6693 = vmatmul.mubr.f32.vlgmr.msra.gmra.mrb[68].mxu1 %v40959_v4 }
 0x2eb   :  { %6697 = vmatprep.mubr.f32.mxu1 %v40964_v7  ;;  %38398 = vmatpush3.bf16.msra.mxu1 %v31149_v45  ;;  %v31196_v45 = vld [vmem:[%s47187_s3 + $0x1278] sm:$0xff]  }
 0x2ec   :  { %38400 = vmatprep.subr.bf16.mxu1 %v31158_v46 }
 0x2ee   :  { %6698 = vmatmul.mubr.f32.gmra.mrb[70].mxu1 %v40979_v11 }
 0x2ef   :  { %38402 = vmatpush3.bf16.msra.mxu1 %v31150_v47  ;;  %7002 = vmatprep.mubr.f32.mxu1 %v40829_v17 }
 0x2f0   :  { %38404 = vmatprep.subr.bf16.mxu1 %v31159_v48  ;;  %v31188_v48 = vld [vmem:[%s47187_s3 + $0x1238] sm:$0xff]  }
 0x2f3   :  { %38406 = vmatpush3.bf16.msra.mxu1 %v31151_v49  ;;  %v31221_v49 = vld [vmem:[%s47187_s3 + $0x1340] sm:$0xff]  }
 0x2f4   :  { %38408 = vmatprep.subr.bf16.mxu1 %v31160_v50 }
 0x2f7   :  { %38410 = vmatpush3.bf16.msra.mxu1 %v31152_v51 }
 0x2f8   :  { %38412 = vmatprep.subr.bf16.mxu1 %v31161_v52  ;;  %v31213_v52 = vld [vmem:[%s47187_s3 + $0x1300] sm:$0xff]  }
 0x2fb   :  { %38414 = vmatpush3.bf16.msra.mxu1 %v31153_v53 }
 0x2fc   :  { %38416 = vmatprep.subr.bf16.mxu1 %v31162_v54  ;;  %v31222_v54 = vld [vmem:[%s47187_s3 + $0x1348] sm:$0xff]  }
 0x2fd   :  { %v32510_v57 = vpop.f32.mrb[44].mxu1 }
 0x2fe   :  { %v32511_v60 = vpop.f32.mrb[45].mxu1 }
 0x2ff   :  { %v42018_v62 = vadd.f32 %v32511_v60, %v32510_v57  ;;  %38418 = vmatpush3.bf16.msra.mxu1 %v31154_v55  ;;  %v31214_v60 = vld [vmem:[%s47187_s3 + $0x1308] sm:$0xff]  }
 0x300   :  { %38420 = vmatprep.subr.bf16.mxu1 %v31163_v58 }
 0x301   :  { %v32513_v2 = vpop.f32.mrb[46].mxu1 }
 0x302   :  { %v32514_v6 = vpop.f32.mrb[47].mxu1 }
 0x303   :  { %v42026_v9 = vadd.f32 %v32514_v6, %v32513_v2  ;;  %38422 = vmatpush3.bf16.msra.mxu1 %v31155_v0  ;;  %v31223_v2 = vld [vmem:[%s47187_s3 + $0x1350] sm:$0xff]  }
 0x304   :  { %38424 = vmatprep.subr.bf16.mxu1 %v31164_v5 }
 0x307   :  { %38426 = vmatpush3.bf16.msra.mxu1 %v31156_v10  ;;  %v31224_v10 = vld [vmem:[%s47187_s3 + $0x1358] sm:$0xff]  }
 0x308   :  { %38464 = vmatprep.subr.bf16.mxu1 %v31189_v13  ;;  %v30725_v13 = vld [vmem:[%s47187_s3 + $0x3c0] sm:$0xff]  }
 0x30a   :  { %7003 = vmatmul.mubr.f32.vlgmr.msra.gmra.mrb[72].mxu1 %v40841_v24 }
 0x30b   :  { %7007 = vmatprep.mubr.f32.mxu1 %v40854_v31  ;;  %38466 = vmatpush3.bf16.msra.mxu1 %v31181_v14  ;;  %v31216_v14 = vld [vmem:[%s47187_s3 + $0x1318] sm:$0xff]  }
 0x30c   :  { %38468 = vmatprep.subr.bf16.mxu1 %v31190_v15  ;;  %v30717_v15 = vld [vmem:[%s47187_s3 + $0x380] sm:$0xff]  }
 0x30e   :  { %7008 = vmatmul.mubr.f32.gmra.mrb[74].mxu1 %v40862_v34 }
 0x30f   :  { %38470 = vmatpush3.bf16.msra.mxu1 %v31182_v16  ;;  %7387 = vmatprep.mubr.f32.mxu1 %v40829_v17  ;;  %v23738_v16 = vld [vmem:[%s47188_s4 + $0x50] sm:$0xff] }
 0x310   :  { %38472 = vmatprep.subr.bf16.mxu1 %v31191_v18  ;;  %v31225_v18 = vld [vmem:[%s47187_s3 + $0x1360] sm:$0xff]  }
 0x313   :  { %38474 = vmatpush3.bf16.msra.mxu1 %v31183_v19  ;;  %v30726_v19 = vld [vmem:[%s47187_s3 + $0x3c8] sm:$0xff]  }
 0x314   :  { %38476 = vmatprep.subr.bf16.mxu1 %v31192_v20  ;;  %v23739_v20 = vld [vmem:[%s47188_s4 + $0x58] sm:$0xff] }
 0x317   :  { %38478 = vmatpush3.bf16.msra.mxu1 %v31184_v21  ;;  %v31217_v21 = vld [vmem:[%s47187_s3 + $0x1320] sm:$0xff]  }
 0x318   :  { %38480 = vmatprep.subr.bf16.mxu1 %v31193_v22  ;;  %v30718_v22 = vld [vmem:[%s47187_s3 + $0x388] sm:$0xff]  }
 0x31b   :  { %38482 = vmatpush3.bf16.msra.mxu1 %v31185_v25  ;;  %v31226_v25 = vld [vmem:[%s47187_s3 + $0x1368] sm:$0xff]  }
 0x31c   :  { %38484 = vmatprep.subr.bf16.mxu1 %v31194_v26  ;;  %v30727_v26 = vld [vmem:[%s47187_s3 + $0x3d0] sm:$0xff]  }
 0x31d   :  { %v32592_v8 = vpop.f32.mrb[48].mxu1 }
 0x31e   :  { %v32593_v33 = vpop.f32.mrb[49].mxu1 }
 0x31f   :  { %v42074_v39 = vadd.f32 %v32593_v33, %v32592_v8  ;;  %38486 = vmatpush3.bf16.msra.mxu1 %v31186_v27  ;;  %v31218_v27 = vld [vmem:[%s47187_s3 + $0x1328] sm:$0xff]   ;;  %v31227_v33 = vld [vmem:[%s47187_s3 + $0x1370] sm:$0xff]  }
 0x320   :  { %38488 = vmatprep.subr.bf16.mxu1 %v31195_v32  ;;  %v30719_v32 = vld [vmem:[%s47187_s3 + $0x390] sm:$0xff]  }
 0x321   :  { %v32595_v44 = vpop.f32.mrb[50].mxu1 }
 0x322   :  { %v32596_v46 = vpop.f32.mrb[51].mxu1 }
 0x323   :  { %v42082_v47 = vadd.f32 %v32596_v46, %v32595_v44  ;;  %38490 = vmatpush3.bf16.msra.mxu1 %v31187_v41  ;;  %v30728_v44 = vld [vmem:[%s47187_s3 + $0x3d8] sm:$0xff]   ;;  %v31219_v46 = vld [vmem:[%s47187_s3 + $0x1330] sm:$0xff]  }
 0x324   :  { %38492 = vmatprep.subr.bf16.mxu1 %v31196_v45 }
 0x327   :  { %v31810_v50 = vpop.f32.mrb[24].mxu0  ;;  %38494 = vmatpush3.bf16.msra.mxu1 %v31188_v48 }
 0x328   :  { %v31811_v51 = vpop.f32.mrb[25].mxu0  ;;  %38532 = vmatprep.subr.bf16.mxu1 %v31221_v49  ;;  %v30720_v49 = vld [vmem:[%s47187_s3 + $0x398] sm:$0xff]  }
 0x329   :  { %v31812_v53 = vadd.f32 %v31811_v51, %v31810_v50  ;;  %v31228_v50 = vld [vmem:[%s47187_s3 + $0x1378] sm:$0xff]  }
 0x32a   :  { %7388 = vmatmul.mubr.f32.vlgmr.msra.gmra.mrb[76].mxu1 %v40841_v24 }
 0x32b   :  { %v1305_v55 = vadd.f32 %v31812_v53, %v41364_v23  ;;  %v31813_v57 = vpop.f32.mrb[26].mxu0  ;;  %7392 = vmatprep.mubr.f32.mxu1 %v40854_v31  ;;  %38534 = vmatpush3.bf16.msra.mxu1 %v31213_v52  ;;  %v31215_v23 = vld [vmem:[%s47187_s3 + $0x1310] sm:$0xff]   ;;  %v30729_v52 = vld [vmem:[%s47187_s3 + $0x3e0] sm:$0xff]  }
 0x32c   :  { %v31814_v58 = vpop.f32.mrb[27].mxu0  ;;  %38536 = vmatprep.subr.bf16.mxu1 %v31222_v54  ;;  %v31220_v54 = vld [vmem:[%s47187_s3 + $0x1338] sm:$0xff]  }
 0x32d   :  { %v31815_v0 = vadd.f32 %v31814_v58, %v31813_v57  ;;  %v31253_v57 = vld [vmem:[%s47187_s3 + $0x1440] sm:$0xff]   ;;  %v30730_v58 = vld [vmem:[%s47187_s3 + $0x3e8] sm:$0xff]  }
 0x32e   :  { %7393 = vmatmul.mubr.f32.gmra.mrb[78].mxu1 %v40862_v34 }
 0x32f   :  { %v1310_v5 = vadd.f32 %v31815_v0, %v41375_v35  ;;  %38538 = vmatpush3.bf16.msra.mxu1 %v31214_v60  ;;  %7772 = vmatprep.mubr.f32.mxu1 %v40829_v17  ;;  %v23737_v35 = vld [vmem:[%s47188_s4 + $0x48] sm:$0xff]  ;;  %v31245_v60 = vld [vmem:[%s47187_s3 + $0x1400] sm:$0xff]  }
 0x330   :  { %38540 = vmatprep.subr.bf16.mxu1 %v31223_v2  ;;  %v30722_v0 = vld [vmem:[%s47187_s3 + $0x3a8] sm:$0xff]  }
 0x331   :  { %v37439_v6 = vpack.c.bf16 %v1310_v5, %v1305_v55  ;;  %v30721_v55 = vld [vmem:[%s47187_s3 + $0x3a0] sm:$0xff]   ;;  %v31254_v2 = vld [vmem:[%s47187_s3 + $0x1448] sm:$0xff]   ;;  %v30731_v5 = vld [vmem:[%s47187_s3 + $0x3f0] sm:$0xff]  }
 0x333   :  { %37440 = vmatprep.subr.bf16.mxu0 %v37439_v6  ;;  %38542 = vmatpush3.bf16.msra.mxu1 %v31215_v23  ;;  %v31246_v23 = vld [vmem:[%s47187_s3 + $0x1408] sm:$0xff]  }
 0x334   :  { %37442 = vmatpush3.bf16.msra.mxu0 %v37439_v6  ;;  %38544 = vmatprep.subr.bf16.mxu1 %v31224_v10  ;;  %v30723_v6 = vld [vmem:[%s47187_s3 + $0x3b0] sm:$0xff]  }
 0x335   :  { %37476 = vmatprep.subr.bf16.mxu0 %v30725_v13  ;;  %v31255_v10 = vld [vmem:[%s47187_s3 + $0x1450] sm:$0xff]   ;;  %v30732_v13 = vld [vmem:[%s47187_s3 + $0x3f8] sm:$0xff]  }
 0x337   :  { %34976 = vmatmul.mubr.msk.f32.vlgmr.msra.gmra.mrb[20].mxu0 %vm839_vm12, %v23737_v35  ;;  %38546 = vmatpush3.bf16.msra.mxu1 %v31216_v14  ;;  %v31247_v35 = vld [vmem:[%s47187_s3 + $0x1410] sm:$0xff]   ;;  %v30724_v14 = vld [vmem:[%s47187_s3 + $0x3b8] sm:$0xff]  }
 0x338   :  { %37478 = vmatpush3.bf16.msra.mxu0 %v30717_v15  ;;  %34978 = vmatprep.mubr.msk.f32.mxu0 %vm839_vm12, %v23738_v16  ;;  %v31256_v15 = vld [vmem:[%s47187_s3 + $0x1458] sm:$0xff]  }
 0x339   :  { %38548 = vmatprep.subr.bf16.mxu1 %v31225_v18  ;;  %37480 = vmatprep.subr.bf16.mxu0 %v30726_v19  ;;  %v31248_v16 = vld [vmem:[%s47187_s3 + $0x1418] sm:$0xff]   ;;  %v31257_v18 = vld [vmem:[%s47187_s3 + $0x1460] sm:$0xff]  }
 0x33a   :  { %v31249_v19 = vld [vmem:[%s47187_s3 + $0x1420] sm:$0xff]  }
 0x33b   :  { %34979 = vmatmul.mubr.msk.f32.gmra.mrb[22].mxu0 %vm839_vm12, %v23739_v20  ;;  %38550 = vmatpush3.bf16.msra.mxu1 %v31217_v21  ;;  %v31258_v20 = vld [vmem:[%s47187_s3 + $0x1468] sm:$0xff]  }
 0x33c   :  { %37482 = vmatpush3.bf16.msra.mxu0 %v30718_v22  ;;  %1687 = vmatprep.mubr.f32.mxu0 %v40874_v37  ;;  %v31250_v21 = vld [vmem:[%s47187_s3 + $0x1428] sm:$0xff]  }
 0x33d   :  { %v32674_v8 = vpop.f32.mrb[52].mxu1  ;;  %38552 = vmatprep.subr.bf16.mxu1 %v31226_v25  ;;  %37484 = vmatprep.subr.bf16.mxu0 %v30727_v26  ;;  %v31259_v25 = vld [vmem:[%s47187_s3 + $0x1470] sm:$0xff]  }
 0x33e   :  { %v32675_v41 = vpop.f32.mrb[53].mxu1 }
 0x33f   :  { %v42166_v45 = vadd.f32 %v32675_v41, %v32674_v8  ;;  %38554 = vmatpush3.bf16.msra.mxu1 %v31218_v27  ;;  %v31251_v8 = vld [vmem:[%s47187_s3 + $0x1430] sm:$0xff]   ;;  %v31260_v41 = vld [vmem:[%s47187_s3 + $0x1478] sm:$0xff]  }
 0x340   :  { %37486 = vmatpush3.bf16.msra.mxu0 %v30719_v32  ;;  %38556 = vmatprep.subr.bf16.mxu1 %v31227_v33 }
 0x341   :  { %v32677_v48 = vpop.f32.mrb[54].mxu1  ;;  %37488 = vmatprep.subr.bf16.mxu0 %v30728_v44 }
 0x342   :  { %v32678_v51 = vpop.f32.mrb[55].mxu1 }
 0x343   :  { %v42180_v53 = vadd.f32 %v32678_v51, %v32677_v48  ;;  %38558 = vmatpush3.bf16.msra.mxu1 %v31219_v46  ;;  %v31252_v48 = vld [vmem:[%s47187_s3 + $0x1438] sm:$0xff]   ;;  %v31277_v51 = vld [vmem:[%s47187_s3 + $0x1500] sm:$0xff]  }
 0x344   :  { %37490 = vmatpush3.bf16.msra.mxu0 %v30720_v49  ;;  %38560 = vmatprep.subr.bf16.mxu1 %v31228_v50  ;;  %v31285_v50 = vld [vmem:[%s47187_s3 + $0x1540] sm:$0xff]  }
 0x345   :  { %37492 = vmatprep.subr.bf16.mxu0 %v30729_v52  ;;  %v31286_v52 = vld [vmem:[%s47187_s3 + $0x1548] sm:$0xff]  }
 0x347   :  { %38562 = vmatpush3.bf16.msra.mxu1 %v31220_v54  ;;  %v31287_v54 = vld [vmem:[%s47187_s3 + $0x1550] sm:$0xff]  }
 0x348   :  { %37494 = vmatpush3.bf16.msra.mxu0 %v30721_v55  ;;  %38600 = vmatprep.subr.bf16.mxu1 %v31253_v57  ;;  %v31279_v55 = vld [vmem:[%s47187_s3 + $0x1510] sm:$0xff]   ;;  %v31288_v57 = vld [vmem:[%s47187_s3 + $0x1558] sm:$0xff]  }
 0x349   :  { %37496 = vmatprep.subr.bf16.mxu0 %v30730_v58  ;;  %v31280_v58 = vld [vmem:[%s47187_s3 + $0x1518] sm:$0xff]  }
 0x34a   :  { %7773 = vmatmul.mubr.f32.vlgmr.msra.gmra.mrb[80].mxu1 %v40841_v24 }
 0x34b   :  { %7777 = vmatprep.mubr.f32.mxu1 %v40854_v31  ;;  %38602 = vmatpush3.bf16.msra.mxu1 %v31245_v60  ;;  %v31289_v60 = vld [vmem:[%s47187_s3 + $0x1560] sm:$0xff]  }
 0x34c   :  { %37498 = vmatpush3.bf16.msra.mxu0 %v30722_v0  ;;  %38604 = vmatprep.subr.bf16.mxu1 %v31254_v2  ;;  %v31281_v0 = vld [vmem:[%s47187_s3 + $0x1520] sm:$0xff]   ;;  %v31290_v2 = vld [vmem:[%s47187_s3 + $0x1568] sm:$0xff]  }
 0x34d   :  { %37500 = vmatprep.subr.bf16.mxu0 %v30731_v5  ;;  %v31282_v5 = vld [vmem:[%s47187_s3 + $0x1528] sm:$0xff]  }
 0x34e   :  { %7778 = vmatmul.mubr.f32.gmra.mrb[82].mxu1 %v40862_v34 }
 0x34f   :  { %38606 = vmatpush3.bf16.msra.mxu1 %v31246_v23  ;;  %8157 = vmatprep.mubr.f32.mxu1 %v40829_v17 }
 0x350   :  { %37502 = vmatpush3.bf16.msra.mxu0 %v30723_v6  ;;  %38608 = vmatprep.subr.bf16.mxu1 %v31255_v10  ;;  %v31291_v6 = vld [vmem:[%s47187_s3 + $0x1570] sm:$0xff]  }
 0x351   :  { %37504 = vmatprep.subr.bf16.mxu0 %v30732_v13 }
 0x353   :  { %38610 = vmatpush3.bf16.msra.mxu1 %v31247_v35  ;;  %v31283_v35 = vld [vmem:[%s47187_s3 + $0x1530] sm:$0xff]  }
 0x354   :  { %37506 = vmatpush3.bf16.msra.mxu0 %v30724_v14  ;;  %38612 = vmatprep.subr.bf16.mxu1 %v31256_v15  ;;  %v31292_v15 = vld [vmem:[%s47187_s3 + $0x1578] sm:$0xff]  }
 0x357   :  { %1688 = vmatmul.mubr.f32.vlgmr.msra.gmra.mrb[28].mxu0 %v40959_v4  ;;  %38614 = vmatpush3.bf16.msra.mxu1 %v31248_v16 }
 0x358   :  { %1692 = vmatprep.mubr.f32.mxu0 %v40964_v7  ;;  %38616 = vmatprep.subr.bf16.mxu1 %v31257_v18 }
 0x35b   :  { %1693 = vmatmul.mubr.f32.gmra.mrb[30].mxu0 %v40979_v11  ;;  %38618 = vmatpush3.bf16.msra.mxu1 %v31249_v19  ;;  %v31284_v19 = vld [vmem:[%s47187_s3 + $0x1538] sm:$0xff]  }
 0x35c   :  { %38620 = vmatprep.subr.bf16.mxu1 %v31258_v20  ;;  %v31301_v20 = vld [vmem:[%s47187_s3 + $0x15c0] sm:$0xff]  }
 0x35d   :  { %v32712_v22 = vpop.f32.mrb[56].mxu1 }
 0x35e   :  { %v32713_v26 = vpop.f32.mrb[57].mxu1 }
 0x35f   :  { %v32714_v27 = vadd.f32 %v32713_v26, %v32712_v22  ;;  %38622 = vmatpush3.bf16.msra.mxu1 %v31250_v21  ;;  %v31293_v21 = vld [vmem:[%s47187_s3 + $0x1580] sm:$0xff]   ;;  %v31302_v22 = vld [vmem:[%s47187_s3 + $0x15c8] sm:$0xff]   ;;  %v31303_v26 = vld [vmem:[%s47187_s3 + $0x15d0] sm:$0xff]  }
 0x360   :  { %38624 = vmatprep.subr.bf16.mxu1 %v31259_v25  ;;  %v31294_v25 = vld [vmem:[%s47187_s3 + $0x1588] sm:$0xff]  }
 0x361   :  { %v5540_v32 = vadd.f32 %v32714_v27, %v42166_v45  ;;  %v32715_v33 = vpop.f32.mrb[58].mxu1  ;;  %v31295_v27 = vld [vmem:[%s47187_s3 + $0x1590] sm:$0xff]  }
 0x362   :  { %v32716_v44 = vpop.f32.mrb[59].mxu1 }
 0x363   :  { %v32717_v46 = vadd.f32 %v32716_v44, %v32715_v33  ;;  %38626 = vmatpush3.bf16.msra.mxu1 %v31251_v8  ;;  %v31304_v8 = vld [vmem:[%s47187_s3 + $0x15d8] sm:$0xff]   ;;  %v31305_v33 = vld [vmem:[%s47187_s3 + $0x15e0] sm:$0xff]   ;;  %v31306_v44 = vld [vmem:[%s47187_s3 + $0x15e8] sm:$0xff]  }
 0x364   :  { %38628 = vmatprep.subr.bf16.mxu1 %v31260_v41  ;;  %v31297_v41 = vld [vmem:[%s47187_s3 + $0x15a0] sm:$0xff]  }
 0x365   :  { %v5545_v49 = vadd.f32 %v32717_v46, %v42180_v53  ;;  %v31278_v53 = vld [vmem:[%s47187_s3 + $0x1508] sm:$0xff]  }
 0x366   :  { %v31298_v46 = vld [vmem:[%s47187_s3 + $0x15a8] sm:$0xff]  }
 0x367   :  { %38630 = vmatpush3.bf16.msra.mxu1 %v31252_v48  ;;  %v42266_v45 = vpack.c.bf16 %v5545_v49, %v5540_v32  ;;  %v31296_v32 = vld [vmem:[%s47187_s3 + $0x1598] sm:$0xff]   ;;  %v31307_v49 = vld [vmem:[%s47187_s3 + $0x15f0] sm:$0xff]  }
 0x368   :  { %38668 = vmatprep.subr.bf16.mxu1 %v31285_v50 }
 0x36a   :  { %8158 = vmatmul.mubr.f32.vlgmr.msra.gmra.mrb[84].mxu1 %v40841_v24 }
 0x36b   :  { %8162 = vmatprep.mubr.f32.mxu1 %v40854_v31  ;;  %38670 = vmatpush3.bf16.msra.mxu1 %v31277_v51 }
 0x36c   :  { %38672 = vmatprep.subr.bf16.mxu1 %v31286_v52  ;;  %v31299_v52 = vld [vmem:[%s47187_s3 + $0x15b0] sm:$0xff]  }
 0x36e   :  { %8163 = vmatmul.mubr.f32.gmra.mrb[86].mxu1 %v40862_v34 }
 0x36f   :  { %38674 = vmatpush3.bf16.msra.mxu1 %v31278_v53  ;;  %8542 = vmatprep.mubr.f32.mxu1 %v40829_v17 }
 0x370   :  { %38676 = vmatprep.subr.bf16.mxu1 %v31287_v54  ;;  %v31308_v54 = vld [vmem:[%s47187_s3 + $0x15f8] sm:$0xff]  }
 0x373   :  { %38678 = vmatpush3.bf16.msra.mxu1 %v31279_v55 }
 0x374   :  { %38680 = vmatprep.subr.bf16.mxu1 %v31288_v57 }
 0x377   :  { %38682 = vmatpush3.bf16.msra.mxu1 %v31280_v58  ;;  %v31300_v58 = vld [vmem:[%s47187_s3 + $0x15b8] sm:$0xff]  }
 0x378   :  { %38684 = vmatprep.subr.bf16.mxu1 %v31289_v60  ;;  %v31333_v60 = vld [vmem:[%s47187_s3 + $0x16c0] sm:$0xff]  }
 0x37b   :  { %38686 = vmatpush3.bf16.msra.mxu1 %v31281_v0  ;;  %v31325_v0 = vld [vmem:[%s47187_s3 + $0x1680] sm:$0xff]  }
 0x37c   :  { %38688 = vmatprep.subr.bf16.mxu1 %v31290_v2  ;;  %v31334_v2 = vld [vmem:[%s47187_s3 + $0x16c8] sm:$0xff]  }
 0x37d   :  { %v32794_v23 = vpop.f32.mrb[60].mxu1 }
 0x37e   :  { %v32795_v10 = vpop.f32.mrb[61].mxu1 }
 0x37f   :  { %v42308_v13 = vadd.f32 %v32795_v10, %v32794_v23  ;;  %38690 = vmatpush3.bf16.msra.mxu1 %v31282_v5  ;;  %v31326_v5 = vld [vmem:[%s47187_s3 + $0x1688] sm:$0xff]   ;;  %v31335_v23 = vld [vmem:[%s47187_s3 + $0x16d0] sm:$0xff]   ;;  %v31336_v10 = vld [vmem:[%s47187_s3 + $0x16d8] sm:$0xff]  }
 0x380   :  { %38692 = vmatprep.subr.bf16.mxu1 %v31291_v6  ;;  %v31327_v6 = vld [vmem:[%s47187_s3 + $0x1690] sm:$0xff]  }
 0x381   :  { %v32797_v14 = vpop.f32.mrb[62].mxu1 }
 0x382   :  { %v32798_v16 = vpop.f32.mrb[63].mxu1 }
 0x383   :  { %v42316_v18 = vadd.f32 %v32798_v16, %v32797_v14  ;;  %38694 = vmatpush3.bf16.msra.mxu1 %v31283_v35  ;;  %v31328_v35 = vld [vmem:[%s47187_s3 + $0x1698] sm:$0xff]   ;;  %v31337_v14 = vld [vmem:[%s47187_s3 + $0x16e0] sm:$0xff]  }
 0x384   :  { %38696 = vmatprep.subr.bf16.mxu1 %v31292_v15  ;;  %v23808_v15 = vld [vmem:[%s47188_s4 + $0x60] sm:$0xff] }
 0x385   :  { %v31329_v16 = vld [vmem:[%s47187_s3 + $0x16a0] sm:$0xff]   ;;  %34985 = vmatprep.mubr.msk.f32.mxu0 %vm839_vm12, %v23808_v15  ;;  %v31372_v15 = vld [vmem:[%s47187_s3 + $0x17f8] sm:$0xff]  }
 0x387   :  { %38698 = vmatpush3.bf16.msra.mxu1 %v31284_v19  ;;  %v31338_v19 = vld [vmem:[%s47187_s3 + $0x16e8] sm:$0xff]  }
 0x388   :  { %38700 = vmatprep.subr.bf16.mxu1 %v31301_v20  ;;  %v31330_v20 = vld [vmem:[%s47187_s3 + $0x16a8] sm:$0xff]  }
 0x38a   :  { %8543 = vmatmul.mubr.f32.vlgmr.msra.gmra.mrb[88].mxu1 %v40841_v24 }
 0x38b   :  { %8547 = vmatprep.mubr.f32.mxu1 %v40854_v31  ;;  %38702 = vmatpush3.bf16.msra.mxu1 %v31293_v21 }
 0x38c   :  { %38704 = vmatprep.subr.bf16.mxu1 %v31302_v22  ;;  %v31339_v22 = vld [vmem:[%s47187_s3 + $0x16f0] sm:$0xff]  }
 0x38e   :  { %8548 = vmatmul.mubr.f32.gmra.mrb[90].mxu1 %v40862_v34 }
 0x38f   :  { %38706 = vmatpush3.bf16.msra.mxu1 %v31294_v25  ;;  %8617 = vmatprep.mubr.f32.mxu1 %v40874_v37 }
 0x390   :  { %38708 = vmatprep.subr.bf16.mxu1 %v31303_v26 }
 0x393   :  { %38710 = vmatpush3.bf16.msra.mxu1 %v31295_v27  ;;  %v31331_v27 = vld [vmem:[%s47187_s3 + $0x16b0] sm:$0xff]  }
 0x394   :  { %38712 = vmatprep.subr.bf16.mxu1 %v31304_v8 }
 0x397   :  { %38714 = vmatpush3.bf16.msra.mxu1 %v31296_v32  ;;  %v31340_v32 = vld [vmem:[%s47187_s3 + $0x16f8] sm:$0xff]  }
 0x398   :  { %38716 = vmatprep.subr.bf16.mxu1 %v31305_v33 }
 0x39b   :  { %38718 = vmatpush3.bf16.msra.mxu1 %v31297_v41 }
 0x39c   :  { %38720 = vmatprep.subr.bf16.mxu1 %v31306_v44  ;;  %v31332_v44 = vld [vmem:[%s47187_s3 + $0x16b8] sm:$0xff]  }
 0x39d   :  { %v32876_v48 = vpop.f32.mrb[64].mxu1 }
 0x39e   :  { %v32877_v50 = vpop.f32.mrb[65].mxu1 }
 0x39f   :  { %v42364_v51 = vadd.f32 %v32877_v50, %v32876_v48  ;;  %38722 = vmatpush3.bf16.msra.mxu1 %v31298_v46  ;;  %v31365_v46 = vld [vmem:[%s47187_s3 + $0x17c0] sm:$0xff]   ;;  %v31358_v50 = vld [vmem:[%s47187_s3 + $0x1788] sm:$0xff]  }
 0x3a0   :  { %38724 = vmatprep.subr.bf16.mxu1 %v31307_v49  ;;  %v31357_v48 = vld [vmem:[%s47187_s3 + $0x1780] sm:$0xff]   ;;  %v31366_v49 = vld [vmem:[%s47187_s3 + $0x17c8] sm:$0xff]  }
 0x3a1   :  { %v32879_v53 = vpop.f32.mrb[66].mxu1 }
 0x3a2   :  { %v32880_v55 = vpop.f32.mrb[67].mxu1 }
 0x3a3   :  { %v42372_v57 = vadd.f32 %v32880_v55, %v32879_v53  ;;  %38726 = vmatpush3.bf16.msra.mxu1 %v31299_v52  ;;  %v31367_v52 = vld [vmem:[%s47187_s3 + $0x17d0] sm:$0xff]   ;;  %v31360_v55 = vld [vmem:[%s47187_s3 + $0x1798] sm:$0xff]  }
 0x3a4   :  { %38728 = vmatprep.subr.bf16.mxu1 %v31308_v54  ;;  %v31359_v53 = vld [vmem:[%s47187_s3 + $0x1790] sm:$0xff]   ;;  %v31368_v54 = vld [vmem:[%s47187_s3 + $0x17d8] sm:$0xff]  }
 0x3a7   :  { %38730 = vmatpush3.bf16.msra.mxu1 %v31300_v58  ;;  %v31369_v58 = vld [vmem:[%s47187_s3 + $0x17e0] sm:$0xff]  }
 0x3a8   :  { %38768 = vmatprep.subr.bf16.mxu1 %v31333_v60  ;;  %v31361_v60 = vld [vmem:[%s47187_s3 + $0x17a0] sm:$0xff]  }
 0x3aa   :  { %8618 = vmatmul.mubr.f32.vlgmr.msra.gmra.mrb[92].mxu1 %v40959_v4 }
 0x3ab   :  { %8622 = vmatprep.mubr.f32.mxu1 %v40964_v7  ;;  %38770 = vmatpush3.bf16.msra.mxu1 %v31325_v0  ;;  %v31370_v0 = vld [vmem:[%s47187_s3 + $0x17e8] sm:$0xff]  }
 0x3ac   :  { %38772 = vmatprep.subr.bf16.mxu1 %v31334_v2  ;;  %v31362_v2 = vld [vmem:[%s47187_s3 + $0x17a8] sm:$0xff]  }
 0x3ae   :  { %8623 = vmatmul.mubr.f32.gmra.mrb[94].mxu1 %v40979_v11 }
 0x3af   :  { %38774 = vmatpush3.bf16.msra.mxu1 %v31326_v5  ;;  %9002 = vmatprep.mubr.f32.mxu1 %v40874_v37 }
 0x3b0   :  { %38776 = vmatprep.subr.bf16.mxu1 %v31335_v23  ;;  %v31371_v23 = vld [vmem:[%s47187_s3 + $0x17f0] sm:$0xff]  }
 0x3b3   :  { %38778 = vmatpush3.bf16.msra.mxu1 %v31327_v6 }
 0x3b4   :  { %38780 = vmatprep.subr.bf16.mxu1 %v31336_v10 }
 0x3b7   :  { %38782 = vmatpush3.bf16.msra.mxu1 %v31328_v35  ;;  %v31363_v35 = vld [vmem:[%s47187_s3 + $0x17b0] sm:$0xff]  }
 0x3b8   :  { %38784 = vmatprep.subr.bf16.mxu1 %v31337_v14 }
 0x3bb   :  { %38786 = vmatpush3.bf16.msra.mxu1 %v31329_v16 }
 0x3bc   :  { %38788 = vmatprep.subr.bf16.mxu1 %v31338_v19 }
 0x3bd   :  { %v32958_v21 = vpop.f32.mrb[68].mxu1 }
 0x3be   :  { %v32959_v25 = vpop.f32.mrb[69].mxu1 }
 0x3bf   :  { %v42424_v26 = vadd.f32 %v32959_v25, %v32958_v21  ;;  %38790 = vmatpush3.bf16.msra.mxu1 %v31330_v20  ;;  %v31364_v20 = vld [vmem:[%s47187_s3 + $0x17b8] sm:$0xff]   ;;  %v31397_v21 = vld [vmem:[%s47187_s3 + $0x18c0] sm:$0xff]   ;;  %v31398_v25 = vld [vmem:[%s47187_s3 + $0x18c8] sm:$0xff]  }
 0x3c0   :  { %38792 = vmatprep.subr.bf16.mxu1 %v31339_v22  ;;  %v31389_v22 = vld [vmem:[%s47187_s3 + $0x1880] sm:$0xff]  }
 0x3c1   :  { %v32961_v8 = vpop.f32.mrb[70].mxu1 }
 0x3c2   :  { %v32962_v33 = vpop.f32.mrb[71].mxu1 }
 0x3c3   :  { %v42432_v41 = vadd.f32 %v32962_v33, %v32961_v8  ;;  %38794 = vmatpush3.bf16.msra.mxu1 %v31331_v27  ;;  %v31390_v27 = vld [vmem:[%s47187_s3 + $0x1888] sm:$0xff]   ;;  %v31399_v8 = vld [vmem:[%s47187_s3 + $0x18d0] sm:$0xff]   ;;  %v31400_v33 = vld [vmem:[%s47187_s3 + $0x18d8] sm:$0xff]  }
 0x3c4   :  { %38796 = vmatprep.subr.bf16.mxu1 %v31340_v32  ;;  %v31391_v32 = vld [vmem:[%s47187_s3 + $0x1890] sm:$0xff]  }
 0x3c7   :  { %38798 = vmatpush3.bf16.msra.mxu1 %v31332_v44  ;;  %v31392_v44 = vld [vmem:[%s47187_s3 + $0x1898] sm:$0xff]  }
 0x3c8   :  { %38836 = vmatprep.subr.bf16.mxu1 %v31365_v46  ;;  %v31401_v46 = vld [vmem:[%s47187_s3 + $0x18e0] sm:$0xff]  }
 0x3ca   :  { %9003 = vmatmul.mubr.f32.vlgmr.msra.gmra.mrb[96].mxu1 %v40959_v4 }
 0x3cb   :  { %9007 = vmatprep.mubr.f32.mxu1 %v40964_v7  ;;  %38838 = vmatpush3.bf16.msra.mxu1 %v31357_v48  ;;  %v31393_v48 = vld [vmem:[%s47187_s3 + $0x18a0] sm:$0xff]  }
 0x3cc   :  { %38840 = vmatprep.subr.bf16.mxu1 %v31366_v49  ;;  %v31402_v49 = vld [vmem:[%s47187_s3 + $0x18e8] sm:$0xff]  }
 0x3ce   :  { %9008 = vmatmul.mubr.f32.gmra.mrb[98].mxu1 %v40979_v11 }
 0x3cf   :  { %38842 = vmatpush3.bf16.msra.mxu1 %v31358_v50  ;;  %9387 = vmatprep.mubr.f32.mxu1 %v40874_v37  ;;  %v31394_v50 = vld [vmem:[%s47187_s3 + $0x18a8] sm:$0xff]  }
 0x3d0   :  { %38844 = vmatprep.subr.bf16.mxu1 %v31367_v52 }
 0x3d3   :  { %38846 = vmatpush3.bf16.msra.mxu1 %v31359_v53  ;;  %v31403_v53 = vld [vmem:[%s47187_s3 + $0x18f0] sm:$0xff]  }
 0x3d4   :  { %38848 = vmatprep.subr.bf16.mxu1 %v31368_v54 }
 0x3d7   :  { %38850 = vmatpush3.bf16.msra.mxu1 %v31360_v55 }
 0x3d8   :  { %38852 = vmatprep.subr.bf16.mxu1 %v31369_v58  ;;  %v31395_v58 = vld [vmem:[%s47187_s3 + $0x18b0] sm:$0xff]  }
 0x3db   :  { %38854 = vmatpush3.bf16.msra.mxu1 %v31361_v60 }
 0x3dc   :  { %38856 = vmatprep.subr.bf16.mxu1 %v31370_v0  ;;  %v31404_v0 = vld [vmem:[%s47187_s3 + $0x18f8] sm:$0xff]  }
 0x3dd   :  { %v33002_v5 = vpop.f32.mrb[72].mxu1 }
 0x3de   :  { %v33003_v6 = vpop.f32.mrb[73].mxu1 }
 0x3df   :  { %v42480_v10 = vadd.f32 %v33003_v6, %v33002_v5  ;;  %38858 = vmatpush3.bf16.msra.mxu1 %v31362_v2  ;;  %v31413_v6 = vld [vmem:[%s47187_s3 + $0x1940] sm:$0xff]  }
 0x3e0   :  { %38860 = vmatprep.subr.bf16.mxu1 %v31371_v23  ;;  %v31396_v23 = vld [vmem:[%s47187_s3 + $0x18b8] sm:$0xff]  }
 0x3e1   :  { %v33005_v14 = vpop.f32.mrb[74].mxu1 }
 0x3e2   :  { %v33006_v16 = vpop.f32.mrb[75].mxu1 }
 0x3e3   :  { %v42488_v19 = vadd.f32 %v33006_v16, %v33005_v14  ;;  %38862 = vmatpush3.bf16.msra.mxu1 %v31363_v35  ;;  %v31405_v35 = vld [vmem:[%s47187_s3 + $0x1900] sm:$0xff]   ;;  %v31414_v14 = vld [vmem:[%s47187_s3 + $0x1948] sm:$0xff]   ;;  %v31415_v16 = vld [vmem:[%s47187_s3 + $0x1950] sm:$0xff]  }
 0x3e4   :  { %38864 = vmatprep.subr.bf16.mxu1 %v31372_v15  ;;  %v31406_v15 = vld [vmem:[%s47187_s3 + $0x1908] sm:$0xff]  }
 0x3e7   :  { %38866 = vmatpush3.bf16.msra.mxu1 %v31364_v20  ;;  %v31407_v20 = vld [vmem:[%s47187_s3 + $0x1910] sm:$0xff]  }
 0x3e8   :  { %38904 = vmatprep.subr.bf16.mxu1 %v31397_v21  ;;  %v31416_v21 = vld [vmem:[%s47187_s3 + $0x1958] sm:$0xff]  }
 0x3ea   :  { %9388 = vmatmul.mubr.f32.vlgmr.msra.gmra.mrb[100].mxu1 %v40959_v4 }
 0x3eb   :  { %9392 = vmatprep.mubr.f32.mxu1 %v40964_v7  ;;  %38906 = vmatpush3.bf16.msra.mxu1 %v31389_v22  ;;  %v31408_v22 = vld [vmem:[%s47187_s3 + $0x1918] sm:$0xff]  }
 0x3ec   :  { %38908 = vmatprep.subr.bf16.mxu1 %v31398_v25  ;;  %v31417_v25 = vld [vmem:[%s47187_s3 + $0x1960] sm:$0xff]  }
 0x3ee   :  { %9393 = vmatmul.mubr.f32.gmra.mrb[102].mxu1 %v40979_v11 }
 0x3ef   :  { %38910 = vmatpush3.bf16.msra.mxu1 %v31390_v27  ;;  %9772 = vmatprep.mubr.f32.mxu1 %v40874_v37  ;;  %v31409_v27 = vld [vmem:[%s47187_s3 + $0x1920] sm:$0xff]  }
 0x3f0   :  { %38912 = vmatprep.subr.bf16.mxu1 %v31399_v8  ;;  %v31418_v8 = vld [vmem:[%s47187_s3 + $0x1968] sm:$0xff]  }
 0x3f3   :  { %38914 = vmatpush3.bf16.msra.mxu1 %v31391_v32  ;;  %v31410_v32 = vld [vmem:[%s47187_s3 + $0x1928] sm:$0xff]  }
 0x3f4   :  { %38916 = vmatprep.subr.bf16.mxu1 %v31400_v33 }
 0x3f7   :  { %38918 = vmatpush3.bf16.msra.mxu1 %v31392_v44  ;;  %v31419_v44 = vld [vmem:[%s47187_s3 + $0x1970] sm:$0xff]  }
 0x3f8   :  { %38920 = vmatprep.subr.bf16.mxu1 %v31401_v46 }
 0x3fb   :  { %38922 = vmatpush3.bf16.msra.mxu1 %v31393_v48 }
 0x3fc   :  { %38924 = vmatprep.subr.bf16.mxu1 %v31402_v49  ;;  %v31411_v49 = vld [vmem:[%s47187_s3 + $0x1930] sm:$0xff]  }
 0x3fd   :  { %v33084_v52 = vpop.f32.mrb[76].mxu1 }
 0x3fe   :  { %v33085_v54 = vpop.f32.mrb[77].mxu1 }
 0x3ff   :  { %v42536_v55 = vadd.f32 %v33085_v54, %v33084_v52  ;;  %38926 = vmatpush3.bf16.msra.mxu1 %v31394_v50  ;;  %v31420_v52 = vld [vmem:[%s47187_s3 + $0x1978] sm:$0xff]  }
 0x400   :  { %38928 = vmatprep.subr.bf16.mxu1 %v31403_v53 }
 0x401   :  { %v33087_v60 = vpop.f32.mrb[78].mxu1 }
 0x402   :  { %v33088_v2 = vpop.f32.mrb[79].mxu1 }
 0x403   :  { %v42544_v5 = vadd.f32 %v33088_v2, %v33087_v60  ;;  %38930 = vmatpush3.bf16.msra.mxu1 %v31395_v58  ;;  %v31412_v58 = vld [vmem:[%s47187_s3 + $0x1938] sm:$0xff]   ;;  %v31445_v60 = vld [vmem:[%s47187_s3 + $0x1a40] sm:$0xff]   ;;  %v31446_v2 = vld [vmem:[%s47187_s3 + $0x1a48] sm:$0xff]  }
 0x404   :  { %38932 = vmatprep.subr.bf16.mxu1 %v31404_v0  ;;  %v31437_v0 = vld [vmem:[%s47187_s3 + $0x1a00] sm:$0xff]  }
 0x407   :  { %38934 = vmatpush3.bf16.msra.mxu1 %v31396_v23 }
 0x408   :  { %38940 = vmatprep.subr.bf16.mxu1 %v31413_v6 }
 0x40a   :  { %9773 = vmatmul.mubr.f32.vlgmr.msra.gmra.mrb[104].mxu1 %v40959_v4 }
 0x40b   :  { %9777 = vmatprep.mubr.f32.mxu1 %v40964_v7  ;;  %38942 = vmatpush3.bf16.msra.mxu1 %v31405_v35 }
 0x40c   :  { %38944 = vmatprep.subr.bf16.mxu1 %v31414_v14  ;;  %v31438_v14 = vld [vmem:[%s47187_s3 + $0x1a08] sm:$0xff]  }
 0x40e   :  { %9778 = vmatmul.mubr.f32.gmra.mrb[106].mxu1 %v40979_v11 }
 0x40f   :  { %38946 = vmatpush3.bf16.msra.mxu1 %v31406_v15  ;;  %10082 = vmatprep.mubr.f32.mxu1 %v40829_v17  ;;  %v31447_v15 = vld [vmem:[%s47187_s3 + $0x1a50] sm:$0xff]  }
 0x410   :  { %38948 = vmatprep.subr.bf16.mxu1 %v31415_v16 }
 0x413   :  { %38950 = vmatpush3.bf16.msra.mxu1 %v31407_v20 }
 0x414   :  { %38952 = vmatprep.subr.bf16.mxu1 %v31416_v21 }
 0x417   :  { %38954 = vmatpush3.bf16.msra.mxu1 %v31408_v22 }
 0x418   :  { %38956 = vmatprep.subr.bf16.mxu1 %v31417_v25  ;;  %v31439_v25 = vld [vmem:[%s47187_s3 + $0x1a10] sm:$0xff]  }
 0x41b   :  { %38958 = vmatpush3.bf16.msra.mxu1 %v31409_v27  ;;  %v31448_v27 = vld [vmem:[%s47187_s3 + $0x1a58] sm:$0xff]  }
 0x41c   :  { %38960 = vmatprep.subr.bf16.mxu1 %v31418_v8 }
 0x41d   :  { %v33166_v33 = vpop.f32.mrb[80].mxu1 }
 0x41e   :  { %v33167_v46 = vpop.f32.mrb[81].mxu1 }
 0x41f   :  { %v42592_v48 = vadd.f32 %v33167_v46, %v33166_v33  ;;  %38962 = vmatpush3.bf16.msra.mxu1 %v31410_v32  ;;  %v31440_v32 = vld [vmem:[%s47187_s3 + $0x1a18] sm:$0xff]   ;;  %v30757_v33 = vld [vmem:[%s47187_s3 + $0x4c0] sm:$0xff]  }
 0x420   :  { %38964 = vmatprep.subr.bf16.mxu1 %v31419_v44  ;;  %v31449_v44 = vld [vmem:[%s47187_s3 + $0x1a60] sm:$0xff]  }
 0x421   :  { %v33169_v50 = vpop.f32.mrb[82].mxu1  ;;  %v30749_v46 = vld [vmem:[%s47187_s3 + $0x480] sm:$0xff]  }
 0x422   :  { %v33170_v53 = vpop.f32.mrb[83].mxu1 }
 0x423   :  { %v42600_v54 = vadd.f32 %v33170_v53, %v33169_v50  ;;  %38966 = vmatpush3.bf16.msra.mxu1 %v31411_v49  ;;  %v31441_v49 = vld [vmem:[%s47187_s3 + $0x1a20] sm:$0xff]   ;;  %v23810_v50 = vld [vmem:[%s47188_s4 + $0x70] sm:$0xff]  ;;  %v31450_v53 = vld [vmem:[%s47187_s3 + $0x1a68] sm:$0xff]  }
 0x424   :  { %38968 = vmatprep.subr.bf16.mxu1 %v31420_v52  ;;  %v30758_v52 = vld [vmem:[%s47187_s3 + $0x4c8] sm:$0xff]  }
 0x427   :  { %38970 = vmatpush3.bf16.msra.mxu1 %v31412_v58  ;;  %v23811_v58 = vld [vmem:[%s47188_s4 + $0x78] sm:$0xff] }
 0x428   :  { %39008 = vmatprep.subr.bf16.mxu1 %v31445_v60  ;;  %v30750_v60 = vld [vmem:[%s47187_s3 + $0x488] sm:$0xff]  }
 0x42a   :  { %v31892_v23 = vpop.f32.mrb[28].mxu0  ;;  %10083 = vmatmul.mubr.f32.vlgmr.msra.gmra.mrb[108].mxu1 %v40841_v24 }
 0x42b   :  { %v31893_v6 = vpop.f32.mrb[29].mxu0  ;;  %10087 = vmatprep.mubr.f32.mxu1 %v40854_v31  ;;  %39010 = vmatpush3.bf16.msra.mxu1 %v31437_v0 }
 0x42c   :  { %v31894_v35 = vadd.f32 %v31893_v6, %v31892_v23  ;;  %39012 = vmatprep.subr.bf16.mxu1 %v31446_v2  ;;  %v31442_v2 = vld [vmem:[%s47187_s3 + $0x1a28] sm:$0xff]   ;;  %v30759_v23 = vld [vmem:[%s47187_s3 + $0x4d0] sm:$0xff]  }
 0x42e   :  { %v1690_v16 = vadd.f32 %v31894_v35, %v41423_v56  ;;  %v31895_v20 = vpop.f32.mrb[30].mxu0  ;;  %10088 = vmatmul.mubr.f32.gmra.mrb[110].mxu1 %v40862_v34  ;;  %v31451_v35 = vld [vmem:[%s47187_s3 + $0x1a70] sm:$0xff]  }
 0x42f   :  { %v31896_v21 = vpop.f32.mrb[31].mxu0  ;;  %39014 = vmatpush3.bf16.msra.mxu1 %v31438_v14  ;;  %10467 = vmatprep.mubr.f32.mxu1 %v40829_v17 }
 0x430   :  { %v31897_v22 = vadd.f32 %v31896_v21, %v31895_v20  ;;  %39016 = vmatprep.subr.bf16.mxu1 %v31447_v15  ;;  %v30751_v15 = vld [vmem:[%s47187_s3 + $0x490] sm:$0xff]   ;;  %v30760_v21 = vld [vmem:[%s47187_s3 + $0x4d8] sm:$0xff]  }
 0x431   :  { %v31443_v20 = vld [vmem:[%s47187_s3 + $0x1a30] sm:$0xff]  }
 0x432   :  { %v1695_v8 = vadd.f32 %v31897_v22, %v41431_v1  ;;  %v23809_v1 = vld [vmem:[%s47188_s4 + $0x68] sm:$0xff] }
 0x433   :  { %39018 = vmatpush3.bf16.msra.mxu1 %v31439_v25  ;;  %v31452_v25 = vld [vmem:[%s47187_s3 + $0x1a78] sm:$0xff]  }
 0x434   :  { %v37507_v56 = vpack.c.bf16 %v1695_v8, %v1690_v16  ;;  %39020 = vmatprep.subr.bf16.mxu1 %v31448_v27  ;;  %v30752_v8 = vld [vmem:[%s47187_s3 + $0x498] sm:$0xff]  }
 0x436   :  { %37508 = vmatprep.subr.bf16.mxu0 %v37507_v56 }
 0x437   :  { %37510 = vmatpush3.bf16.msra.mxu0 %v37507_v56  ;;  %39022 = vmatpush3.bf16.msra.mxu1 %v31440_v32  ;;  %v31444_v56 = vld [vmem:[%s47187_s3 + $0x1a38] sm:$0xff]   ;;  %v30761_v32 = vld [vmem:[%s47187_s3 + $0x4e0] sm:$0xff]  }
 0x438   :  { %37544 = vmatprep.subr.bf16.mxu0 %v30757_v33  ;;  %39024 = vmatprep.subr.bf16.mxu1 %v31449_v44  ;;  %v30753_v33 = vld [vmem:[%s47187_s3 + $0x4a0] sm:$0xff]   ;;  %v30762_v44 = vld [vmem:[%s47187_s3 + $0x4e8] sm:$0xff]  }
 0x43a   :  { %34986 = vmatmul.mubr.msk.f32.vlgmr.msra.gmra.mrb[20].mxu0 %vm839_vm12, %v23809_v1  ;;  %v30754_v1 = vld [vmem:[%s47187_s3 + $0x4a8] sm:$0xff]  }
 0x43b   :  { %37546 = vmatpush3.bf16.msra.mxu0 %v30749_v46  ;;  %39026 = vmatpush3.bf16.msra.mxu1 %v31441_v49  ;;  %v30763_v46 = vld [vmem:[%s47187_s3 + $0x4f0] sm:$0xff]  }
 0x43c   :  { %34988 = vmatprep.mubr.msk.f32.mxu0 %vm839_vm12, %v23810_v50  ;;  %37548 = vmatprep.subr.bf16.mxu0 %v30758_v52  ;;  %v30755_v49 = vld [vmem:[%s47187_s3 + $0x4b0] sm:$0xff]   ;;  %v30764_v50 = vld [vmem:[%s47187_s3 + $0x4f8] sm:$0xff]  }
 0x43d   :  { %v33248_v0 = vpop.f32.mrb[84].mxu1  ;;  %39028 = vmatprep.subr.bf16.mxu1 %v31450_v53  ;;  %v30756_v52 = vld [vmem:[%s47187_s3 + $0x4b8] sm:$0xff]  }
 0x43e   :  { %34989 = vmatmul.mubr.msk.f32.gmra.mrb[22].mxu0 %vm839_vm12, %v23811_v58  ;;  %v33249_v6 = vpop.f32.mrb[85].mxu1 }
 0x43f   :  { %v42677_v14 = vadd.f32 %v33249_v6, %v33248_v0  ;;  %37550 = vmatpush3.bf16.msra.mxu0 %v30750_v60  ;;  %2072 = vmatprep.mubr.f32.mxu0 %v40874_v37 }
 0x440   :  { %39030 = vmatpush3.bf16.msra.mxu1 %v31442_v2  ;;  %37552 = vmatprep.subr.bf16.mxu0 %v30759_v23 }
 0x441   :  { %v33251_v16 = vpop.f32.mrb[86].mxu1  ;;  %39032 = vmatprep.subr.bf16.mxu1 %v31451_v35 }
 0x442   :  { %v33252_v22 = vpop.f32.mrb[87].mxu1 }
 0x443   :  { %v42692_v27 = vadd.f32 %v33252_v22, %v33251_v16  ;;  %37554 = vmatpush3.bf16.msra.mxu0 %v30751_v15 }
 0x444   :  { %39034 = vmatpush3.bf16.msra.mxu1 %v31443_v20  ;;  %37556 = vmatprep.subr.bf16.mxu0 %v30760_v21 }
 0x445   :  { %39036 = vmatprep.subr.bf16.mxu1 %v31452_v25 }
 0x447   :  { %37558 = vmatpush3.bf16.msra.mxu0 %v30752_v8 }
 0x448   :  { %39038 = vmatpush3.bf16.msra.mxu1 %v31444_v56  ;;  %37560 = vmatprep.subr.bf16.mxu0 %v30761_v32 }
 0x44b   :  { %10468 = vmatmul.mubr.f32.vlgmr.msra.gmra.mrb[112].mxu1 %v40841_v24  ;;  %37562 = vmatpush3.bf16.msra.mxu0 %v30753_v33 }
 0x44c   :  { %10472 = vmatprep.mubr.f32.mxu1 %v40854_v31  ;;  %37564 = vmatprep.subr.bf16.mxu0 %v30762_v44 }
 0x44f   :  { %10473 = vmatmul.mubr.f32.gmra.mrb[114].mxu1 %v40862_v34  ;;  %37566 = vmatpush3.bf16.msra.mxu0 %v30754_v1 }
 0x450   :  { %37568 = vmatprep.subr.bf16.mxu0 %v30763_v46 }
 0x453   :  { %37570 = vmatpush3.bf16.msra.mxu0 %v30755_v49  ;;  %v23880_v49 = vld [vmem:[%s47188_s4 + $0x80] sm:$0xff] }
 0x454   :  { %37572 = vmatprep.subr.bf16.mxu0 %v30764_v50 }
 0x457   :  { %37574 = vmatpush3.bf16.msra.mxu0 %v30756_v52 }
 0x45a   :  { %2073 = vmatmul.mubr.f32.vlgmr.msra.gmra.mrb[32].mxu0 %v40959_v4 }
 0x45b   :  { %2077 = vmatprep.mubr.f32.mxu0 %v40964_v7 }
 0x45d   :  { %v33330_v53 = vpop.f32.mrb[88].mxu1 }
 0x45e   :  { %2078 = vmatmul.mubr.f32.gmra.mrb[34].mxu0 %v40979_v11  ;;  %v33331_v58 = vpop.f32.mrb[89].mxu1 }
 0x45f   :  { %v33332_v60 = vadd.f32 %v33331_v58, %v33330_v53  ;;  %34995 = vmatprep.mubr.msk.f32.mxu0 %vm839_vm12, %v23880_v49 }
 0x461   :  { %v33333_v0 = vpop.f32.mrb[90].mxu1 }
 0x462   :  { %v33334_v2 = vpop.f32.mrb[91].mxu1 }
 0x463   :  { %v33335_v23 = vadd.f32 %v33334_v2, %v33333_v0 }
 0x47d   :  { %v33368_v6 = vpop.f32.mrb[92].mxu1 }
 0x47e   :  { %v33369_v35 = vpop.f32.mrb[93].mxu1 }
 0x47f   :  { %v33370_v15 = vadd.f32 %v33369_v35, %v33368_v6 }
 0x481   :  { %v8620_v16 = vadd.f32 %v33370_v15, %v33332_v60  ;;  %v33371_v20 = vpop.f32.mrb[94].mxu1 }
 0x482   :  { %v33372_v21 = vpop.f32.mrb[95].mxu1 }
 0x483   :  { %v33373_v22 = vadd.f32 %v33372_v21, %v33371_v20 }
 0x485   :  { %v8625_v25 = vadd.f32 %v33373_v22, %v33335_v23 }
 0x487   :  { %v42730_v8 = vpack.c.bf16 %v8625_v25, %v8620_v16 }
 0x49d   :  { %v33450_v56 = vpop.f32.mrb[96].mxu1 }
 0x49e   :  { %v33451_v32 = vpop.f32.mrb[97].mxu1 }
 0x49f   :  { %v42732_v33 = vadd.f32 %v33451_v32, %v33450_v56 }
 0x4a1   :  { %v33453_v44 = vpop.f32.mrb[98].mxu1 }
 0x4a2   :  { %v33454_v1 = vpop.f32.mrb[99].mxu1 }
 0x4a3   :  { %v42734_v46 = vadd.f32 %v33454_v1, %v33453_v44 }
 0x4bd   :  { %v33532_v50 = vpop.f32.mrb[100].mxu1 }
 0x4be   :  { %v33533_v52 = vpop.f32.mrb[101].mxu1 }
 0x4bf   :  { %v42740_v53 = vadd.f32 %v33533_v52, %v33532_v50 }
 0x4c1   :  { %v33535_v58 = vpop.f32.mrb[102].mxu1 }
 0x4c2   :  { %v33536_v60 = vpop.f32.mrb[103].mxu1 }
 0x4c3   :  { %v42742_v0 = vadd.f32 %v33536_v60, %v33535_v58 }
 0x4dd   :  { %v33614_v2 = vpop.f32.mrb[104].mxu1 }
 0x4de   :  { %v33615_v23 = vpop.f32.mrb[105].mxu1 }
 0x4df   :  { %v42744_v6 = vadd.f32 %v33615_v23, %v33614_v2 }
 0x4e1   :  { %v33617_v35 = vpop.f32.mrb[106].mxu1 }
 0x4e2   :  { %v33618_v15 = vpop.f32.mrb[107].mxu1 }
 0x4e3   :  { %v42746_v16 = vadd.f32 %v33618_v15, %v33617_v35 }
 0x4fd   :  { %v33658_v20 = vpop.f32.mrb[108].mxu1 }
 0x4fe   :  { %v33659_v21 = vpop.f32.mrb[109].mxu1 }
 0x4ff   :  { %v42748_v22 = vadd.f32 %v33659_v21, %v33658_v20 }
 0x501   :  { %47201 = vst [vmem:[#allocation5_spill] sm:$0xff] %v42748_v22  ;;  %v33661_v25 = vpop.f32.mrb[110].mxu1 }
 0x502   :  { %v33662_v56 = vpop.f32.mrb[111].mxu1 }
 0x503   :  { %v42750_v32 = vadd.f32 %v33662_v56, %v33661_v25  ;;  %v23881_v56 = vld [vmem:[%s47188_s4 + $0x88] sm:$0xff] }
 0x51e   :  { %v33740_v44 = vpop.f32.mrb[112].mxu1 }
 0x51f   :  { %v33741_v1 = vpop.f32.mrb[113].mxu1 }
 0x520   :  { %v42752_v49 = vadd.f32 %v33741_v1, %v33740_v44  ;;  %v23882_v44 = vld [vmem:[%s47188_s4 + $0x90] sm:$0xff]  ;;  %v23953_v1 = vld [vmem:[%s47188_s4 + $0xa8] sm:$0xff] }
 0x522   :  { %v33743_v50 = vpop.f32.mrb[114].mxu1 }
 0x523   :  { %v33744_v52 = vpop.f32.mrb[115].mxu1 }
 0x524   :  { %v42754_v58 = vadd.f32 %v33744_v52, %v33743_v50  ;;  %v23954_v50 = vld [vmem:[%s47188_s4 + $0xb0] sm:$0xff]  ;;  %v30806_v52 = vld [vmem:[%s47187_s3 + $0x648] sm:$0xff]  }
 0x52d   :  { %v31974_v60 = vpop.f32.mrb[32].mxu0 }
 0x52e   :  { %v31975_v2 = vpop.f32.mrb[33].mxu0 }
 0x52f   :  { %v31976_v23 = vadd.f32 %v31975_v2, %v31974_v60  ;;  %v23955_v60 = vld [vmem:[%s47188_s4 + $0xb8] sm:$0xff]  ;;  %v30798_v2 = vld [vmem:[%s47187_s3 + $0x608] sm:$0xff]  }
 0x531   :  { %v2075_v35 = vadd.f32 %v31976_v23, %v41484_v30  ;;  %v31977_v15 = vpop.f32.mrb[34].mxu0  ;;  %v30805_v30 = vld [vmem:[%s47187_s3 + $0x640] sm:$0xff]   ;;  %v30807_v23 = vld [vmem:[%s47187_s3 + $0x650] sm:$0xff]  }
 0x532   :  { %v31978_v20 = vpop.f32.mrb[35].mxu0 }
 0x533   :  { %v31979_v21 = vadd.f32 %v31978_v20, %v31977_v15  ;;  %v30808_v15 = vld [vmem:[%s47187_s3 + $0x658] sm:$0xff]  }
 0x534   :  { %v30800_v20 = vld [vmem:[%s47187_s3 + $0x618] sm:$0xff]  }
 0x535   :  { %v2080_v22 = vadd.f32 %v31979_v21, %v41492_v42  ;;  %v23883_v42 = vld [vmem:[%s47188_s4 + $0x98] sm:$0xff]  ;;  %v30809_v21 = vld [vmem:[%s47187_s3 + $0x660] sm:$0xff]  }
 0x537   :  { %v37575_v25 = vpack.c.bf16 %v2080_v22, %v2075_v35  ;;  %v23952_v22 = vld [vmem:[%s47188_s4 + $0xa0] sm:$0xff]  ;;  %v30799_v35 = vld [vmem:[%s47187_s3 + $0x610] sm:$0xff]  }
 0x539   :  { %37576 = vmatprep.subr.bf16.mxu0 %v37575_v25 }
 0x53a   :  { %37578 = vmatpush3.bf16.msra.mxu0 %v37575_v25  ;;  %v30801_v25 = vld [vmem:[%s47187_s3 + $0x620] sm:$0xff]  }
 0x53b   :  { %37644 = vmatprep.subr.bf16.mxu0 %v41680_v12 }
 0x53d   :  { %34996 = vmatmul.mubr.msk.f32.vlgmr.msra.gmra.mrb[20].mxu0 %vm839_vm12, %v23881_v56  ;;  %v30810_v56 = vld [vmem:[%s47187_s3 + $0x668] sm:$0xff]  }
 0x53e   :  { %37646 = vmatpush3.bf16.msra.mxu0 %v41680_v12  ;;  %34998 = vmatprep.mubr.msk.f32.mxu0 %vm839_vm12, %v23882_v44  ;;  %v30797_v12 = vld [vmem:[%s47187_s3 + $0x600] sm:$0xff]   ;;  %v30802_v44 = vld [vmem:[%s47187_s3 + $0x628] sm:$0xff]  }
 0x53f   :  { %37648 = vmatprep.subr.bf16.mxu0 %v30805_v30  ;;  %v30811_v30 = vld [vmem:[%s47187_s3 + $0x670] sm:$0xff]  }
 0x541   :  { %34999 = vmatmul.mubr.msk.f32.gmra.mrb[22].mxu0 %vm839_vm12, %v23883_v42  ;;  %v30803_v42 = vld [vmem:[%s47187_s3 + $0x630] sm:$0xff]  }
 0x542   :  { %35005 = vmatprep.mubr.msk.f32.mxu0 %vm839_vm12, %v23952_v22  ;;  %v30812_v22 = vld [vmem:[%s47187_s3 + $0x678] sm:$0xff]  }
 0x545   :  { %35006 = vmatmul.mubr.msk.f32.vlgmr.msra.gmra.mrb[20].mxu0 %vm839_vm12, %v23953_v1  ;;  %v30804_v1 = vld [vmem:[%s47187_s3 + $0x638] sm:$0xff]  }
 0x546   :  { %37650 = vmatpush3.bf16.msra.mxu0 %v30797_v12  ;;  %35008 = vmatprep.mubr.msk.f32.mxu0 %vm839_vm12, %v23954_v50  ;;  %v24024_v12 = vld [vmem:[%s47188_s4 + $0xc0] sm:$0xff] }
 0x547   :  { %37652 = vmatprep.subr.bf16.mxu0 %v30806_v52 }
 0x549   :  { %35009 = vmatmul.mubr.msk.f32.gmra.mrb[22].mxu0 %vm839_vm12, %v23955_v60 }
 0x54a   :  { %37654 = vmatpush3.bf16.msra.mxu0 %v30798_v2  ;;  %2767 = vmatprep.mubr.f32.mxu0 %v40829_v17 }
 0x54b   :  { %37656 = vmatprep.subr.bf16.mxu0 %v30807_v23 }
 0x54e   :  { %37658 = vmatpush3.bf16.msra.mxu0 %v30799_v35 }
 0x54f   :  { %37660 = vmatprep.subr.bf16.mxu0 %v30808_v15 }
 0x552   :  { %37662 = vmatpush3.bf16.msra.mxu0 %v30800_v20 }
 0x553   :  { %37664 = vmatprep.subr.bf16.mxu0 %v30809_v21 }
 0x556   :  { %37666 = vmatpush3.bf16.msra.mxu0 %v30801_v25  ;;  %v30837_v25 = vld [vmem:[%s47187_s3 + $0x740] sm:$0xff]  }
 0x557   :  { %37668 = vmatprep.subr.bf16.mxu0 %v30810_v56  ;;  %v24025_v56 = vld [vmem:[%s47188_s4 + $0xc8] sm:$0xff] }
 0x55a   :  { %37670 = vmatpush3.bf16.msra.mxu0 %v30802_v44  ;;  %v30838_v44 = vld [vmem:[%s47187_s3 + $0x748] sm:$0xff]  }
 0x55b   :  { %37672 = vmatprep.subr.bf16.mxu0 %v30811_v30  ;;  %v24027_v30 = vld [vmem:[%s47188_s4 + $0xd8] sm:$0xff] }
 0x55e   :  { %37674 = vmatpush3.bf16.msra.mxu0 %v30803_v42  ;;  %v30830_v42 = vld [vmem:[%s47187_s3 + $0x708] sm:$0xff]  }
 0x55f   :  { %37676 = vmatprep.subr.bf16.mxu0 %v30812_v22  ;;  %v30839_v22 = vld [vmem:[%s47187_s3 + $0x750] sm:$0xff]  }
 0x562   :  { %37678 = vmatpush3.bf16.msra.mxu0 %v30804_v1  ;;  %v30831_v1 = vld [vmem:[%s47187_s3 + $0x710] sm:$0xff]  }
 0x565   :  { %2768 = vmatmul.mubr.f32.vlgmr.msra.gmra.mrb[36].mxu0 %v40841_v24 }
 0x566   :  { %2772 = vmatprep.mubr.f32.mxu0 %v40854_v31 }
 0x569   :  { %2773 = vmatmul.mubr.f32.gmra.mrb[38].mxu0 %v40862_v34 }
 0x56a   :  { %35015 = vmatprep.mubr.msk.f32.mxu0 %vm839_vm12, %v24024_v12  ;;  %v30840_v12 = vld [vmem:[%s47187_s3 + $0x758] sm:$0xff]  }
 0x638   :  { %v32100_v50 = vpop.f32.mrb[36].mxu0 }
 0x639   :  { %v32101_v52 = vpop.f32.mrb[37].mxu0 }
 0x63a   :  { %v32102_v60 = vadd.f32 %v32101_v52, %v32100_v50  ;;  %v30832_v50 = vld [vmem:[%s47187_s3 + $0x718] sm:$0xff]   ;;  %v30841_v52 = vld [vmem:[%s47187_s3 + $0x760] sm:$0xff]  }
 0x63c   :  { %v2845_v2 = vadd.f32 %v41734_v36, %v32102_v60  ;;  %v32103_v23 = vpop.f32.mrb[38].mxu0  ;;  %v30829_v36 = vld [vmem:[%s47187_s3 + $0x700] sm:$0xff]  }
 0x63d   :  { %v32104_v35 = vpop.f32.mrb[39].mxu0  ;;  %v30833_v60 = vld [vmem:[%s47187_s3 + $0x720] sm:$0xff]  }
 0x63e   :  { %v32105_v15 = vadd.f32 %v32104_v35, %v32103_v23  ;;  %v30834_v23 = vld [vmem:[%s47187_s3 + $0x728] sm:$0xff]   ;;  %v30843_v35 = vld [vmem:[%s47187_s3 + $0x770] sm:$0xff]  }
 0x640   :  { %v2850_v20 = vadd.f32 %v41742_v43, %v32105_v15  ;;  %v24026_v43 = vld [vmem:[%s47188_s4 + $0xd0] sm:$0xff] }
 0x641   :  { %v30835_v15 = vld [vmem:[%s47187_s3 + $0x730] sm:$0xff]  }
 0x642   :  { %v37711_v21 = vpack.c.bf16 %v2850_v20, %v2845_v2  ;;  %v30842_v2 = vld [vmem:[%s47187_s3 + $0x768] sm:$0xff]   ;;  %v30844_v20 = vld [vmem:[%s47187_s3 + $0x778] sm:$0xff]  }
 0x644   :  { %37712 = vmatprep.subr.bf16.mxu0 %v37711_v21 }
 0x645   :  { %37714 = vmatpush3.bf16.msra.mxu0 %v37711_v21  ;;  %v30836_v21 = vld [vmem:[%s47187_s3 + $0x738] sm:$0xff]  }
 0x646   :  { %37716 = vmatprep.subr.bf16.mxu0 %v30837_v25  ;;  %v24096_v25 = vld [vmem:[%s47188_s4 + $0xe0] sm:$0xff] }
 0x648   :  { %35016 = vmatmul.mubr.msk.f32.vlgmr.msra.gmra.mrb[20].mxu0 %vm839_vm12, %v24025_v56 }
 0x649   :  { %37718 = vmatpush3.bf16.msra.mxu0 %v30829_v36  ;;  %35018 = vmatprep.mubr.msk.f32.mxu0 %vm839_vm12, %v24026_v43 }
 0x64a   :  { %37720 = vmatprep.subr.bf16.mxu0 %v30838_v44 }
 0x64c   :  { %35019 = vmatmul.mubr.msk.f32.gmra.mrb[22].mxu0 %vm839_vm12, %v24027_v30 }
 0x64d   :  { %37722 = vmatpush3.bf16.msra.mxu0 %v30830_v42  ;;  %3152 = vmatprep.mubr.f32.mxu0 %v40829_v17 }
 0x64e   :  { %37724 = vmatprep.subr.bf16.mxu0 %v30839_v22 }
 0x651   :  { %37726 = vmatpush3.bf16.msra.mxu0 %v30831_v1 }
 0x652   :  { %37728 = vmatprep.subr.bf16.mxu0 %v30840_v12 }
 0x655   :  { %37730 = vmatpush3.bf16.msra.mxu0 %v30832_v50  ;;  %v30869_v50 = vld [vmem:[%s47187_s3 + $0x840] sm:$0xff]  }
 0x656   :  { %37732 = vmatprep.subr.bf16.mxu0 %v30841_v52  ;;  %v24097_v52 = vld [vmem:[%s47188_s4 + $0xe8] sm:$0xff] }
 0x659   :  { %37734 = vmatpush3.bf16.msra.mxu0 %v30833_v60  ;;  %v30870_v60 = vld [vmem:[%s47187_s3 + $0x848] sm:$0xff]  }
 0x65a   :  { %37736 = vmatprep.subr.bf16.mxu0 %v30842_v2  ;;  %v24099_v2 = vld [vmem:[%s47188_s4 + $0xf8] sm:$0xff] }
 0x65d   :  { %37738 = vmatpush3.bf16.msra.mxu0 %v30834_v23  ;;  %v30862_v23 = vld [vmem:[%s47187_s3 + $0x808] sm:$0xff]  }
 0x65e   :  { %37740 = vmatprep.subr.bf16.mxu0 %v30843_v35  ;;  %v30871_v35 = vld [vmem:[%s47187_s3 + $0x850] sm:$0xff]  }
 0x661   :  { %37742 = vmatpush3.bf16.msra.mxu0 %v30835_v15  ;;  %v30863_v15 = vld [vmem:[%s47187_s3 + $0x810] sm:$0xff]  }
 0x662   :  { %37744 = vmatprep.subr.bf16.mxu0 %v30844_v20  ;;  %v30872_v20 = vld [vmem:[%s47187_s3 + $0x858] sm:$0xff]  }
 0x665   :  { %37746 = vmatpush3.bf16.msra.mxu0 %v30836_v21  ;;  %v30864_v21 = vld [vmem:[%s47187_s3 + $0x818] sm:$0xff]  }
 0x668   :  { %3153 = vmatmul.mubr.f32.vlgmr.msra.gmra.mrb[40].mxu0 %v40841_v24 }
 0x669   :  { %3157 = vmatprep.mubr.f32.mxu0 %v40854_v31 }
 0x66c   :  { %3158 = vmatmul.mubr.f32.gmra.mrb[42].mxu0 %v40862_v34 }
 0x66d   :  { %35025 = vmatprep.mubr.msk.f32.mxu0 %vm839_vm12, %v24096_v25  ;;  %v30873_v25 = vld [vmem:[%s47187_s3 + $0x860] sm:$0xff]  }
 0x73b   :  { %v32182_v56 = vpop.f32.mrb[40].mxu0 }
 0x73c   :  { %v32183_v36 = vpop.f32.mrb[41].mxu0 }
 0x73d   :  { %v32184_v43 = vadd.f32 %v32183_v36, %v32182_v56  ;;  %v30865_v56 = vld [vmem:[%s47187_s3 + $0x820] sm:$0xff]   ;;  %v30874_v36 = vld [vmem:[%s47187_s3 + $0x868] sm:$0xff]  }
 0x73f   :  { %v3230_v44 = vadd.f32 %v41790_v61, %v32184_v43  ;;  %v32185_v30 = vpop.f32.mrb[42].mxu0  ;;  %v30861_v61 = vld [vmem:[%s47187_s3 + $0x800] sm:$0xff]   ;;  %v30866_v43 = vld [vmem:[%s47187_s3 + $0x828] sm:$0xff]  }
 0x740   :  { %v32186_v42 = vpop.f32.mrb[43].mxu0 }
 0x741   :  { %v32187_v22 = vadd.f32 %v32186_v42, %v32185_v30  ;;  %v30867_v30 = vld [vmem:[%s47187_s3 + $0x830] sm:$0xff]   ;;  %v30876_v42 = vld [vmem:[%s47187_s3 + $0x878] sm:$0xff]  }
 0x743   :  { %v3235_v1 = vadd.f32 %v41798_v63, %v32187_v22  ;;  %v24098_v63 = vld [vmem:[%s47188_s4 + $0xf0] sm:$0xff]  ;;  %v30868_v22 = vld [vmem:[%s47187_s3 + $0x838] sm:$0xff]  }
 0x745   :  { %v37779_v12 = vpack.c.bf16 %v3235_v1, %v3230_v44  ;;  %v30875_v44 = vld [vmem:[%s47187_s3 + $0x870] sm:$0xff]   ;;  %v24168_v1 = vld [vmem:[%s47188_s4 + $0x100] sm:$0xff] }
 0x747   :  { %37780 = vmatprep.subr.bf16.mxu0 %v37779_v12 }
 0x748   :  { %37782 = vmatpush3.bf16.msra.mxu0 %v37779_v12 }
 0x749   :  { %37784 = vmatprep.subr.bf16.mxu0 %v30869_v50 }
 0x74b   :  { %35026 = vmatmul.mubr.msk.f32.vlgmr.msra.gmra.mrb[20].mxu0 %vm839_vm12, %v24097_v52 }
 0x74c   :  { %37786 = vmatpush3.bf16.msra.mxu0 %v30861_v61  ;;  %35028 = vmatprep.mubr.msk.f32.mxu0 %vm839_vm12, %v24098_v63 }
 0x74d   :  { %37788 = vmatprep.subr.bf16.mxu0 %v30870_v60 }
 0x74f   :  { %35029 = vmatmul.mubr.msk.f32.gmra.mrb[22].mxu0 %vm839_vm12, %v24099_v2 }
 0x750   :  { %37790 = vmatpush3.bf16.msra.mxu0 %v30862_v23  ;;  %3537 = vmatprep.mubr.f32.mxu0 %v40829_v17 }
 0x751   :  { %37792 = vmatprep.subr.bf16.mxu0 %v30871_v35 }
 0x754   :  { %37794 = vmatpush3.bf16.msra.mxu0 %v30863_v15  ;;  %v30917_v15 = vld [vmem:[%s47187_s3 + $0x9c0] sm:$0xff]  }
 0x755   :  { %37796 = vmatprep.subr.bf16.mxu0 %v30872_v20  ;;  %v24169_v20 = vld [vmem:[%s47188_s4 + $0x108] sm:$0xff] }
 0x758   :  { %37798 = vmatpush3.bf16.msra.mxu0 %v30864_v21  ;;  %v30918_v21 = vld [vmem:[%s47187_s3 + $0x9c8] sm:$0xff]  }
 0x759   :  { %37800 = vmatprep.subr.bf16.mxu0 %v30873_v25  ;;  %v24171_v25 = vld [vmem:[%s47188_s4 + $0x118] sm:$0xff] }
 0x75c   :  { %37802 = vmatpush3.bf16.msra.mxu0 %v30865_v56  ;;  %v30910_v56 = vld [vmem:[%s47187_s3 + $0x988] sm:$0xff]  }
 0x75d   :  { %37804 = vmatprep.subr.bf16.mxu0 %v30874_v36  ;;  %v30919_v36 = vld [vmem:[%s47187_s3 + $0x9d0] sm:$0xff]  }
 0x760   :  { %37806 = vmatpush3.bf16.msra.mxu0 %v30866_v43  ;;  %v30911_v43 = vld [vmem:[%s47187_s3 + $0x990] sm:$0xff]  }
 0x761   :  { %37808 = vmatprep.subr.bf16.mxu0 %v30875_v44  ;;  %v30920_v44 = vld [vmem:[%s47187_s3 + $0x9d8] sm:$0xff]  }
 0x764   :  { %37810 = vmatpush3.bf16.msra.mxu0 %v30867_v30  ;;  %v30912_v30 = vld [vmem:[%s47187_s3 + $0x998] sm:$0xff]  }
 0x765   :  { %37812 = vmatprep.subr.bf16.mxu0 %v30876_v42  ;;  %v30921_v42 = vld [vmem:[%s47187_s3 + $0x9e0] sm:$0xff]  }
 0x768   :  { %37814 = vmatpush3.bf16.msra.mxu0 %v30868_v22  ;;  %v30913_v22 = vld [vmem:[%s47187_s3 + $0x9a0] sm:$0xff]  }
 0x76b   :  { %3538 = vmatmul.mubr.f32.vlgmr.msra.gmra.mrb[44].mxu0 %v40841_v24 }
 0x76c   :  { %3542 = vmatprep.mubr.f32.mxu0 %v40854_v31 }
 0x76f   :  { %3543 = vmatmul.mubr.f32.gmra.mrb[46].mxu0 %v40862_v34 }
 0x770   :  { %35035 = vmatprep.mubr.msk.f32.mxu0 %vm839_vm12, %v24168_v1  ;;  %v30922_v1 = vld [vmem:[%s47187_s3 + $0x9e8] sm:$0xff]  }
 0x83e   :  { %v32264_v12 = vpop.f32.mrb[44].mxu0 }
 0x83f   :  { %v32265_v50 = vpop.f32.mrb[45].mxu0 }
 0x840   :  { %v32266_v52 = vadd.f32 %v32265_v50, %v32264_v12  ;;  %v30914_v12 = vld [vmem:[%s47187_s3 + $0x9a8] sm:$0xff]   ;;  %v30923_v50 = vld [vmem:[%s47187_s3 + $0x9f0] sm:$0xff]  }
 0x842   :  { %v3615_v61 = vadd.f32 %v41846_v28, %v32266_v52  ;;  %v32267_v63 = vpop.f32.mrb[46].mxu0  ;;  %v30909_v28 = vld [vmem:[%s47187_s3 + $0x980] sm:$0xff]   ;;  %v30915_v52 = vld [vmem:[%s47187_s3 + $0x9b0] sm:$0xff]  }
 0x843   :  { %v32268_v60 = vpop.f32.mrb[47].mxu0 }
 0x844   :  { %v32269_v2 = vadd.f32 %v32268_v60, %v32267_v63  ;;  %v30916_v63 = vld [vmem:[%s47187_s3 + $0x9b8] sm:$0xff]   ;;  %v24240_v60 = vld [vmem:[%s47188_s4 + $0x120] sm:$0xff] }
 0x846   :  { %v3620_v23 = vadd.f32 %v41854_v38, %v32269_v2  ;;  %v24170_v38 = vld [vmem:[%s47188_s4 + $0x110] sm:$0xff] }
 0x848   :  { %v37847_v35 = vpack.c.bf16 %v3620_v23, %v3615_v61  ;;  %v30924_v61 = vld [vmem:[%s47187_s3 + $0x9f8] sm:$0xff]  }
 0x84a   :  { %37848 = vmatprep.subr.bf16.mxu0 %v37847_v35 }
 0x84b   :  { %37850 = vmatpush3.bf16.msra.mxu0 %v37847_v35 }
 0x84c   :  { %37884 = vmatprep.subr.bf16.mxu0 %v30917_v15 }
 0x84e   :  { %35036 = vmatmul.mubr.msk.f32.vlgmr.msra.gmra.mrb[20].mxu0 %vm839_vm12, %v24169_v20 }
 0x84f   :  { %37886 = vmatpush3.bf16.msra.mxu0 %v30909_v28  ;;  %35038 = vmatprep.mubr.msk.f32.mxu0 %vm839_vm12, %v24170_v38 }
 0x850   :  { %37888 = vmatprep.subr.bf16.mxu0 %v30918_v21 }
 0x852   :  { %35039 = vmatmul.mubr.msk.f32.gmra.mrb[22].mxu0 %vm839_vm12, %v24171_v25 }
 0x853   :  { %37890 = vmatpush3.bf16.msra.mxu0 %v30910_v56  ;;  %3997 = vmatprep.mubr.f32.mxu0 %v40874_v37  ;;  %v30949_v56 = vld [vmem:[%s47187_s3 + $0xac0] sm:$0xff]  }
 0x854   :  { %37892 = vmatprep.subr.bf16.mxu0 %v30919_v36  ;;  %v24241_v36 = vld [vmem:[%s47188_s4 + $0x128] sm:$0xff] }
 0x857   :  { %37894 = vmatpush3.bf16.msra.mxu0 %v30911_v43  ;;  %v30950_v43 = vld [vmem:[%s47187_s3 + $0xac8] sm:$0xff]  }
 0x858   :  { %37896 = vmatprep.subr.bf16.mxu0 %v30920_v44  ;;  %v24243_v44 = vld [vmem:[%s47188_s4 + $0x138] sm:$0xff] }
 0x85b   :  { %37898 = vmatpush3.bf16.msra.mxu0 %v30912_v30  ;;  %v30942_v30 = vld [vmem:[%s47187_s3 + $0xa88] sm:$0xff]  }
 0x85c   :  { %37900 = vmatprep.subr.bf16.mxu0 %v30921_v42  ;;  %v30951_v42 = vld [vmem:[%s47187_s3 + $0xad0] sm:$0xff]  }
 0x85f   :  { %37902 = vmatpush3.bf16.msra.mxu0 %v30913_v22  ;;  %v30943_v22 = vld [vmem:[%s47187_s3 + $0xa90] sm:$0xff]  }
 0x860   :  { %37904 = vmatprep.subr.bf16.mxu0 %v30922_v1  ;;  %v30952_v1 = vld [vmem:[%s47187_s3 + $0xad8] sm:$0xff]  }
 0x863   :  { %37906 = vmatpush3.bf16.msra.mxu0 %v30914_v12  ;;  %v30944_v12 = vld [vmem:[%s47187_s3 + $0xa98] sm:$0xff]  }
 0x864   :  { %37908 = vmatprep.subr.bf16.mxu0 %v30923_v50  ;;  %v30953_v50 = vld [vmem:[%s47187_s3 + $0xae0] sm:$0xff]  }
 0x867   :  { %37910 = vmatpush3.bf16.msra.mxu0 %v30915_v52  ;;  %v30945_v52 = vld [vmem:[%s47187_s3 + $0xaa0] sm:$0xff]  }
 0x868   :  { %37912 = vmatprep.subr.bf16.mxu0 %v30924_v61  ;;  %v30954_v61 = vld [vmem:[%s47187_s3 + $0xae8] sm:$0xff]  }
 0x86b   :  { %37914 = vmatpush3.bf16.msra.mxu0 %v30916_v63  ;;  %v30946_v63 = vld [vmem:[%s47187_s3 + $0xaa8] sm:$0xff]  }
 0x86e   :  { %3998 = vmatmul.mubr.f32.vlgmr.msra.gmra.mrb[48].mxu0 %v40959_v4 }
 0x86f   :  { %4002 = vmatprep.mubr.f32.mxu0 %v40964_v7 }
 0x872   :  { %4003 = vmatmul.mubr.f32.gmra.mrb[50].mxu0 %v40979_v11 }
 0x873   :  { %35045 = vmatprep.mubr.msk.f32.mxu0 %vm839_vm12, %v24240_v60  ;;  %v30955_v60 = vld [vmem:[%s47187_s3 + $0xaf0] sm:$0xff]  }
 0x941   :  { %v32384_v2 = vpop.f32.mrb[48].mxu0 }
 0x942   :  { %v32385_v23 = vpop.f32.mrb[49].mxu0 }
 0x943   :  { %v32386_v35 = vadd.f32 %v32385_v23, %v32384_v2  ;;  %v30947_v2 = vld [vmem:[%s47187_s3 + $0xab0] sm:$0xff]   ;;  %v30956_v23 = vld [vmem:[%s47187_s3 + $0xaf8] sm:$0xff]  }
 0x945   :  { %v4000_v15 = vadd.f32 %v32386_v35, %v41906_v59  ;;  %v32387_v20 = vpop.f32.mrb[50].mxu0  ;;  %v30941_v59 = vld [vmem:[%s47187_s3 + $0xa80] sm:$0xff]   ;;  %v30948_v35 = vld [vmem:[%s47187_s3 + $0xab8] sm:$0xff]  }
 0x946   :  { %v32388_v28 = vpop.f32.mrb[51].mxu0 }
 0x947   :  { %v32389_v38 = vadd.f32 %v32388_v28, %v32387_v20 }
 0x949   :  { %v4005_v21 = vadd.f32 %v32389_v38, %v41914_v3  ;;  %v24242_v3 = vld [vmem:[%s47188_s4 + $0x130] sm:$0xff] }
 0x94b   :  { %v37915_v25 = vpack.c.bf16 %v4005_v21, %v4000_v15  ;;  %v24312_v15 = vld [vmem:[%s47188_s4 + $0x140] sm:$0xff] }
 0x94d   :  { %37916 = vmatprep.subr.bf16.mxu0 %v37915_v25 }
 0x94e   :  { %37918 = vmatpush3.bf16.msra.mxu0 %v37915_v25 }
 0x94f   :  { %37952 = vmatprep.subr.bf16.mxu0 %v30949_v56 }
 0x951   :  { %35046 = vmatmul.mubr.msk.f32.vlgmr.msra.gmra.mrb[20].mxu0 %vm839_vm12, %v24241_v36 }
 0x952   :  { %37954 = vmatpush3.bf16.msra.mxu0 %v30941_v59  ;;  %35048 = vmatprep.mubr.msk.f32.mxu0 %vm839_vm12, %v24242_v3 }
 0x953   :  { %37956 = vmatprep.subr.bf16.mxu0 %v30950_v43  ;;  %v30981_v43 = vld [vmem:[%s47187_s3 + $0xbc0] sm:$0xff]  }
 0x955   :  { %35049 = vmatmul.mubr.msk.f32.gmra.mrb[22].mxu0 %vm839_vm12, %v24243_v44  ;;  %v24313_v44 = vld [vmem:[%s47188_s4 + $0x148] sm:$0xff] }
 0x956   :  { %37958 = vmatpush3.bf16.msra.mxu0 %v30942_v30  ;;  %4382 = vmatprep.mubr.f32.mxu0 %v40874_v37  ;;  %v30982_v30 = vld [vmem:[%s47187_s3 + $0xbc8] sm:$0xff]  }
 0x957   :  { %37960 = vmatprep.subr.bf16.mxu0 %v30951_v42  ;;  %v24315_v42 = vld [vmem:[%s47188_s4 + $0x158] sm:$0xff] }
 0x95a   :  { %37962 = vmatpush3.bf16.msra.mxu0 %v30943_v22  ;;  %v30974_v22 = vld [vmem:[%s47187_s3 + $0xb88] sm:$0xff]  }
 0x95b   :  { %37964 = vmatprep.subr.bf16.mxu0 %v30952_v1  ;;  %v30983_v1 = vld [vmem:[%s47187_s3 + $0xbd0] sm:$0xff]  }
 0x95e   :  { %37966 = vmatpush3.bf16.msra.mxu0 %v30944_v12  ;;  %v30975_v12 = vld [vmem:[%s47187_s3 + $0xb90] sm:$0xff]  }
 0x95f   :  { %37968 = vmatprep.subr.bf16.mxu0 %v30953_v50  ;;  %v30984_v50 = vld [vmem:[%s47187_s3 + $0xbd8] sm:$0xff]  }
 0x962   :  { %37970 = vmatpush3.bf16.msra.mxu0 %v30945_v52  ;;  %v30976_v52 = vld [vmem:[%s47187_s3 + $0xb98] sm:$0xff]  }
 0x963   :  { %37972 = vmatprep.subr.bf16.mxu0 %v30954_v61  ;;  %v30985_v61 = vld [vmem:[%s47187_s3 + $0xbe0] sm:$0xff]  }
 0x966   :  { %37974 = vmatpush3.bf16.msra.mxu0 %v30946_v63  ;;  %v30977_v63 = vld [vmem:[%s47187_s3 + $0xba0] sm:$0xff]  }
 0x967   :  { %37976 = vmatprep.subr.bf16.mxu0 %v30955_v60  ;;  %v30986_v60 = vld [vmem:[%s47187_s3 + $0xbe8] sm:$0xff]  }
 0x96a   :  { %37978 = vmatpush3.bf16.msra.mxu0 %v30947_v2  ;;  %v30978_v2 = vld [vmem:[%s47187_s3 + $0xba8] sm:$0xff]  }
 0x96b   :  { %37980 = vmatprep.subr.bf16.mxu0 %v30956_v23  ;;  %v30987_v23 = vld [vmem:[%s47187_s3 + $0xbf0] sm:$0xff]  }
 0x96e   :  { %37982 = vmatpush3.bf16.msra.mxu0 %v30948_v35  ;;  %v30979_v35 = vld [vmem:[%s47187_s3 + $0xbb0] sm:$0xff]  }
 0x971   :  { %4383 = vmatmul.mubr.f32.vlgmr.msra.gmra.mrb[52].mxu0 %v40959_v4 }
 0x972   :  { %4387 = vmatprep.mubr.f32.mxu0 %v40964_v7 }
 0x975   :  { %4388 = vmatmul.mubr.f32.gmra.mrb[54].mxu0 %v40979_v11 }
 0x976   :  { %35055 = vmatprep.mubr.msk.f32.mxu0 %vm839_vm12, %v24312_v15  ;;  %v30988_v15 = vld [vmem:[%s47187_s3 + $0xbf8] sm:$0xff]  }
 0xa44   :  { %v32466_v20 = vpop.f32.mrb[52].mxu0 }
 0xa45   :  { %v32467_v28 = vpop.f32.mrb[53].mxu0 }
 0xa46   :  { %v32468_v38 = vadd.f32 %v32467_v28, %v32466_v20  ;;  %v30980_v20 = vld [vmem:[%s47187_s3 + $0xbb8] sm:$0xff]   ;;  %v24384_v28 = vld [vmem:[%s47188_s4 + $0x160] sm:$0xff] }
 0xa48   :  { %v4385_v21 = vadd.f32 %v32468_v38, %v41962_v29  ;;  %v32469_v25 = vpop.f32.mrb[54].mxu0  ;;  %v30973_v29 = vld [vmem:[%s47187_s3 + $0xb80] sm:$0xff]  }
 0xa49   :  { %v32470_v56 = vpop.f32.mrb[55].mxu0 }
 0xa4a   :  { %v32471_v36 = vadd.f32 %v32470_v56, %v32469_v25 }
 0xa4c   :  { %v4390_v59 = vadd.f32 %v32471_v36, %v41970_v40  ;;  %v24314_v40 = vld [vmem:[%s47188_s4 + $0x150] sm:$0xff] }
 0xa4e   :  { %v37983_v3 = vpack.c.bf16 %v4390_v59, %v4385_v21 }
 0xa50   :  { %37984 = vmatprep.subr.bf16.mxu0 %v37983_v3 }
 0xa51   :  { %37986 = vmatpush3.bf16.msra.mxu0 %v37983_v3 }
 0xa52   :  { %38020 = vmatprep.subr.bf16.mxu0 %v30981_v43 }
 0xa54   :  { %35056 = vmatmul.mubr.msk.f32.vlgmr.msra.gmra.mrb[20].mxu0 %vm839_vm12, %v24313_v44 }
 0xa55   :  { %38022 = vmatpush3.bf16.msra.mxu0 %v30973_v29  ;;  %35058 = vmatprep.mubr.msk.f32.mxu0 %vm839_vm12, %v24314_v40  ;;  %v31013_v29 = vld [vmem:[%s47187_s3 + $0xcc0] sm:$0xff]   ;;  %v24385_v40 = vld [vmem:[%s47188_s4 + $0x168] sm:$0xff] }
 0xa56   :  { %38024 = vmatprep.subr.bf16.mxu0 %v30982_v30  ;;  %v31014_v30 = vld [vmem:[%s47187_s3 + $0xcc8] sm:$0xff]  }
 0xa58   :  { %35059 = vmatmul.mubr.msk.f32.gmra.mrb[22].mxu0 %vm839_vm12, %v24315_v42  ;;  %v24387_v42 = vld [vmem:[%s47188_s4 + $0x178] sm:$0xff] }
 0xa59   :  { %38026 = vmatpush3.bf16.msra.mxu0 %v30974_v22  ;;  %4767 = vmatprep.mubr.f32.mxu0 %v40874_v37  ;;  %v31006_v22 = vld [vmem:[%s47187_s3 + $0xc88] sm:$0xff]  }
 0xa5a   :  { %38028 = vmatprep.subr.bf16.mxu0 %v30983_v1  ;;  %v31015_v1 = vld [vmem:[%s47187_s3 + $0xcd0] sm:$0xff]  }
 0xa5d   :  { %38030 = vmatpush3.bf16.msra.mxu0 %v30975_v12  ;;  %v31007_v12 = vld [vmem:[%s47187_s3 + $0xc90] sm:$0xff]  }
 0xa5e   :  { %38032 = vmatprep.subr.bf16.mxu0 %v30984_v50  ;;  %v31016_v50 = vld [vmem:[%s47187_s3 + $0xcd8] sm:$0xff]  }
 0xa61   :  { %38034 = vmatpush3.bf16.msra.mxu0 %v30976_v52  ;;  %v31008_v52 = vld [vmem:[%s47187_s3 + $0xc98] sm:$0xff]  }
 0xa62   :  { %38036 = vmatprep.subr.bf16.mxu0 %v30985_v61  ;;  %v31017_v61 = vld [vmem:[%s47187_s3 + $0xce0] sm:$0xff]  }
 0xa65   :  { %38038 = vmatpush3.bf16.msra.mxu0 %v30977_v63  ;;  %v31009_v63 = vld [vmem:[%s47187_s3 + $0xca0] sm:$0xff]  }
 0xa66   :  { %38040 = vmatprep.subr.bf16.mxu0 %v30986_v60  ;;  %v31018_v60 = vld [vmem:[%s47187_s3 + $0xce8] sm:$0xff]  }
 0xa69   :  { %38042 = vmatpush3.bf16.msra.mxu0 %v30978_v2  ;;  %v31010_v2 = vld [vmem:[%s47187_s3 + $0xca8] sm:$0xff]  }
 0xa6a   :  { %38044 = vmatprep.subr.bf16.mxu0 %v30987_v23  ;;  %v31019_v23 = vld [vmem:[%s47187_s3 + $0xcf0] sm:$0xff]  }
 0xa6d   :  { %38046 = vmatpush3.bf16.msra.mxu0 %v30979_v35  ;;  %v31011_v35 = vld [vmem:[%s47187_s3 + $0xcb0] sm:$0xff]  }
 0xa6e   :  { %38048 = vmatprep.subr.bf16.mxu0 %v30988_v15  ;;  %v31020_v15 = vld [vmem:[%s47187_s3 + $0xcf8] sm:$0xff]  }
 0xa71   :  { %38050 = vmatpush3.bf16.msra.mxu0 %v30980_v20  ;;  %v31012_v20 = vld [vmem:[%s47187_s3 + $0xcb8] sm:$0xff]  }
 0xa74   :  { %4768 = vmatmul.mubr.f32.vlgmr.msra.gmra.mrb[56].mxu0 %v40959_v4 }
 0xa75   :  { %4772 = vmatprep.mubr.f32.mxu0 %v40964_v7 }
 0xa78   :  { %4773 = vmatmul.mubr.f32.gmra.mrb[58].mxu0 %v40979_v11 }
 0xa79   :  { %35065 = vmatprep.mubr.msk.f32.mxu0 %vm839_vm12, %v24384_v28  ;;  %v24456_v28 = vld [vmem:[%s47188_s4 + $0x180] sm:$0xff] }
 0xb47   :  { %v32548_v38 = vpop.f32.mrb[56].mxu0 }
 0xb48   :  { %v32549_v21 = vpop.f32.mrb[57].mxu0 }
 0xb49   :  { %v32550_v25 = vadd.f32 %v32549_v21, %v32548_v38 }
 0xb4b   :  { %v4770_v56 = vadd.f32 %v32550_v25, %v42018_v62  ;;  %v32551_v36 = vpop.f32.mrb[58].mxu0  ;;  %v31005_v62 = vld [vmem:[%s47187_s3 + $0xc80] sm:$0xff]  }
 0xb4c   :  { %v32552_v59 = vpop.f32.mrb[59].mxu0 }
 0xb4d   :  { %v32553_v3 = vadd.f32 %v32552_v59, %v32551_v36 }
 0xb4f   :  { %v4775_v43 = vadd.f32 %v32553_v3, %v42026_v9  ;;  %v24386_v9 = vld [vmem:[%s47188_s4 + $0x170] sm:$0xff] }
 0xb51   :  { %v38051_v44 = vpack.c.bf16 %v4775_v43, %v4770_v56 }
 0xb53   :  { %38052 = vmatprep.subr.bf16.mxu0 %v38051_v44 }
 0xb54   :  { %38054 = vmatpush3.bf16.msra.mxu0 %v38051_v44 }
 0xb55   :  { %38088 = vmatprep.subr.bf16.mxu0 %v31013_v29  ;;  %v24457_v29 = vld [vmem:[%s47188_s4 + $0x188] sm:$0xff] }
 0xb57   :  { %35066 = vmatmul.mubr.msk.f32.vlgmr.msra.gmra.mrb[20].mxu0 %vm839_vm12, %v24385_v40  ;;  %v24458_v40 = vld [vmem:[%s47188_s4 + $0x190] sm:$0xff] }
 0xb58   :  { %38090 = vmatpush3.bf16.msra.mxu0 %v31005_v62  ;;  %35068 = vmatprep.mubr.msk.f32.mxu0 %vm839_vm12, %v24386_v9  ;;  %v24528_v62 = vld [vmem:[%s47188_s4 + $0x1a0] sm:$0xff]  ;;  %v24529_v9 = vld [vmem:[%s47188_s4 + $0x1a8] sm:$0xff] }
 0xb59   :  { %38092 = vmatprep.subr.bf16.mxu0 %v31014_v30  ;;  %v24530_v30 = vld [vmem:[%s47188_s4 + $0x1b0] sm:$0xff] }
 0xb5b   :  { %35069 = vmatmul.mubr.msk.f32.gmra.mrb[22].mxu0 %vm839_vm12, %v24387_v42  ;;  %v31062_v42 = vld [vmem:[%s47187_s3 + $0xe48] sm:$0xff]  }
 0xb5c   :  { %38094 = vmatpush3.bf16.msra.mxu0 %v31006_v22  ;;  %5152 = vmatprep.mubr.f32.mxu0 %v40874_v37  ;;  %v24531_v22 = vld [vmem:[%s47188_s4 + $0x1b8] sm:$0xff] }
 0xb5d   :  { %38096 = vmatprep.subr.bf16.mxu0 %v31015_v1  ;;  %v31054_v1 = vld [vmem:[%s47187_s3 + $0xe08] sm:$0xff]  }
 0xb60   :  { %38098 = vmatpush3.bf16.msra.mxu0 %v31007_v12  ;;  %v31063_v12 = vld [vmem:[%s47187_s3 + $0xe50] sm:$0xff]  }
 0xb61   :  { %38100 = vmatprep.subr.bf16.mxu0 %v31016_v50  ;;  %v31055_v50 = vld [vmem:[%s47187_s3 + $0xe10] sm:$0xff]  }
 0xb64   :  { %38102 = vmatpush3.bf16.msra.mxu0 %v31008_v52  ;;  %v31064_v52 = vld [vmem:[%s47187_s3 + $0xe58] sm:$0xff]  }
 0xb65   :  { %38104 = vmatprep.subr.bf16.mxu0 %v31017_v61  ;;  %v31056_v61 = vld [vmem:[%s47187_s3 + $0xe18] sm:$0xff]  }
 0xb68   :  { %38106 = vmatpush3.bf16.msra.mxu0 %v31009_v63  ;;  %v31065_v63 = vld [vmem:[%s47187_s3 + $0xe60] sm:$0xff]  }
 0xb69   :  { %38108 = vmatprep.subr.bf16.mxu0 %v31018_v60  ;;  %v31057_v60 = vld [vmem:[%s47187_s3 + $0xe20] sm:$0xff]  }
 0xb6c   :  { %38110 = vmatpush3.bf16.msra.mxu0 %v31010_v2  ;;  %v31066_v2 = vld [vmem:[%s47187_s3 + $0xe68] sm:$0xff]  }
 0xb6d   :  { %38112 = vmatprep.subr.bf16.mxu0 %v31019_v23  ;;  %v31058_v23 = vld [vmem:[%s47187_s3 + $0xe28] sm:$0xff]  }
 0xb70   :  { %38114 = vmatpush3.bf16.msra.mxu0 %v31011_v35  ;;  %v31067_v35 = vld [vmem:[%s47187_s3 + $0xe70] sm:$0xff]  }
 0xb71   :  { %38116 = vmatprep.subr.bf16.mxu0 %v31020_v15  ;;  %v31059_v15 = vld [vmem:[%s47187_s3 + $0xe30] sm:$0xff]  }
 0xb74   :  { %38118 = vmatpush3.bf16.msra.mxu0 %v31012_v20  ;;  %v31068_v20 = vld [vmem:[%s47187_s3 + $0xe78] sm:$0xff]  }
 0xb77   :  { %5153 = vmatmul.mubr.f32.vlgmr.msra.gmra.mrb[60].mxu0 %v40959_v4 }
 0xb78   :  { %5157 = vmatprep.mubr.f32.mxu0 %v40964_v7 }
 0xb7b   :  { %5158 = vmatmul.mubr.f32.gmra.mrb[62].mxu0 %v40979_v11 }
 0xb7c   :  { %35075 = vmatprep.mubr.msk.f32.mxu0 %vm839_vm12, %v24456_v28  ;;  %v31060_v28 = vld [vmem:[%s47187_s3 + $0xe38] sm:$0xff]  }
 0xc4a   :  { %v32630_v38 = vpop.f32.mrb[60].mxu0 }
 0xc4b   :  { %v32631_v21 = vpop.f32.mrb[61].mxu0 }
 0xc4c   :  { %v32632_v25 = vadd.f32 %v32631_v21, %v32630_v38  ;;  %v24600_v38 = vld [vmem:[%s47188_s4 + $0x1c0] sm:$0xff] }
 0xc4e   :  { %v5155_v56 = vadd.f32 %v32632_v25, %v42074_v39  ;;  %v32633_v36 = vpop.f32.mrb[62].mxu0  ;;  %v31061_v39 = vld [vmem:[%s47187_s3 + $0xe40] sm:$0xff]  }
 0xc4f   :  { %v32634_v59 = vpop.f32.mrb[63].mxu0 }
 0xc50   :  { %v32635_v3 = vadd.f32 %v32634_v59, %v32633_v36 }
 0xc52   :  { %v5160_v43 = vadd.f32 %v32635_v3, %v42082_v47  ;;  %v24459_v47 = vld [vmem:[%s47188_s4 + $0x198] sm:$0xff] }
 0xc54   :  { %v38119_v44 = vpack.c.bf16 %v5160_v43, %v5155_v56 }
 0xc56   :  { %38120 = vmatprep.subr.bf16.mxu0 %v38119_v44 }
 0xc57   :  { %38122 = vmatpush3.bf16.msra.mxu0 %v38119_v44 }
 0xc58   :  { %38188 = vmatprep.subr.bf16.mxu0 %v42266_v45 }
 0xc5a   :  { %35076 = vmatmul.mubr.msk.f32.vlgmr.msra.gmra.mrb[20].mxu0 %vm839_vm12, %v24457_v29 }
 0xc5b   :  { %38190 = vmatpush3.bf16.msra.mxu0 %v42266_v45  ;;  %35078 = vmatprep.mubr.msk.f32.mxu0 %vm839_vm12, %v24458_v40  ;;  %v31053_v45 = vld [vmem:[%s47187_s3 + $0xe00] sm:$0xff]  }
 0xc5c   :  { %38192 = vmatprep.subr.bf16.mxu0 %v31061_v39  ;;  %v31093_v40 = vld [vmem:[%s47187_s3 + $0xf40] sm:$0xff]   ;;  %v24601_v39 = vld [vmem:[%s47188_s4 + $0x1c8] sm:$0xff] }
 0xc5e   :  { %35079 = vmatmul.mubr.msk.f32.gmra.mrb[22].mxu0 %vm839_vm12, %v24459_v47  ;;  %v31094_v47 = vld [vmem:[%s47187_s3 + $0xf48] sm:$0xff]  }
 0xc5f   :  { %35085 = vmatprep.mubr.msk.f32.mxu0 %vm839_vm12, %v24528_v62  ;;  %v24603_v62 = vld [vmem:[%s47188_s4 + $0x1d8] sm:$0xff] }
 0xc62   :  { %35086 = vmatmul.mubr.msk.f32.vlgmr.msra.gmra.mrb[20].mxu0 %vm839_vm12, %v24529_v9  ;;  %v31086_v9 = vld [vmem:[%s47187_s3 + $0xf08] sm:$0xff]  }
 0xc63   :  { %38194 = vmatpush3.bf16.msra.mxu0 %v31053_v45  ;;  %35088 = vmatprep.mubr.msk.f32.mxu0 %vm839_vm12, %v24530_v30  ;;  %v31095_v45 = vld [vmem:[%s47187_s3 + $0xf50] sm:$0xff]  }
 0xc64   :  { %38196 = vmatprep.subr.bf16.mxu0 %v31062_v42  ;;  %v31087_v30 = vld [vmem:[%s47187_s3 + $0xf10] sm:$0xff]   ;;  %v31096_v42 = vld [vmem:[%s47187_s3 + $0xf58] sm:$0xff]  }
 0xc66   :  { %35089 = vmatmul.mubr.msk.f32.gmra.mrb[22].mxu0 %vm839_vm12, %v24531_v22  ;;  %v31088_v22 = vld [vmem:[%s47187_s3 + $0xf18] sm:$0xff]  }
 0xc67   :  { %38198 = vmatpush3.bf16.msra.mxu0 %v31054_v1  ;;  %5847 = vmatprep.mubr.f32.mxu0 %v40829_v17  ;;  %v31097_v1 = vld [vmem:[%s47187_s3 + $0xf60] sm:$0xff]  }
 0xc68   :  { %38200 = vmatprep.subr.bf16.mxu0 %v31063_v12  ;;  %v31089_v12 = vld [vmem:[%s47187_s3 + $0xf20] sm:$0xff]  }
 0xc6b   :  { %38202 = vmatpush3.bf16.msra.mxu0 %v31055_v50  ;;  %v31098_v50 = vld [vmem:[%s47187_s3 + $0xf68] sm:$0xff]  }
 0xc6c   :  { %38204 = vmatprep.subr.bf16.mxu0 %v31064_v52  ;;  %v31090_v52 = vld [vmem:[%s47187_s3 + $0xf28] sm:$0xff]  }
 0xc6f   :  { %38206 = vmatpush3.bf16.msra.mxu0 %v31056_v61  ;;  %v31099_v61 = vld [vmem:[%s47187_s3 + $0xf70] sm:$0xff]  }
 0xc70   :  { %38208 = vmatprep.subr.bf16.mxu0 %v31065_v63  ;;  %v31091_v63 = vld [vmem:[%s47187_s3 + $0xf30] sm:$0xff]  }
 0xc73   :  { %38210 = vmatpush3.bf16.msra.mxu0 %v31057_v60  ;;  %v31100_v60 = vld [vmem:[%s47187_s3 + $0xf78] sm:$0xff]  }
 0xc74   :  { %38212 = vmatprep.subr.bf16.mxu0 %v31066_v2  ;;  %v31092_v2 = vld [vmem:[%s47187_s3 + $0xf38] sm:$0xff]  }
 0xc77   :  { %38214 = vmatpush3.bf16.msra.mxu0 %v31058_v23  ;;  %v24672_v23 = vld [vmem:[%s47188_s4 + $0x1e0] sm:$0xff] }
 0xc78   :  { %38216 = vmatprep.subr.bf16.mxu0 %v31067_v35 }
 0xc7b   :  { %38218 = vmatpush3.bf16.msra.mxu0 %v31059_v15 }
 0xc7c   :  { %38220 = vmatprep.subr.bf16.mxu0 %v31068_v20 }
 0xc7f   :  { %38222 = vmatpush3.bf16.msra.mxu0 %v31060_v28 }
 0xc82   :  { %5848 = vmatmul.mubr.f32.vlgmr.msra.gmra.mrb[64].mxu0 %v40841_v24 }
 0xc83   :  { %5852 = vmatprep.mubr.f32.mxu0 %v40854_v31 }
 0xc86   :  { %5853 = vmatmul.mubr.f32.gmra.mrb[66].mxu0 %v40862_v34 }
 0xc87   :  { %35095 = vmatprep.mubr.msk.f32.mxu0 %vm839_vm12, %v24600_v38 }
 0xd55   :  { %v32756_v21 = vpop.f32.mrb[64].mxu0 }
 0xd56   :  { %v32757_v25 = vpop.f32.mrb[65].mxu0 }
 0xd57   :  { %v32758_v56 = vadd.f32 %v32757_v25, %v32756_v21 }
 0xd59   :  { %v5925_v36 = vadd.f32 %v42308_v13, %v32758_v56  ;;  %v32759_v59 = vpop.f32.mrb[66].mxu0  ;;  %v31085_v13 = vld [vmem:[%s47187_s3 + $0xf00] sm:$0xff]  }
 0xd5a   :  { %v32760_v3 = vpop.f32.mrb[67].mxu0 }
 0xd5b   :  { %v32761_v43 = vadd.f32 %v32760_v3, %v32759_v59  ;;  %v31125_v59 = vld [vmem:[%s47187_s3 + $0x1040] sm:$0xff]   ;;  %v24673_v3 = vld [vmem:[%s47188_s4 + $0x1e8] sm:$0xff] }
 0xd5d   :  { %v5930_v44 = vadd.f32 %v42316_v18, %v32761_v43  ;;  %v24602_v18 = vld [vmem:[%s47188_s4 + $0x1d0] sm:$0xff]  ;;  %v31126_v43 = vld [vmem:[%s47187_s3 + $0x1048] sm:$0xff]  }
 0xd5f   :  { %v38255_v29 = vpack.c.bf16 %v5930_v44, %v5925_v36  ;;  %v24675_v44 = vld [vmem:[%s47188_s4 + $0x1f8] sm:$0xff] }
 0xd61   :  { %38256 = vmatprep.subr.bf16.mxu0 %v38255_v29 }
 0xd62   :  { %38258 = vmatpush3.bf16.msra.mxu0 %v38255_v29  ;;  %v31118_v29 = vld [vmem:[%s47187_s3 + $0x1008] sm:$0xff]  }
 0xd63   :  { %38260 = vmatprep.subr.bf16.mxu0 %v31093_v40  ;;  %v31127_v40 = vld [vmem:[%s47187_s3 + $0x1050] sm:$0xff]  }
 0xd65   :  { %35096 = vmatmul.mubr.msk.f32.vlgmr.msra.gmra.mrb[20].mxu0 %vm839_vm12, %v24601_v39  ;;  %v31119_v39 = vld [vmem:[%s47187_s3 + $0x1010] sm:$0xff]  }
 0xd66   :  { %38262 = vmatpush3.bf16.msra.mxu0 %v31085_v13  ;;  %35098 = vmatprep.mubr.msk.f32.mxu0 %vm839_vm12, %v24602_v18  ;;  %v31128_v13 = vld [vmem:[%s47187_s3 + $0x1058] sm:$0xff]  }
 0xd67   :  { %38264 = vmatprep.subr.bf16.mxu0 %v31094_v47  ;;  %v31120_v18 = vld [vmem:[%s47187_s3 + $0x1018] sm:$0xff]   ;;  %v31129_v47 = vld [vmem:[%s47187_s3 + $0x1060] sm:$0xff]  }
 0xd69   :  { %35099 = vmatmul.mubr.msk.f32.gmra.mrb[22].mxu0 %vm839_vm12, %v24603_v62  ;;  %v31121_v62 = vld [vmem:[%s47187_s3 + $0x1020] sm:$0xff]  }
 0xd6a   :  { %38266 = vmatpush3.bf16.msra.mxu0 %v31086_v9  ;;  %6232 = vmatprep.mubr.f32.mxu0 %v40829_v17  ;;  %v31130_v9 = vld [vmem:[%s47187_s3 + $0x1068] sm:$0xff]  }
 0xd6b   :  { %38268 = vmatprep.subr.bf16.mxu0 %v31095_v45  ;;  %v31122_v45 = vld [vmem:[%s47187_s3 + $0x1028] sm:$0xff]  }
 0xd6e   :  { %38270 = vmatpush3.bf16.msra.mxu0 %v31087_v30  ;;  %v31131_v30 = vld [vmem:[%s47187_s3 + $0x1070] sm:$0xff]  }
 0xd6f   :  { %38272 = vmatprep.subr.bf16.mxu0 %v31096_v42  ;;  %v31123_v42 = vld [vmem:[%s47187_s3 + $0x1030] sm:$0xff]  }
 0xd72   :  { %38274 = vmatpush3.bf16.msra.mxu0 %v31088_v22  ;;  %v31132_v22 = vld [vmem:[%s47187_s3 + $0x1078] sm:$0xff]  }
 0xd73   :  { %38276 = vmatprep.subr.bf16.mxu0 %v31097_v1  ;;  %v31124_v1 = vld [vmem:[%s47187_s3 + $0x1038] sm:$0xff]  }
 0xd76   :  { %38278 = vmatpush3.bf16.msra.mxu0 %v31089_v12  ;;  %v24744_v12 = vld [vmem:[%s47188_s4 + $0x200] sm:$0xff] }
 0xd77   :  { %38280 = vmatprep.subr.bf16.mxu0 %v31098_v50 }
 0xd7a   :  { %38282 = vmatpush3.bf16.msra.mxu0 %v31090_v52 }
 0xd7b   :  { %38284 = vmatprep.subr.bf16.mxu0 %v31099_v61 }
 0xd7e   :  { %38286 = vmatpush3.bf16.msra.mxu0 %v31091_v63 }
 0xd7f   :  { %38288 = vmatprep.subr.bf16.mxu0 %v31100_v60 }
 0xd82   :  { %38290 = vmatpush3.bf16.msra.mxu0 %v31092_v2 }
 0xd85   :  { %6233 = vmatmul.mubr.f32.vlgmr.msra.gmra.mrb[68].mxu0 %v40841_v24 }
 0xd86   :  { %6237 = vmatprep.mubr.f32.mxu0 %v40854_v31 }
 0xd89   :  { %6238 = vmatmul.mubr.f32.gmra.mrb[70].mxu0 %v40862_v34 }
 0xd8a   :  { %35105 = vmatprep.mubr.msk.f32.mxu0 %vm839_vm12, %v24672_v23 }
 0xe58   :  { %v32838_v35 = vpop.f32.mrb[68].mxu0 }
 0xe59   :  { %v32839_v15 = vpop.f32.mrb[69].mxu0 }
 0xe5a   :  { %v32840_v20 = vadd.f32 %v32839_v15, %v32838_v35 }
 0xe5c   :  { %v6310_v28 = vadd.f32 %v42364_v51, %v32840_v20  ;;  %v32841_v38 = vpop.f32.mrb[70].mxu0  ;;  %v31117_v51 = vld [vmem:[%s47187_s3 + $0x1000] sm:$0xff]  }
 0xe5d   :  { %v32842_v21 = vpop.f32.mrb[71].mxu0  ;;  %v31173_v20 = vld [vmem:[%s47187_s3 + $0x11c0] sm:$0xff]  }
 0xe5e   :  { %v32843_v25 = vadd.f32 %v32842_v21, %v32841_v38  ;;  %v31174_v38 = vld [vmem:[%s47187_s3 + $0x11c8] sm:$0xff]   ;;  %v24747_v21 = vld [vmem:[%s47188_s4 + $0x218] sm:$0xff] }
 0xe60   :  { %v6315_v56 = vadd.f32 %v42372_v57, %v32843_v25  ;;  %v24674_v57 = vld [vmem:[%s47188_s4 + $0x1f0] sm:$0xff]  ;;  %v31166_v25 = vld [vmem:[%s47187_s3 + $0x1188] sm:$0xff]  }
 0xe62   :  { %v38323_v36 = vpack.c.bf16 %v6315_v56, %v6310_v28  ;;  %v24745_v28 = vld [vmem:[%s47188_s4 + $0x208] sm:$0xff]  ;;  %v31175_v56 = vld [vmem:[%s47187_s3 + $0x11d0] sm:$0xff]  }
 0xe64   :  { %38324 = vmatprep.subr.bf16.mxu0 %v38323_v36 }
 0xe65   :  { %38326 = vmatpush3.bf16.msra.mxu0 %v38323_v36  ;;  %v31167_v36 = vld [vmem:[%s47187_s3 + $0x1190] sm:$0xff]  }
 0xe66   :  { %38328 = vmatprep.subr.bf16.mxu0 %v31125_v59  ;;  %v31176_v59 = vld [vmem:[%s47187_s3 + $0x11d8] sm:$0xff]  }
 0xe68   :  { %35106 = vmatmul.mubr.msk.f32.vlgmr.msra.gmra.mrb[20].mxu0 %vm839_vm12, %v24673_v3  ;;  %v31168_v3 = vld [vmem:[%s47187_s3 + $0x1198] sm:$0xff]  }
 0xe69   :  { %38330 = vmatpush3.bf16.msra.mxu0 %v31117_v51  ;;  %35108 = vmatprep.mubr.msk.f32.mxu0 %vm839_vm12, %v24674_v57  ;;  %v31177_v51 = vld [vmem:[%s47187_s3 + $0x11e0] sm:$0xff]  }
 0xe6a   :  { %38332 = vmatprep.subr.bf16.mxu0 %v31126_v43  ;;  %v31169_v57 = vld [vmem:[%s47187_s3 + $0x11a0] sm:$0xff]   ;;  %v31178_v43 = vld [vmem:[%s47187_s3 + $0x11e8] sm:$0xff]  }
 0xe6c   :  { %35109 = vmatmul.mubr.msk.f32.gmra.mrb[22].mxu0 %vm839_vm12, %v24675_v44  ;;  %v31170_v44 = vld [vmem:[%s47187_s3 + $0x11a8] sm:$0xff]  }
 0xe6d   :  { %38334 = vmatpush3.bf16.msra.mxu0 %v31118_v29  ;;  %6617 = vmatprep.mubr.f32.mxu0 %v40829_v17  ;;  %v31179_v29 = vld [vmem:[%s47187_s3 + $0x11f0] sm:$0xff]  }
 0xe6e   :  { %38336 = vmatprep.subr.bf16.mxu0 %v31127_v40  ;;  %v31171_v40 = vld [vmem:[%s47187_s3 + $0x11b0] sm:$0xff]  }
 0xe71   :  { %38338 = vmatpush3.bf16.msra.mxu0 %v31119_v39  ;;  %v31180_v39 = vld [vmem:[%s47187_s3 + $0x11f8] sm:$0xff]  }
 0xe72   :  { %38340 = vmatprep.subr.bf16.mxu0 %v31128_v13  ;;  %v31172_v13 = vld [vmem:[%s47187_s3 + $0x11b8] sm:$0xff]  }
 0xe75   :  { %38342 = vmatpush3.bf16.msra.mxu0 %v31120_v18  ;;  %v24816_v18 = vld [vmem:[%s47188_s4 + $0x220] sm:$0xff] }
 0xe76   :  { %38344 = vmatprep.subr.bf16.mxu0 %v31129_v47 }
 0xe79   :  { %38346 = vmatpush3.bf16.msra.mxu0 %v31121_v62 }
 0xe7a   :  { %38348 = vmatprep.subr.bf16.mxu0 %v31130_v9 }
 0xe7d   :  { %38350 = vmatpush3.bf16.msra.mxu0 %v31122_v45 }
 0xe7e   :  { %38352 = vmatprep.subr.bf16.mxu0 %v31131_v30 }
 0xe81   :  { %38354 = vmatpush3.bf16.msra.mxu0 %v31123_v42 }
 0xe82   :  { %38356 = vmatprep.subr.bf16.mxu0 %v31132_v22 }
 0xe85   :  { %38358 = vmatpush3.bf16.msra.mxu0 %v31124_v1 }
 0xe88   :  { %6618 = vmatmul.mubr.f32.vlgmr.msra.gmra.mrb[72].mxu0 %v40841_v24 }
 0xe89   :  { %6622 = vmatprep.mubr.f32.mxu0 %v40854_v31 }
 0xe8c   :  { %6623 = vmatmul.mubr.f32.gmra.mrb[74].mxu0 %v40862_v34 }
 0xe8d   :  { %35115 = vmatprep.mubr.msk.f32.mxu0 %vm839_vm12, %v24744_v12 }
 0xf5b   :  { %v32920_v50 = vpop.f32.mrb[72].mxu0 }
 0xf5c   :  { %v32921_v52 = vpop.f32.mrb[73].mxu0 }
 0xf5d   :  { %v32922_v61 = vadd.f32 %v32921_v52, %v32920_v50  ;;  %v31205_v50 = vld [vmem:[%s47187_s3 + $0x12c0] sm:$0xff]   ;;  %v24817_v52 = vld [vmem:[%s47188_s4 + $0x228] sm:$0xff] }
 0xf5f   :  { %v6695_v63 = vadd.f32 %v42424_v26, %v32922_v61  ;;  %v32923_v60 = vpop.f32.mrb[74].mxu0  ;;  %v31165_v26 = vld [vmem:[%s47187_s3 + $0x1180] sm:$0xff]   ;;  %v31206_v61 = vld [vmem:[%s47187_s3 + $0x12c8] sm:$0xff]  }
 0xf60   :  { %v32924_v2 = vpop.f32.mrb[75].mxu0 }
 0xf61   :  { %v32925_v23 = vadd.f32 %v32924_v2, %v32923_v60  ;;  %v31198_v60 = vld [vmem:[%s47187_s3 + $0x1288] sm:$0xff]   ;;  %v31207_v2 = vld [vmem:[%s47187_s3 + $0x12d0] sm:$0xff]  }
 0xf63   :  { %v6700_v35 = vadd.f32 %v42432_v41, %v32925_v23  ;;  %v24746_v41 = vld [vmem:[%s47188_s4 + $0x210] sm:$0xff] }
 0xf64   :  { %v31199_v23 = vld [vmem:[%s47187_s3 + $0x1290] sm:$0xff]  }
 0xf65   :  { %v38391_v15 = vpack.c.bf16 %v6700_v35, %v6695_v63  ;;  %v24819_v63 = vld [vmem:[%s47188_s4 + $0x238] sm:$0xff] }
 0xf66   :  { %v31208_v35 = vld [vmem:[%s47187_s3 + $0x12d8] sm:$0xff]  }
 0xf67   :  { %38392 = vmatprep.subr.bf16.mxu0 %v38391_v15 }
 0xf68   :  { %38394 = vmatpush3.bf16.msra.mxu0 %v38391_v15  ;;  %v31200_v15 = vld [vmem:[%s47187_s3 + $0x1298] sm:$0xff]  }
 0xf69   :  { %38428 = vmatprep.subr.bf16.mxu0 %v31173_v20  ;;  %v31209_v20 = vld [vmem:[%s47187_s3 + $0x12e0] sm:$0xff]  }
 0xf6b   :  { %35116 = vmatmul.mubr.msk.f32.vlgmr.msra.gmra.mrb[20].mxu0 %vm839_vm12, %v24745_v28  ;;  %v31201_v28 = vld [vmem:[%s47187_s3 + $0x12a0] sm:$0xff]  }
 0xf6c   :  { %38430 = vmatpush3.bf16.msra.mxu0 %v31165_v26  ;;  %35118 = vmatprep.mubr.msk.f32.mxu0 %vm839_vm12, %v24746_v41  ;;  %v31210_v26 = vld [vmem:[%s47187_s3 + $0x12e8] sm:$0xff]  }
 0xf6d   :  { %38432 = vmatprep.subr.bf16.mxu0 %v31174_v38  ;;  %v31202_v41 = vld [vmem:[%s47187_s3 + $0x12a8] sm:$0xff]   ;;  %v31211_v38 = vld [vmem:[%s47187_s3 + $0x12f0] sm:$0xff]  }
 0xf6f   :  { %35119 = vmatmul.mubr.msk.f32.gmra.mrb[22].mxu0 %vm839_vm12, %v24747_v21  ;;  %v31203_v21 = vld [vmem:[%s47187_s3 + $0x12b0] sm:$0xff]  }
 0xf70   :  { %38434 = vmatpush3.bf16.msra.mxu0 %v31166_v25  ;;  %7077 = vmatprep.mubr.f32.mxu0 %v40874_v37  ;;  %v31212_v25 = vld [vmem:[%s47187_s3 + $0x12f8] sm:$0xff]  }
 0xf71   :  { %38436 = vmatprep.subr.bf16.mxu0 %v31175_v56  ;;  %v31204_v56 = vld [vmem:[%s47187_s3 + $0x12b8] sm:$0xff]  }
 0xf74   :  { %38438 = vmatpush3.bf16.msra.mxu0 %v31167_v36  ;;  %v24888_v36 = vld [vmem:[%s47188_s4 + $0x240] sm:$0xff] }
 0xf75   :  { %38440 = vmatprep.subr.bf16.mxu0 %v31176_v59 }
 0xf78   :  { %38442 = vmatpush3.bf16.msra.mxu0 %v31168_v3 }
 0xf79   :  { %38444 = vmatprep.subr.bf16.mxu0 %v31177_v51 }
 0xf7c   :  { %38446 = vmatpush3.bf16.msra.mxu0 %v31169_v57 }
 0xf7d   :  { %38448 = vmatprep.subr.bf16.mxu0 %v31178_v43 }
 0xf80   :  { %38450 = vmatpush3.bf16.msra.mxu0 %v31170_v44 }
 0xf81   :  { %38452 = vmatprep.subr.bf16.mxu0 %v31179_v29 }
 0xf84   :  { %38454 = vmatpush3.bf16.msra.mxu0 %v31171_v40 }
 0xf85   :  { %38456 = vmatprep.subr.bf16.mxu0 %v31180_v39 }
 0xf88   :  { %38458 = vmatpush3.bf16.msra.mxu0 %v31172_v13  ;;  %v31237_v13 = vld [vmem:[%s47187_s3 + $0x13c0] sm:$0xff]  }
 0xf8b   :  { %7078 = vmatmul.mubr.f32.vlgmr.msra.gmra.mrb[76].mxu0 %v40959_v4 }
 0xf8c   :  { %7082 = vmatprep.mubr.f32.mxu0 %v40964_v7 }
 0xf8f   :  { %7083 = vmatmul.mubr.f32.gmra.mrb[78].mxu0 %v40979_v11 }
 0xf90   :  { %35125 = vmatprep.mubr.msk.f32.mxu0 %vm839_vm12, %v24816_v18  ;;  %v24889_v18 = vld [vmem:[%s47188_s4 + $0x248] sm:$0xff] }
0x105e   :  { %v33040_v47 = vpop.f32.mrb[76].mxu0 }
0x105f   :  { %v33041_v62 = vpop.f32.mrb[77].mxu0 }
0x1060   :  { %v33042_v9 = vadd.f32 %v33041_v62, %v33040_v47  ;;  %v31238_v47 = vld [vmem:[%s47187_s3 + $0x13c8] sm:$0xff]   ;;  %v24891_v62 = vld [vmem:[%s47188_s4 + $0x258] sm:$0xff] }
0x1062   :  { %v7080_v45 = vadd.f32 %v33042_v9, %v42480_v10  ;;  %v33043_v30 = vpop.f32.mrb[78].mxu0  ;;  %v31197_v10 = vld [vmem:[%s47187_s3 + $0x1280] sm:$0xff]   ;;  %v31230_v9 = vld [vmem:[%s47187_s3 + $0x1388] sm:$0xff]  }
0x1063   :  { %v33044_v42 = vpop.f32.mrb[79].mxu0 }
0x1064   :  { %v33045_v22 = vadd.f32 %v33044_v42, %v33043_v30  ;;  %v31231_v30 = vld [vmem:[%s47187_s3 + $0x1390] sm:$0xff]   ;;  %v31240_v42 = vld [vmem:[%s47187_s3 + $0x13d8] sm:$0xff]  }
0x1066   :  { %v7085_v1 = vadd.f32 %v33045_v22, %v42488_v19  ;;  %v24818_v19 = vld [vmem:[%s47188_s4 + $0x230] sm:$0xff]  ;;  %v31232_v22 = vld [vmem:[%s47187_s3 + $0x1398] sm:$0xff]  }
0x1068   :  { %v38459_v12 = vpack.c.bf16 %v7085_v1, %v7080_v45  ;;  %v31239_v45 = vld [vmem:[%s47187_s3 + $0x13d0] sm:$0xff]   ;;  %v31241_v1 = vld [vmem:[%s47187_s3 + $0x13e0] sm:$0xff]  }
0x106a   :  { %38460 = vmatprep.subr.bf16.mxu0 %v38459_v12 }
0x106b   :  { %38462 = vmatpush3.bf16.msra.mxu0 %v38459_v12  ;;  %v31233_v12 = vld [vmem:[%s47187_s3 + $0x13a0] sm:$0xff]  }
0x106c   :  { %38496 = vmatprep.subr.bf16.mxu0 %v31205_v50  ;;  %v31242_v50 = vld [vmem:[%s47187_s3 + $0x13e8] sm:$0xff]  }
0x106e   :  { %35126 = vmatmul.mubr.msk.f32.vlgmr.msra.gmra.mrb[20].mxu0 %vm839_vm12, %v24817_v52  ;;  %v31234_v52 = vld [vmem:[%s47187_s3 + $0x13a8] sm:$0xff]  }
0x106f   :  { %38498 = vmatpush3.bf16.msra.mxu0 %v31197_v10  ;;  %35128 = vmatprep.mubr.msk.f32.mxu0 %vm839_vm12, %v24818_v19  ;;  %v31243_v10 = vld [vmem:[%s47187_s3 + $0x13f0] sm:$0xff]  }
0x1070   :  { %38500 = vmatprep.subr.bf16.mxu0 %v31206_v61  ;;  %v31235_v19 = vld [vmem:[%s47187_s3 + $0x13b0] sm:$0xff]   ;;  %v31244_v61 = vld [vmem:[%s47187_s3 + $0x13f8] sm:$0xff]  }
0x1072   :  { %35129 = vmatmul.mubr.msk.f32.gmra.mrb[22].mxu0 %vm839_vm12, %v24819_v63  ;;  %v31236_v63 = vld [vmem:[%s47187_s3 + $0x13b8] sm:$0xff]  }
0x1073   :  { %38502 = vmatpush3.bf16.msra.mxu0 %v31198_v60  ;;  %7462 = vmatprep.mubr.f32.mxu0 %v40874_v37  ;;  %v24960_v60 = vld [vmem:[%s47188_s4 + $0x260] sm:$0xff] }
0x1074   :  { %38504 = vmatprep.subr.bf16.mxu0 %v31207_v2 }
0x1077   :  { %38506 = vmatpush3.bf16.msra.mxu0 %v31199_v23 }
0x1078   :  { %38508 = vmatprep.subr.bf16.mxu0 %v31208_v35 }
0x107b   :  { %38510 = vmatpush3.bf16.msra.mxu0 %v31200_v15 }
0x107c   :  { %38512 = vmatprep.subr.bf16.mxu0 %v31209_v20 }
0x107f   :  { %38514 = vmatpush3.bf16.msra.mxu0 %v31201_v28 }
0x1080   :  { %38516 = vmatprep.subr.bf16.mxu0 %v31210_v26 }
0x1083   :  { %38518 = vmatpush3.bf16.msra.mxu0 %v31202_v41 }
0x1084   :  { %38520 = vmatprep.subr.bf16.mxu0 %v31211_v38 }
0x1087   :  { %38522 = vmatpush3.bf16.msra.mxu0 %v31203_v21  ;;  %v31269_v21 = vld [vmem:[%s47187_s3 + $0x14c0] sm:$0xff]  }
0x1088   :  { %38524 = vmatprep.subr.bf16.mxu0 %v31212_v25  ;;  %v24961_v25 = vld [vmem:[%s47188_s4 + $0x268] sm:$0xff] }
0x108b   :  { %38526 = vmatpush3.bf16.msra.mxu0 %v31204_v56  ;;  %v31270_v56 = vld [vmem:[%s47187_s3 + $0x14c8] sm:$0xff]  }
0x108e   :  { %7463 = vmatmul.mubr.f32.vlgmr.msra.gmra.mrb[80].mxu0 %v40959_v4 }
0x108f   :  { %7467 = vmatprep.mubr.f32.mxu0 %v40964_v7 }
0x1092   :  { %7468 = vmatmul.mubr.f32.gmra.mrb[82].mxu0 %v40979_v11 }
0x1093   :  { %35135 = vmatprep.mubr.msk.f32.mxu0 %vm839_vm12, %v24888_v36  ;;  %v24963_v36 = vld [vmem:[%s47188_s4 + $0x278] sm:$0xff] }
0x1161   :  { %v33122_v59 = vpop.f32.mrb[80].mxu0 }
0x1162   :  { %v33123_v3 = vpop.f32.mrb[81].mxu0 }
0x1163   :  { %v33124_v51 = vadd.f32 %v33123_v3, %v33122_v59  ;;  %v31262_v59 = vld [vmem:[%s47187_s3 + $0x1488] sm:$0xff]   ;;  %v31271_v3 = vld [vmem:[%s47187_s3 + $0x14d0] sm:$0xff]  }
0x1165   :  { %v7465_v57 = vadd.f32 %v33124_v51, %v42536_v55  ;;  %v33125_v43 = vpop.f32.mrb[82].mxu0  ;;  %v31229_v55 = vld [vmem:[%s47187_s3 + $0x1380] sm:$0xff]   ;;  %v31263_v51 = vld [vmem:[%s47187_s3 + $0x1490] sm:$0xff]  }
0x1166   :  { %v33126_v44 = vpop.f32.mrb[83].mxu0 }
0x1167   :  { %v33127_v29 = vadd.f32 %v33126_v44, %v33125_v43  ;;  %v31264_v43 = vld [vmem:[%s47187_s3 + $0x1498] sm:$0xff]   ;;  %v31273_v44 = vld [vmem:[%s47187_s3 + $0x14e0] sm:$0xff]  }
0x1169   :  { %v7470_v40 = vadd.f32 %v33127_v29, %v42544_v5  ;;  %v24890_v5 = vld [vmem:[%s47188_s4 + $0x250] sm:$0xff]  ;;  %v31265_v29 = vld [vmem:[%s47187_s3 + $0x14a0] sm:$0xff]  }
0x116b   :  { %v38527_v39 = vpack.c.bf16 %v7470_v40, %v7465_v57  ;;  %v31272_v57 = vld [vmem:[%s47187_s3 + $0x14d8] sm:$0xff]   ;;  %v31274_v40 = vld [vmem:[%s47187_s3 + $0x14e8] sm:$0xff]  }
0x116d   :  { %38528 = vmatprep.subr.bf16.mxu0 %v38527_v39 }
0x116e   :  { %38530 = vmatpush3.bf16.msra.mxu0 %v38527_v39  ;;  %v31266_v39 = vld [vmem:[%s47187_s3 + $0x14a8] sm:$0xff]  }
0x116f   :  { %38564 = vmatprep.subr.bf16.mxu0 %v31237_v13  ;;  %v31275_v13 = vld [vmem:[%s47187_s3 + $0x14f0] sm:$0xff]  }
0x1171   :  { %35136 = vmatmul.mubr.msk.f32.vlgmr.msra.gmra.mrb[20].mxu0 %vm839_vm12, %v24889_v18  ;;  %v31267_v18 = vld [vmem:[%s47187_s3 + $0x14b0] sm:$0xff]  }
0x1172   :  { %38566 = vmatpush3.bf16.msra.mxu0 %v31229_v55  ;;  %35138 = vmatprep.mubr.msk.f32.mxu0 %vm839_vm12, %v24890_v5  ;;  %v31276_v55 = vld [vmem:[%s47187_s3 + $0x14f8] sm:$0xff]  }
0x1173   :  { %38568 = vmatprep.subr.bf16.mxu0 %v31238_v47  ;;  %v31268_v5 = vld [vmem:[%s47187_s3 + $0x14b8] sm:$0xff]   ;;  %v25032_v47 = vld [vmem:[%s47188_s4 + $0x280] sm:$0xff] }
0x1175   :  { %35139 = vmatmul.mubr.msk.f32.gmra.mrb[22].mxu0 %vm839_vm12, %v24891_v62 }
0x1176   :  { %38570 = vmatpush3.bf16.msra.mxu0 %v31230_v9  ;;  %7847 = vmatprep.mubr.f32.mxu0 %v40874_v37 }
0x1177   :  { %38572 = vmatprep.subr.bf16.mxu0 %v31239_v45 }
0x117a   :  { %38574 = vmatpush3.bf16.msra.mxu0 %v31231_v30 }
0x117b   :  { %38576 = vmatprep.subr.bf16.mxu0 %v31240_v42 }
0x117e   :  { %38578 = vmatpush3.bf16.msra.mxu0 %v31232_v22 }
0x117f   :  { %38580 = vmatprep.subr.bf16.mxu0 %v31241_v1 }
0x1182   :  { %38582 = vmatpush3.bf16.msra.mxu0 %v31233_v12 }
0x1183   :  { %38584 = vmatprep.subr.bf16.mxu0 %v31242_v50 }
0x1186   :  { %38586 = vmatpush3.bf16.msra.mxu0 %v31234_v52  ;;  %v25033_v52 = vld [vmem:[%s47188_s4 + $0x288] sm:$0xff] }
0x1187   :  { %38588 = vmatprep.subr.bf16.mxu0 %v31243_v10  ;;  %v25034_v10 = vld [vmem:[%s47188_s4 + $0x290] sm:$0xff] }
0x118a   :  { %38590 = vmatpush3.bf16.msra.mxu0 %v31235_v19  ;;  %v25104_v19 = vld [vmem:[%s47188_s4 + $0x2a0] sm:$0xff] }
0x118b   :  { %38592 = vmatprep.subr.bf16.mxu0 %v31244_v61  ;;  %v25105_v61 = vld [vmem:[%s47188_s4 + $0x2a8] sm:$0xff] }
0x118e   :  { %38594 = vmatpush3.bf16.msra.mxu0 %v31236_v63  ;;  %v25106_v63 = vld [vmem:[%s47188_s4 + $0x2b0] sm:$0xff] }
0x1191   :  { %7848 = vmatmul.mubr.f32.vlgmr.msra.gmra.mrb[84].mxu0 %v40959_v4 }
0x1192   :  { %7852 = vmatprep.mubr.f32.mxu0 %v40964_v7 }
0x1195   :  { %7853 = vmatmul.mubr.f32.gmra.mrb[86].mxu0 %v40979_v11 }
0x1196   :  { %35145 = vmatprep.mubr.msk.f32.mxu0 %vm839_vm12, %v24960_v60  ;;  %v31318_v60 = vld [vmem:[%s47187_s3 + $0x1648] sm:$0xff]  }
0x1264   :  { %v33204_v2 = vpop.f32.mrb[84].mxu0 }
0x1265   :  { %v33205_v23 = vpop.f32.mrb[85].mxu0 }
0x1266   :  { %v33206_v35 = vadd.f32 %v33205_v23, %v33204_v2  ;;  %v25107_v2 = vld [vmem:[%s47188_s4 + $0x2b8] sm:$0xff]  ;;  %v31310_v23 = vld [vmem:[%s47187_s3 + $0x1608] sm:$0xff]  }
0x1268   :  { %v7850_v15 = vadd.f32 %v33206_v35, %v42592_v48  ;;  %v33207_v20 = vpop.f32.mrb[86].mxu0  ;;  %v31261_v48 = vld [vmem:[%s47187_s3 + $0x1480] sm:$0xff]   ;;  %v31319_v35 = vld [vmem:[%s47187_s3 + $0x1650] sm:$0xff]  }
0x1269   :  { %v33208_v28 = vpop.f32.mrb[87].mxu0 }
0x126a   :  { %v33209_v26 = vadd.f32 %v33208_v28, %v33207_v20  ;;  %v31320_v20 = vld [vmem:[%s47187_s3 + $0x1658] sm:$0xff]  }
0x126b   :  { %v31312_v28 = vld [vmem:[%s47187_s3 + $0x1618] sm:$0xff]  }
0x126c   :  { %v7855_v41 = vadd.f32 %v33209_v26, %v42600_v54  ;;  %v24962_v54 = vld [vmem:[%s47188_s4 + $0x270] sm:$0xff]  ;;  %v31321_v26 = vld [vmem:[%s47187_s3 + $0x1660] sm:$0xff]  }
0x126e   :  { %v38595_v38 = vpack.c.bf16 %v7855_v41, %v7850_v15  ;;  %v31311_v15 = vld [vmem:[%s47187_s3 + $0x1610] sm:$0xff]   ;;  %v31313_v41 = vld [vmem:[%s47187_s3 + $0x1620] sm:$0xff]  }
0x1270   :  { %38596 = vmatprep.subr.bf16.mxu0 %v38595_v38 }
0x1271   :  { %38598 = vmatpush3.bf16.msra.mxu0 %v38595_v38  ;;  %v31322_v38 = vld [vmem:[%s47187_s3 + $0x1668] sm:$0xff]  }
0x1272   :  { %38632 = vmatprep.subr.bf16.mxu0 %v31269_v21  ;;  %v31314_v21 = vld [vmem:[%s47187_s3 + $0x1628] sm:$0xff]  }
0x1274   :  { %35146 = vmatmul.mubr.msk.f32.vlgmr.msra.gmra.mrb[20].mxu0 %vm839_vm12, %v24961_v25  ;;  %v31323_v25 = vld [vmem:[%s47187_s3 + $0x1670] sm:$0xff]  }
0x1275   :  { %38634 = vmatpush3.bf16.msra.mxu0 %v31261_v48  ;;  %35148 = vmatprep.mubr.msk.f32.mxu0 %vm839_vm12, %v24962_v54  ;;  %v31315_v48 = vld [vmem:[%s47187_s3 + $0x1630] sm:$0xff]   ;;  %v31324_v54 = vld [vmem:[%s47187_s3 + $0x1678] sm:$0xff]  }
0x1276   :  { %38636 = vmatprep.subr.bf16.mxu0 %v31270_v56  ;;  %v31316_v56 = vld [vmem:[%s47187_s3 + $0x1638] sm:$0xff]  }
0x1278   :  { %35149 = vmatmul.mubr.msk.f32.gmra.mrb[22].mxu0 %vm839_vm12, %v24963_v36  ;;  %v25176_v36 = vld [vmem:[%s47188_s4 + $0x2c0] sm:$0xff] }
0x1279   :  { %38638 = vmatpush3.bf16.msra.mxu0 %v31262_v59  ;;  %8232 = vmatprep.mubr.f32.mxu0 %v40874_v37 }
0x127a   :  { %38640 = vmatprep.subr.bf16.mxu0 %v31271_v3 }
0x127d   :  { %38642 = vmatpush3.bf16.msra.mxu0 %v31263_v51 }
0x127e   :  { %38644 = vmatprep.subr.bf16.mxu0 %v31272_v57 }
0x1281   :  { %38646 = vmatpush3.bf16.msra.mxu0 %v31264_v43 }
0x1282   :  { %38648 = vmatprep.subr.bf16.mxu0 %v31273_v44 }
0x1285   :  { %38650 = vmatpush3.bf16.msra.mxu0 %v31265_v29 }
0x1286   :  { %38652 = vmatprep.subr.bf16.mxu0 %v31274_v40 }
0x1289   :  { %38654 = vmatpush3.bf16.msra.mxu0 %v31266_v39 }
0x128a   :  { %38656 = vmatprep.subr.bf16.mxu0 %v31275_v13  ;;  %v31349_v13 = vld [vmem:[%s47187_s3 + $0x1740] sm:$0xff]  }
0x128d   :  { %38658 = vmatpush3.bf16.msra.mxu0 %v31267_v18  ;;  %v25177_v18 = vld [vmem:[%s47188_s4 + $0x2c8] sm:$0xff] }
0x128e   :  { %38660 = vmatprep.subr.bf16.mxu0 %v31276_v55  ;;  %v31350_v55 = vld [vmem:[%s47187_s3 + $0x1748] sm:$0xff]  }
0x1291   :  { %38662 = vmatpush3.bf16.msra.mxu0 %v31268_v5  ;;  %v25179_v5 = vld [vmem:[%s47188_s4 + $0x2d8] sm:$0xff] }
0x1294   :  { %8233 = vmatmul.mubr.f32.vlgmr.msra.gmra.mrb[88].mxu0 %v40959_v4 }
0x1295   :  { %8237 = vmatprep.mubr.f32.mxu0 %v40964_v7 }
0x1298   :  { %8238 = vmatmul.mubr.f32.gmra.mrb[90].mxu0 %v40979_v11 }
0x1299   :  { %35155 = vmatprep.mubr.msk.f32.mxu0 %vm839_vm12, %v25032_v47  ;;  %v31342_v47 = vld [vmem:[%s47187_s3 + $0x1708] sm:$0xff]  }
0x1367   :  { %v33286_v62 = vpop.f32.mrb[88].mxu0 }
0x1368   :  { %v33287_v9 = vpop.f32.mrb[89].mxu0 }
0x1369   :  { %v33288_v45 = vadd.f32 %v33287_v9, %v33286_v62  ;;  %v31351_v62 = vld [vmem:[%s47187_s3 + $0x1750] sm:$0xff]  }
0x136a   :  { %v31343_v9 = vld [vmem:[%s47187_s3 + $0x1710] sm:$0xff]  }
0x136b   :  { %v8235_v30 = vadd.f32 %v33288_v45, %v42677_v14  ;;  %v33289_v42 = vpop.f32.mrb[90].mxu0  ;;  %v31317_v14 = vld [vmem:[%s47187_s3 + $0x1640] sm:$0xff]   ;;  %v31352_v45 = vld [vmem:[%s47187_s3 + $0x1758] sm:$0xff]  }
0x136c   :  { %v33290_v22 = vpop.f32.mrb[91].mxu0 }
0x136d   :  { %v33291_v1 = vadd.f32 %v33290_v22, %v33289_v42  ;;  %v31353_v42 = vld [vmem:[%s47187_s3 + $0x1760] sm:$0xff]  }
0x136e   :  { %v31345_v22 = vld [vmem:[%s47187_s3 + $0x1720] sm:$0xff]  }
0x136f   :  { %v8240_v12 = vadd.f32 %v33291_v1, %v42692_v27  ;;  %v25035_v27 = vld [vmem:[%s47188_s4 + $0x298] sm:$0xff]  ;;  %v31354_v1 = vld [vmem:[%s47187_s3 + $0x1768] sm:$0xff]  }
0x1371   :  { %v38663_v50 = vpack.c.bf16 %v8240_v12, %v8235_v30  ;;  %v31344_v30 = vld [vmem:[%s47187_s3 + $0x1718] sm:$0xff]   ;;  %v31346_v12 = vld [vmem:[%s47187_s3 + $0x1728] sm:$0xff]  }
0x1373   :  { %38664 = vmatprep.subr.bf16.mxu0 %v38663_v50 }
0x1374   :  { %38666 = vmatpush3.bf16.msra.mxu0 %v38663_v50  ;;  %v31355_v50 = vld [vmem:[%s47187_s3 + $0x1770] sm:$0xff]  }
0x1375   :  { %38732 = vmatprep.subr.bf16.mxu0 %v42730_v8 }
0x1377   :  { %35156 = vmatmul.mubr.msk.f32.vlgmr.msra.gmra.mrb[20].mxu0 %vm839_vm12, %v25033_v52  ;;  %v31347_v52 = vld [vmem:[%s47187_s3 + $0x1730] sm:$0xff]  }
0x1378   :  { %38734 = vmatpush3.bf16.msra.mxu0 %v42730_v8  ;;  %35158 = vmatprep.mubr.msk.f32.mxu0 %vm839_vm12, %v25034_v10  ;;  %v31309_v8 = vld [vmem:[%s47187_s3 + $0x1600] sm:$0xff]   ;;  %v31356_v10 = vld [vmem:[%s47187_s3 + $0x1778] sm:$0xff]  }
0x1379   :  { %38736 = vmatprep.subr.bf16.mxu0 %v31317_v14  ;;  %v31348_v14 = vld [vmem:[%s47187_s3 + $0x1738] sm:$0xff]  }
0x137b   :  { %35159 = vmatmul.mubr.msk.f32.gmra.mrb[22].mxu0 %vm839_vm12, %v25035_v27  ;;  %v25248_v27 = vld [vmem:[%s47188_s4 + $0x2e0] sm:$0xff] }
0x137c   :  { %35165 = vmatprep.mubr.msk.f32.mxu0 %vm839_vm12, %v25104_v19 }
0x137f   :  { %35166 = vmatmul.mubr.msk.f32.vlgmr.msra.gmra.mrb[20].mxu0 %vm839_vm12, %v25105_v61 }
0x1380   :  { %38738 = vmatpush3.bf16.msra.mxu0 %v31309_v8  ;;  %35168 = vmatprep.mubr.msk.f32.mxu0 %vm839_vm12, %v25106_v63 }
0x1381   :  { %38740 = vmatprep.subr.bf16.mxu0 %v31318_v60 }
0x1383   :  { %35169 = vmatmul.mubr.msk.f32.gmra.mrb[22].mxu0 %vm839_vm12, %v25107_v2 }
0x1384   :  { %38742 = vmatpush3.bf16.msra.mxu0 %v31310_v23  ;;  %8927 = vmatprep.mubr.f32.mxu0 %v40829_v17 }
0x1385   :  { %38744 = vmatprep.subr.bf16.mxu0 %v31319_v35 }
0x1388   :  { %38746 = vmatpush3.bf16.msra.mxu0 %v31311_v15 }
0x1389   :  { %38748 = vmatprep.subr.bf16.mxu0 %v31320_v20  ;;  %v31381_v20 = vld [vmem:[%s47187_s3 + $0x1840] sm:$0xff]  }
0x138c   :  { %38750 = vmatpush3.bf16.msra.mxu0 %v31312_v28  ;;  %v25249_v28 = vld [vmem:[%s47188_s4 + $0x2e8] sm:$0xff] }
0x138d   :  { %38752 = vmatprep.subr.bf16.mxu0 %v31321_v26  ;;  %v31382_v26 = vld [vmem:[%s47187_s3 + $0x1848] sm:$0xff]  }
0x1390   :  { %38754 = vmatpush3.bf16.msra.mxu0 %v31313_v41  ;;  %v25251_v41 = vld [vmem:[%s47188_s4 + $0x2f8] sm:$0xff] }
0x1391   :  { %38756 = vmatprep.subr.bf16.mxu0 %v31322_v38  ;;  %v31374_v38 = vld [vmem:[%s47187_s3 + $0x1808] sm:$0xff]  }
0x1394   :  { %38758 = vmatpush3.bf16.msra.mxu0 %v31314_v21  ;;  %v31383_v21 = vld [vmem:[%s47187_s3 + $0x1850] sm:$0xff]  }
0x1395   :  { %38760 = vmatprep.subr.bf16.mxu0 %v31323_v25  ;;  %v31375_v25 = vld [vmem:[%s47187_s3 + $0x1810] sm:$0xff]  }
0x1398   :  { %38762 = vmatpush3.bf16.msra.mxu0 %v31315_v48  ;;  %v31384_v48 = vld [vmem:[%s47187_s3 + $0x1858] sm:$0xff]  }
0x1399   :  { %38764 = vmatprep.subr.bf16.mxu0 %v31324_v54  ;;  %v31376_v54 = vld [vmem:[%s47187_s3 + $0x1818] sm:$0xff]  }
0x139c   :  { %38766 = vmatpush3.bf16.msra.mxu0 %v31316_v56  ;;  %v31385_v56 = vld [vmem:[%s47187_s3 + $0x1860] sm:$0xff]  }
0x139f   :  { %8928 = vmatmul.mubr.f32.vlgmr.msra.gmra.mrb[92].mxu0 %v40841_v24 }
0x13a0   :  { %8932 = vmatprep.mubr.f32.mxu0 %v40854_v31 }
0x13a3   :  { %8933 = vmatmul.mubr.f32.gmra.mrb[94].mxu0 %v40862_v34 }
0x13a4   :  { %35175 = vmatprep.mubr.msk.f32.mxu0 %vm839_vm12, %v25176_v36  ;;  %v31386_v36 = vld [vmem:[%s47187_s3 + $0x1868] sm:$0xff]  }
0x1472   :  { %v33412_v59 = vpop.f32.mrb[92].mxu0 }
0x1473   :  { %v33413_v3 = vpop.f32.mrb[93].mxu0 }
0x1474   :  { %v33414_v51 = vadd.f32 %v33413_v3, %v33412_v59  ;;  %v31378_v59 = vld [vmem:[%s47187_s3 + $0x1828] sm:$0xff]   ;;  %v31387_v3 = vld [vmem:[%s47187_s3 + $0x1870] sm:$0xff]  }
0x1476   :  { %v9005_v57 = vadd.f32 %v42732_v33, %v33414_v51  ;;  %v33415_v43 = vpop.f32.mrb[94].mxu0  ;;  %v31341_v33 = vld [vmem:[%s47187_s3 + $0x1700] sm:$0xff]   ;;  %v31379_v51 = vld [vmem:[%s47187_s3 + $0x1830] sm:$0xff]  }
0x1477   :  { %v33416_v44 = vpop.f32.mrb[95].mxu0 }
0x1478   :  { %v33417_v29 = vadd.f32 %v33416_v44, %v33415_v43  ;;  %v31380_v43 = vld [vmem:[%s47187_s3 + $0x1838] sm:$0xff]   ;;  %v25320_v44 = vld [vmem:[%s47188_s4 + $0x300] sm:$0xff] }
0x147a   :  { %v9010_v40 = vadd.f32 %v42734_v46, %v33417_v29  ;;  %v25178_v46 = vld [vmem:[%s47188_s4 + $0x2d0] sm:$0xff] }
0x147c   :  { %v38799_v39 = vpack.c.bf16 %v9010_v40, %v9005_v57  ;;  %v31388_v57 = vld [vmem:[%s47187_s3 + $0x1878] sm:$0xff]  }
0x147e   :  { %38800 = vmatprep.subr.bf16.mxu0 %v38799_v39 }
0x147f   :  { %38802 = vmatpush3.bf16.msra.mxu0 %v38799_v39 }
0x1480   :  { %38804 = vmatprep.subr.bf16.mxu0 %v31349_v13 }
0x1482   :  { %35176 = vmatmul.mubr.msk.f32.vlgmr.msra.gmra.mrb[20].mxu0 %vm839_vm12, %v25177_v18 }
0x1483   :  { %38806 = vmatpush3.bf16.msra.mxu0 %v31341_v33  ;;  %35178 = vmatprep.mubr.msk.f32.mxu0 %vm839_vm12, %v25178_v46 }
0x1484   :  { %38808 = vmatprep.subr.bf16.mxu0 %v31350_v55 }
0x1486   :  { %35179 = vmatmul.mubr.msk.f32.gmra.mrb[22].mxu0 %vm839_vm12, %v25179_v5  ;;  %v31430_v5 = vld [vmem:[%s47187_s3 + $0x19c8] sm:$0xff]  }
0x1487   :  { %38810 = vmatpush3.bf16.msra.mxu0 %v31342_v47  ;;  %9312 = vmatprep.mubr.f32.mxu0 %v40829_v17  ;;  %v25323_v47 = vld [vmem:[%s47188_s4 + $0x318] sm:$0xff] }
0x1488   :  { %38812 = vmatprep.subr.bf16.mxu0 %v31351_v62  ;;  %v31422_v62 = vld [vmem:[%s47187_s3 + $0x1988] sm:$0xff]  }
0x148b   :  { %38814 = vmatpush3.bf16.msra.mxu0 %v31343_v9  ;;  %v31431_v9 = vld [vmem:[%s47187_s3 + $0x19d0] sm:$0xff]  }
0x148c   :  { %38816 = vmatprep.subr.bf16.mxu0 %v31352_v45  ;;  %v31423_v45 = vld [vmem:[%s47187_s3 + $0x1990] sm:$0xff]  }
0x148f   :  { %38818 = vmatpush3.bf16.msra.mxu0 %v31344_v30  ;;  %v31432_v30 = vld [vmem:[%s47187_s3 + $0x19d8] sm:$0xff]  }
0x1490   :  { %38820 = vmatprep.subr.bf16.mxu0 %v31353_v42  ;;  %v31424_v42 = vld [vmem:[%s47187_s3 + $0x1998] sm:$0xff]  }
0x1493   :  { %38822 = vmatpush3.bf16.msra.mxu0 %v31345_v22  ;;  %v31433_v22 = vld [vmem:[%s47187_s3 + $0x19e0] sm:$0xff]  }
0x1494   :  { %38824 = vmatprep.subr.bf16.mxu0 %v31354_v1  ;;  %v31425_v1 = vld [vmem:[%s47187_s3 + $0x19a0] sm:$0xff]  }
0x1497   :  { %38826 = vmatpush3.bf16.msra.mxu0 %v31346_v12  ;;  %v31434_v12 = vld [vmem:[%s47187_s3 + $0x19e8] sm:$0xff]  }
0x1498   :  { %38828 = vmatprep.subr.bf16.mxu0 %v31355_v50  ;;  %v31426_v50 = vld [vmem:[%s47187_s3 + $0x19a8] sm:$0xff]  }
0x149b   :  { %38830 = vmatpush3.bf16.msra.mxu0 %v31347_v52  ;;  %v31435_v52 = vld [vmem:[%s47187_s3 + $0x19f0] sm:$0xff]  }
0x149c   :  { %38832 = vmatprep.subr.bf16.mxu0 %v31356_v10  ;;  %v31427_v10 = vld [vmem:[%s47187_s3 + $0x19b0] sm:$0xff]  }
0x149f   :  { %38834 = vmatpush3.bf16.msra.mxu0 %v31348_v14  ;;  %v31436_v14 = vld [vmem:[%s47187_s3 + $0x19f8] sm:$0xff]  }
0x14a2   :  { %9313 = vmatmul.mubr.f32.vlgmr.msra.gmra.mrb[96].mxu0 %v40841_v24 }
0x14a3   :  { %9317 = vmatprep.mubr.f32.mxu0 %v40854_v31 }
0x14a6   :  { %9318 = vmatmul.mubr.f32.gmra.mrb[98].mxu0 %v40862_v34 }
0x14a7   :  { %35185 = vmatprep.mubr.msk.f32.mxu0 %vm839_vm12, %v25248_v27  ;;  %v31428_v27 = vld [vmem:[%s47187_s3 + $0x19b8] sm:$0xff]  }
0x1575   :  { %v33494_v19 = vpop.f32.mrb[96].mxu0 }
0x1576   :  { %v33495_v61 = vpop.f32.mrb[97].mxu0 }
0x1577   :  { %v33496_v8 = vadd.f32 %v33495_v61, %v33494_v19  ;;  %v25392_v19 = vld [vmem:[%s47188_s4 + $0x320] sm:$0xff] }
0x1579   :  { %v9390_v63 = vadd.f32 %v42740_v53, %v33496_v8  ;;  %v33497_v60 = vpop.f32.mrb[98].mxu0  ;;  %v31373_v53 = vld [vmem:[%s47187_s3 + $0x1800] sm:$0xff]  }
0x157a   :  { %v33498_v2 = vpop.f32.mrb[99].mxu0 }
0x157b   :  { %v33499_v23 = vadd.f32 %v33498_v2, %v33497_v60  ;;  %v47202_v60 = vld [vmem:[#allocation5_spill] sm:$0xff] }
0x157d   :  { %v9395_v35 = vadd.f32 %v42742_v0, %v33499_v23  ;;  %v25250_v0 = vld [vmem:[%s47188_s4 + $0x2f0] sm:$0xff] }
0x157f   :  { %v38867_v15 = vpack.c.bf16 %v9395_v35, %v9390_v63 }
0x1581   :  { %38868 = vmatprep.subr.bf16.mxu0 %v38867_v15 }
0x1582   :  { %38870 = vmatpush3.bf16.msra.mxu0 %v38867_v15 }
0x1583   :  { %38872 = vmatprep.subr.bf16.mxu0 %v31381_v20 }
0x1585   :  { %35186 = vmatmul.mubr.msk.f32.vlgmr.msra.gmra.mrb[20].mxu0 %vm839_vm12, %v25249_v28 }
0x1586   :  { %38874 = vmatpush3.bf16.msra.mxu0 %v31373_v53  ;;  %35188 = vmatprep.mubr.msk.f32.mxu0 %vm839_vm12, %v25250_v0  ;;  %v31461_v53 = vld [vmem:[%s47187_s3 + $0x1ac0] sm:$0xff]   ;;  %v25393_v0 = vld [vmem:[%s47188_s4 + $0x328] sm:$0xff] }
0x1587   :  { %38876 = vmatprep.subr.bf16.mxu0 %v31382_v26  ;;  %v31453_v26 = vld [vmem:[%s47187_s3 + $0x1a80] sm:$0xff]  }
0x1589   :  { %35189 = vmatmul.mubr.msk.f32.gmra.mrb[22].mxu0 %vm839_vm12, %v25251_v41  ;;  %v31462_v41 = vld [vmem:[%s47187_s3 + $0x1ac8] sm:$0xff]  }
0x158a   :  { %38878 = vmatpush3.bf16.msra.mxu0 %v31374_v38  ;;  %9697 = vmatprep.mubr.f32.mxu0 %v40829_v17  ;;  %v31377_v17 = vld [vmem:[%s47187_s3 + $0x1820] sm:$0xff]   ;;  %v25395_v38 = vld [vmem:[%s47188_s4 + $0x338] sm:$0xff] }
0x158b   :  { %38880 = vmatprep.subr.bf16.mxu0 %v31383_v21  ;;  %v31454_v21 = vld [vmem:[%s47187_s3 + $0x1a88] sm:$0xff]  }
0x158e   :  { %38882 = vmatpush3.bf16.msra.mxu0 %v31375_v25  ;;  %v31463_v25 = vld [vmem:[%s47187_s3 + $0x1ad0] sm:$0xff]  }
0x158f   :  { %38884 = vmatprep.subr.bf16.mxu0 %v31384_v48  ;;  %v31455_v48 = vld [vmem:[%s47187_s3 + $0x1a90] sm:$0xff]  }
0x1592   :  { %38886 = vmatpush3.bf16.msra.mxu0 %v31376_v54  ;;  %v31464_v54 = vld [vmem:[%s47187_s3 + $0x1ad8] sm:$0xff]  }
0x1593   :  { %38888 = vmatprep.subr.bf16.mxu0 %v31385_v56  ;;  %v31456_v56 = vld [vmem:[%s47187_s3 + $0x1a98] sm:$0xff]  }
0x1596   :  { %38890 = vmatpush3.bf16.msra.mxu0 %v31377_v17  ;;  %v31465_v17 = vld [vmem:[%s47187_s3 + $0x1ae0] sm:$0xff]  }
0x1597   :  { %38892 = vmatprep.subr.bf16.mxu0 %v31386_v36  ;;  %v31466_v36 = vld [vmem:[%s47187_s3 + $0x1ae8] sm:$0xff]  }
0x159a   :  { %38894 = vmatpush3.bf16.msra.mxu0 %v31378_v59  ;;  %v31458_v59 = vld [vmem:[%s47187_s3 + $0x1aa8] sm:$0xff]  }
0x159b   :  { %38896 = vmatprep.subr.bf16.mxu0 %v31387_v3  ;;  %v31467_v3 = vld [vmem:[%s47187_s3 + $0x1af0] sm:$0xff]  }
0x159e   :  { %38898 = vmatpush3.bf16.msra.mxu0 %v31379_v51  ;;  %v31459_v51 = vld [vmem:[%s47187_s3 + $0x1ab0] sm:$0xff]  }
0x159f   :  { %38900 = vmatprep.subr.bf16.mxu0 %v31388_v57  ;;  %v31468_v57 = vld [vmem:[%s47187_s3 + $0x1af8] sm:$0xff]  }
0x15a2   :  { %38902 = vmatpush3.bf16.msra.mxu0 %v31380_v43  ;;  %v31460_v43 = vld [vmem:[%s47187_s3 + $0x1ab8] sm:$0xff]  }
0x15a5   :  { %9698 = vmatmul.mubr.f32.vlgmr.msra.gmra.mrb[100].mxu0 %v40841_v24 }
0x15a6   :  { %9702 = vmatprep.mubr.f32.mxu0 %v40854_v31  ;;  %v31429_v31 = vld [vmem:[%s47187_s3 + $0x19c0] sm:$0xff]  }
0x15a9   :  { %9703 = vmatmul.mubr.f32.gmra.mrb[102].mxu0 %v40862_v34  ;;  %v25321_v34 = vld [vmem:[%s47188_s4 + $0x308] sm:$0xff] }
0x15aa   :  { %35195 = vmatprep.mubr.msk.f32.mxu0 %vm839_vm12, %v25320_v44  ;;  %v25464_v44 = vld [vmem:[%s47188_s4 + $0x340] sm:$0xff] }
0x1678   :  { %v33576_v29 = vpop.f32.mrb[100].mxu0 }
0x1679   :  { %v33577_v40 = vpop.f32.mrb[101].mxu0 }
0x167a   :  { %v33578_v39 = vadd.f32 %v33577_v40, %v33576_v29  ;;  %v10659_v29 = vld [vmem:[%s47189_s5] sm:$0xff]  ;;  %v10660_v40 = vld [vmem:[%s47189_s5 + $0x8] sm:$0xff] }
0x167b   :  { %10665 = vperm.xlu1 %40522, %v10659_v29   ;;  %v31498_v29 = vld [vmem:[%s47190_s6 + $0xf0] sm:$0xff]  }
0x167c   :  { %v9775_v13 = vadd.f32 %v42744_v6, %v33578_v39  ;;  %v33579_v18 = vpop.f32.mrb[102].mxu0  ;;  %v31421_v6 = vld [vmem:[%s47187_s3 + $0x1980] sm:$0xff]   ;;  %v16862_v39 = vld [vmem:[%s47192_s8 + $0x18] sm:$0xff] }
0x167d   :  { %v33580_v33 = vpop.f32.mrb[103].mxu0 }
0x167e   :  { %v33581_v46 = vadd.f32 %v33580_v33, %v33579_v18  ;;  %v16864_v18 = vld [vmem:[%s47192_s8 + $0x28] sm:$0xff]  ;;  %v31470_v33 = vld [vmem:[%s47190_s6 + $0x10] sm:$0xff]  }
0x167f   :  { %10670 = vperm.xlu1 %40522, %v10660_v40   ;;  %v31499_v40 = vld [vmem:[%s47190_s6 + $0xf8] sm:$0xff]  }
0x1680   :  { %v9780_v24 = vadd.f32 %v42746_v16, %v33581_v46  ;;  %v25322_v16 = vld [vmem:[%s47188_s4 + $0x310] sm:$0xff] }
0x1682   :  { %v38935_v55 = vpack.c.bf16 %v9780_v24, %v9775_v13  ;;  %v31469_v13 = vld [vmem:[%s47190_s6 + $0x8] sm:$0xff]  }
0x1684   :  { %38936 = vmatprep.subr.bf16.mxu0 %v38935_v55 }
0x1685   :  { %38938 = vmatpush3.bf16.msra.mxu0 %v38935_v55 }
0x1686   :  { %38972 = vmatprep.subr.bf16.mxu0 %v31429_v31 }
0x1688   :  { %35196 = vmatmul.mubr.msk.f32.vlgmr.msra.gmra.mrb[20].mxu0 %vm839_vm12, %v25321_v34 }
0x1689   :  { %38974 = vmatpush3.bf16.msra.mxu0 %v31421_v6  ;;  %35198 = vmatprep.mubr.msk.f32.mxu0 %vm839_vm12, %v25322_v16 }
0x168a   :  { %38976 = vmatprep.subr.bf16.mxu0 %v31430_v5 }
0x168c   :  { %35199 = vmatmul.mubr.msk.f32.gmra.mrb[22].mxu0 %vm839_vm12, %v25323_v47 }
0x168d   :  { %38978 = vmatpush3.bf16.msra.mxu0 %v31422_v62  ;;  %10157 = vmatprep.mubr.f32.mxu0 %v40874_v37  ;;  %v25465_v62 = vld [vmem:[%s47188_s4 + $0x348] sm:$0xff] }
0x168e   :  { %38980 = vmatprep.subr.bf16.mxu0 %v31431_v9  ;;  %v25466_v9 = vld [vmem:[%s47188_s4 + $0x350] sm:$0xff] }
0x1691   :  { %38982 = vmatpush3.bf16.msra.mxu0 %v31423_v45  ;;  %v31472_v45 = vld [vmem:[%s47190_s6 + $0x20] sm:$0xff]  }
0x1692   :  { %38984 = vmatprep.subr.bf16.mxu0 %v31432_v30 }
0x1695   :  { %38986 = vmatpush3.bf16.msra.mxu0 %v31424_v42 }
0x1696   :  { %38988 = vmatprep.subr.bf16.mxu0 %v31433_v22 }
0x1699   :  { %38990 = vmatpush3.bf16.msra.mxu0 %v31425_v1 }
0x169a   :  { %38992 = vmatprep.subr.bf16.mxu0 %v31434_v12 }
0x169d   :  { %38994 = vmatpush3.bf16.msra.mxu0 %v31426_v50 }
0x169e   :  { %38996 = vmatprep.subr.bf16.mxu0 %v31435_v52 }
0x16a1   :  { %38998 = vmatpush3.bf16.msra.mxu0 %v31427_v10 }
0x16a2   :  { %39000 = vmatprep.subr.bf16.mxu0 %v31436_v14 }
0x16a5   :  { %39002 = vmatpush3.bf16.msra.mxu0 %v31428_v27 }
0x16a8   :  { %10158 = vmatmul.mubr.f32.vlgmr.msra.gmra.mrb[104].mxu0 %v40959_v4 }
0x16a9   :  { %10162 = vmatprep.mubr.f32.mxu0 %v40964_v7 }
0x16ac   :  { %10163 = vmatmul.mubr.f32.gmra.mrb[106].mxu0 %v40979_v11 }
0x16ad   :  { %35205 = vmatprep.mubr.msk.f32.mxu0 %vm839_vm12, %v25392_v19  ;;  %v10676_v19 = vpop.permute.xlu0 %10675 }
0x16fa   :  { %v10666_v30 = vpop.permute.xlu1 %10665 }
0x16fe   :  { %v10671_v42 = vpop.permute.xlu1 %10670 }
0x177b   :  { %v33696_v61 = vpop.f32.mrb[104].mxu0 }
0x177c   :  { %v33697_v8 = vpop.f32.mrb[105].mxu0 }
0x177d   :  { %v33698_v63 = vadd.f32 %v33697_v8, %v33696_v61 }
0x177f   :  { %v10160_v2 = vadd.f32 %v33698_v63, %v47202_v60  ;;  %v33699_v23 = vpop.f32.mrb[106].mxu0 }
0x1780   :  { %v33700_v35 = vpop.f32.mrb[107].mxu0 }
0x1781   :  { %v33701_v15 = vadd.f32 %v33700_v35, %v33699_v23  ;;  %v31473_v35 = vld [vmem:[%s47190_s6 + $0x28] sm:$0xff]  }
0x1783   :  { %v10165_v20 = vadd.f32 %v33701_v15, %v42750_v32  ;;  %v25394_v32 = vld [vmem:[%s47188_s4 + $0x330] sm:$0xff] }
0x1785   :  { %v39003_v28 = vpack.c.bf16 %v10165_v20, %v10160_v2 }
0x1787   :  { %39004 = vmatprep.subr.bf16.mxu0 %v39003_v28 }
0x1788   :  { %39006 = vmatpush3.bf16.msra.mxu0 %v39003_v28 }
0x1789   :  { %39040 = vmatprep.subr.bf16.mxu0 %v31461_v53  ;;  %v31474_v53 = vld [vmem:[%s47190_s6 + $0x30] sm:$0xff]  }
0x178b   :  { %35206 = vmatmul.mubr.msk.f32.vlgmr.msra.gmra.mrb[20].mxu0 %vm839_vm12, %v25393_v0  ;;  %v31475_v0 = vld [vmem:[%s47190_s6 + $0x38] sm:$0xff]  }
0x178c   :  { %39042 = vmatpush3.bf16.msra.mxu0 %v31453_v26  ;;  %35208 = vmatprep.mubr.msk.f32.mxu0 %vm839_vm12, %v25394_v32  ;;  %v31476_v26 = vld [vmem:[%s47190_s6 + $0x40] sm:$0xff]   ;;  %v31477_v32 = vld [vmem:[%s47190_s6 + $0x48] sm:$0xff]  }
0x178d   :  { %39044 = vmatprep.subr.bf16.mxu0 %v31462_v41  ;;  %v31478_v41 = vld [vmem:[%s47190_s6 + $0x50] sm:$0xff]  }
0x178f   :  { %35209 = vmatmul.mubr.msk.f32.gmra.mrb[22].mxu0 %vm839_vm12, %v25395_v38  ;;  %v31479_v38 = vld [vmem:[%s47190_s6 + $0x58] sm:$0xff]  }
0x1790   :  { %39046 = vmatpush3.bf16.msra.mxu0 %v31454_v21  ;;  %10542 = vmatprep.mubr.f32.mxu0 %v40874_v37  ;;  %v31457_v37 = vld [vmem:[%s47187_s3 + $0x1aa0] sm:$0xff]  }
0x1791   :  { %39048 = vmatprep.subr.bf16.mxu0 %v31463_v25  ;;  %v31480_v21 = vld [vmem:[%s47190_s6 + $0x60] sm:$0xff]   ;;  %v31481_v25 = vld [vmem:[%s47190_s6 + $0x68] sm:$0xff]  }
0x1794   :  { %39050 = vmatpush3.bf16.msra.mxu0 %v31455_v48  ;;  %v31482_v48 = vld [vmem:[%s47190_s6 + $0x70] sm:$0xff]  }
0x1795   :  { %39052 = vmatprep.subr.bf16.mxu0 %v31464_v54  ;;  %v31483_v54 = vld [vmem:[%s47190_s6 + $0x78] sm:$0xff]  }
0x1798   :  { %39054 = vmatpush3.bf16.msra.mxu0 %v31456_v56  ;;  %v31484_v56 = vld [vmem:[%s47190_s6 + $0x80] sm:$0xff]  }
0x1799   :  { %39056 = vmatprep.subr.bf16.mxu0 %v31465_v17  ;;  %v31485_v17 = vld [vmem:[%s47190_s6 + $0x88] sm:$0xff]  }
0x179c   :  { %39058 = vmatpush3.bf16.msra.mxu0 %v31457_v37  ;;  %v31486_v37 = vld [vmem:[%s47190_s6 + $0x90] sm:$0xff]  }
0x179d   :  { %39060 = vmatprep.subr.bf16.mxu0 %v31466_v36  ;;  %v31487_v36 = vld [vmem:[%s47190_s6 + $0x98] sm:$0xff]  }
0x17a0   :  { %39062 = vmatpush3.bf16.msra.mxu0 %v31458_v59  ;;  %v31492_v59 = vld [vmem:[%s47190_s6 + $0xc0] sm:$0xff]  }
0x17a1   :  { %39064 = vmatprep.subr.bf16.mxu0 %v31467_v3  ;;  %v31493_v3 = vld [vmem:[%s47190_s6 + $0xc8] sm:$0xff]  }
0x17a4   :  { %39066 = vmatpush3.bf16.msra.mxu0 %v31459_v51  ;;  %v31494_v51 = vld [vmem:[%s47190_s6 + $0xd0] sm:$0xff]  }
0x17a5   :  { %39068 = vmatprep.subr.bf16.mxu0 %v31468_v57  ;;  %v31495_v57 = vld [vmem:[%s47190_s6 + $0xd8] sm:$0xff]  }
0x17a8   :  { %39070 = vmatpush3.bf16.msra.mxu0 %v31460_v43  ;;  %v31496_v43 = vld [vmem:[%s47190_s6 + $0xe0] sm:$0xff]  }
0x17ab   :  { %10543 = vmatmul.mubr.f32.vlgmr.msra.gmra.mrb[108].mxu0 %v40959_v4  ;;  %v10662_v4 = vld [vmem:[%s47189_s5 + $0x18] sm:$0xff] }
0x17ac   :  { %10547 = vmatprep.mubr.f32.mxu0 %v40964_v7  ;;  %10680 = vperm.xlu1 %40522, %v10662_v4   ;;  %v16860_v7 = vld [vmem:[%s47192_s8 + $0x8] sm:$0xff]  ;;  %v31500_v4 = vld [vmem:[%s47190_s6 + $0x100] sm:$0xff]  }
0x17af   :  { %10548 = vmatmul.mubr.f32.gmra.mrb[110].mxu0 %v40979_v11  ;;  %v30175_v11 = vld [vmem:[%s47190_s6] sm:$0xff]  }
0x17b0   :  { %35215 = vmatprep.mubr.msk.f32.mxu0 %vm839_vm12, %v25464_v44  ;;  %16872 = vperm.xlu1 %40522, %v16860_v7   ;;  %v31497_v44 = vld [vmem:[%s47190_s6 + $0xe8] sm:$0xff]  }
0x17b1   :  { %39076 = vmatprep.subr.bf16.mxu1 %v30175_v11  ;;  %v31501_v7 = vld [vmem:[%s47190_s6 + $0x108] sm:$0xff]  }
0x17b2   :  { %39078 = vmatpush3.bf16.msra.mxu1 %v30175_v11  ;;  %v31502_v11 = vld [vmem:[%s47190_s6 + $0x110] sm:$0xff]  }
0x17b3   :  { %39080 = vmatprep.subr.bf16.mxu1 %v31469_v13 }
0x17b4   :  { %16882 = vperm.xlu1 %40522, %v16862_v39   ;;  %v31503_v39 = vld [vmem:[%s47190_s6 + $0x118] sm:$0xff]  }
0x17b6   :  { %39082 = vmatpush3.bf16.msra.mxu1 %v31469_v13  ;;  %v31504_v13 = vld [vmem:[%s47190_s6 + $0x120] sm:$0xff]  }
0x17b7   :  { %39084 = vmatprep.subr.bf16.mxu1 %v31470_v33 }
0x17b8   :  { %16892 = vperm.xlu1 %40522, %v16864_v18   ;;  %v25488_v18 = vld [vmem:[%s47191_s7 + $0x30] sm:$0xff] }
0x17ba   :  { %39086 = vmatpush3.bf16.msra.mxu1 %v31470_v33  ;;  %v31505_v33 = vld [vmem:[%s47190_s6 + $0x128] sm:$0xff]  }
0x182b   :  { %v10681_v10 = vpop.permute.xlu1 %10680 }
0x187e   :  { %v33778_v46 = vpop.f32.mrb[108].mxu0 }
0x187f   :  { %v33779_v24 = vpop.f32.mrb[109].mxu0 }
0x1880   :  { %v33780_v55 = vadd.f32 %v33779_v24, %v33778_v46  ;;  %v31506_v46 = vld [vmem:[%s47190_s6 + $0x130] sm:$0xff]   ;;  %v31507_v24 = vld [vmem:[%s47190_s6 + $0x138] sm:$0xff]  }
0x1882   :  { %v10545_v31 = vadd.f32 %v33780_v55, %v42752_v49  ;;  %v33781_v34 = vpop.f32.mrb[110].mxu0  ;;  %v25467_v49 = vld [vmem:[%s47188_s4 + $0x358] sm:$0xff]  ;;  %v31508_v55 = vld [vmem:[%s47190_s6 + $0x140] sm:$0xff]  }
0x1883   :  { %v33782_v6 = vpop.f32.mrb[111].mxu0 }
0x1884   :  { %v33783_v16 = vadd.f32 %v33782_v6, %v33781_v34  ;;  %v31510_v34 = vld [vmem:[%s47190_s6 + $0x150] sm:$0xff]   ;;  %v31511_v6 = vld [vmem:[%s47190_s6 + $0x158] sm:$0xff]  }
0x1886   :  { %v10550_v5 = vadd.f32 %v33783_v16, %v42754_v58  ;;  %v31471_v58 = vld [vmem:[%s47190_s6 + $0x18] sm:$0xff]   ;;  %v31512_v16 = vld [vmem:[%s47190_s6 + $0x160] sm:$0xff]  }
0x1887   :  { %39088 = vmatprep.subr.bf16.mxu1 %v31471_v58 }
0x1888   :  { %v39071_v47 = vpack.c.bf16 %v10550_v5, %v10545_v31  ;;  %39090 = vmatpush3.bf16.msra.mxu1 %v31471_v58  ;;  %v31509_v31 = vld [vmem:[%s47190_s6 + $0x148] sm:$0xff]   ;;  %v31522_v58 = vld [vmem:[%s47190_s6 + $0x1b0] sm:$0xff]  }
0x1889   :  { %39092 = vmatprep.subr.bf16.mxu1 %v31472_v45  ;;  %v31513_v5 = vld [vmem:[%s47190_s6 + $0x168] sm:$0xff]  }
0x188a   :  { %39072 = vmatprep.subr.bf16.mxu0 %v39071_v47 }
0x188b   :  { %39074 = vmatpush3.bf16.msra.mxu0 %v39071_v47  ;;  %v31514_v47 = vld [vmem:[%s47190_s6 + $0x170] sm:$0xff]  }
0x188e   :  { %35216 = vmatmul.mubr.msk.f32.vlgmr.msra.gmra.mrb[20].mxu0 %vm839_vm12, %v25465_v62  ;;  %v31515_v62 = vld [vmem:[%s47190_s6 + $0x178] sm:$0xff]  }
0x188f   :  { %35218 = vmatprep.mubr.msk.f32.mxu0 %vm839_vm12, %v25466_v9  ;;  %v31520_v9 = vld [vmem:[%s47190_s6 + $0x1a0] sm:$0xff]  }
0x1892   :  { %35219 = vmatmul.mubr.msk.f32.gmra.mrb[22].mxu0 %vm839_vm12, %v25467_v49  ;;  %v31521_v49 = vld [vmem:[%s47190_s6 + $0x1a8] sm:$0xff]  }
0x1893   :  { %35273 = vmatprep.mubr.msk.f32.mxu0 %vm10932_vm2, %v25488_v18 }
0x1961   :  { %v35217_v22 = vpop.f32.mrb[20].mxu0 }
0x1962   :  { %v10684_v1 = vadd.f32 %v35217_v22, %v10671_v42  ;;  %v10636_v12 = vpop.f32.mrb[21].mxu0  ;;  %v31525_v42 = vld [vmem:[%s47190_s6 + $0x1c8] sm:$0xff]   ;;  %v31526_v22 = vld [vmem:[%s47190_s6 + $0x1d0] sm:$0xff]  }
0x1963   :  { %v10683_v50 = vadd.f32 %v10666_v30, %v10636_v12  ;;  %v31524_v30 = vld [vmem:[%s47190_s6 + $0x1c0] sm:$0xff]  }
0x1964   :  { %vm10688_vm13 = vcmp.ge.f32.partialorder %v10684_v1, 0.0  ;;  %v10692_v52 = vmul.f32 0.1, %v10684_v1  ;;  %v31528_v12 = vld [vmem:[%s47190_s6 + $0x1e0] sm:$0xff]  }
0x1965   :  { %vm10687_vm15 = vcmp.ge.f32.partialorder %v10683_v50, 0.0  ;;  %v10691_v14 = vmul.f32 0.1, %v10683_v50  ;;  %v35220_v27 = vpop.f32.mrb[22].mxu0 }
0x1966   :  { %v44187_v61 = vsel %vm10688_vm13, %v10684_v1, %v10692_v52  ;;  %v10686_v8 = vadd.f32 %v35220_v27, %v10681_v10  ;;  %v10646_v63 = vpop.f32.mrb[23].mxu0  ;;  %v31527_v1 = vld [vmem:[%s47190_s6 + $0x1d8] sm:$0xff]   ;;  %v31530_v52 = vld [vmem:[%s47190_s6 + $0x1f0] sm:$0xff]   ;;  %v31533_v27 = vld [vmem:[%s47190_s6 + $0x208] sm:$0xff]  }
0x1967   :  { %v44189_v60 = vsel %vm10687_vm15, %v10683_v50, %v10691_v14  ;;  %v10685_v2 = vadd.f32 %v10676_v19, %v10646_v63  ;;  %10701 = vst.msk [vmem:[#allocation2 + $0x8] sm:$0xff] %vm10699_vm14, %v44187_v61  ;;  %v31529_v50 = vld [vmem:[%s47190_s6 + $0x1e8] sm:$0xff]   ;;  %v31531_v10 = vld [vmem:[%s47190_s6 + $0x1f8] sm:$0xff]   ;;  %v31532_v14 = vld [vmem:[%s47190_s6 + $0x200] sm:$0xff]  }
0x1968   :  { %vm10690_vm0 = vcmp.ge.f32.partialorder %v10686_v8, 0.0  ;;  %v10694_v23 = vmul.f32 0.1, %v10686_v8  ;;  %35237 = vmatprep.mubr.msk.f32.mxu1 %vm10699_vm14, %v44189_v60  ;;  %10700 = vst.msk [vmem:[#allocation2] sm:$0xff] %vm10699_vm14, %v44189_v60 }
0x1969   :  { %vm10689_vm1 = vcmp.ge.f32.partialorder %v10685_v2, 0.0  ;;  %v10693_v15 = vmul.f32 0.1, %v10685_v2  ;;  %35238 = vmatmul.mubr.msk.f32.vlgmr.msra.gmra.mrb[116].mxu1 %vm10699_vm14, %v44187_v61 }
0x196a   :  { %v44202_v20 = vsel %vm10690_vm0, %v10686_v8, %v10694_v23  ;;  %39094 = vmatpush3.bf16.msra.mxu1 %v31472_v45  ;;  %v31523_v45 = vld [vmem:[%s47190_s6 + $0x1b8] sm:$0xff]   ;;  %v31534_v8 = vld [vmem:[%s47190_s6 + $0x210] sm:$0xff]  }
0x196b   :  { %v44204_v28 = vsel %vm10689_vm1, %v10685_v2, %v10693_v15  ;;  %10703 = vst.msk [vmem:[#allocation2 + $0x18] sm:$0xff] %vm10699_vm14, %v44202_v20  ;;  %39096 = vmatprep.subr.bf16.mxu1 %v31473_v35 }
0x196c   :  { %10702 = vst.msk [vmem:[#allocation2 + $0x10] sm:$0xff] %vm10699_vm14, %v44204_v28  ;;  %35240 = vmatprep.mubr.msk.f32.mxu1 %vm10699_vm14, %v44204_v28 }
0x196d   :  { %35241 = vmatmul.mubr.msk.f32.gmra.mrb[118].mxu1 %vm10699_vm14, %v44202_v20 }
0x196e   :  { %39098 = vmatpush3.bf16.msra.mxu1 %v31473_v35  ;;  %35259 = vmatprep.mubr.msk.f32.mxu1 %vm10699_vm14, %v44189_v60  ;;  %v31535_v35 = vld [vmem:[%s47190_s6 + $0x218] sm:$0xff]  }
0x196f   :  { %39100 = vmatprep.subr.bf16.mxu1 %v31474_v53 }
0x1972   :  { %39102 = vmatpush3.bf16.msra.mxu1 %v31474_v53 }
0x1973   :  { %39104 = vmatprep.subr.bf16.mxu1 %v31475_v0 }
0x1976   :  { %39106 = vmatpush3.bf16.msra.mxu1 %v31475_v0  ;;  %v31536_v0 = vld [vmem:[%s47190_s6 + $0x220] sm:$0xff]  }
0x1977   :  { %39124 = vmatprep.subr.bf16.mxu1 %v31476_v26 }
0x1979   :  { %35260 = vmatmul.mubr.msk.f32.vlgmr.msra.gmra.mrb[120].mxu1 %vm10699_vm14, %v44187_v61 }
0x197a   :  { %35262 = vmatprep.mubr.msk.f32.mxu1 %vm10699_vm14, %v44204_v28  ;;  %39126 = vmatpush3.bf16.msra.mxu1 %v31476_v26  ;;  %v31537_v26 = vld [vmem:[%s47190_s6 + $0x228] sm:$0xff]  }
0x197b   :  { %39128 = vmatprep.subr.bf16.mxu1 %v31477_v32 }
0x197d   :  { %35263 = vmatmul.mubr.msk.f32.gmra.mrb[122].mxu1 %vm10699_vm14, %v44202_v20 }
0x197e   :  { %39130 = vmatpush3.bf16.msra.mxu1 %v31477_v32  ;;  %35315 = vmatprep.mubr.msk.f32.mxu1 %vm10699_vm14, %v44189_v60 }
0x197f   :  { %39132 = vmatprep.subr.bf16.mxu1 %v31478_v41 }
0x1982   :  { %39134 = vmatpush3.bf16.msra.mxu1 %v31478_v41  ;;  %v31538_v41 = vld [vmem:[%s47190_s6 + $0x230] sm:$0xff]  }
0x1983   :  { %39136 = vmatprep.subr.bf16.mxu1 %v31479_v38 }
0x1986   :  { %39138 = vmatpush3.bf16.msra.mxu1 %v31479_v38 }
0x1987   :  { %39148 = vmatprep.subr.bf16.mxu1 %v31480_v21 }
0x1989   :  { %35316 = vmatmul.mubr.msk.f32.vlgmr.msra.gmra.mrb[124].mxu1 %vm10699_vm14, %v44187_v61 }
0x198a   :  { %35318 = vmatprep.mubr.msk.f32.mxu1 %vm10699_vm14, %v44204_v28  ;;  %39150 = vmatpush3.bf16.msra.mxu1 %v31480_v21 }
0x198b   :  { %39152 = vmatprep.subr.bf16.mxu1 %v31481_v25 }
0x198d   :  { %35319 = vmatmul.mubr.msk.f32.gmra.mrb[126].mxu1 %vm10699_vm14, %v44202_v20 }
0x198e   :  { %39154 = vmatpush3.bf16.msra.mxu1 %v31481_v25  ;;  %35354 = vmatprep.mubr.msk.f32.mxu1 %vm10699_vm14, %v44189_v60 }
0x198f   :  { %39156 = vmatprep.subr.bf16.mxu1 %v31482_v48 }
0x1992   :  { %39158 = vmatpush3.bf16.msra.mxu1 %v31482_v48  ;;  %v31539_v48 = vld [vmem:[%s47190_s6 + $0x238] sm:$0xff]  }
0x1993   :  { %39160 = vmatprep.subr.bf16.mxu1 %v31483_v54 }
0x1996   :  { %39162 = vmatpush3.bf16.msra.mxu1 %v31483_v54 }
0x1997   :  { %39172 = vmatprep.subr.bf16.mxu1 %v31484_v56 }
0x1999   :  { %35355 = vmatmul.mubr.msk.f32.vlgmr.msra.gmra.mrb[128].mxu1 %vm10699_vm14, %v44187_v61 }
0x199a   :  { %35357 = vmatprep.mubr.msk.f32.mxu1 %vm10699_vm14, %v44204_v28  ;;  %39174 = vmatpush3.bf16.msra.mxu1 %v31484_v56 }
0x199b   :  { %39176 = vmatprep.subr.bf16.mxu1 %v31485_v17 }
0x199d   :  { %35358 = vmatmul.mubr.msk.f32.gmra.mrb[130].mxu1 %vm10699_vm14, %v44202_v20 }
0x199e   :  { %39178 = vmatpush3.bf16.msra.mxu1 %v31485_v17  ;;  %35393 = vmatprep.mubr.msk.f32.mxu1 %vm10699_vm14, %v44189_v60  ;;  %v31540_v17 = vld [vmem:[%s47190_s6 + $0x240] sm:$0xff]  }
0x199f   :  { %39180 = vmatprep.subr.bf16.mxu1 %v31486_v37 }
0x19a2   :  { %39182 = vmatpush3.bf16.msra.mxu1 %v31486_v37  ;;  %v25489_v37 = vld [vmem:[%s47191_s7 + $0x38] sm:$0xff] }
0x19a3   :  { %39184 = vmatprep.subr.bf16.mxu1 %v31487_v36 }
0x19a6   :  { %39186 = vmatpush3.bf16.msra.mxu1 %v31487_v36  ;;  %v25490_v36 = vld [vmem:[%s47191_s7 + $0x40] sm:$0xff] }
0x19a7   :  { %39220 = vmatprep.subr.bf16.mxu1 %v31492_v59 }
0x19a9   :  { %35394 = vmatmul.mubr.msk.f32.vlgmr.msra.gmra.mrb[132].mxu1 %vm10699_vm14, %v44187_v61 }
0x19aa   :  { %35396 = vmatprep.mubr.msk.f32.mxu1 %vm10699_vm14, %v44204_v28  ;;  %39222 = vmatpush3.bf16.msra.mxu1 %v31492_v59  ;;  %v25491_v59 = vld [vmem:[%s47191_s7 + $0x48] sm:$0xff] }
0x19ab   :  { %39224 = vmatprep.subr.bf16.mxu1 %v31493_v3 }
0x19ad   :  { %35397 = vmatmul.mubr.msk.f32.gmra.mrb[134].mxu1 %vm10699_vm14, %v44202_v20 }
0x19ae   :  { %39226 = vmatpush3.bf16.msra.mxu1 %v31493_v3  ;;  %35471 = vmatprep.mubr.msk.f32.mxu1 %vm10699_vm14, %v44189_v60  ;;  %v31541_v3 = vld [vmem:[%s47190_s6 + $0x248] sm:$0xff]  }
0x19af   :  { %39228 = vmatprep.subr.bf16.mxu1 %v31494_v51 }
0x19b2   :  { %39230 = vmatpush3.bf16.msra.mxu1 %v31494_v51  ;;  %v25492_v51 = vld [vmem:[%s47191_s7 + $0x50] sm:$0xff] }
0x19b3   :  { %39232 = vmatprep.subr.bf16.mxu1 %v31495_v57 }
0x19b6   :  { %39234 = vmatpush3.bf16.msra.mxu1 %v31495_v57 }
0x19b7   :  { %39244 = vmatprep.subr.bf16.mxu1 %v31496_v43 }
0x19b9   :  { %35472 = vmatmul.mubr.msk.f32.vlgmr.msra.gmra.mrb[136].mxu1 %vm10699_vm14, %v44187_v61 }
0x19ba   :  { %35474 = vmatprep.mubr.msk.f32.mxu1 %vm10699_vm14, %v44204_v28  ;;  %39246 = vmatpush3.bf16.msra.mxu1 %v31496_v43 }
0x19bb   :  { %39248 = vmatprep.subr.bf16.mxu1 %v31497_v44 }
0x19bd   :  { %35475 = vmatmul.mubr.msk.f32.gmra.mrb[138].mxu1 %vm10699_vm14, %v44202_v20 }
0x19be   :  { %39250 = vmatpush3.bf16.msra.mxu1 %v31497_v44  ;;  %35510 = vmatprep.mubr.msk.f32.mxu1 %vm10699_vm14, %v44189_v60  ;;  %v25493_v44 = vld [vmem:[%s47191_s7 + $0x58] sm:$0xff] }
0x19bf   :  { %39252 = vmatprep.subr.bf16.mxu1 %v31498_v29 }
0x19c2   :  { %39254 = vmatpush3.bf16.msra.mxu1 %v31498_v29 }
0x19c3   :  { %39256 = vmatprep.subr.bf16.mxu1 %v31499_v40 }
0x19c6   :  { %39258 = vmatpush3.bf16.msra.mxu1 %v31499_v40  ;;  %v31542_v40 = vld [vmem:[%s47190_s6 + $0x250] sm:$0xff]  }
0x19c7   :  { %39268 = vmatprep.subr.bf16.mxu1 %v31500_v4 }
0x19c9   :  { %35511 = vmatmul.mubr.msk.f32.vlgmr.msra.gmra.mrb[140].mxu1 %vm10699_vm14, %v44187_v61 }
0x19ca   :  { %35513 = vmatprep.mubr.msk.f32.mxu1 %vm10699_vm14, %v44204_v28  ;;  %39270 = vmatpush3.bf16.msra.mxu1 %v31500_v4  ;;  %v10817_v4 = vld [vmem:[%s47191_s7] sm:$0xff] }
0x19cb   :  { %39272 = vmatprep.subr.bf16.mxu1 %v31501_v7 }
0x19cd   :  { %35514 = vmatmul.mubr.msk.f32.gmra.mrb[142].mxu1 %vm10699_vm14, %v44202_v20 }
0x19ce   :  { %39274 = vmatpush3.bf16.msra.mxu1 %v31501_v7  ;;  %35549 = vmatprep.mubr.msk.f32.mxu1 %vm10699_vm14, %v44189_v60 }
0x19cf   :  { %39276 = vmatprep.subr.bf16.mxu1 %v31502_v11 }
0x19d2   :  { %39278 = vmatpush3.bf16.msra.mxu1 %v31502_v11 }
0x19d3   :  { %39280 = vmatprep.subr.bf16.mxu1 %v31503_v39 }
0x19d6   :  { %39282 = vmatpush3.bf16.msra.mxu1 %v31503_v39  ;;  %v10818_v39 = vld [vmem:[%s47191_s7 + $0x8] sm:$0xff] }
0x19d7   :  { %39292 = vmatprep.subr.bf16.mxu1 %v31504_v13 }
0x19d9   :  { %35550 = vmatmul.mubr.msk.f32.vlgmr.msra.gmra.mrb[144].mxu1 %vm10699_vm14, %v44187_v61 }
0x19da   :  { %35552 = vmatprep.mubr.msk.f32.mxu1 %vm10699_vm14, %v44204_v28  ;;  %39294 = vmatpush3.bf16.msra.mxu1 %v31504_v13  ;;  %v31543_v13 = vld [vmem:[%s47190_s6 + $0x258] sm:$0xff]  }
0x19db   :  { %39296 = vmatprep.subr.bf16.mxu1 %v31505_v33 }
0x19dd   :  { %35553 = vmatmul.mubr.msk.f32.gmra.mrb[146].mxu1 %vm10699_vm14, %v44202_v20 }
0x19de   :  { %39298 = vmatpush3.bf16.msra.mxu1 %v31505_v33  ;;  %35588 = vmatprep.mubr.msk.f32.mxu1 %vm10699_vm14, %v44189_v60  ;;  %v10819_v33 = vld [vmem:[%s47191_s7 + $0x10] sm:$0xff] }
0x19df   :  { %39300 = vmatprep.subr.bf16.mxu1 %v31506_v46 }
0x19e2   :  { %39302 = vmatpush3.bf16.msra.mxu1 %v31506_v46  ;;  %v10820_v46 = vld [vmem:[%s47191_s7 + $0x18] sm:$0xff] }
0x19e3   :  { %39304 = vmatprep.subr.bf16.mxu1 %v31507_v24 }
0x19e6   :  { %39306 = vmatpush3.bf16.msra.mxu1 %v31507_v24  ;;  %v31548_v24 = vld [vmem:[%s47190_s6 + $0x280] sm:$0xff]  }
0x19e7   :  { %39316 = vmatprep.subr.bf16.mxu1 %v31508_v55 }
0x19e9   :  { %35589 = vmatmul.mubr.msk.f32.vlgmr.msra.gmra.mrb[148].mxu1 %vm10699_vm14, %v44187_v61 }
0x19ea   :  { %35591 = vmatprep.mubr.msk.f32.mxu1 %vm10699_vm14, %v44204_v28  ;;  %39318 = vmatpush3.bf16.msra.mxu1 %v31508_v55  ;;  %v10821_v55 = vld [vmem:[%s47191_s7 + $0x20] sm:$0xff] }
0x19eb   :  { %39320 = vmatprep.subr.bf16.mxu1 %v31509_v31 }
0x19ed   :  { %35592 = vmatmul.mubr.msk.f32.gmra.mrb[150].mxu1 %vm10699_vm14, %v44202_v20 }
0x19ee   :  { %39322 = vmatpush3.bf16.msra.mxu1 %v31509_v31  ;;  %35627 = vmatprep.mubr.msk.f32.mxu1 %vm10699_vm14, %v44189_v60  ;;  %v10822_v31 = vld [vmem:[%s47191_s7 + $0x28] sm:$0xff] }
0x19ef   :  { %39324 = vmatprep.subr.bf16.mxu1 %v31510_v34 }
0x19f2   :  { %39326 = vmatpush3.bf16.msra.mxu1 %v31510_v34  ;;  %v31549_v34 = vld [vmem:[%s47190_s6 + $0x288] sm:$0xff]  }
0x19f3   :  { %39328 = vmatprep.subr.bf16.mxu1 %v31511_v6 }
0x19f6   :  { %39330 = vmatpush3.bf16.msra.mxu1 %v31511_v6  ;;  %v25518_v6 = vld [vmem:[%s47191_s7 + $0x60] sm:$0xff] }
0x19f7   :  { %39340 = vmatprep.subr.bf16.mxu1 %v31512_v16 }
0x19f9   :  { %35628 = vmatmul.mubr.msk.f32.vlgmr.msra.gmra.mrb[152].mxu1 %vm10699_vm14, %v44187_v61 }
0x19fa   :  { %35630 = vmatprep.mubr.msk.f32.mxu1 %vm10699_vm14, %v44204_v28  ;;  %39342 = vmatpush3.bf16.msra.mxu1 %v31512_v16 }
0x19fb   :  { %39344 = vmatprep.subr.bf16.mxu1 %v31513_v5 }
0x19fd   :  { %35631 = vmatmul.mubr.msk.f32.gmra.mrb[154].mxu1 %vm10699_vm14, %v44202_v20 }
0x19fe   :  { %39346 = vmatpush3.bf16.msra.mxu1 %v31513_v5  ;;  %35666 = vmatprep.mubr.msk.f32.mxu1 %vm10699_vm14, %v44189_v60 }
0x19ff   :  { %39348 = vmatprep.subr.bf16.mxu1 %v31514_v47 }
0x1a02   :  { %39350 = vmatpush3.bf16.msra.mxu1 %v31514_v47  ;;  %v25519_v47 = vld [vmem:[%s47191_s7 + $0x68] sm:$0xff] }
0x1a03   :  { %39352 = vmatprep.subr.bf16.mxu1 %v31515_v62 }
0x1a06   :  { %39354 = vmatpush3.bf16.msra.mxu1 %v31515_v62 }
0x1a07   :  { %39388 = vmatprep.subr.bf16.mxu1 %v31520_v9 }
0x1a09   :  { %35667 = vmatmul.mubr.msk.f32.vlgmr.msra.gmra.mrb[156].mxu1 %vm10699_vm14, %v44187_v61 }
0x1a0a   :  { %35669 = vmatprep.mubr.msk.f32.mxu1 %vm10699_vm14, %v44204_v28  ;;  %39390 = vmatpush3.bf16.msra.mxu1 %v31520_v9  ;;  %v31550_v9 = vld [vmem:[%s47190_s6 + $0x290] sm:$0xff]  }
0x1a0b   :  { %39392 = vmatprep.subr.bf16.mxu1 %v31521_v49 }
0x1a0d   :  { %35670 = vmatmul.mubr.msk.f32.gmra.mrb[158].mxu1 %vm10699_vm14, %v44202_v20 }
0x1a0e   :  { %39394 = vmatpush3.bf16.msra.mxu1 %v31521_v49  ;;  %35744 = vmatprep.mubr.msk.f32.mxu1 %vm10699_vm14, %v44189_v60  ;;  %v25520_v49 = vld [vmem:[%s47191_s7 + $0x70] sm:$0xff] }
0x1a0f   :  { %39396 = vmatprep.subr.bf16.mxu1 %v31522_v58 }
0x1a12   :  { %39398 = vmatpush3.bf16.msra.mxu1 %v31522_v58 }
0x1a13   :  { %39400 = vmatprep.subr.bf16.mxu1 %v31523_v45 }
0x1a16   :  { %39402 = vmatpush3.bf16.msra.mxu1 %v31523_v45 }
0x1a17   :  { %39412 = vmatprep.subr.bf16.mxu1 %v31524_v30 }
0x1a19   :  { %35745 = vmatmul.mubr.msk.f32.vlgmr.msra.gmra.mrb[160].mxu1 %vm10699_vm14, %v44187_v61 }
0x1a1a   :  { %35747 = vmatprep.mubr.msk.f32.mxu1 %vm10699_vm14, %v44204_v28  ;;  %39414 = vmatpush3.bf16.msra.mxu1 %v31524_v30  ;;  %v25521_v30 = vld [vmem:[%s47191_s7 + $0x78] sm:$0xff] }
0x1a1b   :  { %39416 = vmatprep.subr.bf16.mxu1 %v31525_v42 }
0x1a1d   :  { %35748 = vmatmul.mubr.msk.f32.gmra.mrb[162].mxu1 %vm10699_vm14, %v44202_v20 }
0x1a1e   :  { %39418 = vmatpush3.bf16.msra.mxu1 %v31525_v42  ;;  %35783 = vmatprep.mubr.msk.f32.mxu1 %vm10699_vm14, %v44189_v60 }
0x1a1f   :  { %39420 = vmatprep.subr.bf16.mxu1 %v31526_v22 }
0x1a22   :  { %39422 = vmatpush3.bf16.msra.mxu1 %v31526_v22  ;;  %v31551_v22 = vld [vmem:[%s47190_s6 + $0x298] sm:$0xff]  }
0x1a23   :  { %39424 = vmatprep.subr.bf16.mxu1 %v31527_v1 }
0x1a26   :  { %39426 = vmatpush3.bf16.msra.mxu1 %v31527_v1  ;;  %v25522_v1 = vld [vmem:[%s47191_s7 + $0x80] sm:$0xff] }
0x1a27   :  { %39436 = vmatprep.subr.bf16.mxu1 %v31528_v12 }
0x1a29   :  { %35784 = vmatmul.mubr.msk.f32.vlgmr.msra.gmra.mrb[164].mxu1 %vm10699_vm14, %v44187_v61 }
0x1a2a   :  { %35786 = vmatprep.mubr.msk.f32.mxu1 %vm10699_vm14, %v44204_v28  ;;  %39438 = vmatpush3.bf16.msra.mxu1 %v31528_v12  ;;  %v25523_v12 = vld [vmem:[%s47191_s7 + $0x88] sm:$0xff] }
0x1a2b   :  { %39440 = vmatprep.subr.bf16.mxu1 %v31529_v50 }
0x1a2d   :  { %35787 = vmatmul.mubr.msk.f32.gmra.mrb[166].mxu1 %vm10699_vm14, %v44202_v20 }
0x1a2e   :  { %39442 = vmatpush3.bf16.msra.mxu1 %v31529_v50  ;;  %35822 = vmatprep.mubr.msk.f32.mxu1 %vm10699_vm14, %v44189_v60  ;;  %v31552_v50 = vld [vmem:[%s47190_s6 + $0x2a0] sm:$0xff]  }
0x1a2f   :  { %39444 = vmatprep.subr.bf16.mxu1 %v31530_v52 }
0x1a32   :  { %39446 = vmatpush3.bf16.msra.mxu1 %v31530_v52  ;;  %v25542_v52 = vld [vmem:[%s47191_s7 + $0x90] sm:$0xff] }
0x1a33   :  { %39448 = vmatprep.subr.bf16.mxu1 %v31531_v10 }
0x1a36   :  { %39450 = vmatpush3.bf16.msra.mxu1 %v31531_v10  ;;  %v25543_v10 = vld [vmem:[%s47191_s7 + $0x98] sm:$0xff] }
0x1a37   :  { %39460 = vmatprep.subr.bf16.mxu1 %v31532_v14 }
0x1a39   :  { %35823 = vmatmul.mubr.msk.f32.vlgmr.msra.gmra.mrb[168].mxu1 %vm10699_vm14, %v44187_v61 }
0x1a3a   :  { %35825 = vmatprep.mubr.msk.f32.mxu1 %vm10699_vm14, %v44204_v28  ;;  %39462 = vmatpush3.bf16.msra.mxu1 %v31532_v14  ;;  %v31553_v14 = vld [vmem:[%s47190_s6 + $0x2a8] sm:$0xff]  }
0x1a3b   :  { %39464 = vmatprep.subr.bf16.mxu1 %v31533_v27 }
0x1a3c   :  { %v35239_v19 = vpop.f32.mrb[116].mxu1 }
0x1a3d   :  { %35826 = vmatmul.mubr.msk.f32.gmra.mrb[170].mxu1 %vm10699_vm14, %v44202_v20  ;;  %v10798_v63 = vpop.f32.mrb[117].mxu1 }
0x1a3e   :  { %v39115_v2 = vpack.c.bf16 %v35239_v19, %v10798_v63  ;;  %39466 = vmatpush3.bf16.msra.mxu1 %v31533_v27  ;;  %35861 = vmatprep.mubr.msk.f32.mxu1 %vm10699_vm14, %v44189_v60  ;;  %v25544_v27 = vld [vmem:[%s47191_s7 + $0xa0] sm:$0xff]  ;;  %v25545_v63 = vld [vmem:[%s47191_s7 + $0xa8] sm:$0xff] }
0x1a3f   :  { %39468 = vmatprep.subr.bf16.mxu1 %v31534_v8 }
0x1a40   :  { %v35242_v23 = vpop.f32.mrb[118].mxu1 }
0x1a41   :  { %v10808_v15 = vpop.f32.mrb[119].mxu1 }
0x1a42   :  { %v39119_v53 = vpack.c.bf16 %v35242_v23, %v10808_v15  ;;  %39470 = vmatpush3.bf16.msra.mxu1 %v31534_v8  ;;  %v31554_v23 = vld [vmem:[%s47190_s6 + $0x2b0] sm:$0xff]  }
0x1a43   :  { %39472 = vmatprep.subr.bf16.mxu1 %v31535_v35 }
0x1a46   :  { %39474 = vmatpush3.bf16.msra.mxu1 %v31535_v35  ;;  %v25546_v35 = vld [vmem:[%s47191_s7 + $0xb0] sm:$0xff] }
0x1a47   :  { %39484 = vmatprep.subr.bf16.mxu1 %v31536_v0 }
0x1a49   :  { %35862 = vmatmul.mubr.msk.f32.vlgmr.msra.gmra.mrb[172].mxu1 %vm10699_vm14, %v44187_v61 }
0x1a4a   :  { %35864 = vmatprep.mubr.msk.f32.mxu1 %vm10699_vm14, %v44204_v28  ;;  %39486 = vmatpush3.bf16.msra.mxu1 %v31536_v0  ;;  %v25547_v0 = vld [vmem:[%s47191_s7 + $0xb8] sm:$0xff] }
0x1a4b   :  { %39488 = vmatprep.subr.bf16.mxu1 %v31537_v26 }
0x1a4c   :  { %v35261_v32 = vpop.f32.mrb[120].mxu1 }
0x1a4d   :  { %v10906_v38 = vpop.f32.mrb[121].mxu1  ;;  %35865 = vmatmul.mubr.msk.f32.gmra.mrb[174].mxu1 %vm10699_vm14, %v44202_v20 }
0x1a4e   :  { %v39107_v21 = vpack.c.bf16 %v35261_v32, %v10906_v38  ;;  %39490 = vmatpush3.bf16.msra.mxu1 %v31537_v26  ;;  %35900 = vmatprep.mubr.msk.f32.mxu1 %vm10699_vm14, %v44189_v60  ;;  %v31555_v32 = vld [vmem:[%s47190_s6 + $0x2b8] sm:$0xff]   ;;  %v31488_v38 = vld [vmem:[%s47190_s6 + $0xa0] sm:$0xff]  }
0x1a4f   :  { %39492 = vmatprep.subr.bf16.mxu1 %v31538_v41 }
0x1a50   :  { %v35264_v25 = vpop.f32.mrb[122].mxu1  ;;  %39108 = vmatprep.subr.bf16.mxu0 %v39107_v21 }
0x1a51   :  { %v10916_v54 = vpop.f32.mrb[123].mxu1  ;;  %39110 = vmatpush3.bf16.msra.mxu0 %v39107_v21  ;;  %v25567_v21 = vld [vmem:[%s47191_s7 + $0xc8] sm:$0xff] }
0x1a52   :  { %v39111_v56 = vpack.c.bf16 %v35264_v25, %v10916_v54  ;;  %39494 = vmatpush3.bf16.msra.mxu1 %v31538_v41  ;;  %v25566_v41 = vld [vmem:[%s47191_s7 + $0xc0] sm:$0xff]  ;;  %v31489_v54 = vld [vmem:[%s47190_s6 + $0xa8] sm:$0xff]  }
0x1a53   :  { %39496 = vmatprep.subr.bf16.mxu1 %v31539_v48  ;;  %v31556_v25 = vld [vmem:[%s47190_s6 + $0x2c0] sm:$0xff]  }
0x1a54   :  { %39112 = vmatprep.subr.bf16.mxu0 %v39111_v56 }
0x1a55   :  { %39114 = vmatpush3.bf16.msra.mxu0 %v39111_v56  ;;  %v25569_v56 = vld [vmem:[%s47191_s7 + $0xd8] sm:$0xff] }
0x1a56   :  { %39116 = vmatprep.subr.bf16.mxu0 %v39115_v2  ;;  %39498 = vmatpush3.bf16.msra.mxu1 %v31539_v48  ;;  %v25568_v48 = vld [vmem:[%s47191_s7 + $0xd0] sm:$0xff] }
0x1a57   :  { %39508 = vmatprep.subr.bf16.mxu1 %v31540_v17 }
0x1a58   :  { %35274 = vmatmul.mubr.msk.f32.vlgmr.msra.gmra.mrb[112].mxu0 %vm10932_vm2, %v25489_v37  ;;  %v25570_v37 = vld [vmem:[%s47191_s7 + $0xe0] sm:$0xff] }
0x1a59   :  { %39118 = vmatpush3.bf16.msra.mxu0 %v39115_v2  ;;  %35901 = vmatmul.mubr.msk.f32.vlgmr.msra.gmra.mrb[176].mxu1 %vm10699_vm14, %v44187_v61 }
0x1a5a   :  { %39120 = vmatprep.subr.bf16.mxu0 %v39119_v53  ;;  %35903 = vmatprep.mubr.msk.f32.mxu1 %vm10699_vm14, %v44204_v28 }
0x1a5b   :  { %39510 = vmatpush3.bf16.msra.mxu1 %v31540_v17  ;;  %35276 = vmatprep.mubr.msk.f32.mxu0 %vm10932_vm2, %v25490_v36  ;;  %v31557_v17 = vld [vmem:[%s47190_s6 + $0x2c8] sm:$0xff]   ;;  %v31490_v36 = vld [vmem:[%s47190_s6 + $0xb0] sm:$0xff]  }
0x1a5c   :  { %35277 = vmatmul.mubr.msk.f32.gmra.mrb[114].mxu0 %vm10932_vm2, %v25491_v59  ;;  %v35317_v57 = vpop.f32.mrb[124].mxu1  ;;  %39512 = vmatprep.subr.bf16.mxu1 %v31541_v3 }
0x1a5d   :  { %39122 = vmatpush3.bf16.msra.mxu0 %v39119_v53  ;;  %v11242_v43 = vpop.f32.mrb[125].mxu1  ;;  %35904 = vmatmul.mubr.msk.f32.gmra.mrb[178].mxu1 %vm10699_vm14, %v44202_v20 }
0x1a5e   :  { %v39139_v29 = vpack.c.bf16 %v35317_v57, %v11242_v43  ;;  %35939 = vmatprep.mubr.msk.f32.mxu1 %vm10699_vm14, %v44189_v60  ;;  %35279 = vmatprep.mubr.msk.f32.mxu0 %vm10932_vm2, %v25492_v51  ;;  %v25571_v51 = vld [vmem:[%s47191_s7 + $0xe8] sm:$0xff]  ;;  %v31558_v57 = vld [vmem:[%s47190_s6 + $0x2d0] sm:$0xff]  }
0x1a5f   :  { %39514 = vmatpush3.bf16.msra.mxu1 %v31541_v3 }
0x1a60   :  { %35280 = vmatmul.mubr.msk.f32.gmra.mrb[116].mxu0 %vm10932_vm2, %v25493_v44  ;;  %v35320_v7 = vpop.f32.mrb[126].mxu1  ;;  %39140 = vmatprep.subr.bf16.mxu0 %v39139_v29  ;;  %v31491_v44 = vld [vmem:[%s47190_s6 + $0xb8] sm:$0xff]  }
0x1a61   :  { %v11252_v11 = vpop.f32.mrb[127].mxu1  ;;  %39516 = vmatprep.subr.bf16.mxu1 %v31542_v40  ;;  %35290 = vmatprep.mubr.msk.f32.mxu0 %vm10932_vm2, %v10817_v4  ;;  %v31559_v4 = vld [vmem:[%s47190_s6 + $0x2d8] sm:$0xff]  }
0x1a62   :  { %v39143_v18 = vpack.c.bf16 %v35320_v7, %v11252_v11  ;;  %v31560_v11 = vld [vmem:[%s47190_s6 + $0x2e0] sm:$0xff]  }
0x1a63   :  { %39518 = vmatpush3.bf16.msra.mxu1 %v31542_v40 }
0x1a64   :  { %35291 = vmatmul.mubr.msk.f32.vlgmr.msra.gmra.mrb[112].mxu0 %vm10932_vm2, %v10818_v39  ;;  %39520 = vmatprep.subr.bf16.mxu1 %v31543_v13  ;;  %v31561_v39 = vld [vmem:[%s47190_s6 + $0x2e8] sm:$0xff]  }
0x1a65   :  { %39142 = vmatpush3.bf16.msra.mxu0 %v39139_v29  ;;  %35293 = vmatprep.mubr.msk.f32.mxu0 %vm10932_vm2, %v10819_v33  ;;  %v31562_v33 = vld [vmem:[%s47190_s6 + $0x2f0] sm:$0xff]  }
0x1a66   :  { %39144 = vmatprep.subr.bf16.mxu0 %v39143_v18 }
0x1a67   :  { %39522 = vmatpush3.bf16.msra.mxu1 %v31543_v13 }
0x1a68   :  { %35294 = vmatmul.mubr.msk.f32.gmra.mrb[114].mxu0 %vm10932_vm2, %v10820_v46  ;;  %39556 = vmatprep.subr.bf16.mxu1 %v31548_v24 }
0x1a69   :  { %39146 = vmatpush3.bf16.msra.mxu0 %v39143_v18  ;;  %35296 = vmatprep.mubr.msk.f32.mxu0 %vm10932_vm2, %v10821_v55 }
0x1a6a   :  { %35940 = vmatmul.mubr.msk.f32.vlgmr.msra.gmra.mrb[180].mxu1 %vm10699_vm14, %v44187_v61 }
0x1a6b   :  { %35942 = vmatprep.mubr.msk.f32.mxu1 %vm10699_vm14, %v44204_v28  ;;  %39558 = vmatpush3.bf16.msra.mxu1 %v31548_v24 }
0x1a6c   :  { %35297 = vmatmul.mubr.msk.f32.gmra.mrb[116].mxu0 %vm10932_vm2, %v10822_v31  ;;  %v35356_v16 = vpop.f32.mrb[128].mxu1  ;;  %39560 = vmatprep.subr.bf16.mxu1 %v31549_v34  ;;  %v31563_v31 = vld [vmem:[%s47190_s6 + $0x2f8] sm:$0xff]  }
0x1a6d   :  { %v11470_v5 = vpop.f32.mrb[129].mxu1  ;;  %35329 = vmatprep.mubr.msk.f32.mxu0 %vm10932_vm2, %v25518_v6  ;;  %v31564_v6 = vld [vmem:[%s47190_s6 + $0x300] sm:$0xff]  }
0x1a6e   :  { %v39163_v62 = vpack.c.bf16 %v35356_v16, %v11470_v5  ;;  %35943 = vmatmul.mubr.msk.f32.gmra.mrb[182].mxu1 %vm10699_vm14, %v44202_v20  ;;  %v31565_v16 = vld [vmem:[%s47190_s6 + $0x308] sm:$0xff]  }
0x1a6f   :  { %39562 = vmatpush3.bf16.msra.mxu1 %v31549_v34  ;;  %36017 = vmatprep.mubr.msk.f32.mxu1 %vm10699_vm14, %v44189_v60 }
0x1a70   :  { %35330 = vmatmul.mubr.msk.f32.vlgmr.msra.gmra.mrb[112].mxu0 %vm10932_vm2, %v25519_v47  ;;  %v35359_v58 = vpop.f32.mrb[130].mxu1  ;;  %39164 = vmatprep.subr.bf16.mxu0 %v39163_v62 }
0x1a71   :  { %v11480_v45 = vpop.f32.mrb[131].mxu1  ;;  %39166 = vmatpush3.bf16.msra.mxu0 %v39163_v62  ;;  %39564 = vmatprep.subr.bf16.mxu1 %v31550_v9  ;;  %v31566_v62 = vld [vmem:[%s47190_s6 + $0x310] sm:$0xff]  }
0x1a72   :  { %v39167_v42 = vpack.c.bf16 %v35359_v58, %v11480_v45  ;;  %35332 = vmatprep.mubr.msk.f32.mxu0 %vm10932_vm2, %v25520_v49  ;;  %v31567_v45 = vld [vmem:[%s47190_s6 + $0x318] sm:$0xff]  }
0x1a73   :  { %39566 = vmatpush3.bf16.msra.mxu1 %v31550_v9 }
0x1a74   :  { %35333 = vmatmul.mubr.msk.f32.gmra.mrb[114].mxu0 %vm10932_vm2, %v25521_v30  ;;  %39168 = vmatprep.subr.bf16.mxu0 %v39167_v42 }
0x1a75   :  { %39170 = vmatpush3.bf16.msra.mxu0 %v39167_v42  ;;  %39568 = vmatprep.subr.bf16.mxu1 %v31551_v22  ;;  %v31568_v42 = vld [vmem:[%s47190_s6 + $0x320] sm:$0xff]  }
0x1a76   :  { %35335 = vmatprep.mubr.msk.f32.mxu0 %vm10932_vm2, %v25522_v1 }
0x1a77   :  { %39570 = vmatpush3.bf16.msra.mxu1 %v31551_v22  ;;  %v31569_v22 = vld [vmem:[%s47190_s6 + $0x328] sm:$0xff]  }
0x1a78   :  { %35336 = vmatmul.mubr.msk.f32.gmra.mrb[116].mxu0 %vm10932_vm2, %v25523_v12  ;;  %39580 = vmatprep.subr.bf16.mxu1 %v31552_v50 }
0x1a79   :  { %35368 = vmatprep.mubr.msk.f32.mxu0 %vm10932_vm2, %v25542_v52 }
0x1a7a   :  { %36018 = vmatmul.mubr.msk.f32.vlgmr.msra.gmra.mrb[184].mxu1 %vm10699_vm14, %v44187_v61 }
0x1a7b   :  { %36020 = vmatprep.mubr.msk.f32.mxu1 %vm10699_vm14, %v44204_v28  ;;  %39582 = vmatpush3.bf16.msra.mxu1 %v31552_v50  ;;  %v31570_v50 = vld [vmem:[%s47190_s6 + $0x330] sm:$0xff]  }
0x1a7c   :  { %35369 = vmatmul.mubr.msk.f32.vlgmr.msra.gmra.mrb[112].mxu0 %vm10932_vm2, %v25543_v10  ;;  %v35395_v19 = vpop.f32.mrb[132].mxu1  ;;  %39584 = vmatprep.subr.bf16.mxu1 %v31553_v14 }
0x1a7d   :  { %v11698_v8 = vpop.f32.mrb[133].mxu1  ;;  %35371 = vmatprep.mubr.msk.f32.mxu0 %vm10932_vm2, %v25544_v27  ;;  %v31571_v27 = vld [vmem:[%s47190_s6 + $0x338] sm:$0xff]  }
0x1a7e   :  { %v39187_v2 = vpack.c.bf16 %v35395_v19, %v11698_v8  ;;  %36021 = vmatmul.mubr.msk.f32.gmra.mrb[186].mxu1 %vm10699_vm14, %v44202_v20 }
0x1a7f   :  { %39586 = vmatpush3.bf16.msra.mxu1 %v31553_v14  ;;  %36056 = vmatprep.mubr.msk.f32.mxu1 %vm10699_vm14, %v44189_v60 }
0x1a80   :  { %35372 = vmatmul.mubr.msk.f32.gmra.mrb[114].mxu0 %vm10932_vm2, %v25545_v63  ;;  %v35398_v15 = vpop.f32.mrb[134].mxu1  ;;  %39188 = vmatprep.subr.bf16.mxu0 %v39187_v2 }
0x1a81   :  { %v11708_v53 = vpop.f32.mrb[135].mxu1  ;;  %39190 = vmatpush3.bf16.msra.mxu0 %v39187_v2  ;;  %39588 = vmatprep.subr.bf16.mxu1 %v31554_v23 }
0x1a82   :  { %v39191_v26 = vpack.c.bf16 %v35398_v15, %v11708_v53  ;;  %35374 = vmatprep.mubr.msk.f32.mxu0 %vm10932_vm2, %v25546_v35 }
0x1a83   :  { %39590 = vmatpush3.bf16.msra.mxu1 %v31554_v23 }
0x1a84   :  { %35375 = vmatmul.mubr.msk.f32.gmra.mrb[116].mxu0 %vm10932_vm2, %v25547_v0  ;;  %39192 = vmatprep.subr.bf16.mxu0 %v39191_v26 }
0x1a85   :  { %39194 = vmatpush3.bf16.msra.mxu0 %v39191_v26  ;;  %39592 = vmatprep.subr.bf16.mxu1 %v31555_v32 }
0x1a86   :  { %35407 = vmatprep.mubr.msk.f32.mxu0 %vm10932_vm2, %v25566_v41  ;;  %39196 = vmatprep.subr.bf16.mxu0 %v31488_v38 }
0x1a87   :  { %39594 = vmatpush3.bf16.msra.mxu1 %v31555_v32 }
0x1a88   :  { %35408 = vmatmul.mubr.msk.f32.vlgmr.msra.gmra.mrb[112].mxu0 %vm10932_vm2, %v25567_v21  ;;  %39604 = vmatprep.subr.bf16.mxu1 %v31556_v25 }
0x1a89   :  { %39198 = vmatpush3.bf16.msra.mxu0 %v31488_v38  ;;  %35410 = vmatprep.mubr.msk.f32.mxu0 %vm10932_vm2, %v25568_v48 }
0x1a8a   :  { %36057 = vmatmul.mubr.msk.f32.vlgmr.msra.gmra.mrb[188].mxu1 %vm10699_vm14, %v44187_v61  ;;  %39200 = vmatprep.subr.bf16.mxu0 %v31489_v54 }
0x1a8b   :  { %36059 = vmatprep.mubr.msk.f32.mxu1 %vm10699_vm14, %v44204_v28  ;;  %39606 = vmatpush3.bf16.msra.mxu1 %v31556_v25 }
0x1a8c   :  { %35411 = vmatmul.mubr.msk.f32.gmra.mrb[114].mxu0 %vm10932_vm2, %v25569_v56  ;;  %v35473_v59 = vpop.f32.mrb[136].mxu1  ;;  %39608 = vmatprep.subr.bf16.mxu1 %v31557_v17 }
0x1a8d   :  { %39202 = vmatpush3.bf16.msra.mxu0 %v31489_v54  ;;  %v12154_v3 = vpop.f32.mrb[137].mxu1  ;;  %35413 = vmatprep.mubr.msk.f32.mxu0 %vm10932_vm2, %v25570_v37  ;;  %v25590_v37 = vld [vmem:[%s47191_s7 + $0xf0] sm:$0xff] }
0x1a8e   :  { %v44703_v43 = vpack.c.bf16 %v35473_v59, %v12154_v3  ;;  %36060 = vmatmul.mubr.msk.f32.gmra.mrb[190].mxu1 %vm10699_vm14, %v44202_v20  ;;  %39204 = vmatprep.subr.bf16.mxu0 %v31490_v36 }
0x1a8f   :  { %39610 = vmatpush3.bf16.msra.mxu1 %v31557_v17  ;;  %36095 = vmatprep.mubr.msk.f32.mxu1 %vm10699_vm14, %v44189_v60 }
0x1a90   :  { %35414 = vmatmul.mubr.msk.f32.gmra.mrb[116].mxu0 %vm10932_vm2, %v25571_v51  ;;  %v35476_v29 = vpop.f32.mrb[138].mxu1  ;;  %39612 = vmatprep.subr.bf16.mxu1 %v31558_v57 }
0x1a91   :  { %39206 = vmatpush3.bf16.msra.mxu0 %v31490_v36  ;;  %35432 = vmatprep.mubr.msk.f32.mxu0 %vm10699_vm14, %v44189_v60  ;;  %v12164_v40 = vpop.f32.mrb[139].mxu1 }
0x1a92   :  { %v44718_v7 = vpack.c.bf16 %v35476_v29, %v12164_v40  ;;  %39208 = vmatprep.subr.bf16.mxu0 %v31491_v44 }
0x1a93   :  { %39614 = vmatpush3.bf16.msra.mxu1 %v31558_v57 }
0x1a94   :  { %39616 = vmatprep.subr.bf16.mxu1 %v31559_v4 }
0x1a95   :  { %39210 = vmatpush3.bf16.msra.mxu0 %v31491_v44 }
0x1a97   :  { %39618 = vmatpush3.bf16.msra.mxu1 %v31559_v4 }
0x1a98   :  { %35433 = vmatmul.mubr.msk.f32.vlgmr.msra.gmra.mrb[118].mxu0 %vm10699_vm14, %v44187_v61  ;;  %39628 = vmatprep.subr.bf16.mxu1 %v31560_v11 }
0x1a99   :  { %35435 = vmatprep.mubr.msk.f32.mxu0 %vm10699_vm14, %v44204_v28 }
0x1a9a   :  { %36096 = vmatmul.mubr.msk.f32.vlgmr.msra.gmra.mrb[192].mxu1 %vm10699_vm14, %v44187_v61 }
0x1a9b   :  { %36098 = vmatprep.mubr.msk.f32.mxu1 %vm10699_vm14, %v44204_v28  ;;  %39630 = vmatpush3.bf16.msra.mxu1 %v31560_v11 }
0x1a9c   :  { %35436 = vmatmul.mubr.msk.f32.gmra.mrb[120].mxu0 %vm10699_vm14, %v44202_v20  ;;  %v35512_v13 = vpop.f32.mrb[140].mxu1  ;;  %39632 = vmatprep.subr.bf16.mxu1 %v31561_v39 }
0x1a9d   :  { %v12382_v18 = vpop.f32.mrb[141].mxu1  ;;  %35446 = vmatprep.mubr.msk.f32.mxu0 %vm10932_vm2, %v25590_v37 }
0x1a9e   :  { %v44739_v46 = vpack.c.bf16 %v35512_v13, %v12382_v18  ;;  %36099 = vmatmul.mubr.msk.f32.gmra.mrb[194].mxu1 %vm10699_vm14, %v44202_v20 }
0x1a9f   :  { %39634 = vmatpush3.bf16.msra.mxu1 %v31561_v39  ;;  %36134 = vmatprep.mubr.msk.f32.mxu1 %vm10699_vm14, %v44189_v60 }
0x1aa0   :  { %v35515_v24 = vpop.f32.mrb[142].mxu1  ;;  %39636 = vmatprep.subr.bf16.mxu1 %v31562_v33 }
0x1aa1   :  { %v12392_v55 = vpop.f32.mrb[143].mxu1 }
0x1aa2   :  { %v44748_v34 = vpack.c.bf16 %v35515_v24, %v12392_v55 }
0x1aa3   :  { %39638 = vmatpush3.bf16.msra.mxu1 %v31562_v33 }
0x1aa4   :  { %39640 = vmatprep.subr.bf16.mxu1 %v31563_v31 }
0x1aa7   :  { %39642 = vmatpush3.bf16.msra.mxu1 %v31563_v31 }
0x1aa8   :  { %39652 = vmatprep.subr.bf16.mxu1 %v31564_v6 }
0x1aaa   :  { %36135 = vmatmul.mubr.msk.f32.vlgmr.msra.gmra.mrb[196].mxu1 %vm10699_vm14, %v44187_v61 }
0x1aab   :  { %36137 = vmatprep.mubr.msk.f32.mxu1 %vm10699_vm14, %v44204_v28  ;;  %39654 = vmatpush3.bf16.msra.mxu1 %v31564_v6 }
0x1aac   :  { %v35551_v5 = vpop.f32.mrb[144].mxu1  ;;  %39656 = vmatprep.subr.bf16.mxu1 %v31565_v16 }
0x1aad   :  { %v12610_v47 = vpop.f32.mrb[145].mxu1 }
0x1aae   :  { %v44763_v9 = vpack.c.bf16 %v35551_v5, %v12610_v47  ;;  %36138 = vmatmul.mubr.msk.f32.gmra.mrb[198].mxu1 %vm10699_vm14, %v44202_v20 }
0x1aaf   :  { %39658 = vmatpush3.bf16.msra.mxu1 %v31565_v16  ;;  %36173 = vmatprep.mubr.msk.f32.mxu1 %vm10699_vm14, %v44189_v60 }
0x1ab0   :  { %v35554_v49 = vpop.f32.mrb[146].mxu1  ;;  %39660 = vmatprep.subr.bf16.mxu1 %v31566_v62 }
0x1ab1   :  { %v12620_v58 = vpop.f32.mrb[147].mxu1 }
0x1ab2   :  { %v44772_v30 = vpack.c.bf16 %v35554_v49, %v12620_v58 }
0x1ab3   :  { %39662 = vmatpush3.bf16.msra.mxu1 %v31566_v62 }
0x1ab4   :  { %39664 = vmatprep.subr.bf16.mxu1 %v31567_v45 }
0x1ab7   :  { %39666 = vmatpush3.bf16.msra.mxu1 %v31567_v45 }
0x1ab8   :  { %39676 = vmatprep.subr.bf16.mxu1 %v31568_v42 }
0x1aba   :  { %36174 = vmatmul.mubr.msk.f32.vlgmr.msra.gmra.mrb[200].mxu1 %vm10699_vm14, %v44187_v61 }
0x1abb   :  { %36176 = vmatprep.mubr.msk.f32.mxu1 %vm10699_vm14, %v44204_v28  ;;  %39678 = vmatpush3.bf16.msra.mxu1 %v31568_v42 }
0x1abc   :  { %v35590_v1 = vpop.f32.mrb[148].mxu1  ;;  %39680 = vmatprep.subr.bf16.mxu1 %v31569_v22 }
0x1abd   :  { %v12838_v12 = vpop.f32.mrb[149].mxu1 }
0x1abe   :  { %v44787_v52 = vpack.c.bf16 %v35590_v1, %v12838_v12  ;;  %36177 = vmatmul.mubr.msk.f32.gmra.mrb[202].mxu1 %vm10699_vm14, %v44202_v20 }
0x1abf   :  { %39682 = vmatpush3.bf16.msra.mxu1 %v31569_v22  ;;  %36212 = vmatprep.mubr.msk.f32.mxu1 %vm10699_vm14, %v44189_v60 }
0x1ac0   :  { %v35593_v10 = vpop.f32.mrb[150].mxu1  ;;  %39684 = vmatprep.subr.bf16.mxu1 %v31570_v50 }
0x1ac1   :  { %v12848_v14 = vpop.f32.mrb[151].mxu1 }
0x1ac2   :  { %v44796_v19 = vpack.c.bf16 %v35593_v10, %v12848_v14 }
0x1ac3   :  { %39686 = vmatpush3.bf16.msra.mxu1 %v31570_v50 }
0x1ac4   :  { %39688 = vmatprep.subr.bf16.mxu1 %v31571_v27 }
0x1ac7   :  { %39690 = vmatpush3.bf16.msra.mxu1 %v31571_v27 }
0x1aca   :  { %36213 = vmatmul.mubr.msk.f32.vlgmr.msra.gmra.mrb[204].mxu1 %vm10699_vm14, %v44187_v61 }
0x1acb   :  { %36215 = vmatprep.mubr.msk.f32.mxu1 %vm10699_vm14, %v44204_v28 }
0x1acc   :  { %v35629_v8 = vpop.f32.mrb[152].mxu1 }
0x1acd   :  { %v13066_v63 = vpop.f32.mrb[153].mxu1 }
0x1ace   :  { %v44802_v2 = vpack.c.bf16 %v35629_v8, %v13066_v63  ;;  %36216 = vmatmul.mubr.msk.f32.gmra.mrb[206].mxu1 %vm10699_vm14, %v44202_v20 }
0x1ad0   :  { %v35632_v23 = vpop.f32.mrb[154].mxu1 }
0x1ad1   :  { %v13076_v35 = vpop.f32.mrb[155].mxu1 }
0x1ad2   :  { %v44806_v15 = vpack.c.bf16 %v35632_v23, %v13076_v35 }
0x1adc   :  { %v35668_v53 = vpop.f32.mrb[156].mxu1 }
0x1add   :  { %v13294_v0 = vpop.f32.mrb[157].mxu1 }
0x1ade   :  { %v44808_v26 = vpack.c.bf16 %v35668_v53, %v13294_v0 }
0x1ae0   :  { %v35671_v32 = vpop.f32.mrb[158].mxu1 }
0x1ae1   :  { %v13304_v41 = vpop.f32.mrb[159].mxu1 }
0x1ae2   :  { %v44810_v38 = vpack.c.bf16 %v35671_v32, %v13304_v41 }
0x1aec   :  { %v35746_v21 = vpop.f32.mrb[160].mxu1 }
0x1aed   :  { %v13750_v25 = vpop.f32.mrb[161].mxu1 }
0x1aee   :  { %v44812_v48 = vpack.c.bf16 %v35746_v21, %v13750_v25 }
0x1af0   :  { %v35749_v54 = vpop.f32.mrb[162].mxu1 }
0x1af1   :  { %v13760_v56 = vpop.f32.mrb[163].mxu1 }
0x1af2   :  { %v44814_v17 = vpack.c.bf16 %v35749_v54, %v13760_v56 }
0x1afc   :  { %v35785_v36 = vpop.f32.mrb[164].mxu1 }
0x1afd   :  { %v13978_v59 = vpop.f32.mrb[165].mxu1 }
0x1afe   :  { %v44820_v3 = vpack.c.bf16 %v35785_v36, %v13978_v59 }
0x1b00   :  { %v35788_v51 = vpop.f32.mrb[166].mxu1 }
0x1b01   :  { %v13988_v57 = vpop.f32.mrb[167].mxu1 }
0x1b02   :  { %v44822_v44 = vpack.c.bf16 %v35788_v51, %v13988_v57 }
0x1b0c   :  { %v35824_v29 = vpop.f32.mrb[168].mxu1 }
0x1b0d   :  { %v14206_v40 = vpop.f32.mrb[169].mxu1 }
0x1b0e   :  { %v44824_v4 = vpack.c.bf16 %v35824_v29, %v14206_v40 }
0x1b10   :  { %v35827_v11 = vpop.f32.mrb[170].mxu1 }
0x1b11   :  { %v14216_v39 = vpop.f32.mrb[171].mxu1 }
0x1b12   :  { %v44826_v13 = vpack.c.bf16 %v35827_v11, %v14216_v39 }
0x1b1c   :  { %v35863_v18 = vpop.f32.mrb[172].mxu1 }
0x1b1d   :  { %v14434_v33 = vpop.f32.mrb[173].mxu1 }
0x1b1e   :  { %v44828_v24 = vpack.c.bf16 %v35863_v18, %v14434_v33  ;;  %v25591_v18 = vld [vmem:[%s47191_s7 + $0xf8] sm:$0xff]  ;;  %v25592_v33 = vld [vmem:[%s47191_s7 + $0x100] sm:$0xff] }
0x1b20   :  { %v35866_v55 = vpop.f32.mrb[174].mxu1 }
0x1b21   :  { %v14444_v31 = vpop.f32.mrb[175].mxu1 }
0x1b22   :  { %v44830_v6 = vpack.c.bf16 %v35866_v55, %v14444_v31  ;;  %v25593_v55 = vld [vmem:[%s47191_s7 + $0x108] sm:$0xff]  ;;  %v25594_v31 = vld [vmem:[%s47191_s7 + $0x110] sm:$0xff] }
0x1b2c   :  { %v35902_v16 = vpop.f32.mrb[176].mxu1 }
0x1b2d   :  { %v14662_v5 = vpop.f32.mrb[177].mxu1 }
0x1b2e   :  { %v44832_v47 = vpack.c.bf16 %v35902_v16, %v14662_v5  ;;  %v25614_v5 = vld [vmem:[%s47191_s7 + $0x120] sm:$0xff] }
0x1b30   :  { %v35905_v62 = vpop.f32.mrb[178].mxu1 }
0x1b31   :  { %v14672_v49 = vpop.f32.mrb[179].mxu1 }
0x1b32   :  { %v44834_v58 = vpack.c.bf16 %v35905_v62, %v14672_v49 }
0x1b3d   :  { %v35941_v45 = vpop.f32.mrb[180].mxu1 }
0x1b3e   :  { %v14890_v42 = vpop.f32.mrb[181].mxu1 }
0x1b3f   :  { %v44836_v22 = vpack.c.bf16 %v35941_v45, %v14890_v42  ;;  %v25616_v42 = vld [vmem:[%s47191_s7 + $0x130] sm:$0xff] }
0x1b41   :  { %v35944_v1 = vpop.f32.mrb[182].mxu1 }
0x1b42   :  { %v14900_v12 = vpop.f32.mrb[183].mxu1 }
0x1b43   :  { %v44838_v50 = vpack.c.bf16 %v35944_v1, %v14900_v12 }
0x1b4d   :  { %v36019_v10 = vpop.f32.mrb[184].mxu1 }
0x1b4e   :  { %v15346_v14 = vpop.f32.mrb[185].mxu1 }
0x1b4f   :  { %v44840_v27 = vpack.c.bf16 %v36019_v10, %v15346_v14  ;;  %v25617_v10 = vld [vmem:[%s47191_s7 + $0x138] sm:$0xff]  ;;  %v25618_v14 = vld [vmem:[%s47191_s7 + $0x140] sm:$0xff] }
0x1b51   :  { %v36022_v8 = vpop.f32.mrb[186].mxu1 }
0x1b52   :  { %v15356_v63 = vpop.f32.mrb[187].mxu1 }
0x1b53   :  { %v44842_v23 = vpack.c.bf16 %v36022_v8, %v15356_v63  ;;  %v25638_v8 = vld [vmem:[%s47191_s7 + $0x150] sm:$0xff] }
0x1b5d   :  { %v36058_v35 = vpop.f32.mrb[188].mxu1 }
0x1b5e   :  { %v15574_v53 = vpop.f32.mrb[189].mxu1 }
0x1b5f   :  { %v44844_v0 = vpack.c.bf16 %v36058_v35, %v15574_v53  ;;  %v25640_v35 = vld [vmem:[%s47191_s7 + $0x160] sm:$0xff] }
0x1b61   :  { %v36061_v32 = vpop.f32.mrb[190].mxu1 }
0x1b62   :  { %v15584_v41 = vpop.f32.mrb[191].mxu1 }
0x1b63   :  { %v44846_v21 = vpack.c.bf16 %v36061_v32, %v15584_v41  ;;  %v25641_v41 = vld [vmem:[%s47191_s7 + $0x168] sm:$0xff] }
0x1b6b   :  { %v35434_v25 = vpop.f32.mrb[118].mxu0 }
0x1b6c   :  { %v11926_v54 = vpop.f32.mrb[119].mxu0 }
0x1b6d   :  { %v39211_v56 = vpack.c.bf16 %v35434_v25, %v11926_v54  ;;  %v36097_v37 = vpop.f32.mrb[192].mxu1  ;;  %v25642_v54 = vld [vmem:[%s47191_s7 + $0x170] sm:$0xff] }
0x1b6e   :  { %v15802_v36 = vpop.f32.mrb[193].mxu1 }
0x1b6f   :  { %v44848_v59 = vpack.c.bf16 %v36097_v37, %v15802_v36  ;;  %v35437_v51 = vpop.f32.mrb[120].mxu0  ;;  %39212 = vmatprep.subr.bf16.mxu0 %v39211_v56  ;;  %v25662_v36 = vld [vmem:[%s47191_s7 + $0x180] sm:$0xff] }
0x1b70   :  { %v11936_v57 = vpop.f32.mrb[121].mxu0  ;;  %39214 = vmatpush3.bf16.msra.mxu0 %v39211_v56 }
0x1b71   :  { %v39215_v29 = vpack.c.bf16 %v35437_v51, %v11936_v57  ;;  %v36100_v40 = vpop.f32.mrb[194].mxu1  ;;  %v25664_v51 = vld [vmem:[%s47191_s7 + $0x190] sm:$0xff]  ;;  %v25665_v57 = vld [vmem:[%s47191_s7 + $0x198] sm:$0xff] }
0x1b72   :  { %v15812_v11 = vpop.f32.mrb[195].mxu1 }
0x1b73   :  { %v44850_v39 = vpack.c.bf16 %v36100_v40, %v15812_v11  ;;  %39216 = vmatprep.subr.bf16.mxu0 %v39215_v29  ;;  %v25666_v40 = vld [vmem:[%s47191_s7 + $0x1a0] sm:$0xff] }
0x1b74   :  { %39218 = vmatpush3.bf16.msra.mxu0 %v39215_v29 }
0x1b75   :  { %39236 = vmatprep.subr.bf16.mxu0 %v44703_v43 }
0x1b77   :  { %35447 = vmatmul.mubr.msk.f32.vlgmr.msra.gmra.mrb[112].mxu0 %vm10932_vm2, %v25591_v18 }
0x1b78   :  { %39238 = vmatpush3.bf16.msra.mxu0 %v44703_v43  ;;  %35449 = vmatprep.mubr.msk.f32.mxu0 %vm10932_vm2, %v25592_v33  ;;  %v25595_v43 = vld [vmem:[%s47191_s7 + $0x118] sm:$0xff] }
0x1b79   :  { %39240 = vmatprep.subr.bf16.mxu0 %v44718_v7 }
0x1b7b   :  { %35450 = vmatmul.mubr.msk.f32.gmra.mrb[114].mxu0 %vm10932_vm2, %v25593_v55  ;;  %v25686_v55 = vld [vmem:[%s47191_s7 + $0x1b0] sm:$0xff] }
0x1b7c   :  { %39242 = vmatpush3.bf16.msra.mxu0 %v44718_v7  ;;  %35452 = vmatprep.mubr.msk.f32.mxu0 %vm10932_vm2, %v25594_v31  ;;  %v25615_v7 = vld [vmem:[%s47191_s7 + $0x128] sm:$0xff] }
0x1b7d   :  { %v36136_v16 = vpop.f32.mrb[196].mxu1  ;;  %39260 = vmatprep.subr.bf16.mxu0 %v44739_v46 }
0x1b7e   :  { %v16030_v62 = vpop.f32.mrb[197].mxu1 }
0x1b7f   :  { %v44879_v49 = vpack.c.bf16 %v36136_v16, %v16030_v62  ;;  %35453 = vmatmul.mubr.msk.f32.gmra.mrb[116].mxu0 %vm10932_vm2, %v25595_v43  ;;  %v25688_v16 = vld [vmem:[%s47191_s7 + $0x1c0] sm:$0xff]  ;;  %v25690_v62 = vld [vmem:[%s47191_s7 + $0x1d0] sm:$0xff] }
0x1b80   :  { %35485 = vmatprep.mubr.msk.f32.mxu0 %vm10932_vm2, %v25614_v5  ;;  %v25689_v5 = vld [vmem:[%s47191_s7 + $0x1c8] sm:$0xff] }
0x1b81   :  { %v36139_v45 = vpop.f32.mrb[198].mxu1 }
0x1b82   :  { %v16040_v1 = vpop.f32.mrb[199].mxu1 }
0x1b83   :  { %v44889_v12 = vpack.c.bf16 %v36139_v45, %v16040_v1  ;;  %35486 = vmatmul.mubr.msk.f32.vlgmr.msra.gmra.mrb[112].mxu0 %vm10932_vm2, %v25615_v7  ;;  %v25710_v7 = vld [vmem:[%s47191_s7 + $0x1e0] sm:$0xff]  ;;  %v25712_v45 = vld [vmem:[%s47191_s7 + $0x1f0] sm:$0xff] }
0x1b84   :  { %39262 = vmatpush3.bf16.msra.mxu0 %v44739_v46  ;;  %35488 = vmatprep.mubr.msk.f32.mxu0 %vm10932_vm2, %v25616_v42  ;;  %v25619_v46 = vld [vmem:[%s47191_s7 + $0x148] sm:$0xff]  ;;  %v25713_v42 = vld [vmem:[%s47191_s7 + $0x1f8] sm:$0xff]  ;;  %v25714_v1 = vld [vmem:[%s47191_s7 + $0x200] sm:$0xff] }
0x1b85   :  { %39264 = vmatprep.subr.bf16.mxu0 %v44748_v34 }
0x1b87   :  { %35489 = vmatmul.mubr.msk.f32.gmra.mrb[114].mxu0 %vm10932_vm2, %v25617_v10  ;;  %v31516_v10 = vld [vmem:[%s47190_s6 + $0x180] sm:$0xff]  }
0x1b88   :  { %39266 = vmatpush3.bf16.msra.mxu0 %v44748_v34  ;;  %35491 = vmatprep.mubr.msk.f32.mxu0 %vm10932_vm2, %v25618_v14  ;;  %v25639_v34 = vld [vmem:[%s47191_s7 + $0x158] sm:$0xff]  ;;  %v25734_v14 = vld [vmem:[%s47191_s7 + $0x210] sm:$0xff] }
0x1b89   :  { %39284 = vmatprep.subr.bf16.mxu0 %v44763_v9 }
0x1b8b   :  { %35492 = vmatmul.mubr.msk.f32.gmra.mrb[116].mxu0 %vm10932_vm2, %v25619_v46  ;;  %v25735_v46 = vld [vmem:[%s47191_s7 + $0x218] sm:$0xff] }
0x1b8c   :  { %35524 = vmatprep.mubr.msk.f32.mxu0 %vm10932_vm2, %v25638_v8  ;;  %v31517_v8 = vld [vmem:[%s47190_s6 + $0x188] sm:$0xff]  }
0x1b8d   :  { %v36175_v63 = vpop.f32.mrb[200].mxu1 }
0x1b8e   :  { %v16258_v53 = vpop.f32.mrb[201].mxu1 }
0x1b8f   :  { %v44919_v32 = vpack.c.bf16 %v36175_v63, %v16258_v53  ;;  %35525 = vmatmul.mubr.msk.f32.vlgmr.msra.gmra.mrb[112].mxu0 %vm10932_vm2, %v25639_v34  ;;  %v25737_v34 = vld [vmem:[%s47191_s7 + $0x228] sm:$0xff]  ;;  %v25738_v63 = vld [vmem:[%s47191_s7 + $0x230] sm:$0xff]  ;;  %v25739_v53 = vld [vmem:[%s47191_s7 + $0x238] sm:$0xff] }
0x1b90   :  { %39286 = vmatpush3.bf16.msra.mxu0 %v44763_v9  ;;  %35527 = vmatprep.mubr.msk.f32.mxu0 %vm10932_vm2, %v25640_v35  ;;  %v25643_v9 = vld [vmem:[%s47191_s7 + $0x178] sm:$0xff]  ;;  %v31518_v35 = vld [vmem:[%s47190_s6 + $0x190] sm:$0xff]  }
0x1b91   :  { %39288 = vmatprep.subr.bf16.mxu0 %v44772_v30  ;;  %v36178_v25 = vpop.f32.mrb[202].mxu1 }
0x1b92   :  { %v16268_v56 = vpop.f32.mrb[203].mxu1 }
0x1b93   :  { %v44931_v37 = vpack.c.bf16 %v36178_v25, %v16268_v56  ;;  %35528 = vmatmul.mubr.msk.f32.gmra.mrb[114].mxu0 %vm10932_vm2, %v25641_v41  ;;  %v31519_v41 = vld [vmem:[%s47190_s6 + $0x198] sm:$0xff]   ;;  %v25758_v25 = vld [vmem:[%s47191_s7 + $0x240] sm:$0xff] }
0x1b94   :  { %39290 = vmatpush3.bf16.msra.mxu0 %v44772_v30  ;;  %35530 = vmatprep.mubr.msk.f32.mxu0 %vm10932_vm2, %v25642_v54  ;;  %v25663_v30 = vld [vmem:[%s47191_s7 + $0x188] sm:$0xff] }
0x1b95   :  { %39308 = vmatprep.subr.bf16.mxu0 %v44787_v52 }
0x1b97   :  { %35531 = vmatmul.mubr.msk.f32.gmra.mrb[116].mxu0 %vm10932_vm2, %v25643_v9 }
0x1b98   :  { %35563 = vmatprep.mubr.msk.f32.mxu0 %vm10932_vm2, %v25662_v36 }
0x1b9b   :  { %35564 = vmatmul.mubr.msk.f32.vlgmr.msra.gmra.mrb[112].mxu0 %vm10932_vm2, %v25663_v30 }
0x1b9c   :  { %39310 = vmatpush3.bf16.msra.mxu0 %v44787_v52  ;;  %35566 = vmatprep.mubr.msk.f32.mxu0 %vm10932_vm2, %v25664_v51  ;;  %v25667_v52 = vld [vmem:[%s47191_s7 + $0x1a8] sm:$0xff] }
0x1b9d   :  { %39312 = vmatprep.subr.bf16.mxu0 %v44796_v19  ;;  %v36214_v29 = vpop.f32.mrb[204].mxu1 }
0x1b9e   :  { %v16486_v11 = vpop.f32.mrb[205].mxu1 }
0x1b9f   :  { %v44961_v18 = vpack.c.bf16 %v36214_v29, %v16486_v11  ;;  %35567 = vmatmul.mubr.msk.f32.gmra.mrb[114].mxu0 %vm10932_vm2, %v25665_v57  ;;  %v25759_v57 = vld [vmem:[%s47191_s7 + $0x248] sm:$0xff]  ;;  %v25760_v29 = vld [vmem:[%s47191_s7 + $0x250] sm:$0xff]  ;;  %v25762_v11 = vld [vmem:[%s47191_s7 + $0x260] sm:$0xff] }
0x1ba0   :  { %39314 = vmatpush3.bf16.msra.mxu0 %v44796_v19  ;;  %35569 = vmatprep.mubr.msk.f32.mxu0 %vm10932_vm2, %v25666_v40  ;;  %v25687_v19 = vld [vmem:[%s47191_s7 + $0x1b8] sm:$0xff] }
0x1ba1   :  { %39332 = vmatprep.subr.bf16.mxu0 %v44802_v2  ;;  %v36217_v33 = vpop.f32.mrb[206].mxu1  ;;  %v25761_v40 = vld [vmem:[%s47191_s7 + $0x258] sm:$0xff] }
0x1ba2   :  { %v16496_v31 = vpop.f32.mrb[207].mxu1 }
0x1ba3   :  { %v44973_v43 = vpack.c.bf16 %v36217_v33, %v16496_v31  ;;  %35570 = vmatmul.mubr.msk.f32.gmra.mrb[116].mxu0 %vm10932_vm2, %v25667_v52  ;;  %v25782_v52 = vld [vmem:[%s47191_s7 + $0x270] sm:$0xff]  ;;  %v25784_v33 = vld [vmem:[%s47191_s7 + $0x280] sm:$0xff] }
0x1ba4   :  { %35602 = vmatprep.mubr.msk.f32.mxu0 %vm10932_vm2, %v25686_v55  ;;  %v25785_v55 = vld [vmem:[%s47191_s7 + $0x288] sm:$0xff]  ;;  %v25786_v31 = vld [vmem:[%s47191_s7 + $0x290] sm:$0xff] }
0x1ba7   :  { %35603 = vmatmul.mubr.msk.f32.vlgmr.msra.gmra.mrb[112].mxu0 %vm10932_vm2, %v25687_v19  ;;  %v25806_v19 = vld [vmem:[%s47191_s7 + $0x2a0] sm:$0xff] }
0x1ba8   :  { %39334 = vmatpush3.bf16.msra.mxu0 %v44802_v2  ;;  %35605 = vmatprep.mubr.msk.f32.mxu0 %vm10932_vm2, %v25688_v16  ;;  %v25691_v2 = vld [vmem:[%s47191_s7 + $0x1d8] sm:$0xff]  ;;  %v25808_v16 = vld [vmem:[%s47191_s7 + $0x2b0] sm:$0xff] }
0x1ba9   :  { %39336 = vmatprep.subr.bf16.mxu0 %v44806_v15 }
0x1bab   :  { %35606 = vmatmul.mubr.msk.f32.gmra.mrb[114].mxu0 %vm10932_vm2, %v25689_v5  ;;  %v25809_v5 = vld [vmem:[%s47191_s7 + $0x2b8] sm:$0xff] }
0x1bac   :  { %39338 = vmatpush3.bf16.msra.mxu0 %v44806_v15  ;;  %35608 = vmatprep.mubr.msk.f32.mxu0 %vm10932_vm2, %v25690_v62  ;;  %v25711_v15 = vld [vmem:[%s47191_s7 + $0x1e8] sm:$0xff]  ;;  %v25810_v62 = vld [vmem:[%s47191_s7 + $0x2c0] sm:$0xff] }
0x1bad   :  { %39356 = vmatprep.subr.bf16.mxu0 %v44808_v26 }
0x1baf   :  { %35609 = vmatmul.mubr.msk.f32.gmra.mrb[116].mxu0 %vm10932_vm2, %v25691_v2  ;;  %v25830_v2 = vld [vmem:[%s47191_s7 + $0x2d0] sm:$0xff] }
0x1bb0   :  { %35641 = vmatprep.mubr.msk.f32.mxu0 %vm10932_vm2, %v25710_v7  ;;  %v25832_v7 = vld [vmem:[%s47191_s7 + $0x2e0] sm:$0xff] }
0x1bb3   :  { %35642 = vmatmul.mubr.msk.f32.vlgmr.msra.gmra.mrb[112].mxu0 %vm10932_vm2, %v25711_v15  ;;  %v25833_v15 = vld [vmem:[%s47191_s7 + $0x2e8] sm:$0xff] }
0x1bb4   :  { %39358 = vmatpush3.bf16.msra.mxu0 %v44808_v26  ;;  %35644 = vmatprep.mubr.msk.f32.mxu0 %vm10932_vm2, %v25712_v45  ;;  %v25715_v26 = vld [vmem:[%s47191_s7 + $0x208] sm:$0xff]  ;;  %v25834_v45 = vld [vmem:[%s47191_s7 + $0x2f0] sm:$0xff] }
0x1bb5   :  { %39360 = vmatprep.subr.bf16.mxu0 %v44810_v38 }
0x1bb7   :  { %35645 = vmatmul.mubr.msk.f32.gmra.mrb[114].mxu0 %vm10932_vm2, %v25713_v42  ;;  %v25854_v42 = vld [vmem:[%s47191_s7 + $0x300] sm:$0xff] }
0x1bb8   :  { %39362 = vmatpush3.bf16.msra.mxu0 %v44810_v38  ;;  %35647 = vmatprep.mubr.msk.f32.mxu0 %vm10932_vm2, %v25714_v1  ;;  %v25736_v38 = vld [vmem:[%s47191_s7 + $0x220] sm:$0xff]  ;;  %v25856_v1 = vld [vmem:[%s47191_s7 + $0x310] sm:$0xff] }
0x1bb9   :  { %39364 = vmatprep.subr.bf16.mxu0 %v31516_v10 }
0x1bbb   :  { %35648 = vmatmul.mubr.msk.f32.gmra.mrb[116].mxu0 %vm10932_vm2, %v25715_v26  ;;  %v25858_v26 = vld [vmem:[%s47191_s7 + $0x320] sm:$0xff] }
0x1bbc   :  { %35680 = vmatprep.mubr.msk.f32.mxu0 %vm10932_vm2, %v25734_v14  ;;  %v25878_v14 = vld [vmem:[%s47191_s7 + $0x330] sm:$0xff] }
0x1bbf   :  { %35681 = vmatmul.mubr.msk.f32.vlgmr.msra.gmra.mrb[112].mxu0 %vm10932_vm2, %v25735_v46  ;;  %v25880_v46 = vld [vmem:[%s47191_s7 + $0x340] sm:$0xff] }
0x1bc0   :  { %39366 = vmatpush3.bf16.msra.mxu0 %v31516_v10  ;;  %35683 = vmatprep.mubr.msk.f32.mxu0 %vm10932_vm2, %v25736_v38  ;;  %v25857_v10 = vld [vmem:[%s47191_s7 + $0x318] sm:$0xff]  ;;  %v25881_v38 = vld [vmem:[%s47191_s7 + $0x348] sm:$0xff] }
0x1bc1   :  { %39368 = vmatprep.subr.bf16.mxu0 %v31517_v8 }
0x1bc3   :  { %35684 = vmatmul.mubr.msk.f32.gmra.mrb[114].mxu0 %vm10932_vm2, %v25737_v34  ;;  %v31544_v34 = vld [vmem:[%s47190_s6 + $0x260] sm:$0xff]  }
0x1bc4   :  { %39370 = vmatpush3.bf16.msra.mxu0 %v31517_v8  ;;  %35686 = vmatprep.mubr.msk.f32.mxu0 %vm10932_vm2, %v25738_v63  ;;  %v25882_v8 = vld [vmem:[%s47191_s7 + $0x350] sm:$0xff]  ;;  %v25902_v63 = vld [vmem:[%s47191_s7 + $0x360] sm:$0xff] }
0x1bc5   :  { %39372 = vmatprep.subr.bf16.mxu0 %v31518_v35 }
0x1bc7   :  { %35687 = vmatmul.mubr.msk.f32.gmra.mrb[116].mxu0 %vm10932_vm2, %v25739_v53  ;;  %v31545_v53 = vld [vmem:[%s47190_s6 + $0x268] sm:$0xff]  }
0x1bc8   :  { %39374 = vmatpush3.bf16.msra.mxu0 %v31518_v35  ;;  %35705 = vmatprep.mubr.msk.f32.mxu0 %vm10699_vm14, %v44189_v60  ;;  %v25903_v35 = vld [vmem:[%s47191_s7 + $0x368] sm:$0xff] }
0x1bc9   :  { %39376 = vmatprep.subr.bf16.mxu0 %v31519_v41 }
0x1bcc   :  { %39378 = vmatpush3.bf16.msra.mxu0 %v31519_v41  ;;  %v25905_v41 = vld [vmem:[%s47191_s7 + $0x378] sm:$0xff] }
0x1bcf   :  { %35706 = vmatmul.mubr.msk.f32.vlgmr.msra.gmra.mrb[122].mxu0 %vm10699_vm14, %v44187_v61 }
0x1bd0   :  { %35708 = vmatprep.mubr.msk.f32.mxu0 %vm10699_vm14, %v44204_v28 }
0x1bd3   :  { %35709 = vmatmul.mubr.msk.f32.gmra.mrb[124].mxu0 %vm10699_vm14, %v44202_v20 }
0x1bd4   :  { %35719 = vmatprep.mubr.msk.f32.mxu0 %vm10932_vm2, %v25758_v25  ;;  %v25906_v25 = vld [vmem:[%s47191_s7 + $0x380] sm:$0xff] }
0x1ca2   :  { %v35707_v54 = vpop.f32.mrb[122].mxu0 }
0x1ca3   :  { %v13522_v56 = vpop.f32.mrb[123].mxu0 }
0x1ca4   :  { %v39379_v9 = vpack.c.bf16 %v35707_v54, %v13522_v56  ;;  %v31546_v54 = vld [vmem:[%s47190_s6 + $0x270] sm:$0xff]   ;;  %v25907_v56 = vld [vmem:[%s47191_s7 + $0x388] sm:$0xff] }
0x1ca6   :  { %v35710_v36 = vpop.f32.mrb[124].mxu0  ;;  %39380 = vmatprep.subr.bf16.mxu0 %v39379_v9 }
0x1ca7   :  { %v13532_v30 = vpop.f32.mrb[125].mxu0  ;;  %39382 = vmatpush3.bf16.msra.mxu0 %v39379_v9  ;;  %v31547_v9 = vld [vmem:[%s47190_s6 + $0x278] sm:$0xff]  }
0x1ca8   :  { %v39383_v51 = vpack.c.bf16 %v35710_v36, %v13532_v30  ;;  %v25926_v36 = vld [vmem:[%s47191_s7 + $0x390] sm:$0xff] }
0x1caa   :  { %39384 = vmatprep.subr.bf16.mxu0 %v39383_v51 }
0x1cab   :  { %39386 = vmatpush3.bf16.msra.mxu0 %v39383_v51 }
0x1cac   :  { %39404 = vmatprep.subr.bf16.mxu0 %v44812_v48 }
0x1cae   :  { %35720 = vmatmul.mubr.msk.f32.vlgmr.msra.gmra.mrb[112].mxu0 %vm10932_vm2, %v25759_v57 }
0x1caf   :  { %39406 = vmatpush3.bf16.msra.mxu0 %v44812_v48  ;;  %35722 = vmatprep.mubr.msk.f32.mxu0 %vm10932_vm2, %v25760_v29  ;;  %v25763_v48 = vld [vmem:[%s47191_s7 + $0x268] sm:$0xff] }
0x1cb0   :  { %39408 = vmatprep.subr.bf16.mxu0 %v44814_v17 }
0x1cb2   :  { %35723 = vmatmul.mubr.msk.f32.gmra.mrb[114].mxu0 %vm10932_vm2, %v25761_v40 }
0x1cb3   :  { %39410 = vmatpush3.bf16.msra.mxu0 %v44814_v17  ;;  %35725 = vmatprep.mubr.msk.f32.mxu0 %vm10932_vm2, %v25762_v11  ;;  %v25783_v17 = vld [vmem:[%s47191_s7 + $0x278] sm:$0xff] }
0x1cb4   :  { %39428 = vmatprep.subr.bf16.mxu0 %v44820_v3 }
0x1cb6   :  { %35726 = vmatmul.mubr.msk.f32.gmra.mrb[116].mxu0 %vm10932_vm2, %v25763_v48  ;;  %v25927_v48 = vld [vmem:[%s47191_s7 + $0x398] sm:$0xff] }
0x1cb7   :  { %35758 = vmatprep.mubr.msk.f32.mxu0 %vm10932_vm2, %v25782_v52  ;;  %v25928_v52 = vld [vmem:[%s47191_s7 + $0x3a0] sm:$0xff] }
0x1cba   :  { %35759 = vmatmul.mubr.msk.f32.vlgmr.msra.gmra.mrb[112].mxu0 %vm10932_vm2, %v25783_v17  ;;  %v25929_v17 = vld [vmem:[%s47191_s7 + $0x3a8] sm:$0xff] }
0x1cbb   :  { %39430 = vmatpush3.bf16.msra.mxu0 %v44820_v3  ;;  %35761 = vmatprep.mubr.msk.f32.mxu0 %vm10932_vm2, %v25784_v33  ;;  %v25787_v3 = vld [vmem:[%s47191_s7 + $0x298] sm:$0xff]  ;;  %v25930_v33 = vld [vmem:[%s47191_s7 + $0x3b0] sm:$0xff] }
0x1cbc   :  { %39432 = vmatprep.subr.bf16.mxu0 %v44822_v44 }
0x1cbe   :  { %35762 = vmatmul.mubr.msk.f32.gmra.mrb[114].mxu0 %vm10932_vm2, %v25785_v55  ;;  %v25950_v55 = vld [vmem:[%s47191_s7 + $0x3c0] sm:$0xff] }
0x1cbf   :  { %39434 = vmatpush3.bf16.msra.mxu0 %v44822_v44  ;;  %35764 = vmatprep.mubr.msk.f32.mxu0 %vm10932_vm2, %v25786_v31  ;;  %v25807_v44 = vld [vmem:[%s47191_s7 + $0x2a8] sm:$0xff]  ;;  %v25952_v31 = vld [vmem:[%s47191_s7 + $0x3d0] sm:$0xff] }
0x1cc0   :  { %39452 = vmatprep.subr.bf16.mxu0 %v44824_v4 }
0x1cc2   :  { %35765 = vmatmul.mubr.msk.f32.gmra.mrb[116].mxu0 %vm10932_vm2, %v25787_v3  ;;  %v25953_v3 = vld [vmem:[%s47191_s7 + $0x3d8] sm:$0xff] }
0x1cc3   :  { %35797 = vmatprep.mubr.msk.f32.mxu0 %vm10932_vm2, %v25806_v19  ;;  %v25954_v19 = vld [vmem:[%s47191_s7 + $0x3e0] sm:$0xff] }
0x1cc6   :  { %35798 = vmatmul.mubr.msk.f32.vlgmr.msra.gmra.mrb[112].mxu0 %vm10932_vm2, %v25807_v44  ;;  %v25974_v44 = vld [vmem:[%s47191_s7 + $0x3f0] sm:$0xff] }
0x1cc7   :  { %39454 = vmatpush3.bf16.msra.mxu0 %v44824_v4  ;;  %35800 = vmatprep.mubr.msk.f32.mxu0 %vm10932_vm2, %v25808_v16  ;;  %v25811_v4 = vld [vmem:[%s47191_s7 + $0x2c8] sm:$0xff]  ;;  %v25976_v16 = vld [vmem:[%s47191_s7 + $0x400] sm:$0xff] }
0x1cc8   :  { %39456 = vmatprep.subr.bf16.mxu0 %v44826_v13 }
0x1cca   :  { %35801 = vmatmul.mubr.msk.f32.gmra.mrb[114].mxu0 %vm10932_vm2, %v25809_v5  ;;  %v25977_v5 = vld [vmem:[%s47191_s7 + $0x408] sm:$0xff] }
0x1ccb   :  { %39458 = vmatpush3.bf16.msra.mxu0 %v44826_v13  ;;  %35803 = vmatprep.mubr.msk.f32.mxu0 %vm10932_vm2, %v25810_v62  ;;  %v25831_v13 = vld [vmem:[%s47191_s7 + $0x2d8] sm:$0xff]  ;;  %v25978_v62 = vld [vmem:[%s47191_s7 + $0x410] sm:$0xff] }
0x1ccc   :  { %39476 = vmatprep.subr.bf16.mxu0 %v44828_v24 }
0x1cce   :  { %35804 = vmatmul.mubr.msk.f32.gmra.mrb[116].mxu0 %vm10932_vm2, %v25811_v4  ;;  %v25998_v4 = vld [vmem:[%s47191_s7 + $0x420] sm:$0xff] }
0x1ccf   :  { %35836 = vmatprep.mubr.msk.f32.mxu0 %vm10932_vm2, %v25830_v2  ;;  %v26000_v2 = vld [vmem:[%s47191_s7 + $0x430] sm:$0xff] }
0x1cd2   :  { %35837 = vmatmul.mubr.msk.f32.vlgmr.msra.gmra.mrb[112].mxu0 %vm10932_vm2, %v25831_v13  ;;  %v26001_v13 = vld [vmem:[%s47191_s7 + $0x438] sm:$0xff] }
0x1cd3   :  { %39478 = vmatpush3.bf16.msra.mxu0 %v44828_v24  ;;  %35839 = vmatprep.mubr.msk.f32.mxu0 %vm10932_vm2, %v25832_v7  ;;  %v25835_v24 = vld [vmem:[%s47191_s7 + $0x2f8] sm:$0xff]  ;;  %v26002_v7 = vld [vmem:[%s47191_s7 + $0x440] sm:$0xff] }
0x1cd4   :  { %39480 = vmatprep.subr.bf16.mxu0 %v44830_v6 }
0x1cd6   :  { %35840 = vmatmul.mubr.msk.f32.gmra.mrb[114].mxu0 %vm10932_vm2, %v25833_v15  ;;  %v26022_v15 = vld [vmem:[%s47191_s7 + $0x450] sm:$0xff] }
0x1cd7   :  { %39482 = vmatpush3.bf16.msra.mxu0 %v44830_v6  ;;  %35842 = vmatprep.mubr.msk.f32.mxu0 %vm10932_vm2, %v25834_v45  ;;  %v25855_v6 = vld [vmem:[%s47191_s7 + $0x308] sm:$0xff]  ;;  %v26024_v45 = vld [vmem:[%s47191_s7 + $0x460] sm:$0xff] }
0x1cd8   :  { %39500 = vmatprep.subr.bf16.mxu0 %v44832_v47 }
0x1cda   :  { %35843 = vmatmul.mubr.msk.f32.gmra.mrb[116].mxu0 %vm10932_vm2, %v25835_v24  ;;  %v26025_v24 = vld [vmem:[%s47191_s7 + $0x468] sm:$0xff] }
0x1cdb   :  { %35875 = vmatprep.mubr.msk.f32.mxu0 %vm10932_vm2, %v25854_v42  ;;  %v26026_v42 = vld [vmem:[%s47191_s7 + $0x470] sm:$0xff] }
0x1cde   :  { %35876 = vmatmul.mubr.msk.f32.vlgmr.msra.gmra.mrb[112].mxu0 %vm10932_vm2, %v25855_v6  ;;  %v26046_v6 = vld [vmem:[%s47191_s7 + $0x480] sm:$0xff] }
0x1cdf   :  { %39502 = vmatpush3.bf16.msra.mxu0 %v44832_v47  ;;  %35878 = vmatprep.mubr.msk.f32.mxu0 %vm10932_vm2, %v25856_v1  ;;  %v25859_v47 = vld [vmem:[%s47191_s7 + $0x328] sm:$0xff]  ;;  %v26048_v1 = vld [vmem:[%s47191_s7 + $0x490] sm:$0xff] }
0x1ce0   :  { %39504 = vmatprep.subr.bf16.mxu0 %v44834_v58 }
0x1ce2   :  { %35879 = vmatmul.mubr.msk.f32.gmra.mrb[114].mxu0 %vm10932_vm2, %v25857_v10  ;;  %v26049_v10 = vld [vmem:[%s47191_s7 + $0x498] sm:$0xff] }
0x1ce3   :  { %39506 = vmatpush3.bf16.msra.mxu0 %v44834_v58  ;;  %35881 = vmatprep.mubr.msk.f32.mxu0 %vm10932_vm2, %v25858_v26  ;;  %v25879_v58 = vld [vmem:[%s47191_s7 + $0x338] sm:$0xff]  ;;  %v26050_v26 = vld [vmem:[%s47191_s7 + $0x4a0] sm:$0xff] }
0x1ce4   :  { %39524 = vmatprep.subr.bf16.mxu0 %v44836_v22 }
0x1ce6   :  { %35882 = vmatmul.mubr.msk.f32.gmra.mrb[116].mxu0 %vm10932_vm2, %v25859_v47  ;;  %v31572_v47 = vld [vmem:[%s47190_s6 + $0x340] sm:$0xff]  }
0x1ce7   :  { %35914 = vmatprep.mubr.msk.f32.mxu0 %vm10932_vm2, %v25878_v14  ;;  %v26070_v14 = vld [vmem:[%s47191_s7 + $0x4b0] sm:$0xff] }
0x1cea   :  { %35915 = vmatmul.mubr.msk.f32.vlgmr.msra.gmra.mrb[112].mxu0 %vm10932_vm2, %v25879_v58  ;;  %v26071_v58 = vld [vmem:[%s47191_s7 + $0x4b8] sm:$0xff] }
0x1ceb   :  { %39526 = vmatpush3.bf16.msra.mxu0 %v44836_v22  ;;  %35917 = vmatprep.mubr.msk.f32.mxu0 %vm10932_vm2, %v25880_v46  ;;  %v25883_v22 = vld [vmem:[%s47191_s7 + $0x358] sm:$0xff]  ;;  %v31573_v46 = vld [vmem:[%s47190_s6 + $0x348] sm:$0xff]  }
0x1cec   :  { %39528 = vmatprep.subr.bf16.mxu0 %v44838_v50 }
0x1cee   :  { %35918 = vmatmul.mubr.msk.f32.gmra.mrb[114].mxu0 %vm10932_vm2, %v25881_v38  ;;  %v26073_v38 = vld [vmem:[%s47191_s7 + $0x4c8] sm:$0xff] }
0x1cef   :  { %39530 = vmatpush3.bf16.msra.mxu0 %v44838_v50  ;;  %35920 = vmatprep.mubr.msk.f32.mxu0 %vm10932_vm2, %v25882_v8  ;;  %v25904_v50 = vld [vmem:[%s47191_s7 + $0x370] sm:$0xff] }
0x1cf0   :  { %39532 = vmatprep.subr.bf16.mxu0 %v31544_v34  ;;  %v26074_v8 = vld [vmem:[%s47191_s7 + $0x4d0] sm:$0xff] }
0x1cf2   :  { %35921 = vmatmul.mubr.msk.f32.gmra.mrb[116].mxu0 %vm10932_vm2, %v25883_v22  ;;  %v26075_v22 = vld [vmem:[%s47191_s7 + $0x4d8] sm:$0xff] }
0x1cf3   :  { %35953 = vmatprep.mubr.msk.f32.mxu0 %vm10932_vm2, %v25902_v63  ;;  %v31575_v63 = vld [vmem:[%s47190_s6 + $0x358] sm:$0xff]  }
0x1cf6   :  { %35954 = vmatmul.mubr.msk.f32.vlgmr.msra.gmra.mrb[112].mxu0 %vm10932_vm2, %v25903_v35  ;;  %v26094_v35 = vld [vmem:[%s47191_s7 + $0x4e0] sm:$0xff] }
0x1cf7   :  { %39534 = vmatpush3.bf16.msra.mxu0 %v31544_v34  ;;  %35956 = vmatprep.mubr.msk.f32.mxu0 %vm10932_vm2, %v25904_v50  ;;  %v31574_v34 = vld [vmem:[%s47190_s6 + $0x350] sm:$0xff]   ;;  %s40550_s6 = smov [#allocation2]  }
0x1cf8   :  { %39536 = vmatprep.subr.bf16.mxu0 %v31545_v53  ;;  %s23569_s24 = sshll.u32 %s40550_s6, 4  ;;  %s23570_s24 = int_to_ptr.vmem [resolvable:$true] %s23569_s24 }
0x1cf9   :  { %s40523_s25 = scalar_lea.vmem %s23570_s24, 512  ;;  %p40528_p1 = scmp.lt.s32.totalorder %s23570_s24, %s23570_s24 }
0x1cfa   :  { %35957 = vmatmul.mubr.msk.f32.gmra.mrb[114].mxu0 %vm10932_vm2, %v25905_v41  ;;  %p40524_p0 = scmp.ne.s32.totalorder %s23570_s24, %s40523_s25  ;;  %p40529_p2 = scmp.lt.s32.totalorder %s40523_s25, %s40523_s25 }
0x1cfb   :  { %39538 = vmatpush3.bf16.msra.mxu0 %v31545_v53  ;;  %35959 = vmatprep.mubr.msk.f32.mxu0 %vm10932_vm2, %v25906_v25 }
0x1cfc   :  { %39540 = vmatprep.subr.bf16.mxu0 %v31546_v54  ;;  %p40530_p3 = por %p40529_p2, %p40528_p1 }
0x1cfe   :  { %35960 = vmatmul.mubr.msk.f32.gmra.mrb[116].mxu0 %vm10932_vm2, %v25907_v56  ;;  %v26098_v56 = vld [vmem:[%s47191_s7 + $0x500] sm:$0xff]  ;;  %p40531_p4 = pnand %p40530_p3, %p40524_p0 }
0x1cff   :  { %39542 = vmatpush3.bf16.msra.mxu0 %v31546_v54  ;;  %35978 = vmatprep.mubr.msk.f32.mxu0 %vm10699_vm14, %v44189_v60  ;;  %v26097_v54 = vld [vmem:[%s47191_s7 + $0x4f8] sm:$0xff] }
0x1d00   :  { %39544 = vmatprep.subr.bf16.mxu0 %v31547_v9 }
0x1d03   :  { %39546 = vmatpush3.bf16.msra.mxu0 %v31547_v9  ;;  %v26099_v9 = vld [vmem:[%s47191_s7 + $0x508] sm:$0xff] }
0x1d06   :  { %35979 = vmatmul.mubr.msk.f32.vlgmr.msra.gmra.mrb[126].mxu0 %vm10699_vm14, %v44187_v61 }
0x1d07   :  { %35981 = vmatprep.mubr.msk.f32.mxu0 %vm10699_vm14, %v44204_v28 }
0x1d0a   :  { %35982 = vmatmul.mubr.msk.f32.gmra.mrb[128].mxu0 %vm10699_vm14, %v44202_v20 }
0x1d0b   :  { %35992 = vmatprep.mubr.msk.f32.mxu0 %vm10932_vm2, %v25926_v36  ;;  %v16926_v36 = vld [vmem:[%s47193_s9] sm:$0xff]  }
0x1dd9   :  { %v35980_v30 = vpop.f32.mrb[126].mxu0 }
0x1dda   :  { %v15118_v51 = vpop.f32.mrb[127].mxu0 }
0x1ddb   :  { %v39547_v57 = vpack.c.bf16 %v35980_v30, %v15118_v51  ;;  %v26143_v30 = vld [vmem:[%s47193_s9 + $0x8] sm:$0xff]   ;;  %v16927_v51 = vunpack.c.l.bf16 %v16926_v36 }
0x1ddd   :  { %v35983_v29 = vpop.f32.mrb[128].mxu0  ;;  %39548 = vmatprep.subr.bf16.mxu0 %v39547_v57  ;;  %36274 = vmatprep.subr.mxu1 %v16927_v51 }
0x1dde   :  { %v15128_v40 = vpop.f32.mrb[129].mxu0  ;;  %39550 = vmatpush3.bf16.msra.mxu0 %v39547_v57  ;;  %v17417_v57 = vunpack.c.l.bf16 %v26143_v30  ;;  %36275 = vmatpush3.msra.mxu1 %v16927_v51  ;;  %v45844_v51 = vld [vmem:[%s47193_s9 + $0x58] sm:$0xff]  }
0x1ddf   :  { %v39551_v11 = vpack.c.bf16 %v35983_v29, %v15128_v40  ;;  %v17051_v29 = vunpack.c.h.bf16 %v16926_v36  ;;  %v17661_v40 = vunpack.c.h.bf16 %v26143_v30 }
0x1de1   :  { %39552 = vmatprep.subr.bf16.mxu0 %v39551_v11  ;;  %36285 = vmatprep.subr.mxu1 %v17051_v29 }
0x1de2   :  { %39554 = vmatpush3.bf16.msra.mxu0 %v39551_v11  ;;  %v16873_v11 = vpop.permute.xlu1 %16872 }
0x1de3   :  { %39572 = vmatprep.subr.bf16.mxu0 %v44840_v27 }
0x1de5   :  { %35993 = vmatmul.mubr.msk.f32.vlgmr.msra.gmra.mrb[112].mxu0 %vm10932_vm2, %v25927_v48  ;;  %v16868_v48 = vpop.permute.xlu0 %16867 }
0x1de6   :  { %39574 = vmatpush3.bf16.msra.mxu0 %v44840_v27  ;;  %35995 = vmatprep.mubr.msk.f32.mxu0 %vm10932_vm2, %v25928_v52  ;;  %v25931_v27 = vld [vmem:[%s47191_s7 + $0x3b8] sm:$0xff] }
0x1de7   :  { %39576 = vmatprep.subr.bf16.mxu0 %v44842_v23 }
0x1de9   :  { %35996 = vmatmul.mubr.msk.f32.gmra.mrb[114].mxu0 %vm10932_vm2, %v25929_v17 }
0x1dea   :  { %39578 = vmatpush3.bf16.msra.mxu0 %v44842_v23  ;;  %35998 = vmatprep.mubr.msk.f32.mxu0 %vm10932_vm2, %v25930_v33  ;;  %v25951_v23 = vld [vmem:[%s47191_s7 + $0x3c8] sm:$0xff] }
0x1deb   :  { %39596 = vmatprep.subr.bf16.mxu0 %v44844_v0 }
0x1ded   :  { %35999 = vmatmul.mubr.msk.f32.gmra.mrb[116].mxu0 %vm10932_vm2, %v25931_v27  ;;  %v16883_v27 = vpop.permute.xlu1 %16882 }
0x1dee   :  { %36031 = vmatprep.mubr.msk.f32.mxu0 %vm10932_vm2, %v25950_v55 }
0x1df1   :  { %36032 = vmatmul.mubr.msk.f32.vlgmr.msra.gmra.mrb[112].mxu0 %vm10932_vm2, %v25951_v23  ;;  %v16878_v23 = vpop.permute.xlu0 %16877 }
0x1df2   :  { %39598 = vmatpush3.bf16.msra.mxu0 %v44844_v0  ;;  %36034 = vmatprep.mubr.msk.f32.mxu0 %vm10932_vm2, %v25952_v31  ;;  %v25955_v0 = vld [vmem:[%s47191_s7 + $0x3e8] sm:$0xff] }
0x1df3   :  { %39600 = vmatprep.subr.bf16.mxu0 %v44846_v21 }
0x1df5   :  { %36035 = vmatmul.mubr.msk.f32.gmra.mrb[114].mxu0 %vm10932_vm2, %v25953_v3  ;;  %v45529_v3 = vld [vmem:[%s47193_s9 + $0x10] sm:$0xff]  }
0x1df6   :  { %39602 = vmatpush3.bf16.msra.mxu0 %v44846_v21  ;;  %36037 = vmatprep.mubr.msk.f32.mxu0 %vm10932_vm2, %v25954_v19  ;;  %v25975_v21 = vld [vmem:[%s47191_s7 + $0x3f8] sm:$0xff] }
0x1df7   :  { %39620 = vmatprep.subr.bf16.mxu0 %v44848_v59 }
0x1df9   :  { %36038 = vmatmul.mubr.msk.f32.gmra.mrb[116].mxu0 %vm10932_vm2, %v25955_v0 }
0x1dfa   :  { %36070 = vmatprep.mubr.msk.f32.mxu0 %vm10932_vm2, %v25974_v44 }
0x1dfd   :  { %36071 = vmatmul.mubr.msk.f32.vlgmr.msra.gmra.mrb[112].mxu0 %vm10932_vm2, %v25975_v21 }
0x1dfe   :  { %39622 = vmatpush3.bf16.msra.mxu0 %v44848_v59  ;;  %36073 = vmatprep.mubr.msk.f32.mxu0 %vm10932_vm2, %v25976_v16  ;;  %v25979_v59 = vld [vmem:[%s47191_s7 + $0x418] sm:$0xff] }
0x1dff   :  { %39624 = vmatprep.subr.bf16.mxu0 %v44850_v39 }
0x1e01   :  { %36074 = vmatmul.mubr.msk.f32.gmra.mrb[114].mxu0 %vm10932_vm2, %v25977_v5 }
0x1e02   :  { %39626 = vmatpush3.bf16.msra.mxu0 %v44850_v39  ;;  %36076 = vmatprep.mubr.msk.f32.mxu0 %vm10932_vm2, %v25978_v62  ;;  %v25999_v39 = vld [vmem:[%s47191_s7 + $0x428] sm:$0xff] }
0x1e03   :  { %39644 = vmatprep.subr.bf16.mxu0 %v44879_v49 }
0x1e05   :  { %36077 = vmatmul.mubr.msk.f32.gmra.mrb[116].mxu0 %vm10932_vm2, %v25979_v59  ;;  %v17905_v59 = vunpack.c.l.bf16 %v45529_v3 }
0x1e06   :  { %36109 = vmatprep.mubr.msk.f32.mxu0 %vm10932_vm2, %v25998_v4 }
0x1e09   :  { %36110 = vmatmul.mubr.msk.f32.vlgmr.msra.gmra.mrb[112].mxu0 %vm10932_vm2, %v25999_v39  ;;  %v16893_v39 = vpop.permute.xlu1 %16892 }
0x1e0a   :  { %39646 = vmatpush3.bf16.msra.mxu0 %v44879_v49  ;;  %36112 = vmatprep.mubr.msk.f32.mxu0 %vm10932_vm2, %v26000_v2  ;;  %v26003_v49 = vld [vmem:[%s47191_s7 + $0x448] sm:$0xff] }
0x1e0b   :  { %39648 = vmatprep.subr.bf16.mxu0 %v44889_v12 }
0x1e0d   :  { %36113 = vmatmul.mubr.msk.f32.gmra.mrb[114].mxu0 %vm10932_vm2, %v26001_v13 }
0x1e0e   :  { %39650 = vmatpush3.bf16.msra.mxu0 %v44889_v12  ;;  %36115 = vmatprep.mubr.msk.f32.mxu0 %vm10932_vm2, %v26002_v7  ;;  %v26023_v12 = vld [vmem:[%s47191_s7 + $0x458] sm:$0xff]  ;;  %v16888_v7 = vpop.permute.xlu0 %16887 }
0x1e0f   :  { %39668 = vmatprep.subr.bf16.mxu0 %v44919_v32 }
0x1e11   :  { %36116 = vmatmul.mubr.msk.f32.gmra.mrb[116].mxu0 %vm10932_vm2, %v26003_v49 }
0x1e12   :  { %36148 = vmatprep.mubr.msk.f32.mxu0 %vm10932_vm2, %v26022_v15 }
0x1e15   :  { %36149 = vmatmul.mubr.msk.f32.vlgmr.msra.gmra.mrb[112].mxu0 %vm10932_vm2, %v26023_v12 }
0x1e16   :  { %39670 = vmatpush3.bf16.msra.mxu0 %v44919_v32  ;;  %36151 = vmatprep.mubr.msk.f32.mxu0 %vm10932_vm2, %v26024_v45  ;;  %v26027_v32 = vld [vmem:[%s47191_s7 + $0x478] sm:$0xff] }
0x1e17   :  { %39672 = vmatprep.subr.bf16.mxu0 %v44931_v37 }
0x1e19   :  { %36152 = vmatmul.mubr.msk.f32.gmra.mrb[114].mxu0 %vm10932_vm2, %v26025_v24 }
0x1e1a   :  { %39674 = vmatpush3.bf16.msra.mxu0 %v44931_v37  ;;  %36154 = vmatprep.mubr.msk.f32.mxu0 %vm10932_vm2, %v26026_v42  ;;  %v26047_v37 = vld [vmem:[%s47191_s7 + $0x488] sm:$0xff] }
0x1e1b   :  { %39692 = vmatprep.subr.bf16.mxu0 %v44961_v18 }
0x1e1d   :  { %36155 = vmatmul.mubr.msk.f32.gmra.mrb[116].mxu0 %vm10932_vm2, %v26027_v32 }
0x1e1e   :  { %36187 = vmatprep.mubr.msk.f32.mxu0 %vm10932_vm2, %v26046_v6 }
0x1e21   :  { %36188 = vmatmul.mubr.msk.f32.vlgmr.msra.gmra.mrb[112].mxu0 %vm10932_vm2, %v26047_v37 }
0x1e22   :  { %39694 = vmatpush3.bf16.msra.mxu0 %v44961_v18  ;;  %36190 = vmatprep.mubr.msk.f32.mxu0 %vm10932_vm2, %v26048_v1  ;;  %v26051_v18 = vld [vmem:[%s47191_s7 + $0x4a8] sm:$0xff]  ;;  %v18149_v1 = vunpack.c.h.bf16 %v45529_v3 }
0x1e23   :  { %39696 = vmatprep.subr.bf16.mxu0 %v44973_v43 }
0x1e25   :  { %36191 = vmatmul.mubr.msk.f32.gmra.mrb[114].mxu0 %vm10932_vm2, %v26049_v10  ;;  %v26235_v10 = vld [vmem:[%s47193_s9 + $0x18] sm:$0xff]  }
0x1e26   :  { %39698 = vmatpush3.bf16.msra.mxu0 %v44973_v43  ;;  %36193 = vmatprep.mubr.msk.f32.mxu0 %vm10932_vm2, %v26050_v26  ;;  %v26072_v43 = vld [vmem:[%s47191_s7 + $0x4c0] sm:$0xff]  ;;  %v18393_v26 = vunpack.c.l.bf16 %v26235_v10 }
0x1e27   :  { %39700 = vmatprep.subr.bf16.mxu0 %v31572_v47 }
0x1e29   :  { %36194 = vmatmul.mubr.msk.f32.gmra.mrb[116].mxu0 %vm10932_vm2, %v26051_v18  ;;  %v26281_v18 = vld [vmem:[%s47193_s9 + $0x20] sm:$0xff]  }
0x1e2a   :  { %36226 = vmatprep.mubr.msk.f32.mxu0 %vm10932_vm2, %v26070_v14  ;;  %v18881_v14 = vunpack.c.l.bf16 %v26281_v18 }
0x1e2d   :  { %36227 = vmatmul.mubr.msk.f32.vlgmr.msra.gmra.mrb[112].mxu0 %vm10932_vm2, %v26071_v58  ;;  %v19125_v58 = vunpack.c.h.bf16 %v26281_v18 }
0x1e2e   :  { %39702 = vmatpush3.bf16.msra.mxu0 %v31572_v47  ;;  %36229 = vmatprep.mubr.msk.f32.mxu0 %vm10932_vm2, %v26072_v43  ;;  %v18637_v47 = vunpack.c.h.bf16 %v26235_v10  ;;  %v26327_v43 = vld [vmem:[%s47193_s9 + $0x28] sm:$0xff]  }
0x1e2f   :  { %39704 = vmatprep.subr.bf16.mxu0 %v31573_v46 }
0x1e31   :  { %36230 = vmatmul.mubr.msk.f32.gmra.mrb[114].mxu0 %vm10932_vm2, %v26073_v38  ;;  %v19613_v38 = vunpack.c.h.bf16 %v26327_v43 }
0x1e32   :  { %39706 = vmatpush3.bf16.msra.mxu0 %v31573_v46  ;;  %36232 = vmatprep.mubr.msk.f32.mxu0 %vm10932_vm2, %v26074_v8  ;;  %v19369_v46 = vunpack.c.l.bf16 %v26327_v43  ;;  %v26373_v8 = vld [vmem:[%s47193_s9 + $0x30] sm:$0xff]  }
0x1e33   :  { %39708 = vmatprep.subr.bf16.mxu0 %v31574_v34 }
0x1e35   :  { %36233 = vmatmul.mubr.msk.f32.gmra.mrb[116].mxu0 %vm10932_vm2, %v26075_v22  ;;  %v20101_v22 = vunpack.c.h.bf16 %v26373_v8 }
0x1e36   :  { %39710 = vmatpush3.bf16.msra.mxu0 %v31574_v34  ;;  %36251 = vmatprep.mubr.msk.f32.mxu0 %vm10699_vm14, %v44189_v60  ;;  %v19857_v34 = vunpack.c.l.bf16 %v26373_v8  ;;  %v45898_v8 = vld [vmem:[%s47193_s9 + $0x60] sm:$0xff]  }
0x1e37   :  { %39712 = vmatprep.subr.bf16.mxu0 %v31575_v63 }
0x1e3a   :  { %39714 = vmatpush3.bf16.msra.mxu0 %v31575_v63  ;;  %v26119_v63 = vld [vmem:[%s47194_s10 + $0x40] sm:$0xff] }
0x1e3d   :  { %36252 = vmatmul.mubr.msk.f32.vlgmr.msra.gmra.mrb[130].mxu0 %vm10699_vm14, %v44187_v61 }
0x1e3e   :  { %36254 = vmatprep.mubr.msk.f32.mxu0 %vm10699_vm14, %v44204_v28  ;;  %v26096_v28 = vld [vmem:[%s47191_s7 + $0x4f0] sm:$0xff] }
0x1e41   :  { %36255 = vmatmul.mubr.msk.f32.gmra.mrb[132].mxu0 %vm10699_vm14, %v44202_v20  ;;  %v26095_v20 = vld [vmem:[%s47191_s7 + $0x4e8] sm:$0xff] }
0x1e42   :  { %36265 = vmatprep.mubr.msk.f32.mxu0 %vm10932_vm2, %v26094_v35  ;;  %v26419_v35 = vld [vmem:[%s47193_s9 + $0x38] sm:$0xff]  }
0x1f10   :  { %v36253_v50 = vpop.f32.mrb[130].mxu0 }
0x1f11   :  { %v16714_v53 = vpop.f32.mrb[131].mxu0 }
0x1f12   :  { %v39715_v60 = vpack.c.bf16 %v36253_v50, %v16714_v53  ;;  %v20345_v50 = vunpack.c.l.bf16 %v26419_v35  ;;  %v20589_v53 = vunpack.c.h.bf16 %v26419_v35  ;;  %v22785_v35 = vunpack.c.l.bf16 %v45898_v8 }
0x1f14   :  { %v36256_v41 = vpop.f32.mrb[132].mxu0  ;;  %39716 = vmatprep.subr.bf16.mxu0 %v39715_v60 }
0x1f15   :  { %v16724_v25 = vpop.f32.mrb[133].mxu0  ;;  %39718 = vmatpush3.bf16.msra.mxu0 %v39715_v60  ;;  %v26465_v60 = vld [vmem:[%s47193_s9 + $0x40] sm:$0xff]  }
0x1f16   :  { %v39719_v61 = vpack.c.bf16 %v36256_v41, %v16724_v25  ;;  %v20833_v41 = vunpack.c.l.bf16 %v26465_v60  ;;  %v21077_v25 = vunpack.c.h.bf16 %v26465_v60 }
0x1f18   :  { %39720 = vmatprep.subr.bf16.mxu0 %v39719_v61 }
0x1f19   :  { %39722 = vmatpush3.bf16.msra.mxu0 %v39719_v61  ;;  %v26511_v61 = vld [vmem:[%s47193_s9 + $0x48] sm:$0xff]  }
0x1f1a   :  { %36344 = vmatprep.subr.mxu0 %v17417_v57 }
0x1f1c   :  { %36266 = vmatmul.mubr.msk.f32.vlgmr.msra.gmra.mrb[112].mxu0 %vm10932_vm2, %v26095_v20  ;;  %v21321_v20 = vunpack.c.l.bf16 %v26511_v61 }
0x1f1d   :  { %36268 = vmatprep.mubr.msk.f32.mxu0 %vm10932_vm2, %v26096_v28  ;;  %36345 = vmatpush3.msra.mxu0 %v17417_v57  ;;  %v21565_v28 = vunpack.c.h.bf16 %v26511_v61 }
0x1f1e   :  { %36379 = vmatprep.subr.mxu0 %v17661_v40 }
0x1f20   :  { %36269 = vmatmul.mubr.msk.f32.gmra.mrb[114].mxu0 %vm10932_vm2, %v26097_v54  ;;  %v26557_v54 = vld [vmem:[%s47193_s9 + $0x50] sm:$0xff]  }
0x1f21   :  { %36271 = vmatprep.mubr.msk.f32.mxu0 %vm10932_vm2, %v26098_v56  ;;  %v21809_v56 = vunpack.c.l.bf16 %v26557_v54 }
0x1f24   :  { %36272 = vmatmul.mubr.msk.f32.gmra.mrb[116].mxu0 %vm10932_vm2, %v26099_v9  ;;  %v22053_v9 = vunpack.c.h.bf16 %v26557_v54 }
0x1fef   :  { %v36267_v52 = vpop.f32.mrb[112].mxu0 }
0x1ff0   :  { %v16896_v17 = vadd.f32 %v36267_v52, %v16873_v11  ;;  %v16824_v33 = vpop.f32.mrb[113].mxu0 }
0x1ff1   :  { %v16895_v55 = vadd.f32 %v16868_v48, %v16824_v33  ;;  %v22297_v48 = vunpack.c.l.bf16 %v45844_v51 }
0x1ff2   :  { %vm16902_vm3 = vcmp.ge.f32.partialorder %v16896_v17, 0.0  ;;  %v16908_v31 = vmul.f32 0.1, %v16896_v17 }
0x1ff3   :  { %vm16901_vm5 = vcmp.ge.f32.partialorder %v16895_v55, 0.0  ;;  %v16907_v19 = vmul.f32 0.1, %v16895_v55  ;;  %v36270_v0 = vpop.f32.mrb[114].mxu0 }
0x1ff4   :  { %v45531_v44 = vsel %vm16902_vm3, %v16896_v17, %v16908_v31  ;;  %v16898_v21 = vadd.f32 %v36270_v0, %v16883_v27  ;;  %v16834_v16 = vpop.f32.mrb[115].mxu0 }
0x1ff5   :  { %16921 = vst.msk [vmem:[%s47197_s13 + $0x8] sm:$0xff] %vm16919_vm4, %v45531_v44  ;;  %v45538_v5 = vsel %vm16901_vm5, %v16895_v55, %v16907_v19  ;;  %v16897_v62 = vadd.f32 %v16878_v23, %v16834_v16 }
0x1ff6   :  { %16920 = vst.msk [vmem:[%s47197_s13] sm:$0xff] %vm16919_vm4, %v45538_v5  ;;  %vm16904_vm6 = vcmp.ge.f32.partialorder %v16898_v21, 0.0  ;;  %v16910_v4 = vmul.f32 0.1, %v16898_v21  ;;  %36276 = vmatprep.mubr.msk.f32.mxu1 %vm16919_vm4, %v45538_v5  ;;  %36346 = vmatprep.mubr.msk.f32.mxu0 %vm16919_vm4, %v45538_v5 }
0x1ff7   :  { %vm16903_vm7 = vcmp.ge.f32.partialorder %v16897_v62, 0.0  ;;  %v16909_v2 = vmul.f32 0.1, %v16897_v62  ;;  %v36273_v13 = vpop.f32.mrb[116].mxu0  ;;  %36277 = vmatmul.mubr.msk.f32.vlgmr.msra.gmra.mrb[208].mxu1 %vm16919_vm4, %v45531_v44  ;;  %36347 = vmatmul.mubr.msk.f32.vlgmr.msra.gmra.mrb[134].mxu0 %vm16919_vm4, %v45531_v44 }
0x1ff8   :  { %v45554_v49 = vsel %vm16904_vm6, %v16898_v21, %v16910_v4  ;;  %v16900_v15 = vadd.f32 %v36273_v13, %v16893_v39  ;;  %v16844_v12 = vpop.f32.mrb[117].mxu0  ;;  %36286 = vmatpush3.msra.mxu1 %v17051_v29  ;;  %36380 = vmatpush3.msra.mxu0 %v17661_v40 }
0x1ff9   :  { %16923 = vst.msk [vmem:[%s47197_s13 + $0x18] sm:$0xff] %vm16919_vm4, %v45554_v49  ;;  %v45561_v45 = vsel %vm16903_vm7, %v16897_v62, %v16909_v2  ;;  %v16899_v24 = vadd.f32 %v16888_v7, %v16844_v12  ;;  %36414 = vmatprep.subr.mxu0 %v17905_v59  ;;  %v22541_v7 = vunpack.c.h.bf16 %v45844_v51  ;;  %v17041_v51 = vld [vmem:[%s47194_s10] sm:$0xff] }
0x1ffa   :  { %16922 = vst.msk [vmem:[%s47197_s13 + $0x10] sm:$0xff] %vm16919_vm4, %v45561_v45  ;;  %vm16906_vm8 = vcmp.ge.f32.partialorder %v16900_v15, 0.0  ;;  %v16912_v42 = vmul.f32 0.1, %v16900_v15  ;;  %36279 = vmatprep.mubr.msk.f32.mxu1 %vm16919_vm4, %v45561_v45  ;;  %36349 = vmatprep.mubr.msk.f32.mxu0 %vm16919_vm4, %v45561_v45 }
0x1ffb   :  { %vm16905_vm9 = vcmp.ge.f32.partialorder %v16899_v24, 0.0  ;;  %v16911_v32 = vmul.f32 0.1, %v16899_v24  ;;  %36280 = vmatmul.mubr.msk.f32.gmra.mrb[210].mxu1 %vm16919_vm4, %v45554_v49  ;;  %36350 = vmatmul.mubr.msk.f32.gmra.mrb[136].mxu0 %vm16919_vm4, %v45554_v49 }
0x1ffc   :  { %v45576_v6 = vsel %vm16906_vm8, %v16900_v15, %v16912_v42 }
0x1ffd   :  { %16925 = vst.msk [vmem:[%s47197_s13 + $0x28] sm:$0xff] %vm16919_vm4, %v45576_v6  ;;  %v45583_v37 = vsel %vm16905_vm9, %v16899_v24, %v16911_v32 }
0x1ffe   :  { %16924 = vst.msk [vmem:[%s47197_s13 + $0x20] sm:$0xff] %vm16919_vm4, %v45583_v37  ;;  %36282 = vmatprep.mubr.msk.f32.mxu1 %vm16919_vm4, %v45583_v37  ;;  %36352 = vmatprep.mubr.msk.f32.mxu0 %vm16919_vm4, %v45583_v37 }
0x1fff   :  { %36283 = vmatmul.mubr.msk.f32.gmra.mrb[212].mxu1 %vm16919_vm4, %v45576_v6  ;;  %36353 = vmatmul.mubr.msk.f32.gmra.mrb[138].mxu0 %vm16919_vm4, %v45576_v6 }
0x2000   :  { %36287 = vmatprep.mubr.msk.f32.mxu1 %vm16919_vm4, %v45538_v5  ;;  %36381 = vmatprep.mubr.msk.f32.mxu0 %vm16919_vm4, %v45538_v5 }
0x2003   :  { %36288 = vmatmul.mubr.msk.f32.vlgmr.msra.gmra.mrb[214].mxu1 %vm16919_vm4, %v45531_v44  ;;  %36382 = vmatmul.mubr.msk.f32.vlgmr.msra.gmra.mrb[140].mxu0 %vm16919_vm4, %v45531_v44 }
0x2004   :  { %36290 = vmatprep.mubr.msk.f32.mxu1 %vm16919_vm4, %v45561_v45  ;;  %36384 = vmatprep.mubr.msk.f32.mxu0 %vm16919_vm4, %v45561_v45 }
0x2005   :  { %36415 = vmatpush3.msra.mxu0 %v17905_v59 }
0x2006   :  { %36449 = vmatprep.subr.mxu0 %v18149_v1 }
0x2007   :  { %36291 = vmatmul.mubr.msk.f32.gmra.mrb[216].mxu1 %vm16919_vm4, %v45554_v49  ;;  %36385 = vmatmul.mubr.msk.f32.gmra.mrb[142].mxu0 %vm16919_vm4, %v45554_v49 }
0x2008   :  { %36293 = vmatprep.mubr.msk.f32.mxu1 %vm16919_vm4, %v45583_v37  ;;  %36387 = vmatprep.mubr.msk.f32.mxu0 %vm16919_vm4, %v45583_v37 }
0x200b   :  { %36294 = vmatmul.mubr.msk.f32.gmra.mrb[218].mxu1 %vm16919_vm4, %v45576_v6  ;;  %36388 = vmatmul.mubr.msk.f32.gmra.mrb[144].mxu0 %vm16919_vm4, %v45576_v6 }
0x200c   :  { %36416 = vmatprep.mubr.msk.f32.mxu0 %vm16919_vm4, %v45538_v5  ;;  %36308 = vmatprep.mubr.msk.f32.mxu1 %vm17156_vm10, %v26119_v63  ;;  %v26121_v63 = vld [vmem:[%s47194_s10 + $0x50] sm:$0xff] }
0x200f   :  { %36417 = vmatmul.mubr.msk.f32.vlgmr.msra.gmra.mrb[146].mxu0 %vm16919_vm4, %v45531_v44 }
0x2010   :  { %36419 = vmatprep.mubr.msk.f32.mxu0 %vm16919_vm4, %v45561_v45  ;;  %36450 = vmatpush3.msra.mxu0 %v18149_v1 }
0x2011   :  { %36484 = vmatprep.subr.mxu0 %v18393_v26 }
0x2013   :  { %36420 = vmatmul.mubr.msk.f32.gmra.mrb[148].mxu0 %vm16919_vm4, %v45554_v49 }
0x2014   :  { %36422 = vmatprep.mubr.msk.f32.mxu0 %vm16919_vm4, %v45583_v37 }
0x2017   :  { %36423 = vmatmul.mubr.msk.f32.gmra.mrb[150].mxu0 %vm16919_vm4, %v45576_v6 }
0x2018   :  { %36451 = vmatprep.mubr.msk.f32.mxu0 %vm16919_vm4, %v45538_v5 }
0x201b   :  { %36452 = vmatmul.mubr.msk.f32.vlgmr.msra.gmra.mrb[152].mxu0 %vm16919_vm4, %v45531_v44 }
0x201c   :  { %36454 = vmatprep.mubr.msk.f32.mxu0 %vm16919_vm4, %v45561_v45  ;;  %36485 = vmatpush3.msra.mxu0 %v18393_v26 }
0x201d   :  { %36519 = vmatprep.subr.mxu0 %v18637_v47 }
0x201f   :  { %36455 = vmatmul.mubr.msk.f32.gmra.mrb[154].mxu0 %vm16919_vm4, %v45554_v49 }
0x2020   :  { %36457 = vmatprep.mubr.msk.f32.mxu0 %vm16919_vm4, %v45583_v37 }
0x2023   :  { %36458 = vmatmul.mubr.msk.f32.gmra.mrb[156].mxu0 %vm16919_vm4, %v45576_v6 }
0x2024   :  { %36486 = vmatprep.mubr.msk.f32.mxu0 %vm16919_vm4, %v45538_v5 }
0x2027   :  { %36487 = vmatmul.mubr.msk.f32.vlgmr.msra.gmra.mrb[158].mxu0 %vm16919_vm4, %v45531_v44 }
0x2028   :  { %36489 = vmatprep.mubr.msk.f32.mxu0 %vm16919_vm4, %v45561_v45  ;;  %36520 = vmatpush3.msra.mxu0 %v18637_v47 }
0x2029   :  { %36554 = vmatprep.subr.mxu0 %v18881_v14 }
0x202b   :  { %36490 = vmatmul.mubr.msk.f32.gmra.mrb[160].mxu0 %vm16919_vm4, %v45554_v49 }
0x202c   :  { %36492 = vmatprep.mubr.msk.f32.mxu0 %vm16919_vm4, %v45583_v37 }
0x202f   :  { %36493 = vmatmul.mubr.msk.f32.gmra.mrb[162].mxu0 %vm16919_vm4, %v45576_v6 }
0x2030   :  { %36521 = vmatprep.mubr.msk.f32.mxu0 %vm16919_vm4, %v45538_v5 }
0x2033   :  { %36522 = vmatmul.mubr.msk.f32.vlgmr.msra.gmra.mrb[164].mxu0 %vm16919_vm4, %v45531_v44 }
0x2034   :  { %36524 = vmatprep.mubr.msk.f32.mxu0 %vm16919_vm4, %v45561_v45  ;;  %36555 = vmatpush3.msra.mxu0 %v18881_v14 }
0x2035   :  { %36589 = vmatprep.subr.mxu0 %v19125_v58 }
0x2037   :  { %36525 = vmatmul.mubr.msk.f32.gmra.mrb[166].mxu0 %vm16919_vm4, %v45554_v49 }
0x2038   :  { %36527 = vmatprep.mubr.msk.f32.mxu0 %vm16919_vm4, %v45583_v37 }
0x203b   :  { %36528 = vmatmul.mubr.msk.f32.gmra.mrb[168].mxu0 %vm16919_vm4, %v45576_v6 }
0x203c   :  { %36556 = vmatprep.mubr.msk.f32.mxu0 %vm16919_vm4, %v45538_v5 }
0x203f   :  { %36557 = vmatmul.mubr.msk.f32.vlgmr.msra.gmra.mrb[170].mxu0 %vm16919_vm4, %v45531_v44 }
0x2040   :  { %36559 = vmatprep.mubr.msk.f32.mxu0 %vm16919_vm4, %v45561_v45  ;;  %36590 = vmatpush3.msra.mxu0 %v19125_v58 }
0x2041   :  { %36624 = vmatprep.subr.mxu0 %v19369_v46 }
0x2043   :  { %36560 = vmatmul.mubr.msk.f32.gmra.mrb[172].mxu0 %vm16919_vm4, %v45554_v49 }
0x2044   :  { %36562 = vmatprep.mubr.msk.f32.mxu0 %vm16919_vm4, %v45583_v37 }
0x2047   :  { %36563 = vmatmul.mubr.msk.f32.gmra.mrb[174].mxu0 %vm16919_vm4, %v45576_v6 }
0x2048   :  { %36591 = vmatprep.mubr.msk.f32.mxu0 %vm16919_vm4, %v45538_v5 }
0x204b   :  { %36592 = vmatmul.mubr.msk.f32.vlgmr.msra.gmra.mrb[176].mxu0 %vm16919_vm4, %v45531_v44 }
0x204c   :  { %36594 = vmatprep.mubr.msk.f32.mxu0 %vm16919_vm4, %v45561_v45  ;;  %36625 = vmatpush3.msra.mxu0 %v19369_v46 }
0x204d   :  { %36659 = vmatprep.subr.mxu0 %v19613_v38 }
0x204f   :  { %36595 = vmatmul.mubr.msk.f32.gmra.mrb[178].mxu0 %vm16919_vm4, %v45554_v49 }
0x2050   :  { %36597 = vmatprep.mubr.msk.f32.mxu0 %vm16919_vm4, %v45583_v37 }
0x2053   :  { %36598 = vmatmul.mubr.msk.f32.gmra.mrb[180].mxu0 %vm16919_vm4, %v45576_v6 }
0x2054   :  { %36626 = vmatprep.mubr.msk.f32.mxu0 %vm16919_vm4, %v45538_v5 }
0x2057   :  { %36627 = vmatmul.mubr.msk.f32.vlgmr.msra.gmra.mrb[182].mxu0 %vm16919_vm4, %v45531_v44 }
0x2058   :  { %36629 = vmatprep.mubr.msk.f32.mxu0 %vm16919_vm4, %v45561_v45  ;;  %36660 = vmatpush3.msra.mxu0 %v19613_v38  ;;  %v26120_v38 = vld [vmem:[%s47194_s10 + $0x48] sm:$0xff] }
0x2059   :  { %36694 = vmatprep.subr.mxu0 %v19857_v34 }
0x205b   :  { %36630 = vmatmul.mubr.msk.f32.gmra.mrb[184].mxu0 %vm16919_vm4, %v45554_v49 }
0x205c   :  { %36632 = vmatprep.mubr.msk.f32.mxu0 %vm16919_vm4, %v45583_v37 }
0x205f   :  { %36633 = vmatmul.mubr.msk.f32.gmra.mrb[186].mxu0 %vm16919_vm4, %v45576_v6 }
0x2060   :  { %36661 = vmatprep.mubr.msk.f32.mxu0 %vm16919_vm4, %v45538_v5 }
0x2063   :  { %36662 = vmatmul.mubr.msk.f32.vlgmr.msra.gmra.mrb[188].mxu0 %vm16919_vm4, %v45531_v44 }
0x2064   :  { %36664 = vmatprep.mubr.msk.f32.mxu0 %vm16919_vm4, %v45561_v45  ;;  %36695 = vmatpush3.msra.mxu0 %v19857_v34 }
0x2065   :  { %36729 = vmatprep.subr.mxu0 %v20101_v22 }
0x2067   :  { %36665 = vmatmul.mubr.msk.f32.gmra.mrb[190].mxu0 %vm16919_vm4, %v45554_v49 }
0x2068   :  { %36667 = vmatprep.mubr.msk.f32.mxu0 %vm16919_vm4, %v45583_v37 }
0x206b   :  { %36668 = vmatmul.mubr.msk.f32.gmra.mrb[192].mxu0 %vm16919_vm4, %v45576_v6 }
0x206c   :  { %36696 = vmatprep.mubr.msk.f32.mxu0 %vm16919_vm4, %v45538_v5 }
0x206f   :  { %36697 = vmatmul.mubr.msk.f32.vlgmr.msra.gmra.mrb[194].mxu0 %vm16919_vm4, %v45531_v44 }
0x2070   :  { %36699 = vmatprep.mubr.msk.f32.mxu0 %vm16919_vm4, %v45561_v45  ;;  %36730 = vmatpush3.msra.mxu0 %v20101_v22 }
0x2071   :  { %36764 = vmatprep.subr.mxu0 %v20345_v50 }
0x2073   :  { %36700 = vmatmul.mubr.msk.f32.gmra.mrb[196].mxu0 %vm16919_vm4, %v45554_v49 }
0x2074   :  { %36702 = vmatprep.mubr.msk.f32.mxu0 %vm16919_vm4, %v45583_v37 }
0x2077   :  { %36703 = vmatmul.mubr.msk.f32.gmra.mrb[198].mxu0 %vm16919_vm4, %v45576_v6 }
0x2078   :  { %36731 = vmatprep.mubr.msk.f32.mxu0 %vm16919_vm4, %v45538_v5 }
0x207b   :  { %36732 = vmatmul.mubr.msk.f32.vlgmr.msra.gmra.mrb[200].mxu0 %vm16919_vm4, %v45531_v44 }
0x207c   :  { %36734 = vmatprep.mubr.msk.f32.mxu0 %vm16919_vm4, %v45561_v45  ;;  %36765 = vmatpush3.msra.mxu0 %v20345_v50 }
0x207d   :  { %36799 = vmatprep.subr.mxu0 %v20589_v53 }
0x207f   :  { %36735 = vmatmul.mubr.msk.f32.gmra.mrb[202].mxu0 %vm16919_vm4, %v45554_v49 }
0x2080   :  { %36737 = vmatprep.mubr.msk.f32.mxu0 %vm16919_vm4, %v45583_v37 }
0x2083   :  { %36738 = vmatmul.mubr.msk.f32.gmra.mrb[204].mxu0 %vm16919_vm4, %v45576_v6 }
0x2084   :  { %36766 = vmatprep.mubr.msk.f32.mxu0 %vm16919_vm4, %v45538_v5 }
0x2087   :  { %36767 = vmatmul.mubr.msk.f32.vlgmr.msra.gmra.mrb[206].mxu0 %vm16919_vm4, %v45531_v44 }
0x2088   :  { %36769 = vmatprep.mubr.msk.f32.mxu0 %vm16919_vm4, %v45561_v45  ;;  %36800 = vmatpush3.msra.mxu0 %v20589_v53  ;;  %v26122_v53 = vld [vmem:[%s47194_s10 + $0x58] sm:$0xff] }
0x2089   :  { %36834 = vmatprep.subr.mxu0 %v20833_v41 }
0x208b   :  { %36770 = vmatmul.mubr.msk.f32.gmra.mrb[208].mxu0 %vm16919_vm4, %v45554_v49 }
0x208c   :  { %36772 = vmatprep.mubr.msk.f32.mxu0 %vm16919_vm4, %v45583_v37 }
0x208f   :  { %36773 = vmatmul.mubr.msk.f32.gmra.mrb[210].mxu0 %vm16919_vm4, %v45576_v6 }
0x2090   :  { %36801 = vmatprep.mubr.msk.f32.mxu0 %vm16919_vm4, %v45538_v5 }
0x2093   :  { %36802 = vmatmul.mubr.msk.f32.vlgmr.msra.gmra.mrb[212].mxu0 %vm16919_vm4, %v45531_v44 }
0x2094   :  { %36804 = vmatprep.mubr.msk.f32.mxu0 %vm16919_vm4, %v45561_v45  ;;  %36835 = vmatpush3.msra.mxu0 %v20833_v41 }
0x2095   :  { %36869 = vmatprep.subr.mxu0 %v21077_v25 }
0x2097   :  { %36805 = vmatmul.mubr.msk.f32.gmra.mrb[214].mxu0 %vm16919_vm4, %v45554_v49 }
0x2098   :  { %36807 = vmatprep.mubr.msk.f32.mxu0 %vm16919_vm4, %v45583_v37 }
0x209b   :  { %36808 = vmatmul.mubr.msk.f32.gmra.mrb[216].mxu0 %vm16919_vm4, %v45576_v6 }
0x209c   :  { %36836 = vmatprep.mubr.msk.f32.mxu0 %vm16919_vm4, %v45538_v5 }
0x209f   :  { %36837 = vmatmul.mubr.msk.f32.vlgmr.msra.gmra.mrb[218].mxu0 %vm16919_vm4, %v45531_v44 }
0x20a0   :  { %36839 = vmatprep.mubr.msk.f32.mxu0 %vm16919_vm4, %v45561_v45  ;;  %36870 = vmatpush3.msra.mxu0 %v21077_v25  ;;  %v26123_v25 = vld [vmem:[%s47194_s10 + $0x60] sm:$0xff] }
0x20a1   :  { %36904 = vmatprep.subr.mxu0 %v21321_v20 }
0x20a3   :  { %36840 = vmatmul.mubr.msk.f32.gmra.mrb[220].mxu0 %vm16919_vm4, %v45554_v49 }
0x20a4   :  { %36842 = vmatprep.mubr.msk.f32.mxu0 %vm16919_vm4, %v45583_v37 }
0x20a7   :  { %36843 = vmatmul.mubr.msk.f32.gmra.mrb[222].mxu0 %vm16919_vm4, %v45576_v6 }
0x20a8   :  { %36871 = vmatprep.mubr.msk.f32.mxu0 %vm16919_vm4, %v45538_v5 }
0x20ab   :  { %36872 = vmatmul.mubr.msk.f32.vlgmr.msra.gmra.mrb[224].mxu0 %vm16919_vm4, %v45531_v44 }
0x20ac   :  { %36874 = vmatprep.mubr.msk.f32.mxu0 %vm16919_vm4, %v45561_v45  ;;  %36905 = vmatpush3.msra.mxu0 %v21321_v20  ;;  %v26124_v20 = vld [vmem:[%s47194_s10 + $0x68] sm:$0xff] }
0x20ad   :  { %36939 = vmatprep.subr.mxu0 %v21565_v28 }
0x20af   :  { %36875 = vmatmul.mubr.msk.f32.gmra.mrb[226].mxu0 %vm16919_vm4, %v45554_v49 }
0x20b0   :  { %36877 = vmatprep.mubr.msk.f32.mxu0 %vm16919_vm4, %v45583_v37 }
0x20b3   :  { %36878 = vmatmul.mubr.msk.f32.gmra.mrb[228].mxu0 %vm16919_vm4, %v45576_v6 }
0x20b4   :  { %36906 = vmatprep.mubr.msk.f32.mxu0 %vm16919_vm4, %v45538_v5 }
0x20b7   :  { %36907 = vmatmul.mubr.msk.f32.vlgmr.msra.gmra.mrb[230].mxu0 %vm16919_vm4, %v45531_v44 }
0x20b8   :  { %36909 = vmatprep.mubr.msk.f32.mxu0 %vm16919_vm4, %v45561_v45  ;;  %36940 = vmatpush3.msra.mxu0 %v21565_v28 }
0x20b9   :  { %36974 = vmatprep.subr.mxu0 %v21809_v56 }
0x20bb   :  { %36910 = vmatmul.mubr.msk.f32.gmra.mrb[232].mxu0 %vm16919_vm4, %v45554_v49 }
0x20bc   :  { %36912 = vmatprep.mubr.msk.f32.mxu0 %vm16919_vm4, %v45583_v37 }
0x20bf   :  { %36913 = vmatmul.mubr.msk.f32.gmra.mrb[234].mxu0 %vm16919_vm4, %v45576_v6 }
0x20c0   :  { %36941 = vmatprep.mubr.msk.f32.mxu0 %vm16919_vm4, %v45538_v5 }
0x20c3   :  { %36942 = vmatmul.mubr.msk.f32.vlgmr.msra.gmra.mrb[236].mxu0 %vm16919_vm4, %v45531_v44 }
0x20c4   :  { %36944 = vmatprep.mubr.msk.f32.mxu0 %vm16919_vm4, %v45561_v45  ;;  %36975 = vmatpush3.msra.mxu0 %v21809_v56  ;;  %v26125_v56 = vld [vmem:[%s47194_s10 + $0x70] sm:$0xff] }
0x20c5   :  { %37009 = vmatprep.subr.mxu0 %v22053_v9 }
0x20c7   :  { %36945 = vmatmul.mubr.msk.f32.gmra.mrb[238].mxu0 %vm16919_vm4, %v45554_v49 }
0x20c8   :  { %36947 = vmatprep.mubr.msk.f32.mxu0 %vm16919_vm4, %v45583_v37 }
0x20ca   :  { %v36278_v36 = vpop.f32.mrb[208].mxu1  ;;  %v36348_v30 = vpop.f32.mrb[134].mxu0 }
0x20cb   :  { %v17012_v57 = vpop.f32.mrb[209].mxu1  ;;  %v17484_v29 = vpop.f32.mrb[135].mxu0  ;;  %36948 = vmatmul.mubr.msk.f32.gmra.mrb[240].mxu0 %vm16919_vm4, %v45576_v6 }
0x20cc   :  { %v45848_v40 = vpack.c.bf16 %v36278_v36, %v17012_v57  ;;  %v45850_v11 = vpack.c.bf16 %v36348_v30, %v17484_v29  ;;  %36976 = vmatprep.mubr.msk.f32.mxu0 %vm16919_vm4, %v45538_v5  ;;  %v26126_v36 = vld [vmem:[%s47194_s10 + $0x78] sm:$0xff]  ;;  %v23029_v57 = vunpack.c.h.bf16 %v45898_v8  ;;  %v26156_v8 = vld [vmem:[%s47194_s10 + $0xb0] sm:$0xff] }
0x20ce   :  { %v36281_v52 = vpop.f32.mrb[210].mxu1  ;;  %v36351_v17 = vpop.f32.mrb[136].mxu0 }
0x20cf   :  { %v17022_v33 = vpop.f32.mrb[211].mxu1  ;;  %v17494_v27 = vpop.f32.mrb[137].mxu0  ;;  %36977 = vmatmul.mubr.msk.f32.vlgmr.msra.gmra.mrb[242].mxu0 %vm16919_vm4, %v45531_v44 }
0x20d0   :  { %v45857_v55 = vpack.c.bf16 %v36281_v52, %v17022_v33  ;;  %v45859_v23 = vpack.c.bf16 %v36351_v17, %v17494_v27  ;;  %36979 = vmatprep.mubr.msk.f32.mxu0 %vm16919_vm4, %v45561_v45  ;;  %37010 = vmatpush3.msra.mxu0 %v22053_v9  ;;  %v17043_v33 = vld [vmem:[%s47194_s10 + $0x10] sm:$0xff] }
0x20d1   :  { %37044 = vmatprep.subr.mxu0 %v22297_v48 }
0x20d2   :  { %v36284_v31 = vpop.f32.mrb[212].mxu1  ;;  %v36354_v3 = vpop.f32.mrb[138].mxu0 }
0x20d3   :  { %v17032_v19 = vpop.f32.mrb[213].mxu1  ;;  %v17504_v0 = vpop.f32.mrb[139].mxu0  ;;  %36980 = vmatmul.mubr.msk.f32.gmra.mrb[244].mxu0 %vm16919_vm4, %v45554_v49 }
0x20d4   :  { %v45865_v21 = vpack.c.bf16 %v36284_v31, %v17032_v19  ;;  %v45867_v16 = vpack.c.bf16 %v36354_v3, %v17504_v0  ;;  %36982 = vmatprep.mubr.msk.f32.mxu0 %vm16919_vm4, %v45583_v37  ;;  %v17045_v3 = vld [vmem:[%s47194_s10 + $0x20] sm:$0xff]  ;;  %v17046_v0 = vld [vmem:[%s47194_s10 + $0x28] sm:$0xff] }
0x20d6   :  { %v36289_v62 = vpop.f32.mrb[214].mxu1  ;;  %v36383_v59 = vpop.f32.mrb[140].mxu0 }
0x20d7   :  { %v17118_v4 = vpop.f32.mrb[215].mxu1  ;;  %v17728_v39 = vpop.f32.mrb[141].mxu0  ;;  %36983 = vmatmul.mubr.msk.f32.gmra.mrb[246].mxu0 %vm16919_vm4, %v45576_v6 }
0x20d8   :  { %v39723_v2 = vpack.c.bf16 %v36289_v62, %v17118_v4  ;;  %v45873_v13 = vpack.c.bf16 %v36383_v59, %v17728_v39  ;;  %37011 = vmatprep.mubr.msk.f32.mxu0 %vm16919_vm4, %v45538_v5  ;;  %v17047_v59 = vld [vmem:[%s47194_s10 + $0x30] sm:$0xff] }
0x20da   :  { %v36292_v15 = vpop.f32.mrb[216].mxu1  ;;  %39724 = vmatprep.subr.bf16.mxu1 %v39723_v2  ;;  %v36386_v12 = vpop.f32.mrb[142].mxu0 }
0x20db   :  { %v17128_v24 = vpop.f32.mrb[217].mxu1  ;;  %39726 = vmatpush3.bf16.msra.mxu1 %v39723_v2  ;;  %v17738_v42 = vpop.f32.mrb[143].mxu0  ;;  %37012 = vmatmul.mubr.msk.f32.vlgmr.msra.gmra.mrb[248].mxu0 %vm16919_vm4, %v45531_v44  ;;  %v17048_v2 = vld [vmem:[%s47194_s10 + $0x38] sm:$0xff] }
0x20dc   :  { %v39727_v32 = vpack.c.bf16 %v36292_v15, %v17128_v24  ;;  %v45880_v1 = vpack.c.bf16 %v36386_v12, %v17738_v42  ;;  %37014 = vmatprep.mubr.msk.f32.mxu0 %vm16919_vm4, %v45561_v45  ;;  %37045 = vmatpush3.msra.mxu0 %v22297_v48  ;;  %v17042_v48 = vld [vmem:[%s47194_s10 + $0x8] sm:$0xff]  ;;  %v26150_v15 = vld [vmem:[%s47194_s10 + $0x80] sm:$0xff] }
0x20dd   :  { %37079 = vmatprep.subr.mxu0 %v22541_v7  ;;  %v26151_v24 = vld [vmem:[%s47194_s10 + $0x88] sm:$0xff] }
0x20de   :  { %v36295_v10 = vpop.f32.mrb[218].mxu1  ;;  %39728 = vmatprep.subr.bf16.mxu1 %v39727_v32  ;;  %v36389_v26 = vpop.f32.mrb[144].mxu0 }
0x20df   :  { %v17138_v47 = vpop.f32.mrb[219].mxu1  ;;  %39730 = vmatpush3.bf16.msra.mxu1 %v39727_v32  ;;  %v17748_v18 = vpop.f32.mrb[145].mxu0  ;;  %37015 = vmatmul.mubr.msk.f32.gmra.mrb[250].mxu0 %vm16919_vm4, %v45554_v49 }
0x20e0   :  { %v39731_v14 = vpack.c.bf16 %v36295_v10, %v17138_v47  ;;  %v45886_v58 = vpack.c.bf16 %v36389_v26, %v17748_v18  ;;  %37017 = vmatprep.mubr.msk.f32.mxu0 %vm16919_vm4, %v45583_v37  ;;  %v26152_v10 = vld [vmem:[%s47194_s10 + $0x90] sm:$0xff]  ;;  %v26153_v47 = vld [vmem:[%s47194_s10 + $0x98] sm:$0xff] }
0x20e2   :  { %39732 = vmatprep.subr.bf16.mxu1 %v39731_v14  ;;  %v36418_v43 = vpop.f32.mrb[146].mxu0 }
0x20e3   :  { %39734 = vmatpush3.bf16.msra.mxu1 %v39731_v14  ;;  %v17972_v46 = vpop.f32.mrb[147].mxu0  ;;  %37018 = vmatmul.mubr.msk.f32.gmra.mrb[252].mxu0 %vm16919_vm4, %v45576_v6  ;;  %v26154_v14 = vld [vmem:[%s47194_s10 + $0xa0] sm:$0xff] }
0x20e4   :  { %v45900_v34 = vpack.c.bf16 %v36418_v43, %v17972_v46  ;;  %39736 = vmatprep.subr.bf16.mxu1 %v45848_v40  ;;  %37046 = vmatprep.mubr.msk.f32.mxu0 %vm16919_vm4, %v45538_v5  ;;  %v26155_v46 = vld [vmem:[%s47194_s10 + $0xa8] sm:$0xff] }
0x20e6   :  { %36309 = vmatmul.mubr.msk.f32.vlgmr.msra.gmra.mrb[220].mxu1 %vm17156_vm10, %v26120_v38  ;;  %v36421_v22 = vpop.f32.mrb[148].mxu0 }
0x20e7   :  { %39738 = vmatpush3.bf16.msra.mxu1 %v45848_v40  ;;  %v17982_v50 = vpop.f32.mrb[149].mxu0  ;;  %37047 = vmatmul.mubr.msk.f32.vlgmr.msra.gmra.mrb[254].mxu0 %vm16919_vm4, %v45531_v44 }
0x20e8   :  { %v45916_v60 = vpack.c.bf16 %v36421_v22, %v17982_v50  ;;  %39740 = vmatprep.subr.bf16.mxu1 %v45857_v55  ;;  %37049 = vmatprep.mubr.msk.f32.mxu0 %vm16919_vm4, %v45561_v45  ;;  %v26173_v50 = vld [vmem:[%s47194_s10 + $0xc0] sm:$0xff] }
0x20e9   :  { %36311 = vmatprep.mubr.msk.f32.mxu1 %vm17156_vm10, %v26121_v63  ;;  %37080 = vmatpush3.msra.mxu0 %v22541_v7  ;;  %v26157_v63 = vld [vmem:[%s47194_s10 + $0xb8] sm:$0xff] }
0x20ea   :  { %36312 = vmatmul.mubr.msk.f32.gmra.mrb[222].mxu1 %vm17156_vm10, %v26122_v53  ;;  %v36424_v41 = vpop.f32.mrb[150].mxu0  ;;  %37114 = vmatprep.subr.mxu0 %v22785_v35 }
0x20eb   :  { %39742 = vmatpush3.bf16.msra.mxu1 %v45857_v55  ;;  %v17992_v61 = vpop.f32.mrb[151].mxu0  ;;  %37050 = vmatmul.mubr.msk.f32.gmra.mrb[0].mxu0 %vm16919_vm4, %v45554_v49  ;;  %v17044_v55 = vld [vmem:[%s47194_s10 + $0x18] sm:$0xff] }
0x20ec   :  { %v45932_v28 = vpack.c.bf16 %v36424_v41, %v17992_v61  ;;  %39744 = vmatprep.subr.bf16.mxu1 %v45865_v21  ;;  %37052 = vmatprep.mubr.msk.f32.mxu0 %vm16919_vm4, %v45583_v37  ;;  %v26174_v41 = vld [vmem:[%s47194_s10 + $0xc8] sm:$0xff] }
0x20ed   :  { %36314 = vmatprep.mubr.msk.f32.mxu1 %vm17156_vm10, %v26123_v25 }
0x20ee   :  { %36315 = vmatmul.mubr.msk.f32.gmra.mrb[224].mxu1 %vm17156_vm10, %v26124_v20  ;;  %v36453_v54 = vpop.f32.mrb[152].mxu0  ;;  %v26175_v20 = vld [vmem:[%s47194_s10 + $0xd0] sm:$0xff] }
0x20ef   :  { %39746 = vmatpush3.bf16.msra.mxu1 %v45865_v21  ;;  %v18216_v9 = vpop.f32.mrb[153].mxu0  ;;  %37053 = vmatmul.mubr.msk.f32.gmra.mrb[2].mxu0 %vm16919_vm4, %v45576_v6  ;;  %v26695_v21 = vld [vmem:[%s47193_s9 + $0x68] sm:$0xf] }
0x20f0   :  { %v45948_v30 = vpack.c.bf16 %v36453_v54, %v18216_v9  ;;  %39748 = vmatprep.subr.bf16.mxu1 %v45850_v11  ;;  %37081 = vmatprep.mubr.msk.f32.mxu0 %vm16919_vm4, %v45538_v5  ;;  %v23273_v4 = vunpack.c.l.bf16 %v26695_v21 }
0x20f1   :  { %36317 = vmatprep.mubr.msk.f32.mxu1 %vm17156_vm10, %v26125_v56  ;;  %v26176_v56 = vld [vmem:[%s47194_s10 + $0xd8] sm:$0xff] }
0x20f2   :  { %36318 = vmatmul.mubr.msk.f32.gmra.mrb[226].mxu1 %vm17156_vm10, %v26126_v36  ;;  %v36456_v29 = vpop.f32.mrb[154].mxu0  ;;  %v26178_v36 = vld [vmem:[%s47194_s10 + $0xe8] sm:$0xff] }
0x20f3   :  { %v18226_v40 = vpop.f32.mrb[155].mxu0  ;;  %37082 = vmatmul.mubr.msk.f32.vlgmr.msra.gmra.mrb[4].mxu0 %vm16919_vm4, %v45531_v44  ;;  %36332 = vmatprep.mubr.msk.f32.mxu1 %vm17156_vm10, %v17041_v51 }
0x20f4   :  { %v45965_v52 = vpack.c.bf16 %v36456_v29, %v18226_v40  ;;  %37084 = vmatprep.mubr.msk.f32.mxu0 %vm16919_vm4, %v45561_v45  ;;  %37115 = vmatpush3.msra.mxu0 %v22785_v35  ;;  %v26196_v29 = vld [vmem:[%s47194_s10 + $0x100] sm:$0xff] }
0x20f5   :  { %37149 = vmatprep.subr.mxu0 %v23029_v57 }
0x20f6   :  { %36333 = vmatmul.mubr.msk.f32.vlgmr.msra.gmra.mrb[220].mxu1 %vm17156_vm10, %v17042_v48  ;;  %v36459_v17 = vpop.f32.mrb[156].mxu0 }
0x20f7   :  { %39750 = vmatpush3.bf16.msra.mxu1 %v45850_v11  ;;  %v18236_v27 = vpop.f32.mrb[157].mxu0  ;;  %37085 = vmatmul.mubr.msk.f32.gmra.mrb[6].mxu0 %vm16919_vm4, %v45554_v49 }
0x20f8   :  { %39752 = vmatprep.subr.bf16.mxu1 %v45859_v23  ;;  %v45980_v31 = vpack.c.bf16 %v36459_v17, %v18236_v27  ;;  %37087 = vmatprep.mubr.msk.f32.mxu0 %vm16919_vm4, %v45583_v37  ;;  %v26198_v17 = vld [vmem:[%s47194_s10 + $0x110] sm:$0xff] }
0x20f9   :  { %36335 = vmatprep.mubr.msk.f32.mxu1 %vm17156_vm10, %v17043_v33 }
0x20fa   :  { %36336 = vmatmul.mubr.msk.f32.gmra.mrb[222].mxu1 %vm17156_vm10, %v17044_v55  ;;  %v36488_v11 = vpop.f32.mrb[158].mxu0  ;;  %v26199_v55 = vld [vmem:[%s47194_s10 + $0x118] sm:$0xff] }
0x20fb   :  { %39754 = vmatpush3.bf16.msra.mxu1 %v45859_v23  ;;  %v18460_v19 = vpop.f32.mrb[159].mxu0  ;;  %37088 = vmatmul.mubr.msk.f32.gmra.mrb[8].mxu0 %vm16919_vm4, %v45576_v6 }
0x20fc   :  { %39756 = vmatprep.subr.bf16.mxu1 %v45867_v16  ;;  %v45999_v62 = vpack.c.bf16 %v36488_v11, %v18460_v19  ;;  %37116 = vmatprep.mubr.msk.f32.mxu0 %vm16919_vm4, %v45538_v5 }
0x20fd   :  { %36338 = vmatprep.mubr.msk.f32.mxu1 %vm17156_vm10, %v17045_v3  ;;  %v26200_v3 = vld [vmem:[%s47194_s10 + $0x120] sm:$0xff] }
0x20fe   :  { %36339 = vmatmul.mubr.msk.f32.gmra.mrb[224].mxu1 %vm17156_vm10, %v17046_v0  ;;  %v36491_v23 = vpop.f32.mrb[160].mxu0  ;;  %v26201_v0 = vld [vmem:[%s47194_s10 + $0x128] sm:$0xff] }
0x20ff   :  { %39758 = vmatpush3.bf16.msra.mxu1 %v45867_v16  ;;  %v18470_v39 = vpop.f32.mrb[161].mxu0  ;;  %37117 = vmatmul.mubr.msk.f32.vlgmr.msra.gmra.mrb[10].mxu0 %vm16919_vm4, %v45531_v44 }
0x2100   :  { %39760 = vmatprep.subr.bf16.mxu1 %v45873_v13  ;;  %v46015_v7 = vpack.c.bf16 %v36491_v23, %v18470_v39  ;;  %37119 = vmatprep.mubr.msk.f32.mxu0 %vm16919_vm4, %v45561_v45  ;;  %v26202_v23 = vld [vmem:[%s47194_s10 + $0x130] sm:$0xff] }
0x2101   :  { %36341 = vmatprep.mubr.msk.f32.mxu1 %vm17156_vm10, %v17047_v59  ;;  %37150 = vmatpush3.msra.mxu0 %v23029_v57  ;;  %v26180_v57 = vld [vmem:[%s47194_s10 + $0xf8] sm:$0xff] }
0x2102   :  { %36342 = vmatmul.mubr.msk.f32.gmra.mrb[226].mxu1 %vm17156_vm10, %v17048_v2  ;;  %v36494_v16 = vpop.f32.mrb[162].mxu0  ;;  %37184 = vmatprep.subr.mxu0 %v23273_v4  ;;  %v26219_v2 = vld [vmem:[%s47194_s10 + $0x140] sm:$0xff] }
0x2103   :  { %v18480_v12 = vpop.f32.mrb[163].mxu0  ;;  %37120 = vmatmul.mubr.msk.f32.gmra.mrb[12].mxu0 %vm16919_vm4, %v45554_v49  ;;  %36367 = vmatprep.mubr.msk.f32.mxu1 %vm17156_vm10, %v26150_v15 }
0x2104   :  { %v46030_v42 = vpack.c.bf16 %v36494_v16, %v18480_v12  ;;  %37122 = vmatprep.mubr.msk.f32.mxu0 %vm16919_vm4, %v45583_v37 }
0x2106   :  { %36368 = vmatmul.mubr.msk.f32.vlgmr.msra.gmra.mrb[220].mxu1 %vm17156_vm10, %v26151_v24  ;;  %v36523_v32 = vpop.f32.mrb[164].mxu0  ;;  %v26221_v24 = vld [vmem:[%s47194_s10 + $0x150] sm:$0xff] }
0x2107   :  { %39762 = vmatpush3.bf16.msra.mxu1 %v45873_v13  ;;  %v18704_v26 = vpop.f32.mrb[165].mxu0  ;;  %37123 = vmatmul.mubr.msk.f32.gmra.mrb[14].mxu0 %vm16919_vm4, %v45576_v6 }
0x2108   :  { %39764 = vmatprep.subr.bf16.mxu1 %v45880_v1  ;;  %v46045_v18 = vpack.c.bf16 %v36523_v32, %v18704_v26  ;;  %37151 = vmatprep.mubr.msk.f32.mxu0 %vm16919_vm4, %v45538_v5  ;;  %v26222_v26 = vld [vmem:[%s47194_s10 + $0x158] sm:$0xff] }
0x2109   :  { %36370 = vmatprep.mubr.msk.f32.mxu1 %vm17156_vm10, %v26152_v10 }
0x210a   :  { %36371 = vmatmul.mubr.msk.f32.gmra.mrb[222].mxu1 %vm17156_vm10, %v26153_v47  ;;  %v36526_v13 = vpop.f32.mrb[166].mxu0 }
0x210b   :  { %39766 = vmatpush3.bf16.msra.mxu1 %v45880_v1  ;;  %v18714_v43 = vpop.f32.mrb[167].mxu0  ;;  %37152 = vmatmul.mubr.msk.f32.vlgmr.msra.gmra.mrb[16].mxu0 %vm16919_vm4, %v45531_v44 }
0x210c   :  { %39768 = vmatprep.subr.bf16.mxu1 %v45886_v58  ;;  %v46061_v38 = vpack.c.bf16 %v36526_v13, %v18714_v43  ;;  %37154 = vmatprep.mubr.msk.f32.mxu0 %vm16919_vm4, %v45561_v45  ;;  %v26223_v13 = vld [vmem:[%s47194_s10 + $0x160] sm:$0xff]  ;;  %v26224_v43 = vld [vmem:[%s47194_s10 + $0x168] sm:$0xff] }
0x210d   :  { %36373 = vmatprep.mubr.msk.f32.mxu1 %vm17156_vm10, %v26154_v14  ;;  %37185 = vmatpush3.msra.mxu0 %v23273_v4  ;;  %v26203_v4 = vld [vmem:[%s47194_s10 + $0x138] sm:$0xff] }
0x210e   :  { %36374 = vmatmul.mubr.msk.f32.gmra.mrb[224].mxu1 %vm17156_vm10, %v26155_v46  ;;  %v36529_v1 = vpop.f32.mrb[168].mxu0 }
0x210f   :  { %39770 = vmatpush3.bf16.msra.mxu1 %v45886_v58  ;;  %v18724_v22 = vpop.f32.mrb[169].mxu0  ;;  %37155 = vmatmul.mubr.msk.f32.gmra.mrb[18].mxu0 %vm16919_vm4, %v45554_v49 }
0x2110   :  { %39772 = vmatprep.subr.bf16.mxu1 %v45900_v34  ;;  %v46077_v35 = vpack.c.bf16 %v36529_v1, %v18724_v22  ;;  %37157 = vmatprep.mubr.msk.f32.mxu0 %vm16919_vm4, %v45583_v37  ;;  %v26225_v1 = vld [vmem:[%s47194_s10 + $0x170] sm:$0xff]  ;;  %v26226_v22 = vld [vmem:[%s47194_s10 + $0x178] sm:$0xff] }
0x2111   :  { %36376 = vmatprep.mubr.msk.f32.mxu1 %vm17156_vm10, %v26156_v8 }
0x2112   :  { %36377 = vmatmul.mubr.msk.f32.gmra.mrb[226].mxu1 %vm17156_vm10, %v26157_v63  ;;  %v36558_v58 = vpop.f32.mrb[170].mxu0 }
0x2113   :  { %v18948_v53 = vpop.f32.mrb[171].mxu0  ;;  %37158 = vmatmul.mubr.msk.f32.gmra.mrb[24].mxu0 %vm16919_vm4, %v45576_v6  ;;  %36402 = vmatprep.mubr.msk.f32.mxu1 %vm17156_vm10, %v26173_v50  ;;  %v26242_v50 = vld [vmem:[%s47194_s10 + $0x180] sm:$0xff] }
0x2114   :  { %v46092_v25 = vpack.c.bf16 %v36558_v58, %v18948_v53  ;;  %37186 = vmatprep.mubr.msk.f32.mxu0 %vm16919_vm4, %v45538_v5 }
0x2116   :  { %36403 = vmatmul.mubr.msk.f32.vlgmr.msra.gmra.mrb[220].mxu1 %vm17156_vm10, %v26174_v41  ;;  %v36561_v61 = vpop.f32.mrb[172].mxu0 }
0x2117   :  { %39774 = vmatpush3.bf16.msra.mxu1 %v45900_v34  ;;  %v18958_v54 = vpop.f32.mrb[173].mxu0  ;;  %37187 = vmatmul.mubr.msk.f32.vlgmr.msra.gmra.mrb[26].mxu0 %vm16919_vm4, %v45531_v44  ;;  %v26177_v44 = vld [vmem:[%s47194_s10 + $0xe0] sm:$0xff] }
0x2118   :  { %39776 = vmatprep.subr.bf16.mxu1 %v45916_v60  ;;  %v46107_v5 = vpack.c.bf16 %v36561_v61, %v18958_v54  ;;  %37189 = vmatprep.mubr.msk.f32.mxu0 %vm16919_vm4, %v45561_v45  ;;  %v26244_v61 = vld [vmem:[%s47194_s10 + $0x190] sm:$0xff] }
0x2119   :  { %36405 = vmatprep.mubr.msk.f32.mxu1 %vm17156_vm10, %v26175_v20 }
0x211a   :  { %36406 = vmatmul.mubr.msk.f32.gmra.mrb[222].mxu1 %vm17156_vm10, %v26176_v56  ;;  %v36564_v34 = vpop.f32.mrb[174].mxu0  ;;  %v26245_v56 = vld [vmem:[%s47194_s10 + $0x198] sm:$0xff] }
0x211b   :  { %39778 = vmatpush3.bf16.msra.mxu1 %v45916_v60  ;;  %v18968_v9 = vpop.f32.mrb[175].mxu0  ;;  %37190 = vmatmul.mubr.msk.f32.gmra.mrb[28].mxu0 %vm16919_vm4, %v45554_v49  ;;  %v26179_v60 = vld [vmem:[%s47194_s10 + $0xf0] sm:$0xff] }
0x211c   :  { %39780 = vmatprep.subr.bf16.mxu1 %v45932_v28  ;;  %v46123_v45 = vpack.c.bf16 %v36564_v34, %v18968_v9  ;;  %37192 = vmatprep.mubr.msk.f32.mxu0 %vm16919_vm4, %v45583_v37 }
0x211d   :  { %36408 = vmatprep.mubr.msk.f32.mxu1 %vm17156_vm10, %v26177_v44  ;;  %v26246_v44 = vld [vmem:[%s47194_s10 + $0x1a0] sm:$0xff] }
0x211e   :  { %36409 = vmatmul.mubr.msk.f32.gmra.mrb[224].mxu1 %vm17156_vm10, %v26178_v36  ;;  %v36593_v49 = vpop.f32.mrb[176].mxu0  ;;  %v26247_v36 = vld [vmem:[%s47194_s10 + $0x1a8] sm:$0xff] }
0x211f   :  { %39782 = vmatpush3.bf16.msra.mxu1 %v45932_v28  ;;  %v19192_v51 = vpop.f32.mrb[177].mxu0  ;;  %37193 = vmatmul.mubr.msk.f32.gmra.mrb[30].mxu0 %vm16919_vm4, %v45576_v6  ;;  %v26197_v6 = vld [vmem:[%s47194_s10 + $0x108] sm:$0xff] }
0x2120   :  { %39784 = vmatprep.subr.bf16.mxu1 %v45948_v30  ;;  %v46139_v37 = vpack.c.bf16 %v36593_v49, %v19192_v51  ;;  %36411 = vmatprep.mubr.msk.f32.mxu1 %vm17156_vm10, %v26179_v60  ;;  %v26248_v49 = vld [vmem:[%s47194_s10 + $0x1b0] sm:$0xff] }
0x2122   :  { %36412 = vmatmul.mubr.msk.f32.gmra.mrb[226].mxu1 %vm17156_vm10, %v26180_v57  ;;  %v36596_v28 = vpop.f32.mrb[178].mxu0  ;;  %v26249_v57 = vld [vmem:[%s47194_s10 + $0x1b8] sm:$0xff] }
0x2123   :  { %v19202_v40 = vpop.f32.mrb[179].mxu0  ;;  %36437 = vmatprep.mubr.msk.f32.mxu1 %vm17156_vm10, %v26196_v29 }
0x2124   :  { %v46150_v48 = vpack.c.bf16 %v36596_v28, %v19202_v40  ;;  %v26265_v28 = vld [vmem:[%s47194_s10 + $0x1c0] sm:$0xff] }
0x2126   :  { %36438 = vmatmul.mubr.msk.f32.vlgmr.msra.gmra.mrb[220].mxu1 %vm17156_vm10, %v26197_v6  ;;  %v36599_v33 = vpop.f32.mrb[180].mxu0 }
0x2127   :  { %39786 = vmatpush3.bf16.msra.mxu1 %v45948_v30  ;;  %v19212_v27 = vpop.f32.mrb[181].mxu0  ;;  %36440 = vmatprep.mubr.msk.f32.mxu1 %vm17156_vm10, %v26198_v17 }
0x2128   :  { %39788 = vmatprep.subr.bf16.mxu1 %v45965_v52  ;;  %v46162_v11 = vpack.c.bf16 %v36599_v33, %v19212_v27  ;;  %v26267_v33 = vld [vmem:[%s47194_s10 + $0x1d0] sm:$0xff] }
0x212a   :  { %36441 = vmatmul.mubr.msk.f32.gmra.mrb[222].mxu1 %vm17156_vm10, %v26199_v55  ;;  %v36628_v19 = vpop.f32.mrb[182].mxu0 }
0x212b   :  { %39790 = vmatpush3.bf16.msra.mxu1 %v45965_v52  ;;  %v19436_v30 = vpop.f32.mrb[183].mxu0  ;;  %36443 = vmatprep.mubr.msk.f32.mxu1 %vm17156_vm10, %v26200_v3  ;;  %v26268_v3 = vld [vmem:[%s47194_s10 + $0x1d8] sm:$0xff] }
0x212c   :  { %39792 = vmatprep.subr.bf16.mxu1 %v45980_v31  ;;  %v46174_v21 = vpack.c.bf16 %v36628_v19, %v19436_v30  ;;  %v26269_v30 = vld [vmem:[%s47194_s10 + $0x1e0] sm:$0xff] }
0x212e   :  { %36444 = vmatmul.mubr.msk.f32.gmra.mrb[224].mxu1 %vm17156_vm10, %v26201_v0  ;;  %v36631_v59 = vpop.f32.mrb[184].mxu0 }
0x212f   :  { %39794 = vmatpush3.bf16.msra.mxu1 %v45980_v31  ;;  %v19446_v52 = vpop.f32.mrb[185].mxu0  ;;  %36446 = vmatprep.mubr.msk.f32.mxu1 %vm17156_vm10, %v26202_v23  ;;  %v26220_v31 = vld [vmem:[%s47194_s10 + $0x148] sm:$0xff] }
0x2130   :  { %39796 = vmatprep.subr.bf16.mxu1 %v45999_v62  ;;  %v46186_v39 = vpack.c.bf16 %v36631_v59, %v19446_v52  ;;  %v26270_v23 = vld [vmem:[%s47194_s10 + $0x1e8] sm:$0xff]  ;;  %v26271_v52 = vld [vmem:[%s47194_s10 + $0x1f0] sm:$0xff] }
0x2132   :  { %36447 = vmatmul.mubr.msk.f32.gmra.mrb[226].mxu1 %vm17156_vm10, %v26203_v4  ;;  %v36634_v15 = vpop.f32.mrb[186].mxu0 }
0x2133   :  { %v19456_v16 = vpop.f32.mrb[187].mxu0  ;;  %36472 = vmatprep.mubr.msk.f32.mxu1 %vm17156_vm10, %v26219_v2  ;;  %v26272_v2 = vld [vmem:[%s47194_s10 + $0x1f8] sm:$0xff] }
0x2134   :  { %v46196_v12 = vpack.c.bf16 %v36634_v15, %v19456_v16  ;;  %v26288_v16 = vld [vmem:[%s47194_s10 + $0x200] sm:$0xff] }
0x2136   :  { %36473 = vmatmul.mubr.msk.f32.vlgmr.msra.gmra.mrb[220].mxu1 %vm17156_vm10, %v26220_v31  ;;  %v36663_v32 = vpop.f32.mrb[188].mxu0 }
0x2137   :  { %39798 = vmatpush3.bf16.msra.mxu1 %v45999_v62  ;;  %v19680_v10 = vpop.f32.mrb[189].mxu0  ;;  %36475 = vmatprep.mubr.msk.f32.mxu1 %vm17156_vm10, %v26221_v24 }
0x2138   :  { %39800 = vmatprep.subr.bf16.mxu1 %v46015_v7  ;;  %v46208_v47 = vpack.c.bf16 %v36663_v32, %v19680_v10  ;;  %v26290_v10 = vld [vmem:[%s47194_s10 + $0x210] sm:$0xff] }
0x213a   :  { %36476 = vmatmul.mubr.msk.f32.gmra.mrb[222].mxu1 %vm17156_vm10, %v26222_v26  ;;  %v36666_v14 = vpop.f32.mrb[190].mxu0 }
0x213b   :  { %39802 = vmatpush3.bf16.msra.mxu1 %v46015_v7  ;;  %v19690_v62 = vpop.f32.mrb[191].mxu0  ;;  %36478 = vmatprep.mubr.msk.f32.mxu1 %vm17156_vm10, %v26223_v13 }
0x213c   :  { %39804 = vmatprep.subr.bf16.mxu1 %v46030_v42  ;;  %v46220_v46 = vpack.c.bf16 %v36666_v14, %v19690_v62  ;;  %v26291_v14 = vld [vmem:[%s47194_s10 + $0x218] sm:$0xff] }
0x213e   :  { %36479 = vmatmul.mubr.msk.f32.gmra.mrb[224].mxu1 %vm17156_vm10, %v26224_v43  ;;  %v36669_v8 = vpop.f32.mrb[192].mxu0  ;;  %v26292_v43 = vld [vmem:[%s47194_s10 + $0x220] sm:$0xff] }
0x213f   :  { %39806 = vmatpush3.bf16.msra.mxu1 %v46030_v42  ;;  %v19700_v7 = vpop.f32.mrb[193].mxu0  ;;  %36481 = vmatprep.mubr.msk.f32.mxu1 %vm17156_vm10, %v26225_v1  ;;  %v26243_v42 = vld [vmem:[%s47194_s10 + $0x188] sm:$0xff] }
0x2140   :  { %39808 = vmatprep.subr.bf16.mxu1 %v46045_v18  ;;  %v46232_v63 = vpack.c.bf16 %v36669_v8, %v19700_v7  ;;  %v26293_v8 = vld [vmem:[%s47194_s10 + $0x228] sm:$0xff] }
0x2142   :  { %36482 = vmatmul.mubr.msk.f32.gmra.mrb[226].mxu1 %vm17156_vm10, %v26226_v22  ;;  %v36698_v58 = vpop.f32.mrb[194].mxu0  ;;  %v26294_v22 = vld [vmem:[%s47194_s10 + $0x230] sm:$0xff] }
0x2143   :  { %v19924_v53 = vpop.f32.mrb[195].mxu0  ;;  %36507 = vmatprep.mubr.msk.f32.mxu1 %vm17156_vm10, %v26242_v50 }
0x2144   :  { %v46242_v41 = vpack.c.bf16 %v36698_v58, %v19924_v53  ;;  %v26295_v58 = vld [vmem:[%s47194_s10 + $0x238] sm:$0xff] }
0x2146   :  { %36508 = vmatmul.mubr.msk.f32.vlgmr.msra.gmra.mrb[220].mxu1 %vm17156_vm10, %v26243_v42  ;;  %v36701_v20 = vpop.f32.mrb[196].mxu0  ;;  %v26311_v42 = vld [vmem:[%s47194_s10 + $0x240] sm:$0xff] }
0x2147   :  { %39810 = vmatpush3.bf16.msra.mxu1 %v46045_v18  ;;  %v19934_v54 = vpop.f32.mrb[197].mxu0  ;;  %36510 = vmatprep.mubr.msk.f32.mxu1 %vm17156_vm10, %v26244_v61 }
0x2148   :  { %39812 = vmatprep.subr.bf16.mxu1 %v46061_v38  ;;  %v46254_v34 = vpack.c.bf16 %v36701_v20, %v19934_v54 }
0x214a   :  { %36511 = vmatmul.mubr.msk.f32.gmra.mrb[222].mxu1 %vm17156_vm10, %v26245_v56  ;;  %v36704_v9 = vpop.f32.mrb[198].mxu0  ;;  %v26313_v56 = vld [vmem:[%s47194_s10 + $0x250] sm:$0xff] }
0x214b   :  { %39814 = vmatpush3.bf16.msra.mxu1 %v46061_v38  ;;  %v19944_v18 = vpop.f32.mrb[199].mxu0  ;;  %36513 = vmatprep.mubr.msk.f32.mxu1 %vm17156_vm10, %v26246_v44 }
0x214c   :  { %39816 = vmatprep.subr.bf16.mxu1 %v46077_v35  ;;  %v46266_v60 = vpack.c.bf16 %v36704_v9, %v19944_v18  ;;  %v26314_v18 = vld [vmem:[%s47194_s10 + $0x258] sm:$0xff] }
0x214e   :  { %36514 = vmatmul.mubr.msk.f32.gmra.mrb[224].mxu1 %vm17156_vm10, %v26247_v36  ;;  %v36733_v51 = vpop.f32.mrb[200].mxu0 }
0x214f   :  { %39818 = vmatpush3.bf16.msra.mxu1 %v46077_v35  ;;  %v20168_v38 = vpop.f32.mrb[201].mxu0  ;;  %36516 = vmatprep.mubr.msk.f32.mxu1 %vm17156_vm10, %v26248_v49  ;;  %v26266_v35 = vld [vmem:[%s47194_s10 + $0x1c8] sm:$0xff]  ;;  %v26315_v49 = vld [vmem:[%s47194_s10 + $0x260] sm:$0xff] }
0x2150   :  { %39820 = vmatprep.subr.bf16.mxu1 %v46092_v25  ;;  %v46278_v29 = vpack.c.bf16 %v36733_v51, %v20168_v38  ;;  %v26316_v38 = vld [vmem:[%s47194_s10 + $0x268] sm:$0xff] }
0x2152   :  { %36517 = vmatmul.mubr.msk.f32.gmra.mrb[226].mxu1 %vm17156_vm10, %v26249_v57  ;;  %v36736_v40 = vpop.f32.mrb[202].mxu0 }
0x2153   :  { %v20178_v6 = vpop.f32.mrb[203].mxu0  ;;  %36542 = vmatprep.mubr.msk.f32.mxu1 %vm17156_vm10, %v26265_v28  ;;  %v26317_v28 = vld [vmem:[%s47194_s10 + $0x270] sm:$0xff] }
0x2154   :  { %v46288_v17 = vpack.c.bf16 %v36736_v40, %v20178_v6  ;;  %v26318_v6 = vld [vmem:[%s47194_s10 + $0x278] sm:$0xff] }
0x2156   :  { %36543 = vmatmul.mubr.msk.f32.vlgmr.msra.gmra.mrb[220].mxu1 %vm17156_vm10, %v26266_v35  ;;  %v36739_v27 = vpop.f32.mrb[204].mxu0 }
0x2157   :  { %39822 = vmatpush3.bf16.msra.mxu1 %v46092_v25  ;;  %v20188_v55 = vpop.f32.mrb[205].mxu0  ;;  %36545 = vmatprep.mubr.msk.f32.mxu1 %vm17156_vm10, %v26267_v33  ;;  %v26334_v33 = vld [vmem:[%s47194_s10 + $0x280] sm:$0xff] }
0x2158   :  { %39824 = vmatprep.subr.bf16.mxu1 %v46107_v5  ;;  %v46300_v19 = vpack.c.bf16 %v36739_v27, %v20188_v55 }
0x215a   :  { %36546 = vmatmul.mubr.msk.f32.gmra.mrb[222].mxu1 %vm17156_vm10, %v26268_v3  ;;  %v36768_v0 = vpop.f32.mrb[206].mxu0 }
0x215b   :  { %39826 = vmatpush3.bf16.msra.mxu1 %v46107_v5  ;;  %v20412_v25 = vpop.f32.mrb[207].mxu0  ;;  %36548 = vmatprep.mubr.msk.f32.mxu1 %vm17156_vm10, %v26269_v30  ;;  %v26336_v30 = vld [vmem:[%s47194_s10 + $0x290] sm:$0xff] }
0x215c   :  { %39828 = vmatprep.subr.bf16.mxu1 %v46123_v45  ;;  %v46312_v59 = vpack.c.bf16 %v36768_v0, %v20412_v25 }
0x215e   :  { %36549 = vmatmul.mubr.msk.f32.gmra.mrb[224].mxu1 %vm17156_vm10, %v26270_v23  ;;  %v36771_v4 = vpop.f32.mrb[208].mxu0  ;;  %v26337_v23 = vld [vmem:[%s47194_s10 + $0x298] sm:$0xff] }
0x215f   :  { %39830 = vmatpush3.bf16.msra.mxu1 %v46123_v45  ;;  %v20422_v5 = vpop.f32.mrb[209].mxu0  ;;  %36551 = vmatprep.mubr.msk.f32.mxu1 %vm17156_vm10, %v26271_v52  ;;  %v26289_v45 = vld [vmem:[%s47194_s10 + $0x208] sm:$0xff] }
0x2160   :  { %39832 = vmatprep.subr.bf16.mxu1 %v46139_v37  ;;  %v46324_v15 = vpack.c.bf16 %v36771_v4, %v20422_v5  ;;  %v26338_v4 = vld [vmem:[%s47194_s10 + $0x2a0] sm:$0xff] }
0x2162   :  { %36552 = vmatmul.mubr.msk.f32.gmra.mrb[226].mxu1 %vm17156_vm10, %v26272_v2  ;;  %v36774_v31 = vpop.f32.mrb[210].mxu0  ;;  %v26339_v2 = vld [vmem:[%s47194_s10 + $0x2a8] sm:$0xff] }
0x2163   :  { %v20432_v24 = vpop.f32.mrb[211].mxu0  ;;  %36577 = vmatprep.mubr.msk.f32.mxu1 %vm17156_vm10, %v26288_v16 }
0x2164   :  { %v46334_v32 = vpack.c.bf16 %v36774_v31, %v20432_v24  ;;  %v26340_v31 = vld [vmem:[%s47194_s10 + $0x2b0] sm:$0xff] }
0x2166   :  { %36578 = vmatmul.mubr.msk.f32.vlgmr.msra.gmra.mrb[220].mxu1 %vm17156_vm10, %v26289_v45  ;;  %v36803_v26 = vpop.f32.mrb[212].mxu0  ;;  %v26341_v45 = vld [vmem:[%s47194_s10 + $0x2b8] sm:$0xff] }
0x2167   :  { %39834 = vmatpush3.bf16.msra.mxu1 %v46139_v37  ;;  %v20656_v13 = vpop.f32.mrb[213].mxu0  ;;  %36580 = vmatprep.mubr.msk.f32.mxu1 %vm17156_vm10, %v26290_v10 }
0x2168   :  { %39836 = vmatprep.subr.bf16.mxu1 %v46150_v48  ;;  %v46346_v62 = vpack.c.bf16 %v36803_v26, %v20656_v13  ;;  %v26357_v26 = vld [vmem:[%s47194_s10 + $0x2c0] sm:$0xff] }
0x216a   :  { %36581 = vmatmul.mubr.msk.f32.gmra.mrb[222].mxu1 %vm17156_vm10, %v26291_v14  ;;  %v36806_v1 = vpop.f32.mrb[214].mxu0 }
0x216b   :  { %39838 = vmatpush3.bf16.msra.mxu1 %v46150_v48  ;;  %v20666_v37 = vpop.f32.mrb[215].mxu0  ;;  %36583 = vmatprep.mubr.msk.f32.mxu1 %vm17156_vm10, %v26292_v43 }
0x216c   :  { %39840 = vmatprep.subr.bf16.mxu1 %v46162_v11  ;;  %v46358_v7 = vpack.c.bf16 %v36806_v1, %v20666_v37  ;;  %v26359_v1 = vld [vmem:[%s47194_s10 + $0x2d0] sm:$0xff] }
0x216e   :  { %36584 = vmatmul.mubr.msk.f32.gmra.mrb[224].mxu1 %vm17156_vm10, %v26293_v8  ;;  %v36809_v50 = vpop.f32.mrb[216].mxu0 }
0x216f   :  { %39842 = vmatpush3.bf16.msra.mxu1 %v46162_v11  ;;  %v20676_v48 = vpop.f32.mrb[217].mxu0  ;;  %36586 = vmatprep.mubr.msk.f32.mxu1 %vm17156_vm10, %v26294_v22  ;;  %v26312_v11 = vld [vmem:[%s47194_s10 + $0x248] sm:$0xff]  ;;  %v26360_v22 = vld [vmem:[%s47194_s10 + $0x2d8] sm:$0xff] }
0x2170   :  { %39844 = vmatprep.subr.bf16.mxu1 %v46174_v21  ;;  %v46370_v53 = vpack.c.bf16 %v36809_v50, %v20676_v48  ;;  %v26361_v48 = vld [vmem:[%s47194_s10 + $0x2e0] sm:$0xff] }
0x2172   :  { %36587 = vmatmul.mubr.msk.f32.gmra.mrb[226].mxu1 %vm17156_vm10, %v26295_v58  ;;  %v36838_v61 = vpop.f32.mrb[218].mxu0 }
0x2173   :  { %v20900_v20 = vpop.f32.mrb[219].mxu0  ;;  %36612 = vmatprep.mubr.msk.f32.mxu1 %vm17156_vm10, %v26311_v42  ;;  %v26362_v42 = vld [vmem:[%s47194_s10 + $0x2e8] sm:$0xff] }
0x2174   :  { %v46380_v54 = vpack.c.bf16 %v36838_v61, %v20900_v20  ;;  %v26363_v20 = vld [vmem:[%s47194_s10 + $0x2f0] sm:$0xff] }
0x2176   :  { %36613 = vmatmul.mubr.msk.f32.vlgmr.msra.gmra.mrb[220].mxu1 %vm17156_vm10, %v26312_v11  ;;  %v36841_v44 = vpop.f32.mrb[220].mxu0 }
0x2177   :  { %39846 = vmatpush3.bf16.msra.mxu1 %v46174_v21  ;;  %v20910_v9 = vpop.f32.mrb[221].mxu0  ;;  %36615 = vmatprep.mubr.msk.f32.mxu1 %vm17156_vm10, %v26313_v56  ;;  %v26364_v56 = vld [vmem:[%s47194_s10 + $0x2f8] sm:$0xff] }
0x2178   :  { %39848 = vmatprep.subr.bf16.mxu1 %v46186_v39  ;;  %v46392_v36 = vpack.c.bf16 %v36841_v44, %v20910_v9  ;;  %v26380_v9 = vld [vmem:[%s47194_s10 + $0x300] sm:$0xff] }
0x217a   :  { %36616 = vmatmul.mubr.msk.f32.gmra.mrb[222].mxu1 %vm17156_vm10, %v26314_v18  ;;  %v36844_v51 = vpop.f32.mrb[222].mxu0 }
0x217b   :  { %39850 = vmatpush3.bf16.msra.mxu1 %v46186_v39  ;;  %v20920_v21 = vpop.f32.mrb[223].mxu0  ;;  %36618 = vmatprep.mubr.msk.f32.mxu1 %vm17156_vm10, %v26315_v49 }
0x217c   :  { %39852 = vmatprep.subr.bf16.mxu1 %v46196_v12  ;;  %v46404_v57 = vpack.c.bf16 %v36844_v51, %v20920_v21  ;;  %v26382_v21 = vld [vmem:[%s47194_s10 + $0x310] sm:$0xff] }
0x217e   :  { %36619 = vmatmul.mubr.msk.f32.gmra.mrb[224].mxu1 %vm17156_vm10, %v26316_v38  ;;  %v36873_v40 = vpop.f32.mrb[224].mxu0 }
0x217f   :  { %39854 = vmatpush3.bf16.msra.mxu1 %v46196_v12  ;;  %v21144_v39 = vpop.f32.mrb[225].mxu0  ;;  %36621 = vmatprep.mubr.msk.f32.mxu1 %vm17156_vm10, %v26317_v28  ;;  %v26335_v12 = vld [vmem:[%s47194_s10 + $0x288] sm:$0xff] }
0x2180   :  { %39856 = vmatprep.subr.bf16.mxu1 %v46208_v47  ;;  %v46416_v35 = vpack.c.bf16 %v36873_v40, %v21144_v39  ;;  %v26383_v40 = vld [vmem:[%s47194_s10 + $0x318] sm:$0xff] }
0x2182   :  { %36622 = vmatmul.mubr.msk.f32.gmra.mrb[226].mxu1 %vm17156_vm10, %v26318_v6  ;;  %v36876_v27 = vpop.f32.mrb[226].mxu0  ;;  %v26384_v6 = vld [vmem:[%s47194_s10 + $0x320] sm:$0xff] }
0x2183   :  { %v21154_v55 = vpop.f32.mrb[227].mxu0  ;;  %36647 = vmatprep.mubr.msk.f32.mxu1 %vm17156_vm10, %v26334_v33 }
0x2184   :  { %v46426_v3 = vpack.c.bf16 %v36876_v27, %v21154_v55  ;;  %v26385_v27 = vld [vmem:[%s47194_s10 + $0x328] sm:$0xff] }
0x2186   :  { %36648 = vmatmul.mubr.msk.f32.vlgmr.msra.gmra.mrb[220].mxu1 %vm17156_vm10, %v26335_v12  ;;  %v36879_v0 = vpop.f32.mrb[228].mxu0  ;;  %v26386_v12 = vld [vmem:[%s47194_s10 + $0x330] sm:$0xff] }
0x2187   :  { %39858 = vmatpush3.bf16.msra.mxu1 %v46208_v47  ;;  %v21164_v25 = vpop.f32.mrb[229].mxu0  ;;  %36650 = vmatprep.mubr.msk.f32.mxu1 %vm17156_vm10, %v26336_v30 }
0x2188   :  { %39860 = vmatprep.subr.bf16.mxu1 %v46220_v46  ;;  %v46438_v52 = vpack.c.bf16 %v36879_v0, %v21164_v25  ;;  %v26387_v0 = vld [vmem:[%s47194_s10 + $0x338] sm:$0xff] }
0x218a   :  { %36651 = vmatmul.mubr.msk.f32.gmra.mrb[222].mxu1 %vm17156_vm10, %v26337_v23  ;;  %v36908_v5 = vpop.f32.mrb[230].mxu0  ;;  %v26403_v23 = vld [vmem:[%s47194_s10 + $0x340] sm:$0xff] }
0x218b   :  { %39862 = vmatpush3.bf16.msra.mxu1 %v46220_v46  ;;  %v21388_v47 = vpop.f32.mrb[231].mxu0  ;;  %36653 = vmatprep.mubr.msk.f32.mxu1 %vm17156_vm10, %v26338_v4 }
0x218c   :  { %39864 = vmatprep.subr.bf16.mxu1 %v46232_v63  ;;  %v46450_v16 = vpack.c.bf16 %v36908_v5, %v21388_v47 }
0x218e   :  { %36654 = vmatmul.mubr.msk.f32.gmra.mrb[224].mxu1 %vm17156_vm10, %v26339_v2  ;;  %v36911_v24 = vpop.f32.mrb[232].mxu0  ;;  %v26405_v2 = vld [vmem:[%s47194_s10 + $0x350] sm:$0xff] }
0x218f   :  { %39866 = vmatpush3.bf16.msra.mxu1 %v46232_v63  ;;  %v21398_v46 = vpop.f32.mrb[233].mxu0  ;;  %36656 = vmatprep.mubr.msk.f32.mxu1 %vm17156_vm10, %v26340_v31  ;;  %v26358_v63 = vld [vmem:[%s47194_s10 + $0x2c8] sm:$0xff] }
0x2190   :  { %39868 = vmatprep.subr.bf16.mxu1 %v46242_v41  ;;  %v46462_v10 = vpack.c.bf16 %v36911_v24, %v21398_v46  ;;  %v26406_v46 = vld [vmem:[%s47194_s10 + $0x358] sm:$0xff] }
0x2192   :  { %36657 = vmatmul.mubr.msk.f32.gmra.mrb[226].mxu1 %vm17156_vm10, %v26341_v45  ;;  %v36914_v13 = vpop.f32.mrb[234].mxu0 }
0x2193   :  { %v21408_v14 = vpop.f32.mrb[235].mxu0  ;;  %36682 = vmatprep.mubr.msk.f32.mxu1 %vm17156_vm10, %v26357_v26  ;;  %v26407_v26 = vld [vmem:[%s47194_s10 + $0x360] sm:$0xff] }
0x2194   :  { %v46472_v43 = vpack.c.bf16 %v36914_v13, %v21408_v14  ;;  %v26408_v14 = vld [vmem:[%s47194_s10 + $0x368] sm:$0xff] }
0x2196   :  { %36683 = vmatmul.mubr.msk.f32.vlgmr.msra.gmra.mrb[220].mxu1 %vm17156_vm10, %v26358_v63  ;;  %v36943_v37 = vpop.f32.mrb[236].mxu0 }
0x2197   :  { %39870 = vmatpush3.bf16.msra.mxu1 %v46242_v41  ;;  %v21632_v8 = vpop.f32.mrb[237].mxu0  ;;  %36685 = vmatprep.mubr.msk.f32.mxu1 %vm17156_vm10, %v26359_v1  ;;  %v26409_v1 = vld [vmem:[%s47194_s10 + $0x370] sm:$0xff] }
0x2198   :  { %39872 = vmatprep.subr.bf16.mxu1 %v46254_v34  ;;  %v46484_v50 = vpack.c.bf16 %v36943_v37, %v21632_v8  ;;  %v26410_v8 = vld [vmem:[%s47194_s10 + $0x378] sm:$0xff] }
0x219a   :  { %36686 = vmatmul.mubr.msk.f32.gmra.mrb[222].mxu1 %vm17156_vm10, %v26360_v22  ;;  %v36946_v58 = vpop.f32.mrb[238].mxu0 }
0x219b   :  { %39874 = vmatpush3.bf16.msra.mxu1 %v46254_v34  ;;  %v21642_v41 = vpop.f32.mrb[239].mxu0  ;;  %36688 = vmatprep.mubr.msk.f32.mxu1 %vm17156_vm10, %v26361_v48  ;;  %v26426_v48 = vld [vmem:[%s47194_s10 + $0x380] sm:$0xff] }
0x219c   :  { %39876 = vmatprep.subr.bf16.mxu1 %v46266_v60  ;;  %v46496_v61 = vpack.c.bf16 %v36946_v58, %v21642_v41 }
0x219e   :  { %36689 = vmatmul.mubr.msk.f32.gmra.mrb[224].mxu1 %vm17156_vm10, %v26362_v42  ;;  %v36949_v11 = vpop.f32.mrb[240].mxu0 }
0x219f   :  { %39878 = vmatpush3.bf16.msra.mxu1 %v46266_v60  ;;  %v21652_v34 = vpop.f32.mrb[241].mxu0  ;;  %36691 = vmatprep.mubr.msk.f32.mxu1 %vm17156_vm10, %v26363_v20  ;;  %v26381_v60 = vld [vmem:[%s47194_s10 + $0x308] sm:$0xff]  ;;  %v26428_v20 = vld [vmem:[%s47194_s10 + $0x390] sm:$0xff] }
0x21a0   :  { %39880 = vmatprep.subr.bf16.mxu1 %v46278_v29  ;;  %v46508_v44 = vpack.c.bf16 %v36949_v11, %v21652_v34 }
0x21a2   :  { %36692 = vmatmul.mubr.msk.f32.gmra.mrb[226].mxu1 %vm17156_vm10, %v26364_v56  ;;  %v36978_v18 = vpop.f32.mrb[242].mxu0  ;;  %v26429_v56 = vld [vmem:[%s47194_s10 + $0x398] sm:$0xff] }
0x21a3   :  { %v21876_v49 = vpop.f32.mrb[243].mxu0  ;;  %36717 = vmatprep.mubr.msk.f32.mxu1 %vm17156_vm10, %v26380_v9 }
0x21a4   :  { %v46518_v51 = vpack.c.bf16 %v36978_v18, %v21876_v49  ;;  %v26430_v18 = vld [vmem:[%s47194_s10 + $0x3a0] sm:$0xff] }
0x21a6   :  { %36718 = vmatmul.mubr.msk.f32.vlgmr.msra.gmra.mrb[220].mxu1 %vm17156_vm10, %v26381_v60  ;;  %v36981_v38 = vpop.f32.mrb[244].mxu0  ;;  %v26431_v60 = vld [vmem:[%s47194_s10 + $0x3a8] sm:$0xff] }
0x21a7   :  { %39882 = vmatpush3.bf16.msra.mxu1 %v46278_v29  ;;  %v21886_v28 = vpop.f32.mrb[245].mxu0  ;;  %36720 = vmatprep.mubr.msk.f32.mxu1 %vm17156_vm10, %v26382_v21 }
0x21a8   :  { %39884 = vmatprep.subr.bf16.mxu1 %v46288_v17  ;;  %v46530_v39 = vpack.c.bf16 %v36981_v38, %v21886_v28  ;;  %v26432_v38 = vld [vmem:[%s47194_s10 + $0x3b0] sm:$0xff] }
0x21aa   :  { %36721 = vmatmul.mubr.msk.f32.gmra.mrb[222].mxu1 %vm17156_vm10, %v26383_v40  ;;  %v36984_v33 = vpop.f32.mrb[246].mxu0  ;;  %v26433_v40 = vld [vmem:[%s47194_s10 + $0x3b8] sm:$0xff] }
0x21ab   :  { %39886 = vmatpush3.bf16.msra.mxu1 %v46288_v17  ;;  %v21896_v29 = vpop.f32.mrb[247].mxu0  ;;  %36723 = vmatprep.mubr.msk.f32.mxu1 %vm17156_vm10, %v26384_v6 }
0x21ac   :  { %39888 = vmatprep.subr.bf16.mxu1 %v46300_v19  ;;  %v46542_v55 = vpack.c.bf16 %v36984_v33, %v21896_v29  ;;  %v26449_v33 = vld [vmem:[%s47194_s10 + $0x3c0] sm:$0xff] }
0x21ae   :  { %36724 = vmatmul.mubr.msk.f32.gmra.mrb[224].mxu1 %vm17156_vm10, %v26385_v27  ;;  %v37013_v30 = vpop.f32.mrb[248].mxu0 }
0x21af   :  { %39890 = vmatpush3.bf16.msra.mxu1 %v46300_v19  ;;  %v22120_v17 = vpop.f32.mrb[249].mxu0  ;;  %36726 = vmatprep.mubr.msk.f32.mxu1 %vm17156_vm10, %v26386_v12  ;;  %v26404_v19 = vld [vmem:[%s47194_s10 + $0x348] sm:$0xff] }
0x21b0   :  { %39892 = vmatprep.subr.bf16.mxu1 %v46312_v59  ;;  %v46554_v25 = vpack.c.bf16 %v37013_v30, %v22120_v17  ;;  %v26451_v30 = vld [vmem:[%s47194_s10 + $0x3d0] sm:$0xff] }
0x21b2   :  { %36727 = vmatmul.mubr.msk.f32.gmra.mrb[226].mxu1 %vm17156_vm10, %v26387_v0  ;;  %v37016_v4 = vpop.f32.mrb[250].mxu0 }
0x21b3   :  { %v22130_v5 = vpop.f32.mrb[251].mxu0  ;;  %36752 = vmatprep.mubr.msk.f32.mxu1 %vm17156_vm10, %v26403_v23  ;;  %v26452_v23 = vld [vmem:[%s47194_s10 + $0x3d8] sm:$0xff] }
0x21b4   :  { %v46564_v47 = vpack.c.bf16 %v37016_v4, %v22130_v5  ;;  %v26453_v5 = vld [vmem:[%s47194_s10 + $0x3e0] sm:$0xff] }
0x21b6   :  { %36753 = vmatmul.mubr.msk.f32.vlgmr.msra.gmra.mrb[220].mxu1 %vm17156_vm10, %v26404_v19  ;;  %v37019_v31 = vpop.f32.mrb[252].mxu0 }
0x21b7   :  { %39894 = vmatpush3.bf16.msra.mxu1 %v46312_v59  ;;  %v22140_v24 = vpop.f32.mrb[253].mxu0  ;;  %36755 = vmatprep.mubr.msk.f32.mxu1 %vm17156_vm10, %v26405_v2  ;;  %v26454_v2 = vld [vmem:[%s47194_s10 + $0x3e8] sm:$0xff] }
0x21b8   :  { %39896 = vmatprep.subr.bf16.mxu1 %v46324_v15  ;;  %v46576_v45 = vpack.c.bf16 %v37019_v31, %v22140_v24  ;;  %v26455_v24 = vld [vmem:[%s47194_s10 + $0x3f0] sm:$0xff] }
0x21ba   :  { %36756 = vmatmul.mubr.msk.f32.gmra.mrb[222].mxu1 %vm17156_vm10, %v26406_v46  ;;  %v37048_v13 = vpop.f32.mrb[254].mxu0 }
0x21bb   :  { %39898 = vmatpush3.bf16.msra.mxu1 %v46324_v15  ;;  %v22364_v59 = vpop.f32.mrb[255].mxu0  ;;  %36758 = vmatprep.mubr.msk.f32.mxu1 %vm17156_vm10, %v26407_v26  ;;  %v26456_v26 = vld [vmem:[%s47194_s10 + $0x3f8] sm:$0xff] }
0x21bc   :  { %39900 = vmatprep.subr.bf16.mxu1 %v46334_v32  ;;  %v46588_v63 = vpack.c.bf16 %v37048_v13, %v22364_v59  ;;  %v26472_v59 = vld [vmem:[%s47194_s10 + $0x400] sm:$0xff] }
0x21be   :  { %36759 = vmatmul.mubr.msk.f32.gmra.mrb[224].mxu1 %vm17156_vm10, %v26408_v14  ;;  %v37051_v37 = vpop.f32.mrb[0].mxu0 }
0x21bf   :  { %39902 = vmatpush3.bf16.msra.mxu1 %v46334_v32  ;;  %v22374_v15 = vpop.f32.mrb[1].mxu0  ;;  %36761 = vmatprep.mubr.msk.f32.mxu1 %vm17156_vm10, %v26409_v1  ;;  %v26427_v32 = vld [vmem:[%s47194_s10 + $0x388] sm:$0xff] }
0x21c0   :  { %39904 = vmatprep.subr.bf16.mxu1 %v46346_v62  ;;  %v46600_v22 = vpack.c.bf16 %v37051_v37, %v22374_v15  ;;  %v26474_v15 = vld [vmem:[%s47194_s10 + $0x410] sm:$0xff] }
0x21c2   :  { %36762 = vmatmul.mubr.msk.f32.gmra.mrb[226].mxu1 %vm17156_vm10, %v26410_v8  ;;  %v37054_v58 = vpop.f32.mrb[2].mxu0 }
0x21c3   :  { %v22384_v41 = vpop.f32.mrb[3].mxu0  ;;  %36787 = vmatprep.mubr.msk.f32.mxu1 %vm17156_vm10, %v26426_v48 }
0x21c4   :  { %v46610_v42 = vpack.c.bf16 %v37054_v58, %v22384_v41  ;;  %v26475_v58 = vld [vmem:[%s47194_s10 + $0x418] sm:$0xff] }
0x21c6   :  { %36788 = vmatmul.mubr.msk.f32.vlgmr.msra.gmra.mrb[220].mxu1 %vm17156_vm10, %v26427_v32  ;;  %v37083_v11 = vpop.f32.mrb[4].mxu0  ;;  %v26476_v32 = vld [vmem:[%s47194_s10 + $0x420] sm:$0xff] }
0x21c7   :  { %39906 = vmatpush3.bf16.msra.mxu1 %v46346_v62  ;;  %v22608_v34 = vpop.f32.mrb[5].mxu0  ;;  %36790 = vmatprep.mubr.msk.f32.mxu1 %vm17156_vm10, %v26428_v20 }
0x21c8   :  { %39908 = vmatprep.subr.bf16.mxu1 %v46358_v7  ;;  %v46622_v9 = vpack.c.bf16 %v37083_v11, %v22608_v34  ;;  %v26477_v11 = vld [vmem:[%s47194_s10 + $0x428] sm:$0xff] }
0x21ca   :  { %36791 = vmatmul.mubr.msk.f32.gmra.mrb[222].mxu1 %vm17156_vm10, %v26429_v56  ;;  %v37086_v49 = vpop.f32.mrb[6].mxu0  ;;  %v26478_v56 = vld [vmem:[%s47194_s10 + $0x430] sm:$0xff] }
0x21cb   :  { %39910 = vmatpush3.bf16.msra.mxu1 %v46358_v7  ;;  %v22618_v62 = vpop.f32.mrb[7].mxu0  ;;  %36793 = vmatprep.mubr.msk.f32.mxu1 %vm17156_vm10, %v26430_v18 }
0x21cc   :  { %39912 = vmatprep.subr.bf16.mxu1 %v46370_v53  ;;  %v46634_v21 = vpack.c.bf16 %v37086_v49, %v22618_v62  ;;  %v26479_v49 = vld [vmem:[%s47194_s10 + $0x438] sm:$0xff] }
0x21ce   :  { %36794 = vmatmul.mubr.msk.f32.gmra.mrb[224].mxu1 %vm17156_vm10, %v26431_v60  ;;  %v37089_v28 = vpop.f32.mrb[8].mxu0  ;;  %v26495_v60 = vld [vmem:[%s47194_s10 + $0x440] sm:$0xff] }
0x21cf   :  { %39914 = vmatpush3.bf16.msra.mxu1 %v46370_v53  ;;  %v22628_v7 = vpop.f32.mrb[9].mxu0  ;;  %36796 = vmatprep.mubr.msk.f32.mxu1 %vm17156_vm10, %v26432_v38  ;;  %v26450_v53 = vld [vmem:[%s47194_s10 + $0x3c8] sm:$0xff] }
0x21d0   :  { %39916 = vmatprep.subr.bf16.mxu1 %v46380_v54  ;;  %v46646_v6 = vpack.c.bf16 %v37089_v28, %v22628_v7 }
0x21d2   :  { %36797 = vmatmul.mubr.msk.f32.gmra.mrb[226].mxu1 %vm17156_vm10, %v26433_v40  ;;  %v37118_v29 = vpop.f32.mrb[10].mxu0  ;;  %v26497_v40 = vld [vmem:[%s47194_s10 + $0x450] sm:$0xff] }
0x21d3   :  { %v22852_v27 = vpop.f32.mrb[11].mxu0  ;;  %36822 = vmatprep.mubr.msk.f32.mxu1 %vm17156_vm10, %v26449_v33  ;;  %v26498_v33 = vld [vmem:[%s47194_s10 + $0x458] sm:$0xff] }
0x21d4   :  { %v46656_v12 = vpack.c.bf16 %v37118_v29, %v22852_v27  ;;  %v26499_v29 = vld [vmem:[%s47194_s10 + $0x460] sm:$0xff]  ;;  %v26501_v27 = vld [vmem:[%s47194_s10 + $0x470] sm:$0xff] }
0x21d6   :  { %36823 = vmatmul.mubr.msk.f32.vlgmr.msra.gmra.mrb[220].mxu1 %vm17156_vm10, %v26450_v53  ;;  %v37121_v17 = vpop.f32.mrb[12].mxu0  ;;  %v26518_v53 = vld [vmem:[%s47194_s10 + $0x480] sm:$0xff] }
0x21d7   :  { %39918 = vmatpush3.bf16.msra.mxu1 %v46380_v54  ;;  %v22862_v0 = vpop.f32.mrb[13].mxu0  ;;  %36825 = vmatprep.mubr.msk.f32.mxu1 %vm17156_vm10, %v26451_v30  ;;  %v26520_v30 = vld [vmem:[%s47194_s10 + $0x490] sm:$0xff] }
0x21d8   :  { %39920 = vmatprep.subr.bf16.mxu1 %v46392_v36  ;;  %v46668_v4 = vpack.c.bf16 %v37121_v17, %v22862_v0  ;;  %v26521_v17 = vld [vmem:[%s47194_s10 + $0x498] sm:$0xff]  ;;  %v26522_v0 = vld [vmem:[%s47194_s10 + $0x4a0] sm:$0xff] }
0x21da   :  { %36826 = vmatmul.mubr.msk.f32.gmra.mrb[222].mxu1 %vm17156_vm10, %v26452_v23  ;;  %v37124_v19 = vpop.f32.mrb[14].mxu0  ;;  %v26524_v23 = vld [vmem:[%s47194_s10 + $0x4b0] sm:$0xff] }
0x21db   :  { %39922 = vmatpush3.bf16.msra.mxu1 %v46392_v36  ;;  %v22872_v54 = vpop.f32.mrb[15].mxu0  ;;  %36828 = vmatprep.mubr.msk.f32.mxu1 %vm17156_vm10, %v26453_v5  ;;  %v26541_v5 = vld [vmem:[%s47194_s10 + $0x4c0] sm:$0xff] }
0x21dc   :  { %39924 = vmatprep.subr.bf16.mxu1 %v46404_v57  ;;  %v46680_v31 = vpack.c.bf16 %v37124_v19, %v22872_v54  ;;  %v26543_v19 = vld [vmem:[%s47194_s10 + $0x4d0] sm:$0xff]  ;;  %v26544_v54 = vld [vmem:[%s47194_s10 + $0x4d8] sm:$0xff] }
0x21de   :  { %36829 = vmatmul.mubr.msk.f32.gmra.mrb[224].mxu1 %vm17156_vm10, %v26454_v2  ;;  %v37153_v46 = vpop.f32.mrb[16].mxu0  ;;  %v26545_v2 = vld [vmem:[%s47194_s10 + $0x4e0] sm:$0xff] }
0x21df   :  { %39926 = vmatpush3.bf16.msra.mxu1 %v46404_v57  ;;  %v23096_v36 = vpop.f32.mrb[17].mxu0  ;;  %36831 = vmatprep.mubr.msk.f32.mxu1 %vm17156_vm10, %v26455_v24  ;;  %v26473_v57 = vld [vmem:[%s47194_s10 + $0x408] sm:$0xff]  ;;  %v26547_v24 = vld [vmem:[%s47194_s10 + $0x4f0] sm:$0xff] }
0x21e0   :  { %39928 = vmatprep.subr.bf16.mxu1 %v46416_v35  ;;  %v46692_v13 = vpack.c.bf16 %v37153_v46, %v23096_v36  ;;  %v26564_v46 = vld [vmem:[%s47194_s10 + $0x500] sm:$0xff]  ;;  %v26566_v36 = vld [vmem:[%s47194_s10 + $0x510] sm:$0xff] }
0x21e2   :  { %36832 = vmatmul.mubr.msk.f32.gmra.mrb[226].mxu1 %vm17156_vm10, %v26456_v26  ;;  %v37156_v14 = vpop.f32.mrb[18].mxu0  ;;  %v26567_v26 = vld [vmem:[%s47194_s10 + $0x518] sm:$0xff] }
0x21e3   :  { %v23106_v1 = vpop.f32.mrb[19].mxu0  ;;  %36857 = vmatprep.mubr.msk.f32.mxu1 %vm17156_vm10, %v26472_v59  ;;  %v26568_v59 = vld [vmem:[%s47194_s10 + $0x520] sm:$0xff] }
0x21e4   :  { %v46702_v37 = vpack.c.bf16 %v37156_v14, %v23106_v1  ;;  %v26570_v14 = vld [vmem:[%s47194_s10 + $0x530] sm:$0xff]  ;;  %v26587_v1 = vld [vmem:[%s47194_s10 + $0x540] sm:$0xff] }
0x21e6   :  { %36858 = vmatmul.mubr.msk.f32.vlgmr.msra.gmra.mrb[220].mxu1 %vm17156_vm10, %v26473_v57  ;;  %v37159_v8 = vpop.f32.mrb[24].mxu0  ;;  %v26589_v57 = vld [vmem:[%s47194_s10 + $0x550] sm:$0xff] }
0x21e7   :  { %39930 = vmatpush3.bf16.msra.mxu1 %v46416_v35  ;;  %v23116_v48 = vpop.f32.mrb[25].mxu0  ;;  %36860 = vmatprep.mubr.msk.f32.mxu1 %vm17156_vm10, %v26474_v15  ;;  %v26590_v15 = vld [vmem:[%s47194_s10 + $0x558] sm:$0xff] }
0x21e8   :  { %39932 = vmatprep.subr.bf16.mxu1 %v46426_v3  ;;  %v46714_v41 = vpack.c.bf16 %v37159_v8, %v23116_v48  ;;  %v26591_v8 = vld [vmem:[%s47194_s10 + $0x560] sm:$0xff]  ;;  %v26593_v48 = vld [vmem:[%s47194_s10 + $0x570] sm:$0xff] }
0x21ea   :  { %36861 = vmatmul.mubr.msk.f32.gmra.mrb[222].mxu1 %vm17156_vm10, %v26475_v58  ;;  %v37188_v20 = vpop.f32.mrb[26].mxu0  ;;  %v26610_v58 = vld [vmem:[%s47194_s10 + $0x580] sm:$0xff] }
0x21eb   :  { %39934 = vmatpush3.bf16.msra.mxu1 %v46426_v3  ;;  %v23340_v35 = vpop.f32.mrb[27].mxu0  ;;  %36863 = vmatprep.mubr.msk.f32.mxu1 %vm17156_vm10, %v26476_v32  ;;  %v26612_v32 = vld [vmem:[%s47194_s10 + $0x590] sm:$0xff] }
0x21ec   :  { %39936 = vmatprep.subr.bf16.mxu1 %v46438_v52  ;;  %v46726_v34 = vpack.c.bf16 %v37188_v20, %v23340_v35  ;;  %v26613_v20 = vld [vmem:[%s47194_s10 + $0x598] sm:$0xff]  ;;  %v26614_v35 = vld [vmem:[%s47194_s10 + $0x5a0] sm:$0xff] }
0x21ee   :  { %36864 = vmatmul.mubr.msk.f32.gmra.mrb[224].mxu1 %vm17156_vm10, %v26477_v11  ;;  %v37191_v18 = vpop.f32.mrb[28].mxu0  ;;  %v26616_v11 = vld [vmem:[%s47194_s10 + $0x5b0] sm:$0xff] }
0x21ef   :  { %39938 = vmatpush3.bf16.msra.mxu1 %v46438_v52  ;;  %v23350_v3 = vpop.f32.mrb[29].mxu0  ;;  %36866 = vmatprep.mubr.msk.f32.mxu1 %vm17156_vm10, %v26478_v56  ;;  %v26496_v52 = vld [vmem:[%s47194_s10 + $0x448] sm:$0xff]  ;;  %v26633_v56 = vld [vmem:[%s47194_s10 + $0x5c0] sm:$0xff] }
0x21f0   :  { %39940 = vmatprep.subr.bf16.mxu1 %v46450_v16  ;;  %v46738_v62 = vpack.c.bf16 %v37191_v18, %v23350_v3  ;;  %v26635_v18 = vld [vmem:[%s47194_s10 + $0x5d0] sm:$0xff]  ;;  %v26636_v3 = vld [vmem:[%s47194_s10 + $0x5d8] sm:$0xff] }
0x21f2   :  { %36867 = vmatmul.mubr.msk.f32.gmra.mrb[226].mxu1 %vm17156_vm10, %v26479_v49  ;;  %v37194_v38 = vpop.f32.mrb[30].mxu0  ;;  %v26637_v49 = vld [vmem:[%s47194_s10 + $0x5e0] sm:$0xff] }
0x21f3   :  { %v23360_v28 = vpop.f32.mrb[31].mxu0  ;;  %36892 = vmatprep.mubr.msk.f32.mxu1 %vm17156_vm10, %v26495_v60  ;;  %v26639_v60 = vld [vmem:[%s47194_s10 + $0x5f0] sm:$0xff] }
0x21f4   :  { %v46748_v7 = vpack.c.bf16 %v37194_v38, %v23360_v28  ;;  %v26656_v38 = vld [vmem:[%s47194_s10 + $0x600] sm:$0xff]  ;;  %v26658_v28 = vld [vmem:[%s47194_s10 + $0x610] sm:$0xff] }
0x21f6   :  { %36893 = vmatmul.mubr.msk.f32.vlgmr.msra.gmra.mrb[220].mxu1 %vm17156_vm10, %v26496_v52  ;;  %v26659_v52 = vld [vmem:[%s47194_s10 + $0x618] sm:$0xff] }
0x21f7   :  { %39942 = vmatpush3.bf16.msra.mxu1 %v46450_v16  ;;  %36895 = vmatprep.mubr.msk.f32.mxu1 %vm17156_vm10, %v26497_v40  ;;  %v26500_v16 = vld [vmem:[%s47194_s10 + $0x468] sm:$0xff]  ;;  %v26660_v40 = vld [vmem:[%s47194_s10 + $0x620] sm:$0xff] }
0x21f8   :  { %39944 = vmatprep.subr.bf16.mxu1 %v46462_v10 }
0x21fa   :  { %36896 = vmatmul.mubr.msk.f32.gmra.mrb[222].mxu1 %vm17156_vm10, %v26498_v33  ;;  %v26662_v33 = vld [vmem:[%s47194_s10 + $0x630] sm:$0xff] }
0x21fb   :  { %39946 = vmatpush3.bf16.msra.mxu1 %v46462_v10  ;;  %36898 = vmatprep.mubr.msk.f32.mxu1 %vm17156_vm10, %v26499_v29  ;;  %v26502_v10 = vld [vmem:[%s47194_s10 + $0x478] sm:$0xff]  ;;  %v26679_v29 = vld [vmem:[%s47194_s10 + $0x640] sm:$0xff] }
0x21fc   :  { %39948 = vmatprep.subr.bf16.mxu1 %v46472_v43 }
0x21fe   :  { %36899 = vmatmul.mubr.msk.f32.gmra.mrb[224].mxu1 %vm17156_vm10, %v26500_v16  ;;  %v26681_v16 = vld [vmem:[%s47194_s10 + $0x650] sm:$0xff] }
0x21ff   :  { %39950 = vmatpush3.bf16.msra.mxu1 %v46472_v43  ;;  %36901 = vmatprep.mubr.msk.f32.mxu1 %vm17156_vm10, %v26501_v27  ;;  %v26519_v43 = vld [vmem:[%s47194_s10 + $0x488] sm:$0xff]  ;;  %v26682_v27 = vld [vmem:[%s47194_s10 + $0x658] sm:$0xff] }
0x2200   :  { %39952 = vmatprep.subr.bf16.mxu1 %v46484_v50 }
0x2202   :  { %36902 = vmatmul.mubr.msk.f32.gmra.mrb[226].mxu1 %vm17156_vm10, %v26502_v10  ;;  %v26683_v10 = vld [vmem:[%s47194_s10 + $0x660] sm:$0xff] }
0x2203   :  { %36927 = vmatprep.mubr.msk.f32.mxu1 %vm17156_vm10, %v26518_v53  ;;  %v26685_v53 = vld [vmem:[%s47194_s10 + $0x670] sm:$0xff] }
0x2206   :  { %36928 = vmatmul.mubr.msk.f32.vlgmr.msra.gmra.mrb[220].mxu1 %vm17156_vm10, %v26519_v43  ;;  %v26702_v43 = vld [vmem:[%s47194_s10 + $0x680] sm:$0xff] }
0x2207   :  { %39954 = vmatpush3.bf16.msra.mxu1 %v46484_v50  ;;  %36930 = vmatprep.mubr.msk.f32.mxu1 %vm17156_vm10, %v26520_v30  ;;  %v26523_v50 = vld [vmem:[%s47194_s10 + $0x4a8] sm:$0xff] }
0x2208   :  { %39956 = vmatprep.subr.bf16.mxu1 %v46496_v61  ;;  %v26703_v30 = vld [vmem:[%s47194_s10 + $0x688] sm:$0xff] }
0x220a   :  { %36931 = vmatmul.mubr.msk.f32.gmra.mrb[222].mxu1 %vm17156_vm10, %v26521_v17  ;;  %v26705_v17 = vld [vmem:[%s47194_s10 + $0x698] sm:$0xff] }
0x220b   :  { %39958 = vmatpush3.bf16.msra.mxu1 %v46496_v61  ;;  %36933 = vmatprep.mubr.msk.f32.mxu1 %vm17156_vm10, %v26522_v0  ;;  %v26525_v61 = vld [vmem:[%s47194_s10 + $0x4b8] sm:$0xff]  ;;  %v26706_v0 = vld [vmem:[%s47194_s10 + $0x6a0] sm:$0xff] }
0x220c   :  { %39960 = vmatprep.subr.bf16.mxu1 %v46508_v44 }
0x220e   :  { %36934 = vmatmul.mubr.msk.f32.gmra.mrb[224].mxu1 %vm17156_vm10, %v26523_v50  ;;  %v26707_v50 = vld [vmem:[%s47194_s10 + $0x6a8] sm:$0xff] }
0x220f   :  { %39962 = vmatpush3.bf16.msra.mxu1 %v46508_v44  ;;  %36936 = vmatprep.mubr.msk.f32.mxu1 %vm17156_vm10, %v26524_v23  ;;  %v26542_v44 = vld [vmem:[%s47194_s10 + $0x4c8] sm:$0xff]  ;;  %v26708_v23 = vld [vmem:[%s47194_s10 + $0x6b0] sm:$0xff] }
0x2210   :  { %39964 = vmatprep.subr.bf16.mxu1 %v46518_v51 }
0x2212   :  { %36937 = vmatmul.mubr.msk.f32.gmra.mrb[226].mxu1 %vm17156_vm10, %v26525_v61  ;;  %v26709_v61 = vld [vmem:[%s47194_s10 + $0x6b8] sm:$0xff] }
0x2213   :  { %36962 = vmatprep.mubr.msk.f32.mxu1 %vm17156_vm10, %v26541_v5 }
0x2216   :  { %36963 = vmatmul.mubr.msk.f32.vlgmr.msra.gmra.mrb[220].mxu1 %vm17156_vm10, %v26542_v44 }
0x2217   :  { %39966 = vmatpush3.bf16.msra.mxu1 %v46518_v51  ;;  %36965 = vmatprep.mubr.msk.f32.mxu1 %vm17156_vm10, %v26543_v19  ;;  %v26546_v51 = vld [vmem:[%s47194_s10 + $0x4e8] sm:$0xff] }
0x2218   :  { %39968 = vmatprep.subr.bf16.mxu1 %v46530_v39 }
0x221a   :  { %36966 = vmatmul.mubr.msk.f32.gmra.mrb[222].mxu1 %vm17156_vm10, %v26544_v54 }
0x221b   :  { %39970 = vmatpush3.bf16.msra.mxu1 %v46530_v39  ;;  %36968 = vmatprep.mubr.msk.f32.mxu1 %vm17156_vm10, %v26545_v2  ;;  %v26548_v39 = vld [vmem:[%s47194_s10 + $0x4f8] sm:$0xff] }
0x221c   :  { %39972 = vmatprep.subr.bf16.mxu1 %v46542_v55 }
0x221e   :  { %36969 = vmatmul.mubr.msk.f32.gmra.mrb[224].mxu1 %vm17156_vm10, %v26546_v51 }
0x221f   :  { %39974 = vmatpush3.bf16.msra.mxu1 %v46542_v55  ;;  %36971 = vmatprep.mubr.msk.f32.mxu1 %vm17156_vm10, %v26547_v24  ;;  %v26565_v55 = vld [vmem:[%s47194_s10 + $0x508] sm:$0xff] }
0x2220   :  { %39976 = vmatprep.subr.bf16.mxu1 %v46554_v25 }
0x2222   :  { %36972 = vmatmul.mubr.msk.f32.gmra.mrb[226].mxu1 %vm17156_vm10, %v26548_v39 }
0x2223   :  { %36997 = vmatprep.mubr.msk.f32.mxu1 %vm17156_vm10, %v26564_v46 }
0x2226   :  { %36998 = vmatmul.mubr.msk.f32.vlgmr.msra.gmra.mrb[220].mxu1 %vm17156_vm10, %v26565_v55 }
0x2227   :  { %39978 = vmatpush3.bf16.msra.mxu1 %v46554_v25  ;;  %37000 = vmatprep.mubr.msk.f32.mxu1 %vm17156_vm10, %v26566_v36  ;;  %v26569_v25 = vld [vmem:[%s47194_s10 + $0x528] sm:$0xff] }
0x2228   :  { %39980 = vmatprep.subr.bf16.mxu1 %v46564_v47 }
0x222a   :  { %37001 = vmatmul.mubr.msk.f32.gmra.mrb[222].mxu1 %vm17156_vm10, %v26567_v26 }
0x222b   :  { %39982 = vmatpush3.bf16.msra.mxu1 %v46564_v47  ;;  %37003 = vmatprep.mubr.msk.f32.mxu1 %vm17156_vm10, %v26568_v59  ;;  %v26571_v47 = vld [vmem:[%s47194_s10 + $0x538] sm:$0xff] }
0x222c   :  { %39984 = vmatprep.subr.bf16.mxu1 %v46576_v45 }
0x222e   :  { %37004 = vmatmul.mubr.msk.f32.gmra.mrb[224].mxu1 %vm17156_vm10, %v26569_v25 }
0x222f   :  { %39986 = vmatpush3.bf16.msra.mxu1 %v46576_v45  ;;  %37006 = vmatprep.mubr.msk.f32.mxu1 %vm17156_vm10, %v26570_v14  ;;  %v26588_v45 = vld [vmem:[%s47194_s10 + $0x548] sm:$0xff] }
0x2230   :  { %39988 = vmatprep.subr.bf16.mxu1 %v46588_v63 }
0x2232   :  { %37007 = vmatmul.mubr.msk.f32.gmra.mrb[226].mxu1 %vm17156_vm10, %v26571_v47 }
0x2233   :  { %37032 = vmatprep.mubr.msk.f32.mxu1 %vm17156_vm10, %v26587_v1 }
0x2236   :  { %37033 = vmatmul.mubr.msk.f32.vlgmr.msra.gmra.mrb[220].mxu1 %vm17156_vm10, %v26588_v45 }
0x2237   :  { %39990 = vmatpush3.bf16.msra.mxu1 %v46588_v63  ;;  %37035 = vmatprep.mubr.msk.f32.mxu1 %vm17156_vm10, %v26589_v57  ;;  %v26592_v63 = vld [vmem:[%s47194_s10 + $0x568] sm:$0xff] }
0x2238   :  { %39992 = vmatprep.subr.bf16.mxu1 %v46600_v22 }
0x223a   :  { %37036 = vmatmul.mubr.msk.f32.gmra.mrb[222].mxu1 %vm17156_vm10, %v26590_v15 }
0x223b   :  { %39994 = vmatpush3.bf16.msra.mxu1 %v46600_v22  ;;  %37038 = vmatprep.mubr.msk.f32.mxu1 %vm17156_vm10, %v26591_v8  ;;  %v26594_v22 = vld [vmem:[%s47194_s10 + $0x578] sm:$0xff] }
0x223c   :  { %39996 = vmatprep.subr.bf16.mxu1 %v46610_v42 }
0x223e   :  { %37039 = vmatmul.mubr.msk.f32.gmra.mrb[224].mxu1 %vm17156_vm10, %v26592_v63 }
0x223f   :  { %39998 = vmatpush3.bf16.msra.mxu1 %v46610_v42  ;;  %37041 = vmatprep.mubr.msk.f32.mxu1 %vm17156_vm10, %v26593_v48  ;;  %v26611_v42 = vld [vmem:[%s47194_s10 + $0x588] sm:$0xff] }
0x2240   :  { %40000 = vmatprep.subr.bf16.mxu1 %v46622_v9 }
0x2242   :  { %37042 = vmatmul.mubr.msk.f32.gmra.mrb[226].mxu1 %vm17156_vm10, %v26594_v22 }
0x2243   :  { %37067 = vmatprep.mubr.msk.f32.mxu1 %vm17156_vm10, %v26610_v58 }
0x2246   :  { %37068 = vmatmul.mubr.msk.f32.vlgmr.msra.gmra.mrb[220].mxu1 %vm17156_vm10, %v26611_v42 }
0x2247   :  { %40002 = vmatpush3.bf16.msra.mxu1 %v46622_v9  ;;  %37070 = vmatprep.mubr.msk.f32.mxu1 %vm17156_vm10, %v26612_v32  ;;  %v26615_v9 = vld [vmem:[%s47194_s10 + $0x5a8] sm:$0xff] }
0x2248   :  { %40004 = vmatprep.subr.bf16.mxu1 %v46634_v21 }
0x224a   :  { %37071 = vmatmul.mubr.msk.f32.gmra.mrb[222].mxu1 %vm17156_vm10, %v26613_v20 }
0x224b   :  { %40006 = vmatpush3.bf16.msra.mxu1 %v46634_v21  ;;  %37073 = vmatprep.mubr.msk.f32.mxu1 %vm17156_vm10, %v26614_v35  ;;  %v26617_v21 = vld [vmem:[%s47194_s10 + $0x5b8] sm:$0xff] }
0x224c   :  { %40008 = vmatprep.subr.bf16.mxu1 %v46646_v6 }
0x224e   :  { %37074 = vmatmul.mubr.msk.f32.gmra.mrb[224].mxu1 %vm17156_vm10, %v26615_v9 }
0x224f   :  { %40010 = vmatpush3.bf16.msra.mxu1 %v46646_v6  ;;  %37076 = vmatprep.mubr.msk.f32.mxu1 %vm17156_vm10, %v26616_v11  ;;  %v26634_v6 = vld [vmem:[%s47194_s10 + $0x5c8] sm:$0xff] }
0x2250   :  { %40012 = vmatprep.subr.bf16.mxu1 %v46656_v12 }
0x2252   :  { %37077 = vmatmul.mubr.msk.f32.gmra.mrb[226].mxu1 %vm17156_vm10, %v26617_v21 }
0x2253   :  { %37102 = vmatprep.mubr.msk.f32.mxu1 %vm17156_vm10, %v26633_v56 }
0x2256   :  { %37103 = vmatmul.mubr.msk.f32.vlgmr.msra.gmra.mrb[220].mxu1 %vm17156_vm10, %v26634_v6 }
0x2257   :  { %40014 = vmatpush3.bf16.msra.mxu1 %v46656_v12  ;;  %37105 = vmatprep.mubr.msk.f32.mxu1 %vm17156_vm10, %v26635_v18  ;;  %v26638_v12 = vld [vmem:[%s47194_s10 + $0x5e8] sm:$0xff] }
0x2258   :  { %40016 = vmatprep.subr.bf16.mxu1 %v46668_v4 }
0x225a   :  { %37106 = vmatmul.mubr.msk.f32.gmra.mrb[222].mxu1 %vm17156_vm10, %v26636_v3 }
0x225b   :  { %40018 = vmatpush3.bf16.msra.mxu1 %v46668_v4  ;;  %37108 = vmatprep.mubr.msk.f32.mxu1 %vm17156_vm10, %v26637_v49  ;;  %v26640_v4 = vld [vmem:[%s47194_s10 + $0x5f8] sm:$0xff] }
0x225c   :  { %40020 = vmatprep.subr.bf16.mxu1 %v46680_v31 }
0x225e   :  { %37109 = vmatmul.mubr.msk.f32.gmra.mrb[224].mxu1 %vm17156_vm10, %v26638_v12 }
0x225f   :  { %40022 = vmatpush3.bf16.msra.mxu1 %v46680_v31  ;;  %37111 = vmatprep.mubr.msk.f32.mxu1 %vm17156_vm10, %v26639_v60  ;;  %v26657_v31 = vld [vmem:[%s47194_s10 + $0x608] sm:$0xff] }
0x2260   :  { %40024 = vmatprep.subr.bf16.mxu1 %v46692_v13 }
0x2262   :  { %37112 = vmatmul.mubr.msk.f32.gmra.mrb[226].mxu1 %vm17156_vm10, %v26640_v4 }
0x2263   :  { %37137 = vmatprep.mubr.msk.f32.mxu1 %vm17156_vm10, %v26656_v38 }
0x2266   :  { %37138 = vmatmul.mubr.msk.f32.vlgmr.msra.gmra.mrb[220].mxu1 %vm17156_vm10, %v26657_v31 }
0x2267   :  { %40026 = vmatpush3.bf16.msra.mxu1 %v46692_v13  ;;  %37140 = vmatprep.mubr.msk.f32.mxu1 %vm17156_vm10, %v26658_v28  ;;  %v26661_v13 = vld [vmem:[%s47194_s10 + $0x628] sm:$0xff] }
0x2268   :  { %40028 = vmatprep.subr.bf16.mxu1 %v46702_v37 }
0x226a   :  { %37141 = vmatmul.mubr.msk.f32.gmra.mrb[222].mxu1 %vm17156_vm10, %v26659_v52 }
0x226b   :  { %40030 = vmatpush3.bf16.msra.mxu1 %v46702_v37  ;;  %37143 = vmatprep.mubr.msk.f32.mxu1 %vm17156_vm10, %v26660_v40  ;;  %v26663_v37 = vld [vmem:[%s47194_s10 + $0x638] sm:$0xff] }
0x226c   :  { %40032 = vmatprep.subr.bf16.mxu1 %v46714_v41 }
0x226e   :  { %37144 = vmatmul.mubr.msk.f32.gmra.mrb[224].mxu1 %vm17156_vm10, %v26661_v13 }
0x226f   :  { %40034 = vmatpush3.bf16.msra.mxu1 %v46714_v41  ;;  %37146 = vmatprep.mubr.msk.f32.mxu1 %vm17156_vm10, %v26662_v33  ;;  %v26680_v41 = vld [vmem:[%s47194_s10 + $0x648] sm:$0xff] }
0x2270   :  { %40036 = vmatprep.subr.bf16.mxu1 %v46726_v34 }
0x2272   :  { %37147 = vmatmul.mubr.msk.f32.gmra.mrb[226].mxu1 %vm17156_vm10, %v26663_v37 }
0x2273   :  { %37172 = vmatprep.mubr.msk.f32.mxu1 %vm17156_vm10, %v26679_v29 }
0x2276   :  { %37173 = vmatmul.mubr.msk.f32.vlgmr.msra.gmra.mrb[220].mxu1 %vm17156_vm10, %v26680_v41 }
0x2277   :  { %40038 = vmatpush3.bf16.msra.mxu1 %v46726_v34  ;;  %37175 = vmatprep.mubr.msk.f32.mxu1 %vm17156_vm10, %v26681_v16  ;;  %v26684_v34 = vld [vmem:[%s47194_s10 + $0x668] sm:$0xff] }
0x2278   :  { %40040 = vmatprep.subr.bf16.mxu1 %v46738_v62 }
0x227a   :  { %37176 = vmatmul.mubr.msk.f32.gmra.mrb[222].mxu1 %vm17156_vm10, %v26682_v27 }
0x227b   :  { %40042 = vmatpush3.bf16.msra.mxu1 %v46738_v62  ;;  %37178 = vmatprep.mubr.msk.f32.mxu1 %vm17156_vm10, %v26683_v10  ;;  %v26686_v62 = vld [vmem:[%s47194_s10 + $0x678] sm:$0xff] }
0x227c   :  { %40044 = vmatprep.subr.bf16.mxu1 %v46748_v7 }
0x227e   :  { %37179 = vmatmul.mubr.msk.f32.gmra.mrb[224].mxu1 %vm17156_vm10, %v26684_v34 }
0x227f   :  { %40046 = vmatpush3.bf16.msra.mxu1 %v46748_v7  ;;  %37181 = vmatprep.mubr.msk.f32.mxu1 %vm17156_vm10, %v26685_v53  ;;  %v26704_v7 = vld [vmem:[%s47194_s10 + $0x690] sm:$0xff] }
0x2282   :  { %37182 = vmatmul.mubr.msk.f32.gmra.mrb[226].mxu1 %vm17156_vm10, %v26686_v62 }
0x2283   :  { %37207 = vmatprep.mubr.msk.f32.mxu1 %vm17156_vm10, %v26702_v43 }
0x2286   :  { %37208 = vmatmul.mubr.msk.f32.vlgmr.msra.gmra.mrb[220].mxu1 %vm17156_vm10, %v26703_v30 }
0x2287   :  { %37210 = vmatprep.mubr.msk.f32.mxu1 %vm17156_vm10, %v26704_v7 }
0x228a   :  { %37211 = vmatmul.mubr.msk.f32.gmra.mrb[222].mxu1 %vm17156_vm10, %v26705_v17 }
0x228b   :  { %37213 = vmatprep.mubr.msk.f32.mxu1 %vm17156_vm10, %v26706_v0 }
0x228e   :  { %37214 = vmatmul.mubr.msk.f32.gmra.mrb[224].mxu1 %vm17156_vm10, %v26707_v50 }
0x228f   :  { %37216 = vmatprep.mubr.msk.f32.mxu1 %vm17156_vm10, %v26708_v23 }
0x2292   :  { %37217 = vmatmul.mubr.msk.f32.gmra.mrb[226].mxu1 %vm17156_vm10, %v26709_v61 }
0x2293   :  { %40534 = shalt.err (!%p40531_p4)
}
0x2294   :  { %s40535_s26 = scalar_lea.hbm %s47196_s12, 512 }
0x2295   :  { %p40536_p5 = scmp.ne.s32.totalorder %s47196_s12, %s40535_s26  ;;  %p40539_p6 = scmp.lt.u32.totalorder %s40535_s26, %s47196_s12 }
0x2297   :  { %p40541_p7 = pnand %p40539_p6, %p40536_p5 }
0x2299   :  { %40544 = shalt.err (!%p40541_p7)
}
0x229a   :  { %s40551_s3 = smov 128   ;;  %s40552_s30 = smov 8   ;;  %v23516_v5 = vld [vmem:[%s47195_s11 + $0x8] sm:$0xff]  ;;  %v23515_v44 = vld [vmem:[%s47195_s11] sm:$0xff]  ;;  %v23518_v24 = vld [vmem:[%s47195_s11 + $0x18] sm:$0xff]  ;;  %vm23555_vm12 = vcmask 7168  }
0x229b   :  { %23575 = dma.vmem_to_hbm [thread:$0]  %s23570_s24, 512, %s47196_s12, [#allocation3], %s40551_s3, %s40551_s3, %s40552_s30  }
0x229c   :  { %v23517_v46 = vld [vmem:[%s47195_s11 + $0x10] sm:$0xff]  ;;  %v23520_v1 = vld [vmem:[%s47195_s11 + $0x28] sm:$0xff]  ;;  %v23519_v57 = vld [vmem:[%s47195_s11 + $0x20] sm:$0xff] }
0x229d   :  { %v23522_v32 = vld [vmem:[%s47195_s11 + $0x38] sm:$0xff]  ;;  %v23521_v35 = vld [vmem:[%s47195_s11 + $0x30] sm:$0xff] }
0x2359   :  { %v37209_v19 = vpop.f32.mrb[220].mxu1 }
0x235a   :  { %v23524_v54 = vadd.f32 %v37209_v19, %v23516_v5  ;;  %v23468_v2 = vpop.f32.mrb[221].mxu1 }
0x235b   :  { %v23523_v51 = vadd.f32 %v23515_v44, %v23468_v2 }
0x235c   :  { %vm23532_vm11 = vcmp.ge.f32.partialorder %v23524_v54, 0.0  ;;  %v23540_v39 = vmul.f32 0.1, %v23524_v54 }
0x235d   :  { %vm23531_vm13 = vcmp.ge.f32.partialorder %v23523_v51, 0.0  ;;  %v23539_v55 = vmul.f32 0.1, %v23523_v51  ;;  %v37212_v36 = vpop.f32.mrb[222].mxu1 }
0x235e   :  { %v23548_v26 = vsel %vm23532_vm11, %v23524_v54, %v23540_v39  ;;  %v23526_v59 = vadd.f32 %v37212_v36, %v23518_v24  ;;  %v23478_v25 = vpop.f32.mrb[223].mxu1 }
0x235f   :  { %23557 = vst.msk [vmem:[%s47198_s14 + $0x8] sm:$0xff] %vm23555_vm12, %v23548_v26  ;;  %v23547_v14 = vsel %vm23531_vm13, %v23523_v51, %v23539_v55  ;;  %v23525_v47 = vadd.f32 %v23517_v46, %v23478_v25 }
0x2360   :  { %23556 = vst.msk [vmem:[%s47198_s14] sm:$0xff] %vm23555_vm12, %v23547_v14  ;;  %vm23534_vm14 = vcmp.ge.f32.partialorder %v23526_v59, 0.0  ;;  %v23542_v45 = vmul.f32 0.1, %v23526_v59 }
0x2361   :  { %vm23533_vm15 = vcmp.ge.f32.partialorder %v23525_v47, 0.0  ;;  %v23541_v15 = vmul.f32 0.1, %v23525_v47  ;;  %v37215_v8 = vpop.f32.mrb[224].mxu1 }
0x2362   :  { %v23550_v63 = vsel %vm23534_vm14, %v23526_v59, %v23542_v45  ;;  %v23528_v48 = vadd.f32 %v37215_v8, %v23520_v1  ;;  %v23488_v22 = vpop.f32.mrb[225].mxu1 }
0x2363   :  { %23559 = vst.msk [vmem:[%s47198_s14 + $0x18] sm:$0xff] %vm23555_vm12, %v23550_v63  ;;  %v23549_v58 = vsel %vm23533_vm15, %v23525_v47, %v23541_v15  ;;  %v23527_v42 = vadd.f32 %v23519_v57, %v23488_v22 }
0x2364   :  { %23558 = vst.msk [vmem:[%s47198_s14 + $0x10] sm:$0xff] %vm23555_vm12, %v23549_v58  ;;  %vm23536_vm0 = vcmp.ge.f32.partialorder %v23528_v48, 0.0  ;;  %v23544_v20 = vmul.f32 0.1, %v23528_v48 }
0x2365   :  { %vm23535_vm1 = vcmp.ge.f32.partialorder %v23527_v42, 0.0  ;;  %v23543_v9 = vmul.f32 0.1, %v23527_v42  ;;  %v37218_v11 = vpop.f32.mrb[226].mxu1 }
0x2366   :  { %v23552_v21 = vsel %vm23536_vm0, %v23528_v48, %v23544_v20  ;;  %v23530_v56 = vadd.f32 %v37218_v11, %v23522_v32  ;;  %v23498_v6 = vpop.f32.mrb[227].mxu1 }
0x2367   :  { %23561 = vst.msk [vmem:[%s47198_s14 + $0x28] sm:$0xff] %vm23555_vm12, %v23552_v21  ;;  %v23551_v18 = vsel %vm23535_vm1, %v23527_v42, %v23543_v9  ;;  %v23529_v3 = vadd.f32 %v23521_v35, %v23498_v6 }
0x2368   :  { %23560 = vst.msk [vmem:[%s47198_s14 + $0x20] sm:$0xff] %vm23555_vm12, %v23551_v18  ;;  %vm23538_vm2 = vcmp.ge.f32.partialorder %v23530_v56, 0.0  ;;  %v23546_v49 = vmul.f32 0.1, %v23530_v56 }
0x2369   :  { %vm23537_vm3 = vcmp.ge.f32.partialorder %v23529_v3, 0.0  ;;  %v23545_v12 = vmul.f32 0.1, %v23529_v3 }
0x236a   :  { %v23554_v60 = vsel %vm23538_vm2, %v23530_v56, %v23546_v49 }
0x236b   :  { %23563 = vst.msk [vmem:[%s47198_s14 + $0x38] sm:$0xff] %vm23555_vm12, %v23554_v60  ;;  %v23553_v4 = vsel %vm23537_vm3, %v23529_v3, %v23545_v12 }
0x236c   :  { %23562 = vst.msk [vmem:[%s47198_s14 + $0x30] sm:$0xff] %vm23555_vm12, %v23553_v4 }
0x236d   :  { %40545 = dma.done.wait [#allocation3], 512  }
0x236e   :  { %40546 = vsyncadd [#allocation3], 4294966784 }
0x236f   :  { %23587 = vsyncpa [#allocation3], 1 }

</bundles_post_ra>
